<compile_context>
chip_gen: v7x
topology: tpu7x:2x2x1
jax: 0.10.0
libtpu: 0.0.40
codegen_flags: <defaults>
</compile_context>

<pallas_src>
import jax
import jax.numpy as jnp
from jax.experimental import pallas as pl
from jax.experimental.pallas import tpu as pltpu

BN_EPS = 1e-3
MAX_TM = 512  # cap on rows (N*Ho*Wo) processed per grid step


def _round_up(x, m):
    return ((x + m - 1) // m) * m


def _choose_tm(m, cap=MAX_TM):
    """Row-tile size: big tiles amortize per-step overhead (~0.35us); keep it a
    multiple of 64 (bf16/f32 sublane friendly) and ensure >=2 grid steps when
    there is enough work so 2-TensorCore chips (v7x) keep both cores busy."""
    if m <= 64:
        return 64
    return min(cap, _round_up((m + 1) // 2, 64))


# ----------------------------------------------------------------------------
# Pallas kernels
# ----------------------------------------------------------------------------
def _matmul_bias_relu_kernel(a_ref, w_ref, b_ref, o_ref):
    # a: (TM, K) bf16 im2col patches, w: (K, Cout) bf16 (BN scale pre-folded),
    # b: (1, Cout) f32 bias.  Accumulate in f32 on the MXU, epilogue on VPU.
    acc = jnp.dot(a_ref[...], w_ref[...], preferred_element_type=jnp.float32)
    o_ref[...] = jnp.maximum(acc + b_ref[...], 0.0).astype(o_ref.dtype)


def _maxpool_kernel(p_ref, o_ref):
    # p: (9, TM, C) the 3x3 window taps, reduce-max over the window axis
    o_ref[...] = jnp.max(p_ref[...], axis=0)


# ----------------------------------------------------------------------------
# Glue: im2col patch extraction / weight repack (plain JAX)
# ----------------------------------------------------------------------------
def _im2col(x, kh, kw, sh, sw, ph, pw):
    n, h, w, c = x.shape
    xp = jnp.pad(x, ((0, 0), (ph, ph), (pw, pw), (0, 0)))
    ho = (h + 2 * ph - kh) // sh + 1
    wo = (w + 2 * pw - kw) // sw + 1
    cols = []
    for di in range(kh):
        for dj in range(kw):
            cols.append(xp[:, di:di + (ho - 1) * sh + 1:sh,
                           dj:dj + (wo - 1) * sw + 1:sw, :])
    patches = jnp.concatenate(cols, axis=-1)          # (n, ho, wo, kh*kw*c)
    return patches.reshape(n * ho * wo, kh * kw * c), (n, ho, wo)


def conv_bn_relu(x, w, scale, bias, stride=(1, 1), padding=(0, 0),
                 out_dtype=jnp.float32):
    """x: NHWC (f32 or bf16).  w: torch layout (Cout, Cin, kh, kw).  BN folded
    as y = relu((x conv w) * scale + bias).  Returns NHWC in `out_dtype`."""
    cout, cin, kh, kw = w.shape
    a, (n, ho, wo) = _im2col(x, kh, kw, stride[0], stride[1],
                             padding[0], padding[1])
    k = kh * kw * cin

    # repack weights to the im2col column order ((di, dj) outer, cin inner),
    # fold the BN scale in, then cast both MXU operands to bf16.
    w2 = jnp.transpose(w, (2, 3, 1, 0)).reshape(k, cout)
    w2 = (w2 * scale.reshape(1, cout)).astype(jnp.bfloat16)
    a = a.astype(jnp.bfloat16)
    bias2 = bias.reshape(1, cout).astype(jnp.float32)

    m = a.shape[0]
    tm = _choose_tm(m)
    mpad = _round_up(m, tm)
    if mpad != m:
        a = jnp.pad(a, ((0, mpad - m), (0, 0)))

    out_itemsize = jnp.dtype(out_dtype).itemsize
    cost = pl.CostEstimate(
        flops=2 * mpad * k * cout,
        transcendentals=0,
        bytes_accessed=mpad * k * 2 + k * cout * 2
        + mpad * cout * out_itemsize + cout * 4,
    )

    out = pl.pallas_call(
        _matmul_bias_relu_kernel,
        out_shape=jax.ShapeDtypeStruct((mpad, cout), out_dtype),
        grid=(mpad // tm,),
        in_specs=[
            pl.BlockSpec((tm, k), lambda i: (i, 0)),
            pl.BlockSpec((k, cout), lambda i: (0, 0)),
            pl.BlockSpec((1, cout), lambda i: (0, 0)),
        ],
        out_specs=pl.BlockSpec((tm, cout), lambda i: (i, 0)),
        compiler_params=pltpu.CompilerParams(
            dimension_semantics=("parallel",)),
        cost_estimate=cost,
    )(a, w2, bias2)
    return out[:m].reshape(n, ho, wo, cout)


def maxpool_3x3_s2(x):
    """F.max_pool2d(x, 3, 2) on NHWC input (kept in f32 to match reference)."""
    n, h, w, c = x.shape
    ho = (h - 3) // 2 + 1
    wo = (w - 3) // 2 + 1
    taps = []
    for di in range(3):
        for dj in range(3):
            taps.append(x[:, di:di + (ho - 1) * 2 + 1:2,
                          dj:dj + (wo - 1) * 2 + 1:2, :])
    p = jnp.stack(taps, axis=0).reshape(9, n * ho * wo, c)

    m = p.shape[1]
    tm = _choose_tm(m)
    mpad = _round_up(m, tm)
    if mpad != m:
        p = jnp.pad(p, ((0, 0), (0, mpad - m), (0, 0)),
                    constant_values=-jnp.inf)

    cost = pl.CostEstimate(flops=8 * mpad * c, transcendentals=0,
                           bytes_accessed=10 * mpad * c * 4)

    out = pl.pallas_call(
        _maxpool_kernel,
        out_shape=jax.ShapeDtypeStruct((mpad, c), x.dtype),
        grid=(mpad // tm,),
        in_specs=[pl.BlockSpec((9, tm, c), lambda i: (0, i, 0))],
        out_specs=pl.BlockSpec((tm, c), lambda i: (i, 0)),
        compiler_params=pltpu.CompilerParams(
            dimension_semantics=("parallel",)),
        cost_estimate=cost,
    )(p)
    return out[:m].reshape(n, ho, wo, c)


# ----------------------------------------------------------------------------
# InceptionD forward (NCHW in / NCHW out, like the PyTorch module)
# ----------------------------------------------------------------------------
def inception_d_forward(x_nchw, params):
    x = jnp.transpose(x_nchw, (0, 2, 3, 1)).astype(jnp.float32)  # -> NHWC
    xb = x.astype(jnp.bfloat16)  # conv branches read x once, in bf16

    # Fused 1x1 stem: branch3x3_1 (192) ++ branch7x7x3_1 (192) -> 384 channels
    w1a, s1a, b1a = params["branch3x3_1"]
    w1b, s1b, b1b = params["branch7x7x3_1"]
    w1 = jnp.concatenate([w1a, w1b], axis=0)
    s1 = jnp.concatenate([s1a, s1b], axis=0)
    b1 = jnp.concatenate([b1a, b1b], axis=0)
    stem = conv_bn_relu(xb, w1, s1, b1, out_dtype=jnp.bfloat16)
    b3_in = stem[..., :192]
    b7_in = stem[..., 192:]

    b3 = conv_bn_relu(b3_in, *params["branch3x3_2"], stride=(2, 2),
                      out_dtype=jnp.float32)

    b7 = conv_bn_relu(b7_in, *params["branch7x7x3_2"], padding=(0, 3),
                      out_dtype=jnp.bfloat16)
    b7 = conv_bn_relu(b7, *params["branch7x7x3_3"], padding=(3, 0),
                      out_dtype=jnp.bfloat16)
    b7 = conv_bn_relu(b7, *params["branch7x7x3_4"], stride=(2, 2),
                      out_dtype=jnp.float32)

    bp = maxpool_3x3_s2(x)

    out = jnp.concatenate([b3, b7, bp], axis=-1)      # channel concat (NHWC)
    return jnp.transpose(out, (0, 3, 1, 2))           # -> NCHW


# ----------------------------------------------------------------------------
# Deterministic parameter construction (Conv weight + folded BatchNorm)
# ----------------------------------------------------------------------------
def make_conv_params(key, cout, cin, kh, kw):
    kw_, kg, kb, km, kv = jax.random.split(key, 5)
    fan_in = cin * kh * kw
    w = jax.random.normal(kw_, (cout, cin, kh, kw), jnp.float32) / jnp.sqrt(fan_in)
    gamma = jax.random.uniform(kg, (cout,), jnp.float32, 0.5, 1.5)
    beta = 0.1 * jax.random.normal(kb, (cout,), jnp.float32)
    mean = 0.1 * jax.random.normal(km, (cout,), jnp.float32)
    var = jax.random.uniform(kv, (cout,), jnp.float32, 0.5, 1.5)
    scale = gamma / jnp.sqrt(var + BN_EPS)
    bias = beta - mean * scale
    return (w, scale, bias)


def make_inception_d_params(key, in_channels):
    keys = jax.random.split(key, 6)
    return {
        "branch3x3_1":   make_conv_params(keys[0], 192, in_channels, 1, 1),
        "branch3x3_2":   make_conv_params(keys[1], 320, 192, 3, 3),
        "branch7x7x3_1": make_conv_params(keys[2], 192, in_channels, 1, 1),
        "branch7x7x3_2": make_conv_params(keys[3], 192, 192, 1, 7),
        "branch7x7x3_3": make_conv_params(keys[4], 192, 192, 7, 1),
        "branch7x7x3_4": make_conv_params(keys[5], 192, 192, 3, 3),
    }


# ----------------------------------------------------------------------------
# Pure-JAX reference (f32, HIGHEST precision) for a sanity check
# ----------------------------------------------------------------------------
def _ref_conv(x, w, scale, bias, stride=(1, 1), padding=(0, 0)):
    w_hwio = jnp.transpose(w, (2, 3, 1, 0))
    y = jax.lax.conv_general_dilated(
        x, w_hwio, window_strides=stride,
        padding=[(padding[0], padding[0]), (padding[1], padding[1])],
        dimension_numbers=("NHWC", "HWIO", "NHWC"),
        precision=jax.lax.Precision.HIGHEST)
    return jnp.maximum(y * scale + bias, 0.0)


def _ref_forward(x_nchw, params):
    x = jnp.transpose(x_nchw, (0, 2, 3, 1))
    b3 = _ref_conv(x, *params["branch3x3_1"])
    b3 = _ref_conv(b3, *params["branch3x3_2"], stride=(2, 2))
    b7 = _ref_conv(x, *params["branch7x7x3_1"])
    b7 = _ref_conv(b7, *params["branch7x7x3_2"], padding=(0, 3))
    b7 = _ref_conv(b7, *params["branch7x7x3_3"], padding=(3, 0))
    b7 = _ref_conv(b7, *params["branch7x7x3_4"], stride=(2, 2))
    bp = jax.lax.reduce_window(x, -jnp.inf, jax.lax.max,
                               (1, 3, 3, 1), (1, 2, 2, 1), "VALID")
    out = jnp.concatenate([b3, b7, bp], axis=-1)
    return jnp.transpose(out, (0, 3, 1, 2))


if __name__ == "__main__":
    key = jax.random.PRNGKey(0)
    k_x, k_p = jax.random.split(key)

    batch, in_channels, hw = 2, 16, 17
    x = jax.random.normal(k_x, (batch, in_channels, hw, hw), jnp.float32)
    params = make_inception_d_params(k_p, in_channels)

    out = jax.jit(inception_d_forward)(x, params)
    out = jax.block_until_ready(out)

    # shape check: (N, 320 + 192 + Cin, 8, 8)
    assert out.shape == (batch, 320 + 192 + in_channels, 8, 8), out.shape

    ref = _ref_forward(x, params)
    max_ref = float(jnp.max(jnp.abs(ref)))
    max_err = float(jnp.max(jnp.abs(out.astype(jnp.float32) - ref)))
    # bf16 MXU operands (f32 accumulation) => tolerance scaled to the output
    # magnitude; ~0.5% relative error expected, allow 2.5%.
    tol = max(5e-2, 2.5e-2 * max_ref)
    assert max_err < tol, f"max abs error {max_err} vs tolerance {tol}"

    print("KERNEL_OK")
</pallas_src>

<mosaic_0001>
module attributes {stable_mosaic.version = 11 : i64} {
  func.func @_matmul_bias_relu_kernel(%arg0: i32, %arg1: memref<320x16xbf16, #tpu.memory_space<vmem>>, %arg2: memref<16x384xbf16, #tpu.memory_space<vmem>>, %arg3: memref<1x384xf32, #tpu.memory_space<vmem>>, %arg4: memref<320x384xbf16, #tpu.memory_space<vmem>>) attributes {dimension_semantics = [#tpu.dimension_semantics<parallel>], iteration_bounds = array<i64: 2>, scalar_prefetch = 0 : i64, scratch_operands = 0 : i64, tpu.core_type = #tpu.core_type<tc>, window_params = [{transform_indices = @transform_0, window_bounds = array<i64: 320, 16>}, {pipeline_mode = #tpu.pipeline_mode<synchronous>, transform_indices = @transform_1, window_bounds = array<i64: 16, 384>}, {pipeline_mode = #tpu.pipeline_mode<synchronous>, transform_indices = @transform_2, window_bounds = array<i64: 1, 384>}, {transform_indices = @transform_3, window_bounds = array<i64: 320, 384>}]} {
    %c0 = arith.constant 0 : index
    %c0_0 = arith.constant 0 : index
    %0 = vector.load %arg1[%c0, %c0_0] : memref<320x16xbf16, #tpu.memory_space<vmem>>, vector<320x16xbf16>
    %c0_1 = arith.constant 0 : index
    %c0_2 = arith.constant 0 : index
    %1 = vector.load %arg2[%c0_1, %c0_2] : memref<16x384xbf16, #tpu.memory_space<vmem>>, vector<16x384xbf16>
    %cst = arith.constant dense<0.000000e+00> : vector<320x384xf32>
    %2 = tpu.matmul %0, %1, %cst {dimension_numbers = #tpu.dot_dimension_numbers<[1], [0], [0], [1], [0, 0, 1, 1], [], []>} : vector<320x16xbf16>, vector<16x384xbf16>, vector<320x384xf32> -> vector<320x384xf32>
    %c0_3 = arith.constant 0 : index
    %c0_4 = arith.constant 0 : index
    %3 = vector.load %arg3[%c0_3, %c0_4] : memref<1x384xf32, #tpu.memory_space<vmem>>, vector<1x384xf32>
    %4 = vector.broadcast %3 : vector<1x384xf32> to vector<320x384xf32>
    %5 = arith.addf %2, %4 : vector<320x384xf32>
    %cst_5 = arith.constant 0.000000e+00 : f32
    %6 = vector.broadcast %cst_5 : f32 to vector<320x384xf32>
    %7 = arith.maximumf %5, %6 : vector<320x384xf32>
    %8 = arith.truncf %7 : vector<320x384xf32> to vector<320x384xbf16>
    %c0_6 = arith.constant 0 : index
    %c0_7 = arith.constant 0 : index
    %9 = vector.load %arg4[%c0_6, %c0_7] : memref<320x384xbf16, #tpu.memory_space<vmem>>, vector<320x384xbf16>
    tpu.vector_store %arg4[%c0_6, %c0_7], %8 {strides = array<i32>} : memref<320x384xbf16, #tpu.memory_space<vmem>>, vector<320x384xbf16>,
    return
  }
  func.func @transform_0(%arg0: i32) -> (i32, i32) {
    %c0_i32 = arith.constant 0 : i32
    %c0_i32_0 = arith.constant 0 : i32
    return %arg0, %c0_i32 : i32, i32
  }
  func.func @transform_1(%arg0: i32) -> (i32, i32) {
    %c0_i32 = arith.constant 0 : i32
    %c0_i32_0 = arith.constant 0 : i32
    %c0_i32_1 = arith.constant 0 : i32
    return %c0_i32, %c0_i32_0 : i32, i32
  }
  func.func @transform_2(%arg0: i32) -> (i32, i32) {
    %c0_i32 = arith.constant 0 : i32
    %c0_i32_0 = arith.constant 0 : i32
    %c0_i32_1 = arith.constant 0 : i32
    return %c0_i32, %c0_i32_0 : i32, i32
  }
  func.func @transform_3(%arg0: i32) -> (i32, i32) {
    %c0_i32 = arith.constant 0 : i32
    %c0_i32_0 = arith.constant 0 : i32
    return %arg0, %c0_i32 : i32, i32
  }
}

module attributes {stable_mosaic.version = 11 : i64} {
  func.func @_matmul_bias_relu_kernel(%arg0: i32, %arg1: memref<320x1344xbf16, #tpu.memory_space<vmem>>, %arg2: memref<1344x192xbf16, #tpu.memory_space<vmem>>, %arg3: memref<1x192xf32, #tpu.memory_space<vmem>>, %arg4: memref<320x192xbf16, #tpu.memory_space<vmem>>) attributes {dimension_semantics = [#tpu.dimension_semantics<parallel>], iteration_bounds = array<i64: 2>, scalar_prefetch = 0 : i64, scratch_operands = 0 : i64, tpu.core_type = #tpu.core_type<tc>, window_params = [{transform_indices = @transform_0, window_bounds = array<i64: 320, 1344>}, {pipeline_mode = #tpu.pipeline_mode<synchronous>, transform_indices = @transform_1, window_bounds = array<i64: 1344, 192>}, {pipeline_mode = #tpu.pipeline_mode<synchronous>, transform_indices = @transform_2, window_bounds = array<i64: 1, 192>}, {transform_indices = @transform_3, window_bounds = array<i64: 320, 192>}]} {
    %c0 = arith.constant 0 : index
    %c0_0 = arith.constant 0 : index
    %0 = vector.load %arg1[%c0, %c0_0] : memref<320x1344xbf16, #tpu.memory_space<vmem>>, vector<320x1344xbf16>
    %c0_1 = arith.constant 0 : index
    %c0_2 = arith.constant 0 : index
    %1 = vector.load %arg2[%c0_1, %c0_2] : memref<1344x192xbf16, #tpu.memory_space<vmem>>, vector<1344x192xbf16>
    %cst = arith.constant dense<0.000000e+00> : vector<320x192xf32>
    %2 = tpu.matmul %0, %1, %cst {dimension_numbers = #tpu.dot_dimension_numbers<[1], [0], [0], [1], [0, 0, 1, 1], [], []>} : vector<320x1344xbf16>, vector<1344x192xbf16>, vector<320x192xf32> -> vector<320x192xf32>
    %c0_3 = arith.constant 0 : index
    %c0_4 = arith.constant 0 : index
    %3 = vector.load %arg3[%c0_3, %c0_4] : memref<1x192xf32, #tpu.memory_space<vmem>>, vector<1x192xf32>
    %4 = vector.broadcast %3 : vector<1x192xf32> to vector<320x192xf32>
    %5 = arith.addf %2, %4 : vector<320x192xf32>
    %cst_5 = arith.constant 0.000000e+00 : f32
    %6 = vector.broadcast %cst_5 : f32 to vector<320x192xf32>
    %7 = arith.maximumf %5, %6 : vector<320x192xf32>
    %8 = arith.truncf %7 : vector<320x192xf32> to vector<320x192xbf16>
    %c0_6 = arith.constant 0 : index
    %c0_7 = arith.constant 0 : index
    %9 = vector.load %arg4[%c0_6, %c0_7] : memref<320x192xbf16, #tpu.memory_space<vmem>>, vector<320x192xbf16>
    tpu.vector_store %arg4[%c0_6, %c0_7], %8 {strides = array<i32>} : memref<320x192xbf16, #tpu.memory_space<vmem>>, vector<320x192xbf16>,
    return
  }
  func.func @transform_0(%arg0: i32) -> (i32, i32) {
    %c0_i32 = arith.constant 0 : i32
    %c0_i32_0 = arith.constant 0 : i32
    return %arg0, %c0_i32 : i32, i32
  }
  func.func @transform_1(%arg0: i32) -> (i32, i32) {
    %c0_i32 = arith.constant 0 : i32
    %c0_i32_0 = arith.constant 0 : i32
    %c0_i32_1 = arith.constant 0 : i32
    return %c0_i32, %c0_i32_0 : i32, i32
  }
  func.func @transform_2(%arg0: i32) -> (i32, i32) {
    %c0_i32 = arith.constant 0 : i32
    %c0_i32_0 = arith.constant 0 : i32
    %c0_i32_1 = arith.constant 0 : i32
    return %c0_i32, %c0_i32_0 : i32, i32
  }
  func.func @transform_3(%arg0: i32) -> (i32, i32) {
    %c0_i32 = arith.constant 0 : i32
    %c0_i32_0 = arith.constant 0 : i32
    return %arg0, %c0_i32 : i32, i32
  }
}

module attributes {stable_mosaic.version = 11 : i64} {
  func.func @_matmul_bias_relu_kernel(%arg0: i32, %arg1: memref<64x1728xbf16, #tpu.memory_space<vmem>>, %arg2: memref<1728x192xbf16, #tpu.memory_space<vmem>>, %arg3: memref<1x192xf32, #tpu.memory_space<vmem>>, %arg4: memref<64x192xf32, #tpu.memory_space<vmem>>) attributes {dimension_semantics = [#tpu.dimension_semantics<parallel>], iteration_bounds = array<i64: 2>, scalar_prefetch = 0 : i64, scratch_operands = 0 : i64, tpu.core_type = #tpu.core_type<tc>, window_params = [{transform_indices = @transform_0, window_bounds = array<i64: 64, 1728>}, {pipeline_mode = #tpu.pipeline_mode<synchronous>, transform_indices = @transform_1, window_bounds = array<i64: 1728, 192>}, {pipeline_mode = #tpu.pipeline_mode<synchronous>, transform_indices = @transform_2, window_bounds = array<i64: 1, 192>}, {transform_indices = @transform_3, window_bounds = array<i64: 64, 192>}]} {
    %c0 = arith.constant 0 : index
    %c0_0 = arith.constant 0 : index
    %0 = vector.load %arg1[%c0, %c0_0] : memref<64x1728xbf16, #tpu.memory_space<vmem>>, vector<64x1728xbf16>
    %c0_1 = arith.constant 0 : index
    %c0_2 = arith.constant 0 : index
    %1 = vector.load %arg2[%c0_1, %c0_2] : memref<1728x192xbf16, #tpu.memory_space<vmem>>, vector<1728x192xbf16>
    %cst = arith.constant dense<0.000000e+00> : vector<64x192xf32>
    %2 = tpu.matmul %0, %1, %cst {dimension_numbers = #tpu.dot_dimension_numbers<[1], [0], [0], [1], [0, 0, 1, 1], [], []>} : vector<64x1728xbf16>, vector<1728x192xbf16>, vector<64x192xf32> -> vector<64x192xf32>
    %c0_3 = arith.constant 0 : index
    %c0_4 = arith.constant 0 : index
    %3 = vector.load %arg3[%c0_3, %c0_4] : memref<1x192xf32, #tpu.memory_space<vmem>>, vector<1x192xf32>
    %4 = vector.broadcast %3 : vector<1x192xf32> to vector<64x192xf32>
    %5 = arith.addf %2, %4 : vector<64x192xf32>
    %cst_5 = arith.constant 0.000000e+00 : f32
    %6 = vector.broadcast %cst_5 : f32 to vector<64x192xf32>
    %7 = arith.maximumf %5, %6 : vector<64x192xf32>
    %c0_6 = arith.constant 0 : index
    %c0_7 = arith.constant 0 : index
    %8 = vector.load %arg4[%c0_6, %c0_7] : memref<64x192xf32, #tpu.memory_space<vmem>>, vector<64x192xf32>
    tpu.vector_store %arg4[%c0_6, %c0_7], %7 {strides = array<i32>} : memref<64x192xf32, #tpu.memory_space<vmem>>, vector<64x192xf32>,
    return
  }
  func.func @transform_0(%arg0: i32) -> (i32, i32) {
    %c0_i32 = arith.constant 0 : i32
    %c0_i32_0 = arith.constant 0 : i32
    return %arg0, %c0_i32 : i32, i32
  }
  func.func @transform_1(%arg0: i32) -> (i32, i32) {
    %c0_i32 = arith.constant 0 : i32
    %c0_i32_0 = arith.constant 0 : i32
    %c0_i32_1 = arith.constant 0 : i32
    return %c0_i32, %c0_i32_0 : i32, i32
  }
  func.func @transform_2(%arg0: i32) -> (i32, i32) {
    %c0_i32 = arith.constant 0 : i32
    %c0_i32_0 = arith.constant 0 : i32
    %c0_i32_1 = arith.constant 0 : i32
    return %c0_i32, %c0_i32_0 : i32, i32
  }
  func.func @transform_3(%arg0: i32) -> (i32, i32) {
    %c0_i32 = arith.constant 0 : i32
    %c0_i32_0 = arith.constant 0 : i32
    return %arg0, %c0_i32 : i32, i32
  }
}

module attributes {stable_mosaic.version = 11 : i64} {
  func.func @_matmul_bias_relu_kernel(%arg0: i32, %arg1: memref<64x1728xbf16, #tpu.memory_space<vmem>>, %arg2: memref<1728x320xbf16, #tpu.memory_space<vmem>>, %arg3: memref<1x320xf32, #tpu.memory_space<vmem>>, %arg4: memref<64x320xf32, #tpu.memory_space<vmem>>) attributes {dimension_semantics = [#tpu.dimension_semantics<parallel>], iteration_bounds = array<i64: 2>, scalar_prefetch = 0 : i64, scratch_operands = 0 : i64, tpu.core_type = #tpu.core_type<tc>, window_params = [{transform_indices = @transform_0, window_bounds = array<i64: 64, 1728>}, {pipeline_mode = #tpu.pipeline_mode<synchronous>, transform_indices = @transform_1, window_bounds = array<i64: 1728, 320>}, {pipeline_mode = #tpu.pipeline_mode<synchronous>, transform_indices = @transform_2, window_bounds = array<i64: 1, 320>}, {transform_indices = @transform_3, window_bounds = array<i64: 64, 320>}]} {
    %c0 = arith.constant 0 : index
    %c0_0 = arith.constant 0 : index
    %0 = vector.load %arg1[%c0, %c0_0] : memref<64x1728xbf16, #tpu.memory_space<vmem>>, vector<64x1728xbf16>
    %c0_1 = arith.constant 0 : index
    %c0_2 = arith.constant 0 : index
    %1 = vector.load %arg2[%c0_1, %c0_2] : memref<1728x320xbf16, #tpu.memory_space<vmem>>, vector<1728x320xbf16>
    %cst = arith.constant dense<0.000000e+00> : vector<64x320xf32>
    %2 = tpu.matmul %0, %1, %cst {dimension_numbers = #tpu.dot_dimension_numbers<[1], [0], [0], [1], [0, 0, 1, 1], [], []>} : vector<64x1728xbf16>, vector<1728x320xbf16>, vector<64x320xf32> -> vector<64x320xf32>
    %c0_3 = arith.constant 0 : index
    %c0_4 = arith.constant 0 : index
    %3 = vector.load %arg3[%c0_3, %c0_4] : memref<1x320xf32, #tpu.memory_space<vmem>>, vector<1x320xf32>
    %4 = vector.broadcast %3 : vector<1x320xf32> to vector<64x320xf32>
    %5 = arith.addf %2, %4 : vector<64x320xf32>
    %cst_5 = arith.constant 0.000000e+00 : f32
    %6 = vector.broadcast %cst_5 : f32 to vector<64x320xf32>
    %7 = arith.maximumf %5, %6 : vector<64x320xf32>
    %c0_6 = arith.constant 0 : index
    %c0_7 = arith.constant 0 : index
    %8 = vector.load %arg4[%c0_6, %c0_7] : memref<64x320xf32, #tpu.memory_space<vmem>>, vector<64x320xf32>
    tpu.vector_store %arg4[%c0_6, %c0_7], %7 {strides = array<i32>} : memref<64x320xf32, #tpu.memory_space<vmem>>, vector<64x320xf32>,
    return
  }
  func.func @transform_0(%arg0: i32) -> (i32, i32) {
    %c0_i32 = arith.constant 0 : i32
    %c0_i32_0 = arith.constant 0 : i32
    return %arg0, %c0_i32 : i32, i32
  }
  func.func @transform_1(%arg0: i32) -> (i32, i32) {
    %c0_i32 = arith.constant 0 : i32
    %c0_i32_0 = arith.constant 0 : i32
    %c0_i32_1 = arith.constant 0 : i32
    return %c0_i32, %c0_i32_0 : i32, i32
  }
  func.func @transform_2(%arg0: i32) -> (i32, i32) {
    %c0_i32 = arith.constant 0 : i32
    %c0_i32_0 = arith.constant 0 : i32
    %c0_i32_1 = arith.constant 0 : i32
    return %c0_i32, %c0_i32_0 : i32, i32
  }
  func.func @transform_3(%arg0: i32) -> (i32, i32) {
    %c0_i32 = arith.constant 0 : i32
    %c0_i32_0 = arith.constant 0 : i32
    return %arg0, %c0_i32 : i32, i32
  }
}

module attributes {stable_mosaic.version = 11 : i64} {
  func.func @_maxpool_kernel(%arg0: i32, %arg1: memref<9x64x16xf32, #tpu.memory_space<vmem>>, %arg2: memref<64x16xf32, #tpu.memory_space<vmem>>) attributes {dimension_semantics = [#tpu.dimension_semantics<parallel>], iteration_bounds = array<i64: 2>, scalar_prefetch = 0 : i64, scratch_operands = 0 : i64, tpu.core_type = #tpu.core_type<tc>, window_params = [{transform_indices = @transform_0, window_bounds = array<i64: 9, 64, 16>}, {transform_indices = @transform_1, window_bounds = array<i64: 64, 16>}]} {
    %c0 = arith.constant 0 : index
    %c0_0 = arith.constant 0 : index
    %c0_1 = arith.constant 0 : index
    %0 = vector.load %arg1[%c0, %c0_0, %c0_1] : memref<9x64x16xf32, #tpu.memory_space<vmem>>, vector<9x64x16xf32>
    %cst = arith.constant dense<0xFF800000> : vector<64x16xf32>
    %1 = vector.multi_reduction <maximumf>, %0, %cst [0] : vector<9x64x16xf32> to vector<64x16xf32>
    %c0_2 = arith.constant 0 : index
    %c0_3 = arith.constant 0 : index
    %2 = vector.load %arg2[%c0_2, %c0_3] : memref<64x16xf32, #tpu.memory_space<vmem>>, vector<64x16xf32>
    tpu.vector_store %arg2[%c0_2, %c0_3], %1 {strides = array<i32>} : memref<64x16xf32, #tpu.memory_space<vmem>>, vector<64x16xf32>,
    return
  }
  func.func @transform_0(%arg0: i32) -> (i32, i32, i32) {
    %c0_i32 = arith.constant 0 : i32
    %c0_i32_0 = arith.constant 0 : i32
    %c0_i32_1 = arith.constant 0 : i32
    return %c0_i32, %arg0, %c0_i32_0 : i32, i32, i32
  }
  func.func @transform_1(%arg0: i32) -> (i32, i32) {
    %c0_i32 = arith.constant 0 : i32
    %c0_i32_0 = arith.constant 0 : i32
    return %arg0, %c0_i32 : i32, i32
  }
}

</mosaic_0001>

<bundles_post_ra>
// kernel: inception_d_forward.6
= control target key start
LH: loop header
LB: loop body
LE: loop exit
PB: predicated region body
PF: predicated region fallthrough
CT: control target
= control target key end

     0   :  { %s1859_s12 = smov 0   ;;  %s2200_s0 = inlined_call_operand.vmem [shape: bf16[640,16], index: 0, kind: input, shape index: {}]   ;;  %s2201_s1 = inlined_call_operand.vmem [shape: bf16[16,384], index: 1, kind: input, shape index: {}]   ;;  %s2202_s2 = inlined_call_operand.vmem [shape: f32[1,384], index: 2, kind: input, shape index: {}]   ;;  %s2203_s3 = inlined_call_operand.vmem [shape: bf16[640,384], index: 3, kind: output, shape index: {}]  }
   0x1 LB: > { %s1499_s13 = sadd.s32 4294967295, %s1836_s12   ;;  %p1503_p0 = scmp.ge.s32.totalorder %s1836_s12, 1  ;;  %s1836_s12 = sphi %s1859_s12, %s13_s12  }
   0x2   : > { %p138_p1 = scmp.lt.s32.totalorder %s1836_s12, 3 }
   0x4   : > { %p139_p2 = pnand %p1503_p0, %p138_p1 }
   0x5   : > { %v1806_v0 = vld [vmem:[%s2201_s1 + $0x4] ss:$12 sps:$4 sm:$0xff] (!%p139_p2)   ;;  %s163_s16 = smul.u32 (!%p139_p2), 40, %s1499_s13  ;;  %v1808_v1 = vld [vmem:[%s2201_s1] ss:$12 sps:$4 sm:$0xff] (!%p139_p2)   ;;  %v1838_v2 = vmov (!%p139_p2), 0   ;;  %v223_v24 = vlaneseq (!%p139_p2) }
   0x6   : > { %142 = sbr.rel (%p139_p2) target bundleno = 351 (0x15f), region = 32  ;;  %447 = vmatprep.mubr.bf16.mxu0 (!%p139_p2), %v1838_v2  ;;  %597 = vmatprep.mubr.bf16.mxu1 (!%p139_p2), %v1838_v2  ;;  %v1809_v3 = vld [vmem:[%s2201_s1 + $0x8] ss:$12 sps:$4 sm:$0xff] (!%p139_p2)   ;;  %vm354_vm0 = vcmask (!%p139_p2), 130048   ;;  %v1978_v27 = vld [vmem:[%s2202_s2] sm:$0x7] (!%p139_p2) }
   0x7   : > { %1794 = vmatprep.subr.bf16.mxu1 (!%p139_p2), %v1806_v0  ;;  %415 = vmatprep.subr.bf16.mxu0 (!%p139_p2), %v1806_v0  ;;  %p164_p3 = scmp.lt.s32.totalorder (!%p139_p2), %s163_s16, 79  ;;  %v1972_v25 = vshrl.u32 (!%p139_p2), %v223_v24, 7 }
   0x8   : > { %1795 = vmatpush1.bf16.msra.mxu1 (!%p139_p2), %v1808_v1  ;;  %416 = vmatpush1.bf16.msra.mxu0 (!%p139_p2), %v1808_v1 }
   0x9   : > { %1752 = vmatprep.subr.bf16.mxu1 (!%p139_p2), %v1809_v3  ;;  %v225_v26 = vsub.s32 (!%p139_p2), 0, %v1972_v25  ;;  %v229_v28 = vsub.s32 (!%p139_p2), 1, %v1972_v25 }
   0xb   : > { %v1982_v29 = vrot.slane (!%p139_p2), %v1978_v27, %v225_v26  ;;  %v1985_v30 = vrot.slane (!%p139_p2), %v1978_v27, %v229_v28 }
   0xd   : > { %s2205_s16 = smov (!%p164_p3, %s163_s16), 79 }
   0xe   : > { %s1504_s21 = sshll.u32 %s2205_s16, 2  ;;  %s1796_s27 = smul.u32 12, %s2205_s16 }
   0xf   : > { %s1884_s24 = scalar_lea.vmem %s2200_s0, %s1504_s21 }
  0x10   : > { %v1810_v4 = vld [vmem:[%s1884_s24] sm:$0xff]   ;;  %v1888_v5 = vld [vmem:[%s1884_s24 + $0x78] sm:$0xff]   ;;  %v1812_v6 = vld [vmem:[%s1884_s24 + $0x8] sm:$0xff]   ;;  %s1998_s30 = scalar_lea.vmem %s2203_s3, %s1796_s27 }
  0x11   : > { %1529 = vmatmul.mubr.msk.bf16.vlgmr.msra.gmra.mrb[0].mxu0 %vm354_vm0, %v1810_v4  ;;  %1544 = vmatmul.mubr.msk.bf16.vlgmr.msra.gmra.mrb[0].mxu1 %vm354_vm0, %v1888_v5  ;;  %v1897_v7 = vld [vmem:[%s1884_s24 + $0x80] sm:$0xff]   ;;  %v1814_v8 = vld [vmem:[%s1884_s24 + $0x10] sm:$0xff]   ;;  %v1815_v9 = vld [vmem:[%s1884_s24 + $0x88] sm:$0xff]  }
  0x12   : > { %457 = vmatprep.mubr.bf16.mxu0 %v1838_v2  ;;  %1753 = vmatpush3.bf16.msra.mxu1 %v1809_v3  ;;  %v1816_v10 = vld [vmem:[%s1884_s24 + $0x18] sm:$0xff]   ;;  %v1817_v11 = vld [vmem:[%s1884_s24 + $0x90] sm:$0xff]   ;;  %v1818_v12 = vld [vmem:[%s1884_s24 + $0x20] sm:$0xff]  }
  0x13   : > { %607 = vmatprep.mubr.bf16.mxu1 %v1838_v2  ;;  %v1819_v13 = vld [vmem:[%s1884_s24 + $0x98] sm:$0xff]   ;;  %v1820_v14 = vld [vmem:[%s1884_s24 + $0x28] sm:$0xff]   ;;  %v1821_v15 = vld [vmem:[%s1884_s24 + $0x30] sm:$0xff]  }
  0x14   : > { %v1822_v16 = vld [vmem:[%s1884_s24 + $0x38] sm:$0xff]   ;;  %v1823_v17 = vld [vmem:[%s1884_s24 + $0x40] sm:$0xff]   ;;  %v1824_v18 = vld [vmem:[%s1884_s24 + $0x48] sm:$0xff]  }
  0x15   : > { %v1825_v19 = vld [vmem:[%s1884_s24 + $0x50] sm:$0xff]   ;;  %v1826_v20 = vld [vmem:[%s1884_s24 + $0x58] sm:$0xff]   ;;  %v1827_v21 = vld [vmem:[%s1884_s24 + $0x60] sm:$0xff]  }
  0x16   : > { %v1828_v22 = vld [vmem:[%s1884_s24 + $0x68] sm:$0xff]   ;;  %v1829_v23 = vld [vmem:[%s1884_s24 + $0x70] sm:$0xff]  }
  0x19   : > { %1530 = vmatmul.mubr.msk.bf16.gmra.mrb[4].mxu0 %vm354_vm0, %v1812_v6  ;;  %1545 = vmatmul.mubr.msk.bf16.gmra.mrb[4].mxu1 %vm354_vm0, %v1897_v7 }
  0x1a   : > { %467 = vmatprep.mubr.bf16.mxu0 %v1838_v2  ;;  %617 = vmatprep.mubr.bf16.mxu1 %v1838_v2 }
  0x21   : > { %1531 = vmatmul.mubr.msk.bf16.gmra.mrb[8].mxu0 %vm354_vm0, %v1814_v8  ;;  %1546 = vmatmul.mubr.msk.bf16.gmra.mrb[8].mxu1 %vm354_vm0, %v1815_v9 }
  0x22   : > { %477 = vmatprep.mubr.bf16.mxu0 %v1838_v2  ;;  %627 = vmatprep.mubr.bf16.mxu1 %v1838_v2 }
  0x29   : > { %1532 = vmatmul.mubr.msk.bf16.gmra.mrb[12].mxu0 %vm354_vm0, %v1816_v10  ;;  %1547 = vmatmul.mubr.msk.bf16.gmra.mrb[12].mxu1 %vm354_vm0, %v1817_v11 }
  0x2a   : > { %487 = vmatprep.mubr.bf16.mxu0 %v1838_v2  ;;  %637 = vmatprep.mubr.bf16.mxu1 %v1838_v2 }
  0x31   : > { %1533 = vmatmul.mubr.msk.bf16.gmra.mrb[16].mxu0 %vm354_vm0, %v1818_v12  ;;  %1548 = vmatmul.mubr.msk.bf16.gmra.mrb[16].mxu1 %vm354_vm0, %v1819_v13 }
  0x32   : > { %497 = vmatprep.mubr.bf16.mxu0 %v1838_v2  ;;  %1754 = vmatprep.mubr.msk.bf16.mxu1 %vm354_vm0, %v1810_v4 }
  0x39   : > { %1534 = vmatmul.mubr.msk.bf16.gmra.mrb[20].mxu0 %vm354_vm0, %v1820_v14  ;;  %1755 = vmatmul.mubr.msk.bf16.vlgmr.msra.gmra.mrb[20].mxu1 %vm354_vm0, %v1812_v6 }
  0x3a   : > { %507 = vmatprep.mubr.bf16.mxu0 %v1838_v2  ;;  %1758 = vmatprep.mubr.msk.bf16.mxu1 %vm354_vm0, %v1814_v8 }
  0x41   : > { %1535 = vmatmul.mubr.msk.bf16.gmra.mrb[24].mxu0 %vm354_vm0, %v1821_v15  ;;  %1759 = vmatmul.mubr.msk.bf16.gmra.mrb[24].mxu1 %vm354_vm0, %v1816_v10 }
  0x42   : > { %517 = vmatprep.mubr.bf16.mxu0 %v1838_v2  ;;  %1762 = vmatprep.mubr.msk.bf16.mxu1 %vm354_vm0, %v1818_v12 }
  0x49   : > { %1536 = vmatmul.mubr.msk.bf16.gmra.mrb[28].mxu0 %vm354_vm0, %v1822_v16  ;;  %1763 = vmatmul.mubr.msk.bf16.gmra.mrb[28].mxu1 %vm354_vm0, %v1820_v14 }
  0x4a   : > { %527 = vmatprep.mubr.bf16.mxu0 %v1838_v2  ;;  %1766 = vmatprep.mubr.msk.bf16.mxu1 %vm354_vm0, %v1821_v15 }
  0x51   : > { %1537 = vmatmul.mubr.msk.bf16.gmra.mrb[32].mxu0 %vm354_vm0, %v1823_v17  ;;  %1767 = vmatmul.mubr.msk.bf16.gmra.mrb[32].mxu1 %vm354_vm0, %v1822_v16 }
  0x52   : > { %537 = vmatprep.mubr.bf16.mxu0 %v1838_v2  ;;  %1770 = vmatprep.mubr.msk.bf16.mxu1 %vm354_vm0, %v1823_v17 }
  0x59   : > { %1538 = vmatmul.mubr.msk.bf16.gmra.mrb[36].mxu0 %vm354_vm0, %v1824_v18  ;;  %1771 = vmatmul.mubr.msk.bf16.gmra.mrb[36].mxu1 %vm354_vm0, %v1824_v18 }
  0x5a   : > { %547 = vmatprep.mubr.bf16.mxu0 %v1838_v2  ;;  %1774 = vmatprep.mubr.msk.bf16.mxu1 %vm354_vm0, %v1825_v19 }
  0x61   : > { %1539 = vmatmul.mubr.msk.bf16.gmra.mrb[40].mxu0 %vm354_vm0, %v1825_v19  ;;  %1775 = vmatmul.mubr.msk.bf16.gmra.mrb[40].mxu1 %vm354_vm0, %v1826_v20 }
  0x62   : > { %557 = vmatprep.mubr.bf16.mxu0 %v1838_v2  ;;  %1778 = vmatprep.mubr.msk.bf16.mxu1 %vm354_vm0, %v1827_v21 }
  0x69   : > { %1540 = vmatmul.mubr.msk.bf16.gmra.mrb[44].mxu0 %vm354_vm0, %v1826_v20  ;;  %1779 = vmatmul.mubr.msk.bf16.gmra.mrb[44].mxu1 %vm354_vm0, %v1828_v22 }
  0x6a   : > { %567 = vmatprep.mubr.bf16.mxu0 %v1838_v2  ;;  %1782 = vmatprep.mubr.msk.bf16.mxu1 %vm354_vm0, %v1829_v23 }
  0x71   : > { %1541 = vmatmul.mubr.msk.bf16.gmra.mrb[48].mxu0 %vm354_vm0, %v1827_v21  ;;  %1783 = vmatmul.mubr.msk.bf16.gmra.mrb[48].mxu1 %vm354_vm0, %v1888_v5 }
  0x72   : > { %577 = vmatprep.mubr.bf16.mxu0 %v1838_v2  ;;  %1786 = vmatprep.mubr.msk.bf16.mxu1 %vm354_vm0, %v1897_v7 }
  0x79   : > { %1542 = vmatmul.mubr.msk.bf16.gmra.mrb[52].mxu0 %vm354_vm0, %v1828_v22  ;;  %1787 = vmatmul.mubr.msk.bf16.gmra.mrb[52].mxu1 %vm354_vm0, %v1815_v9 }
  0x7a   : > { %587 = vmatprep.mubr.bf16.mxu0 %v1838_v2  ;;  %1790 = vmatprep.mubr.msk.bf16.mxu1 %vm354_vm0, %v1817_v11 }
  0x81   : > { %1543 = vmatmul.mubr.msk.bf16.gmra.mrb[56].mxu0 %vm354_vm0, %v1829_v23  ;;  %1791 = vmatmul.mubr.msk.bf16.gmra.mrb[56].mxu1 %vm354_vm0, %v1819_v13 }
  0xe4   : > { %v449_v31 = vpop.f32.mrb[0].mxu0  ;;  %v599_v33 = vpop.f32.mrb[0].mxu1 }
  0xe5   : > { %v450_v32 = vadd.f32 %v449_v31, %v1982_v29  ;;  %v451_v34 = vpop.f32.mrb[1].mxu0  ;;  %v600_v35 = vadd.f32 %v599_v33, %v1982_v29  ;;  %v601_v37 = vpop.f32.mrb[1].mxu1 }
  0xe6   : > { %v452_v36 = vadd.f32 %v451_v34, %v1985_v30  ;;  %v453_v38 = vpop.f32.mrb[2].mxu0  ;;  %v602_v40 = vadd.f32 %v601_v37, %v1985_v30  ;;  %v603_v42 = vpop.f32.mrb[2].mxu1 }
  0xe7   : > { %v841_v39 = vmax.f32 %v450_v32, 0.0  ;;  %v454_v41 = vadd.f32 %v453_v38, %v1982_v29  ;;  %v455_v43 = vpop.f32.mrb[3].mxu0  ;;  %v931_v44 = vmax.f32 %v600_v35, 0.0  ;;  %v604_v46 = vadd.f32 %v603_v42, %v1982_v29  ;;  %v605_v48 = vpop.f32.mrb[3].mxu1 }
  0xe8   : > { %v842_v45 = vmax.f32 %v452_v36, 0.0  ;;  %v456_v47 = vadd.f32 %v455_v43, %v1985_v30  ;;  %v932_v49 = vmax.f32 %v602_v40, 0.0  ;;  %v606_v51 = vadd.f32 %v605_v48, %v1985_v30 }
  0xe9   : > { %v844_v50 = vmax.f32 %v454_v41, 0.0  ;;  %v934_v53 = vmax.f32 %v604_v46, 0.0 }
  0xea   : > { %v1651_v52 = vpack.c.bf16 %v842_v45, %v841_v39  ;;  %v845_v54 = vmax.f32 %v456_v47, 0.0  ;;  %v1711_v55 = vpack.c.bf16 %v932_v49, %v931_v44  ;;  %v935_v56 = vmax.f32 %v606_v51, 0.0 }
  0xec   : > { %1361 = vst [vmem:[%s1998_s30] sm:$0xff] %v1651_v52  ;;  %v1653_v57 = vpack.c.bf16 %v845_v54, %v844_v50  ;;  %v459_v58 = vpop.f32.mrb[4].mxu0  ;;  %1421 = vst [vmem:[%s1998_s30 + $0x168] sm:$0xff] %v1711_v55  ;;  %v1713_v59 = vpack.c.bf16 %v935_v56, %v934_v53  ;;  %v609_v61 = vpop.f32.mrb[4].mxu1 }
  0xed   : > { %v460_v60 = vadd.f32 %v459_v58, %v1982_v29  ;;  %v461_v62 = vpop.f32.mrb[5].mxu0  ;;  %v610_v63 = vadd.f32 %v609_v61, %v1982_v29  ;;  %v611_v1 = vpop.f32.mrb[5].mxu1 }
  0xee   : > { %1363 = vst [vmem:[%s1998_s30 + $0xc] sm:$0xff] %v1653_v57  ;;  %v462_v0 = vadd.f32 %v461_v62, %v1985_v30  ;;  %v463_v2 = vpop.f32.mrb[6].mxu0  ;;  %1423 = vst [vmem:[%s1998_s30 + $0x174] sm:$0xff] %v1713_v59  ;;  %v612_v4 = vadd.f32 %v611_v1, %v1985_v30  ;;  %v613_v6 = vpop.f32.mrb[6].mxu1 }
  0xef   : > { %v847_v3 = vmax.f32 %v460_v60, 0.0  ;;  %v464_v5 = vadd.f32 %v463_v2, %v1982_v29  ;;  %v465_v7 = vpop.f32.mrb[7].mxu0  ;;  %v937_v8 = vmax.f32 %v610_v63, 0.0  ;;  %v614_v10 = vadd.f32 %v613_v6, %v1982_v29  ;;  %v615_v12 = vpop.f32.mrb[7].mxu1 }
  0xf0   : > { %v848_v9 = vmax.f32 %v462_v0, 0.0  ;;  %v466_v11 = vadd.f32 %v465_v7, %v1985_v30  ;;  %v938_v13 = vmax.f32 %v612_v4, 0.0  ;;  %v616_v15 = vadd.f32 %v615_v12, %v1985_v30 }
  0xf1   : > { %v850_v14 = vmax.f32 %v464_v5, 0.0  ;;  %v940_v17 = vmax.f32 %v614_v10, 0.0 }
  0xf2   : > { %v1655_v16 = vpack.c.bf16 %v848_v9, %v847_v3  ;;  %v851_v18 = vmax.f32 %v466_v11, 0.0  ;;  %v1715_v19 = vpack.c.bf16 %v938_v13, %v937_v8  ;;  %v941_v20 = vmax.f32 %v616_v15, 0.0 }
  0xf4   : > { %1365 = vst [vmem:[%s1998_s30 + $0x18] sm:$0xff] %v1655_v16  ;;  %v1657_v21 = vpack.c.bf16 %v851_v18, %v850_v14  ;;  %v469_v22 = vpop.f32.mrb[8].mxu0  ;;  %1425 = vst [vmem:[%s1998_s30 + $0x180] sm:$0xff] %v1715_v19  ;;  %v1717_v23 = vpack.c.bf16 %v941_v20, %v940_v17  ;;  %v619_v26 = vpop.f32.mrb[8].mxu1 }
  0xf5   : > { %v470_v24 = vadd.f32 %v469_v22, %v1982_v29  ;;  %v471_v28 = vpop.f32.mrb[9].mxu0  ;;  %v620_v31 = vadd.f32 %v619_v26, %v1982_v29  ;;  %v621_v33 = vpop.f32.mrb[9].mxu1 }
  0xf6   : > { %1367 = vst [vmem:[%s1998_s30 + $0x24] sm:$0xff] %v1657_v21  ;;  %v472_v32 = vadd.f32 %v471_v28, %v1985_v30  ;;  %v473_v34 = vpop.f32.mrb[10].mxu0  ;;  %1427 = vst [vmem:[%s1998_s30 + $0x18c] sm:$0xff] %v1717_v23  ;;  %v622_v36 = vadd.f32 %v621_v33, %v1985_v30  ;;  %v623_v38 = vpop.f32.mrb[10].mxu1 }
  0xf7   : > { %v853_v35 = vmax.f32 %v470_v24, 0.0  ;;  %v474_v37 = vadd.f32 %v473_v34, %v1982_v29  ;;  %v475_v39 = vpop.f32.mrb[11].mxu0  ;;  %v943_v40 = vmax.f32 %v620_v31, 0.0  ;;  %v624_v42 = vadd.f32 %v623_v38, %v1982_v29  ;;  %v625_v44 = vpop.f32.mrb[11].mxu1 }
  0xf8   : > { %v854_v41 = vmax.f32 %v472_v32, 0.0  ;;  %v476_v43 = vadd.f32 %v475_v39, %v1985_v30  ;;  %v944_v45 = vmax.f32 %v622_v36, 0.0  ;;  %v626_v47 = vadd.f32 %v625_v44, %v1985_v30 }
  0xf9   : > { %v856_v46 = vmax.f32 %v474_v37, 0.0  ;;  %v946_v49 = vmax.f32 %v624_v42, 0.0  ;;  %v233_v31 = vsub.s32 2, %v1972_v25 }
  0xfa   : > { %v1659_v48 = vpack.c.bf16 %v854_v41, %v853_v35  ;;  %v857_v50 = vmax.f32 %v476_v43, 0.0  ;;  %v1719_v51 = vpack.c.bf16 %v944_v45, %v943_v40  ;;  %v947_v52 = vmax.f32 %v626_v47, 0.0 }
  0xfb   : > { %v2051_v47 = vrot.slane %v1978_v27, %v233_v31 }
  0xfc   : > { %1369 = vst [vmem:[%s1998_s30 + $0x30] sm:$0xff] %v1659_v48  ;;  %v1661_v53 = vpack.c.bf16 %v857_v50, %v856_v46  ;;  %v479_v54 = vpop.f32.mrb[12].mxu0  ;;  %1429 = vst [vmem:[%s1998_s30 + $0x198] sm:$0xff] %v1719_v51  ;;  %v1721_v55 = vpack.c.bf16 %v947_v52, %v946_v49  ;;  %v629_v57 = vpop.f32.mrb[12].mxu1 }
  0xfd   : > { %v480_v56 = vadd.f32 %v479_v54, %v1982_v29  ;;  %v481_v58 = vpop.f32.mrb[13].mxu0  ;;  %v630_v59 = vadd.f32 %v629_v57, %v1982_v29  ;;  %v631_v61 = vpop.f32.mrb[13].mxu1 }
  0xfe   : > { %1371 = vst [vmem:[%s1998_s30 + $0x3c] sm:$0xff] %v1661_v53  ;;  %v482_v60 = vadd.f32 %v481_v58, %v1985_v30  ;;  %v483_v62 = vpop.f32.mrb[14].mxu0  ;;  %1431 = vst [vmem:[%s1998_s30 + $0x1a4] sm:$0xff] %v1721_v55  ;;  %v632_v0 = vadd.f32 %v631_v61, %v1985_v30  ;;  %v633_v2 = vpop.f32.mrb[14].mxu1 }
  0xff   : > { %v859_v63 = vmax.f32 %v480_v56, 0.0  ;;  %v484_v1 = vadd.f32 %v483_v62, %v1982_v29  ;;  %v485_v3 = vpop.f32.mrb[15].mxu0  ;;  %v949_v4 = vmax.f32 %v630_v59, 0.0  ;;  %v634_v6 = vadd.f32 %v633_v2, %v1982_v29  ;;  %v635_v8 = vpop.f32.mrb[15].mxu1 }
 0x100   : > { %v860_v5 = vmax.f32 %v482_v60, 0.0  ;;  %v486_v7 = vadd.f32 %v485_v3, %v1985_v30  ;;  %v950_v9 = vmax.f32 %v632_v0, 0.0  ;;  %v636_v11 = vadd.f32 %v635_v8, %v1985_v30 }
 0x101   : > { %v862_v10 = vmax.f32 %v484_v1, 0.0  ;;  %v952_v13 = vmax.f32 %v634_v6, 0.0 }
 0x102   : > { %v1663_v12 = vpack.c.bf16 %v860_v5, %v859_v63  ;;  %v863_v14 = vmax.f32 %v486_v7, 0.0  ;;  %v1723_v15 = vpack.c.bf16 %v950_v9, %v949_v4  ;;  %v953_v16 = vmax.f32 %v636_v11, 0.0 }
 0x104   : > { %1373 = vst [vmem:[%s1998_s30 + $0x48] sm:$0xff] %v1663_v12  ;;  %v1665_v17 = vpack.c.bf16 %v863_v14, %v862_v10  ;;  %v489_v18 = vpop.f32.mrb[16].mxu0  ;;  %1433 = vst [vmem:[%s1998_s30 + $0x1b0] sm:$0xff] %v1723_v15  ;;  %v1725_v19 = vpack.c.bf16 %v953_v16, %v952_v13  ;;  %v639_v21 = vpop.f32.mrb[16].mxu1 }
 0x105   : > { %v490_v20 = vadd.f32 %v489_v18, %v1982_v29  ;;  %v491_v22 = vpop.f32.mrb[17].mxu0  ;;  %v640_v23 = vadd.f32 %v639_v21, %v1982_v29  ;;  %v641_v26 = vpop.f32.mrb[17].mxu1 }
 0x106   : > { %1375 = vst [vmem:[%s1998_s30 + $0x54] sm:$0xff] %v1665_v17  ;;  %v492_v24 = vadd.f32 %v491_v22, %v1985_v30  ;;  %v493_v28 = vpop.f32.mrb[18].mxu0  ;;  %1435 = vst [vmem:[%s1998_s30 + $0x1bc] sm:$0xff] %v1725_v19  ;;  %v642_v33 = vadd.f32 %v641_v26, %v1985_v30  ;;  %v643_v35 = vpop.f32.mrb[18].mxu1 }
 0x107   : > { %v865_v32 = vmax.f32 %v490_v20, 0.0  ;;  %v494_v34 = vadd.f32 %v493_v28, %v1982_v29  ;;  %v495_v36 = vpop.f32.mrb[19].mxu0  ;;  %v955_v37 = vmax.f32 %v640_v23, 0.0  ;;  %v644_v39 = vadd.f32 %v643_v35, %v1982_v29  ;;  %v645_v41 = vpop.f32.mrb[19].mxu1 }
 0x108   : > { %v866_v38 = vmax.f32 %v492_v24, 0.0  ;;  %v496_v40 = vadd.f32 %v495_v36, %v1985_v30  ;;  %v956_v42 = vmax.f32 %v642_v33, 0.0  ;;  %v646_v25 = vadd.f32 %v645_v41, %v1985_v30 }
 0x109   : > { %v868_v43 = vmax.f32 %v494_v34, 0.0  ;;  %v958_v45 = vmax.f32 %v644_v39, 0.0 }
 0x10a   : > { %v1667_v44 = vpack.c.bf16 %v866_v38, %v865_v32  ;;  %v869_v46 = vmax.f32 %v496_v40, 0.0  ;;  %v1727_v48 = vpack.c.bf16 %v956_v42, %v955_v37  ;;  %v959_v49 = vmax.f32 %v646_v25, 0.0 }
 0x10c   : > { %1377 = vst [vmem:[%s1998_s30 + $0x60] sm:$0xff] %v1667_v44  ;;  %v1669_v50 = vpack.c.bf16 %v869_v46, %v868_v43  ;;  %v499_v51 = vpop.f32.mrb[20].mxu0  ;;  %1437 = vst [vmem:[%s1998_s30 + $0x1c8] sm:$0xff] %v1727_v48  ;;  %v1729_v52 = vpack.c.bf16 %v959_v49, %v958_v45  ;;  %v1756_v54 = vpop.f32.mrb[20].mxu1 }
 0x10d   : > { %v500_v53 = vadd.f32 %v499_v51, %v1982_v29  ;;  %v501_v55 = vpop.f32.mrb[21].mxu0  ;;  %v691_v56 = vadd.f32 %v1756_v54, %v2051_v47  ;;  %v682_v58 = vpop.f32.mrb[21].mxu1 }
 0x10e   : > { %1379 = vst [vmem:[%s1998_s30 + $0x6c] sm:$0xff] %v1669_v50  ;;  %v502_v57 = vadd.f32 %v501_v55, %v1985_v30  ;;  %v503_v27 = vpop.f32.mrb[22].mxu0  ;;  %1439 = vst [vmem:[%s1998_s30 + $0x1d4] sm:$0xff] %v1729_v52  ;;  %v683_v60 = vadd.f32 %v682_v58, %v2051_v47  ;;  %v1757_v62 = vpop.f32.mrb[22].mxu1 }
 0x10f   : > { %v871_v59 = vmax.f32 %v500_v53, 0.0  ;;  %v504_v61 = vadd.f32 %v503_v27, %v1982_v29  ;;  %v505_v63 = vpop.f32.mrb[23].mxu0  ;;  %v849_v0 = vmax.f32 %v691_v56, 0.0  ;;  %v694_v2 = vadd.f32 %v1757_v62, %v2051_v47  ;;  %v685_v4 = vpop.f32.mrb[23].mxu1 }
 0x110   : > { %v872_v1 = vmax.f32 %v502_v57, 0.0  ;;  %v506_v3 = vadd.f32 %v505_v63, %v1985_v30  ;;  %v843_v5 = vmax.f32 %v683_v60, 0.0  ;;  %v686_v7 = vadd.f32 %v685_v4, %v2051_v47 }
 0x111   : > { %v874_v6 = vmax.f32 %v504_v61, 0.0  ;;  %v1656_v8 = vpack.c.bf16 %v849_v0, %v849_v0  ;;  %v852_v10 = vmax.f32 %v694_v2, 0.0 }
 0x112   : > { %v1671_v9 = vpack.c.bf16 %v872_v1, %v871_v59  ;;  %v875_v11 = vmax.f32 %v506_v3, 0.0  ;;  %v1652_v12 = vpack.c.bf16 %v843_v5, %v843_v5  ;;  %v846_v13 = vmax.f32 %v686_v7, 0.0 }
 0x113   : > { %1366 = vst [vmem:[%s1998_s30 + $0x20] sm:$0xf] %v1656_v8  ;;  %v1658_v14 = vpack.c.bf16 %v852_v10, %v852_v10 }
 0x114   : > { %1381 = vst [vmem:[%s1998_s30 + $0x78] sm:$0xff] %v1671_v9  ;;  %v1673_v15 = vpack.c.bf16 %v875_v11, %v874_v6  ;;  %v509_v16 = vpop.f32.mrb[24].mxu0  ;;  %1362 = vst [vmem:[%s1998_s30 + $0x8] sm:$0xf] %v1652_v12  ;;  %v1654_v17 = vpack.c.bf16 %v846_v13, %v846_v13  ;;  %v1760_v19 = vpop.f32.mrb[24].mxu1 }
 0x115   : > { %v510_v18 = vadd.f32 %v509_v16, %v1982_v29  ;;  %v511_v20 = vpop.f32.mrb[25].mxu0  ;;  %1368 = vst [vmem:[%s1998_s30 + $0x2c] sm:$0xf] %v1658_v14  ;;  %v707_v21 = vadd.f32 %v1760_v19, %v2051_v47  ;;  %v698_v23 = vpop.f32.mrb[25].mxu1 }
 0x116   : > { %1383 = vst [vmem:[%s1998_s30 + $0x84] sm:$0xff] %v1673_v15  ;;  %v512_v22 = vadd.f32 %v511_v20, %v1985_v30  ;;  %v513_v24 = vpop.f32.mrb[26].mxu0  ;;  %1364 = vst [vmem:[%s1998_s30 + $0x14] sm:$0xf] %v1654_v17  ;;  %v699_v28 = vadd.f32 %v698_v23, %v2051_v47  ;;  %v1761_v32 = vpop.f32.mrb[26].mxu1 }
 0x117   : > { %v877_v26 = vmax.f32 %v510_v18, 0.0  ;;  %v514_v31 = vadd.f32 %v513_v24, %v1982_v29  ;;  %v515_v33 = vpop.f32.mrb[27].mxu0  ;;  %v861_v34 = vmax.f32 %v707_v21, 0.0  ;;  %v710_v36 = vadd.f32 %v1761_v32, %v2051_v47  ;;  %v701_v38 = vpop.f32.mrb[27].mxu1 }
 0x118   : > { %v878_v35 = vmax.f32 %v512_v22, 0.0  ;;  %v516_v37 = vadd.f32 %v515_v33, %v1985_v30  ;;  %v855_v39 = vmax.f32 %v699_v28, 0.0  ;;  %v702_v41 = vadd.f32 %v701_v38, %v2051_v47 }
 0x119   : > { %v880_v40 = vmax.f32 %v514_v31, 0.0  ;;  %v1664_v42 = vpack.c.bf16 %v861_v34, %v861_v34  ;;  %v864_v25 = vmax.f32 %v710_v36, 0.0 }
 0x11a   : > { %v1675_v43 = vpack.c.bf16 %v878_v35, %v877_v26  ;;  %v881_v44 = vmax.f32 %v516_v37, 0.0  ;;  %v1660_v45 = vpack.c.bf16 %v855_v39, %v855_v39  ;;  %v858_v46 = vmax.f32 %v702_v41, 0.0 }
 0x11b   : > { %1374 = vst [vmem:[%s1998_s30 + $0x50] sm:$0xf] %v1664_v42  ;;  %v1666_v48 = vpack.c.bf16 %v864_v25, %v864_v25 }
 0x11c   : > { %1385 = vst [vmem:[%s1998_s30 + $0x90] sm:$0xff] %v1675_v43  ;;  %v1677_v49 = vpack.c.bf16 %v881_v44, %v880_v40  ;;  %v519_v50 = vpop.f32.mrb[28].mxu0  ;;  %1370 = vst [vmem:[%s1998_s30 + $0x38] sm:$0xf] %v1660_v45  ;;  %v1662_v51 = vpack.c.bf16 %v858_v46, %v858_v46  ;;  %v1764_v53 = vpop.f32.mrb[28].mxu1 }
 0x11d   : > { %v520_v52 = vadd.f32 %v519_v50, %v1982_v29  ;;  %v521_v54 = vpop.f32.mrb[29].mxu0  ;;  %1376 = vst [vmem:[%s1998_s30 + $0x5c] sm:$0xf] %v1666_v48  ;;  %v723_v55 = vadd.f32 %v1764_v53, %v2051_v47  ;;  %v714_v57 = vpop.f32.mrb[29].mxu1 }
 0x11e   : > { %1387 = vst [vmem:[%s1998_s30 + $0x9c] sm:$0xff] %v1677_v49  ;;  %v522_v56 = vadd.f32 %v521_v54, %v1985_v30  ;;  %v523_v58 = vpop.f32.mrb[30].mxu0  ;;  %1372 = vst [vmem:[%s1998_s30 + $0x44] sm:$0xf] %v1662_v51  ;;  %v715_v59 = vadd.f32 %v714_v57, %v2051_v47  ;;  %v1765_v61 = vpop.f32.mrb[30].mxu1 }
 0x11f   : > { %v883_v27 = vmax.f32 %v520_v52, 0.0  ;;  %v524_v60 = vadd.f32 %v523_v58, %v1982_v29  ;;  %v525_v62 = vpop.f32.mrb[31].mxu0  ;;  %v873_v63 = vmax.f32 %v723_v55, 0.0  ;;  %v726_v1 = vadd.f32 %v1765_v61, %v2051_v47  ;;  %v717_v3 = vpop.f32.mrb[31].mxu1 }
 0x120   : > { %v884_v0 = vmax.f32 %v522_v56, 0.0  ;;  %v526_v2 = vadd.f32 %v525_v62, %v1985_v30  ;;  %v867_v4 = vmax.f32 %v715_v59, 0.0  ;;  %v718_v6 = vadd.f32 %v717_v3, %v2051_v47 }
 0x121   : > { %v886_v5 = vmax.f32 %v524_v60, 0.0  ;;  %v1672_v7 = vpack.c.bf16 %v873_v63, %v873_v63  ;;  %v876_v9 = vmax.f32 %v726_v1, 0.0 }
 0x122   : > { %v1679_v8 = vpack.c.bf16 %v884_v0, %v883_v27  ;;  %v887_v10 = vmax.f32 %v526_v2, 0.0  ;;  %v1668_v11 = vpack.c.bf16 %v867_v4, %v867_v4  ;;  %v870_v12 = vmax.f32 %v718_v6, 0.0 }
 0x123   : > { %1382 = vst [vmem:[%s1998_s30 + $0x80] sm:$0xf] %v1672_v7  ;;  %v1674_v13 = vpack.c.bf16 %v876_v9, %v876_v9 }
 0x124   : > { %1389 = vst [vmem:[%s1998_s30 + $0xa8] sm:$0xff] %v1679_v8  ;;  %v1681_v14 = vpack.c.bf16 %v887_v10, %v886_v5  ;;  %v529_v15 = vpop.f32.mrb[32].mxu0  ;;  %1378 = vst [vmem:[%s1998_s30 + $0x68] sm:$0xf] %v1668_v11  ;;  %v1670_v16 = vpack.c.bf16 %v870_v12, %v870_v12  ;;  %v1768_v18 = vpop.f32.mrb[32].mxu1 }
 0x125   : > { %v530_v17 = vadd.f32 %v529_v15, %v1982_v29  ;;  %v531_v19 = vpop.f32.mrb[33].mxu0  ;;  %1384 = vst [vmem:[%s1998_s30 + $0x8c] sm:$0xf] %v1674_v13  ;;  %v739_v20 = vadd.f32 %v1768_v18, %v2051_v47  ;;  %v730_v22 = vpop.f32.mrb[33].mxu1 }
 0x126   : > { %1391 = vst [vmem:[%s1998_s30 + $0xb4] sm:$0xff] %v1681_v14  ;;  %v532_v21 = vadd.f32 %v531_v19, %v1985_v30  ;;  %v533_v23 = vpop.f32.mrb[34].mxu0  ;;  %1380 = vst [vmem:[%s1998_s30 + $0x74] sm:$0xf] %v1670_v16  ;;  %v731_v26 = vadd.f32 %v730_v22, %v2051_v47  ;;  %v1769_v31 = vpop.f32.mrb[34].mxu1 }
 0x127   : > { %v889_v24 = vmax.f32 %v530_v17, 0.0  ;;  %v534_v28 = vadd.f32 %v533_v23, %v1982_v29  ;;  %v535_v32 = vpop.f32.mrb[35].mxu0  ;;  %v885_v33 = vmax.f32 %v739_v20, 0.0  ;;  %v742_v35 = vadd.f32 %v1769_v31, %v2051_v47  ;;  %v733_v37 = vpop.f32.mrb[35].mxu1 }
 0x128   : > { %v890_v34 = vmax.f32 %v532_v21, 0.0  ;;  %v536_v36 = vadd.f32 %v535_v32, %v1985_v30  ;;  %v879_v38 = vmax.f32 %v731_v26, 0.0  ;;  %v734_v40 = vadd.f32 %v733_v37, %v2051_v47 }
 0x129   : > { %v892_v39 = vmax.f32 %v534_v28, 0.0  ;;  %v1680_v41 = vpack.c.bf16 %v885_v33, %v885_v33  ;;  %v888_v43 = vmax.f32 %v742_v35, 0.0 }
 0x12a   : > { %v1683_v42 = vpack.c.bf16 %v890_v34, %v889_v24  ;;  %v893_v25 = vmax.f32 %v536_v36, 0.0  ;;  %v1676_v44 = vpack.c.bf16 %v879_v38, %v879_v38  ;;  %v882_v45 = vmax.f32 %v734_v40, 0.0 }
 0x12b   : > { %1390 = vst [vmem:[%s1998_s30 + $0xb0] sm:$0xf] %v1680_v41  ;;  %v1682_v46 = vpack.c.bf16 %v888_v43, %v888_v43 }
 0x12c   : > { %1393 = vst [vmem:[%s1998_s30 + $0xc0] sm:$0xff] %v1683_v42  ;;  %v1685_v48 = vpack.c.bf16 %v893_v25, %v892_v39  ;;  %v539_v49 = vpop.f32.mrb[36].mxu0  ;;  %1386 = vst [vmem:[%s1998_s30 + $0x98] sm:$0xf] %v1676_v44  ;;  %v1678_v50 = vpack.c.bf16 %v882_v45, %v882_v45  ;;  %v1772_v52 = vpop.f32.mrb[36].mxu1 }
 0x12d   : > { %v540_v51 = vadd.f32 %v539_v49, %v1982_v29  ;;  %v541_v53 = vpop.f32.mrb[37].mxu0  ;;  %1392 = vst [vmem:[%s1998_s30 + $0xbc] sm:$0xf] %v1682_v46  ;;  %v755_v54 = vadd.f32 %v1772_v52, %v2051_v47  ;;  %v746_v56 = vpop.f32.mrb[37].mxu1 }
 0x12e   : > { %1395 = vst [vmem:[%s1998_s30 + $0xcc] sm:$0xff] %v1685_v48  ;;  %v542_v55 = vadd.f32 %v541_v53, %v1985_v30  ;;  %v543_v57 = vpop.f32.mrb[38].mxu0  ;;  %1388 = vst [vmem:[%s1998_s30 + $0xa4] sm:$0xf] %v1678_v50  ;;  %v747_v27 = vadd.f32 %v746_v56, %v2051_v47  ;;  %v1773_v60 = vpop.f32.mrb[38].mxu1 }
 0x12f   : > { %v895_v58 = vmax.f32 %v540_v51, 0.0  ;;  %v544_v59 = vadd.f32 %v543_v57, %v1982_v29  ;;  %v545_v61 = vpop.f32.mrb[39].mxu0  ;;  %v897_v62 = vmax.f32 %v755_v54, 0.0  ;;  %v758_v0 = vadd.f32 %v1773_v60, %v2051_v47  ;;  %v749_v2 = vpop.f32.mrb[39].mxu1 }
 0x130   : > { %v896_v63 = vmax.f32 %v542_v55, 0.0  ;;  %v546_v1 = vadd.f32 %v545_v61, %v1985_v30  ;;  %v891_v3 = vmax.f32 %v747_v27, 0.0  ;;  %v750_v5 = vadd.f32 %v749_v2, %v2051_v47 }
 0x131   : > { %v898_v4 = vmax.f32 %v544_v59, 0.0  ;;  %v1688_v6 = vpack.c.bf16 %v897_v62, %v897_v62  ;;  %v900_v8 = vmax.f32 %v758_v0, 0.0 }
 0x132   : > { %v1687_v7 = vpack.c.bf16 %v896_v63, %v895_v58  ;;  %v899_v9 = vmax.f32 %v546_v1, 0.0  ;;  %v1684_v10 = vpack.c.bf16 %v891_v3, %v891_v3  ;;  %v894_v11 = vmax.f32 %v750_v5, 0.0 }
 0x133   : > { %1398 = vst [vmem:[%s1998_s30 + $0xe0] sm:$0xf] %v1688_v6  ;;  %v1690_v12 = vpack.c.bf16 %v900_v8, %v900_v8 }
 0x134   : > { %1397 = vst [vmem:[%s1998_s30 + $0xd8] sm:$0xff] %v1687_v7  ;;  %v1689_v13 = vpack.c.bf16 %v899_v9, %v898_v4  ;;  %v549_v14 = vpop.f32.mrb[40].mxu0  ;;  %1394 = vst [vmem:[%s1998_s30 + $0xc8] sm:$0xf] %v1684_v10  ;;  %v1686_v15 = vpack.c.bf16 %v894_v11, %v894_v11  ;;  %v1776_v17 = vpop.f32.mrb[40].mxu1 }
 0x135   : > { %v550_v16 = vadd.f32 %v549_v14, %v1982_v29  ;;  %v551_v18 = vpop.f32.mrb[41].mxu0  ;;  %1400 = vst [vmem:[%s1998_s30 + $0xec] sm:$0xf] %v1690_v12  ;;  %v771_v19 = vadd.f32 %v1776_v17, %v2051_v47  ;;  %v762_v21 = vpop.f32.mrb[41].mxu1 }
 0x136   : > { %1399 = vst [vmem:[%s1998_s30 + $0xe4] sm:$0xff] %v1689_v13  ;;  %v552_v20 = vadd.f32 %v551_v18, %v1985_v30  ;;  %v553_v22 = vpop.f32.mrb[42].mxu0  ;;  %1396 = vst [vmem:[%s1998_s30 + $0xd4] sm:$0xf] %v1686_v15  ;;  %v763_v24 = vadd.f32 %v762_v21, %v2051_v47  ;;  %v1777_v28 = vpop.f32.mrb[42].mxu1 }
 0x137   : > { %v901_v23 = vmax.f32 %v550_v16, 0.0  ;;  %v554_v26 = vadd.f32 %v553_v22, %v1982_v29  ;;  %v555_v31 = vpop.f32.mrb[43].mxu0  ;;  %v909_v32 = vmax.f32 %v771_v19, 0.0  ;;  %v774_v34 = vadd.f32 %v1777_v28, %v2051_v47  ;;  %v765_v36 = vpop.f32.mrb[43].mxu1 }
 0x138   : > { %v902_v33 = vmax.f32 %v552_v20, 0.0  ;;  %v556_v35 = vadd.f32 %v555_v31, %v1985_v30  ;;  %v903_v37 = vmax.f32 %v763_v24, 0.0  ;;  %v766_v39 = vadd.f32 %v765_v36, %v2051_v47 }
 0x139   : > { %v904_v38 = vmax.f32 %v554_v26, 0.0  ;;  %v1696_v40 = vpack.c.bf16 %v909_v32, %v909_v32  ;;  %v912_v42 = vmax.f32 %v774_v34, 0.0 }
 0x13a   : > { %v1691_v41 = vpack.c.bf16 %v902_v33, %v901_v23  ;;  %v905_v43 = vmax.f32 %v556_v35, 0.0  ;;  %v1692_v25 = vpack.c.bf16 %v903_v37, %v903_v37  ;;  %v906_v44 = vmax.f32 %v766_v39, 0.0 }
 0x13b   : > { %1406 = vst [vmem:[%s1998_s30 + $0x110] sm:$0xf] %v1696_v40  ;;  %v1698_v45 = vpack.c.bf16 %v912_v42, %v912_v42 }
 0x13c   : > { %1401 = vst [vmem:[%s1998_s30 + $0xf0] sm:$0xff] %v1691_v41  ;;  %v1693_v46 = vpack.c.bf16 %v905_v43, %v904_v38  ;;  %v559_v48 = vpop.f32.mrb[44].mxu0  ;;  %1402 = vst [vmem:[%s1998_s30 + $0xf8] sm:$0xf] %v1692_v25  ;;  %v1694_v49 = vpack.c.bf16 %v906_v44, %v906_v44  ;;  %v1780_v51 = vpop.f32.mrb[44].mxu1 }
 0x13d   : > { %v560_v50 = vadd.f32 %v559_v48, %v1982_v29  ;;  %v561_v52 = vpop.f32.mrb[45].mxu0  ;;  %1408 = vst [vmem:[%s1998_s30 + $0x11c] sm:$0xf] %v1698_v45  ;;  %v787_v53 = vadd.f32 %v1780_v51, %v2051_v47  ;;  %v778_v55 = vpop.f32.mrb[45].mxu1 }
 0x13e   : > { %1403 = vst [vmem:[%s1998_s30 + $0xfc] sm:$0xff] %v1693_v46  ;;  %v562_v54 = vadd.f32 %v561_v52, %v1985_v30  ;;  %v563_v56 = vpop.f32.mrb[46].mxu0  ;;  %1404 = vst [vmem:[%s1998_s30 + $0x104] sm:$0xf] %v1694_v49  ;;  %v779_v58 = vadd.f32 %v778_v55, %v2051_v47  ;;  %v1781_v59 = vpop.f32.mrb[46].mxu1 }
 0x13f   : > { %v907_v57 = vmax.f32 %v560_v50, 0.0  ;;  %v564_v27 = vadd.f32 %v563_v56, %v1982_v29  ;;  %v565_v60 = vpop.f32.mrb[47].mxu0  ;;  %v921_v61 = vmax.f32 %v787_v53, 0.0  ;;  %v790_v63 = vadd.f32 %v1781_v59, %v2051_v47  ;;  %v781_v1 = vpop.f32.mrb[47].mxu1 }
 0x140   : > { %v908_v62 = vmax.f32 %v562_v54, 0.0  ;;  %v566_v0 = vadd.f32 %v565_v60, %v1985_v30  ;;  %v915_v2 = vmax.f32 %v779_v58, 0.0  ;;  %v782_v4 = vadd.f32 %v781_v1, %v2051_v47 }
 0x141   : > { %v910_v3 = vmax.f32 %v564_v27, 0.0  ;;  %v1704_v5 = vpack.c.bf16 %v921_v61, %v921_v61  ;;  %v924_v7 = vmax.f32 %v790_v63, 0.0 }
 0x142   : > { %v1695_v6 = vpack.c.bf16 %v908_v62, %v907_v57  ;;  %v911_v8 = vmax.f32 %v566_v0, 0.0  ;;  %v1700_v9 = vpack.c.bf16 %v915_v2, %v915_v2  ;;  %v918_v10 = vmax.f32 %v782_v4, 0.0 }
 0x143   : > { %1414 = vst [vmem:[%s1998_s30 + $0x140] sm:$0xf] %v1704_v5  ;;  %v1706_v11 = vpack.c.bf16 %v924_v7, %v924_v7 }
 0x144   : > { %1405 = vst [vmem:[%s1998_s30 + $0x108] sm:$0xff] %v1695_v6  ;;  %v1697_v12 = vpack.c.bf16 %v911_v8, %v910_v3  ;;  %v569_v13 = vpop.f32.mrb[48].mxu0  ;;  %1410 = vst [vmem:[%s1998_s30 + $0x128] sm:$0xf] %v1700_v9  ;;  %v1702_v14 = vpack.c.bf16 %v918_v10, %v918_v10  ;;  %v1784_v16 = vpop.f32.mrb[48].mxu1 }
 0x145   : > { %v570_v15 = vadd.f32 %v569_v13, %v1982_v29  ;;  %v571_v17 = vpop.f32.mrb[49].mxu0  ;;  %1416 = vst [vmem:[%s1998_s30 + $0x14c] sm:$0xf] %v1706_v11  ;;  %v803_v18 = vadd.f32 %v1784_v16, %v2051_v47  ;;  %v794_v20 = vpop.f32.mrb[49].mxu1 }
 0x146   : > { %1407 = vst [vmem:[%s1998_s30 + $0x114] sm:$0xff] %v1697_v12  ;;  %v572_v19 = vadd.f32 %v571_v17, %v1985_v30  ;;  %v573_v21 = vpop.f32.mrb[50].mxu0  ;;  %1412 = vst [vmem:[%s1998_s30 + $0x134] sm:$0xf] %v1702_v14  ;;  %v795_v23 = vadd.f32 %v794_v20, %v2051_v47  ;;  %v1785_v26 = vpop.f32.mrb[50].mxu1 }
 0x147   : > { %v913_v22 = vmax.f32 %v570_v15, 0.0  ;;  %v574_v24 = vadd.f32 %v573_v21, %v1982_v29  ;;  %v575_v28 = vpop.f32.mrb[51].mxu0  ;;  %v933_v31 = vmax.f32 %v803_v18, 0.0  ;;  %v806_v33 = vadd.f32 %v1785_v26, %v2051_v47  ;;  %v797_v35 = vpop.f32.mrb[51].mxu1 }
 0x148   : > { %v914_v32 = vmax.f32 %v572_v19, 0.0  ;;  %v576_v34 = vadd.f32 %v575_v28, %v1985_v30  ;;  %v927_v36 = vmax.f32 %v795_v23, 0.0  ;;  %v798_v38 = vadd.f32 %v797_v35, %v2051_v47 }
 0x149   : > { %v916_v37 = vmax.f32 %v574_v24, 0.0  ;;  %v1712_v39 = vpack.c.bf16 %v933_v31, %v933_v31  ;;  %v936_v41 = vmax.f32 %v806_v33, 0.0 }
 0x14a   : > { %v1699_v40 = vpack.c.bf16 %v914_v32, %v913_v22  ;;  %v917_v42 = vmax.f32 %v576_v34, 0.0  ;;  %v1708_v43 = vpack.c.bf16 %v927_v36, %v927_v36  ;;  %v930_v25 = vmax.f32 %v798_v38, 0.0 }
 0x14b   : > { %1422 = vst [vmem:[%s1998_s30 + $0x170] sm:$0xf] %v1712_v39  ;;  %v1714_v44 = vpack.c.bf16 %v936_v41, %v936_v41 }
 0x14c   : > { %1409 = vst [vmem:[%s1998_s30 + $0x120] sm:$0xff] %v1699_v40  ;;  %v1701_v45 = vpack.c.bf16 %v917_v42, %v916_v37  ;;  %v579_v46 = vpop.f32.mrb[52].mxu0  ;;  %1418 = vst [vmem:[%s1998_s30 + $0x158] sm:$0xf] %v1708_v43  ;;  %v1710_v48 = vpack.c.bf16 %v930_v25, %v930_v25  ;;  %v1788_v50 = vpop.f32.mrb[52].mxu1 }
 0x14d   : > { %v580_v49 = vadd.f32 %v579_v46, %v1982_v29  ;;  %v581_v51 = vpop.f32.mrb[53].mxu0  ;;  %1424 = vst [vmem:[%s1998_s30 + $0x17c] sm:$0xf] %v1714_v44  ;;  %v819_v52 = vadd.f32 %v1788_v50, %v2051_v47  ;;  %v810_v54 = vpop.f32.mrb[53].mxu1 }
 0x14e   : > { %1411 = vst [vmem:[%s1998_s30 + $0x12c] sm:$0xff] %v1701_v45  ;;  %v582_v53 = vadd.f32 %v581_v51, %v1985_v30  ;;  %v583_v55 = vpop.f32.mrb[54].mxu0  ;;  %1420 = vst [vmem:[%s1998_s30 + $0x164] sm:$0xf] %v1710_v48  ;;  %v811_v57 = vadd.f32 %v810_v54, %v2051_v47  ;;  %v1789_v27 = vpop.f32.mrb[54].mxu1 }
 0x14f   : > { %v919_v56 = vmax.f32 %v580_v49, 0.0  ;;  %v584_v58 = vadd.f32 %v583_v55, %v1982_v29  ;;  %v585_v59 = vpop.f32.mrb[55].mxu0  ;;  %v945_v60 = vmax.f32 %v819_v52, 0.0  ;;  %v822_v62 = vadd.f32 %v1789_v27, %v2051_v47  ;;  %v813_v0 = vpop.f32.mrb[55].mxu1 }
 0x150   : > { %v920_v61 = vmax.f32 %v582_v53, 0.0  ;;  %v586_v63 = vadd.f32 %v585_v59, %v1985_v30  ;;  %v939_v1 = vmax.f32 %v811_v57, 0.0  ;;  %v814_v3 = vadd.f32 %v813_v0, %v2051_v47 }
 0x151   : > { %v922_v2 = vmax.f32 %v584_v58, 0.0  ;;  %v1720_v4 = vpack.c.bf16 %v945_v60, %v945_v60  ;;  %v948_v6 = vmax.f32 %v822_v62, 0.0 }
 0x152   : > { %v1703_v5 = vpack.c.bf16 %v920_v61, %v919_v56  ;;  %v923_v7 = vmax.f32 %v586_v63, 0.0  ;;  %v1716_v8 = vpack.c.bf16 %v939_v1, %v939_v1  ;;  %v942_v9 = vmax.f32 %v814_v3, 0.0 }
 0x153   : > { %1430 = vst [vmem:[%s1998_s30 + $0x1a0] sm:$0xf] %v1720_v4  ;;  %v1722_v10 = vpack.c.bf16 %v948_v6, %v948_v6 }
 0x154   : > { %1413 = vst [vmem:[%s1998_s30 + $0x138] sm:$0xff] %v1703_v5  ;;  %v1705_v11 = vpack.c.bf16 %v923_v7, %v922_v2  ;;  %v589_v12 = vpop.f32.mrb[56].mxu0  ;;  %1426 = vst [vmem:[%s1998_s30 + $0x188] sm:$0xf] %v1716_v8  ;;  %v1718_v13 = vpack.c.bf16 %v942_v9, %v942_v9  ;;  %v1792_v15 = vpop.f32.mrb[56].mxu1 }
 0x155   : > { %v590_v14 = vadd.f32 %v589_v12, %v1982_v29  ;;  %v591_v16 = vpop.f32.mrb[57].mxu0  ;;  %1432 = vst [vmem:[%s1998_s30 + $0x1ac] sm:$0xf] %v1722_v10  ;;  %v835_v17 = vadd.f32 %v1792_v15, %v2051_v47  ;;  %v826_v19 = vpop.f32.mrb[57].mxu1 }
 0x156   : > { %1415 = vst [vmem:[%s1998_s30 + $0x144] sm:$0xff] %v1705_v11  ;;  %v592_v18 = vadd.f32 %v591_v16, %v1985_v30  ;;  %v593_v20 = vpop.f32.mrb[58].mxu0  ;;  %1428 = vst [vmem:[%s1998_s30 + $0x194] sm:$0xf] %v1718_v13  ;;  %v827_v22 = vadd.f32 %v826_v19, %v2051_v47  ;;  %v1793_v24 = vpop.f32.mrb[58].mxu1 }
 0x157   : > { %v925_v21 = vmax.f32 %v590_v14, 0.0  ;;  %v594_v23 = vadd.f32 %v593_v20, %v1982_v29  ;;  %v595_v26 = vpop.f32.mrb[59].mxu0  ;;  %v957_v28 = vmax.f32 %v835_v17, 0.0  ;;  %v838_v32 = vadd.f32 %v1793_v24, %v2051_v47  ;;  %v829_v34 = vpop.f32.mrb[59].mxu1 }
 0x158   : > { %v926_v31 = vmax.f32 %v592_v18, 0.0  ;;  %v596_v33 = vadd.f32 %v595_v26, %v1985_v30  ;;  %v951_v35 = vmax.f32 %v827_v22, 0.0  ;;  %v830_v37 = vadd.f32 %v829_v34, %v2051_v47 }
 0x159   : > { %v928_v36 = vmax.f32 %v594_v23, 0.0  ;;  %v1728_v29 = vpack.c.bf16 %v957_v28, %v957_v28  ;;  %v960_v39 = vmax.f32 %v838_v32, 0.0 }
 0x15a   : > { %v1707_v38 = vpack.c.bf16 %v926_v31, %v925_v21  ;;  %v929_v40 = vmax.f32 %v596_v33, 0.0  ;;  %v1724_v41 = vpack.c.bf16 %v951_v35, %v951_v35  ;;  %v954_v42 = vmax.f32 %v830_v37, 0.0 }
 0x15b   : > { %1438 = vst [vmem:[%s1998_s30 + $0x1d0] sm:$0xf] %v1728_v29  ;;  %v1730_v43 = vpack.c.bf16 %v960_v39, %v960_v39 }
 0x15c   : > { %1417 = vst [vmem:[%s1998_s30 + $0x150] sm:$0xff] %v1707_v38  ;;  %v1709_v25 = vpack.c.bf16 %v929_v40, %v928_v36  ;;  %1434 = vst [vmem:[%s1998_s30 + $0x1b8] sm:$0xf] %v1724_v41  ;;  %v1726_v30 = vpack.c.bf16 %v954_v42, %v954_v42 }
 0x15d   : > { %1440 = vst [vmem:[%s1998_s30 + $0x1dc] sm:$0xf] %v1730_v43 }
 0x15e   : > { %1419 = vst [vmem:[%s1998_s30 + $0x15c] sm:$0xff] %v1709_v25  ;;  %1436 = vst [vmem:[%s1998_s30 + $0x1c4] sm:$0xf] %v1726_v30 }
 0x15f PF: > { %s13_s12 = sadd.s32 1, %s1836_s12  }
 0x160   : > { %p10_p4 = scmp.ge.s32.totalorder %s13_s12, 4  }
 0x162   :  { %12 = sbr.rel (!%p10_p4) target bundleno = 1 (0x1), region = 62 }

// kernel: inception_d_forward.8
= control target key start
LH: loop header
LB: loop body
LE: loop exit
PB: predicated region body
PF: predicated region fallthrough
CT: control target
= control target key end

     0   :  { %s6010_s12 = smov 0   ;;  %s7012_s0 = inlined_call_operand.vmem [shape: bf16[640,1344], index: 0, kind: input, shape index: {}]   ;;  %s7013_s1 = inlined_call_operand.vmem [shape: bf16[1344,192], index: 1, kind: input, shape index: {}]   ;;  %s7014_s2 = inlined_call_operand.vmem [shape: f32[1,192], index: 2, kind: input, shape index: {}]   ;;  %s7015_s3 = inlined_call_operand.vmem [shape: bf16[640,192], index: 3, kind: output, shape index: {}]  }
   0x1 LB: > { %s4420_s13 = sadd.s32 4294967295, %s5987_s12   ;;  %p4424_p0 = scmp.ge.s32.totalorder %s5987_s12, 1  ;;  %s5987_s12 = sphi %s6010_s12, %s13_s12  }
   0x2   : > { %p139_p1 = scmp.lt.s32.totalorder %s5987_s12, 3 }
   0x4   : > { %p140_p2 = pnand %p4424_p0, %p139_p1 }
   0x5   : > { %v5409_v0 = vld [vmem:[%s7013_s1 + $0x4] ss:$8 sps:$4 sm:$0xff] (!%p140_p2)   ;;  %v5413_v2 = vld [vmem:[%s7013_s1] ss:$8 sps:$4 sm:$0xff] (!%p140_p2)   ;;  %v5415_v4 = vld [vmem:[%s7013_s1 + $0x14] ss:$8 sps:$4 sm:$0xff] (!%p140_p2)  }
   0x6   : > { %143 = sbr.rel (%p140_p2) target bundleno = 766 (0x2fe), region = 32  ;;  %v5411_v1 = vld [vmem:[%s7013_s1 + $0x304] ss:$8 sps:$4 sm:$0xff] (!%p140_p2)   ;;  %2601 = vmatprep.subr.bf16.mxu1 (!%p140_p2), %v5409_v0  ;;  %v5414_v3 = vld [vmem:[%s7013_s1 + $0x300] ss:$8 sps:$4 sm:$0xff] (!%p140_p2)   ;;  %vm2540_vm0 = vcmask (!%p140_p2), 523264  }
   0x7   : > { %3300 = vmatprep.subr.bf16.mxu0 (!%p140_p2), %v5411_v1  ;;  %2602 = vmatpush1.bf16.msra.mxu1 (!%p140_p2), %v5413_v2  ;;  %v5417_v5 = vld [vmem:[%s7013_s1 + $0x314] ss:$8 sps:$4 sm:$0xff] (!%p140_p2)   ;;  %v5419_v6 = vld [vmem:[%s7013_s1 + $0x10] ss:$8 sps:$4 sm:$0xff] (!%p140_p2)   ;;  %v5421_v8 = vld [vmem:[%s7013_s1 + $0x24] ss:$8 sps:$4 sm:$0xff] (!%p140_p2)  }
   0x8   : > { %3301 = vmatpush1.bf16.msra.mxu0 (!%p140_p2), %v5414_v3  ;;  %2603 = vmatprep.subr.bf16.mxu1 (!%p140_p2), %v5415_v4  ;;  %v5420_v7 = vld [vmem:[%s7013_s1 + $0x310] ss:$8 sps:$4 sm:$0xff] (!%p140_p2)   ;;  %v5423_v9 = vld [vmem:[%s7013_s1 + $0x324] ss:$8 sps:$4 sm:$0xff] (!%p140_p2)   ;;  %v5425_v10 = vld [vmem:[%s7013_s1 + $0x20] ss:$8 sps:$4 sm:$0xff] (!%p140_p2)  }
   0x9   : > { %3302 = vmatprep.subr.bf16.mxu0 (!%p140_p2), %v5417_v5  ;;  %v5426_v11 = vld [vmem:[%s7013_s1 + $0x320] ss:$8 sps:$4 sm:$0xff] (!%p140_p2)   ;;  %v5427_v12 = vld [vmem:[%s7013_s1 + $0x34] ss:$8 sps:$4 sm:$0xff] (!%p140_p2)   ;;  %v5431_v14 = vld [vmem:[%s7013_s1 + $0x30] ss:$8 sps:$4 sm:$0xff] (!%p140_p2)  }
   0xa   : > { %v5429_v13 = vld [vmem:[%s7013_s1 + $0x334] ss:$8 sps:$4 sm:$0xff] (!%p140_p2)   ;;  %v5432_v15 = vld [vmem:[%s7013_s1 + $0x330] ss:$8 sps:$4 sm:$0xff] (!%p140_p2)   ;;  %v5433_v16 = vld [vmem:[%s7013_s1 + $0x44] ss:$8 sps:$4 sm:$0xff] (!%p140_p2)  }
   0xb   : > { %2604 = vmatpush1.bf16.msra.mxu1 (!%p140_p2), %v5419_v6  ;;  %v5435_v17 = vld [vmem:[%s7013_s1 + $0x344] ss:$8 sps:$4 sm:$0xff] (!%p140_p2)   ;;  %v5437_v18 = vld [vmem:[%s7013_s1 + $0x40] ss:$8 sps:$4 sm:$0xff] (!%p140_p2)   ;;  %v5439_v20 = vld [vmem:[%s7013_s1 + $0x54] ss:$8 sps:$4 sm:$0xff] (!%p140_p2)  }
   0xc   : > { %3303 = vmatpush1.bf16.msra.mxu0 (!%p140_p2), %v5420_v7  ;;  %2605 = vmatprep.subr.bf16.mxu1 (!%p140_p2), %v5421_v8  ;;  %v5438_v19 = vld [vmem:[%s7013_s1 + $0x340] ss:$8 sps:$4 sm:$0xff] (!%p140_p2)   ;;  %v5441_v21 = vld [vmem:[%s7013_s1 + $0x354] ss:$8 sps:$4 sm:$0xff] (!%p140_p2)   ;;  %v5443_v22 = vld [vmem:[%s7013_s1 + $0x50] ss:$8 sps:$4 sm:$0xff] (!%p140_p2)  }
   0xd   : > { %3304 = vmatprep.subr.bf16.mxu0 %v5423_v9  ;;  %v5444_v23 = vld [vmem:[%s7013_s1 + $0x350] ss:$8 sps:$4 sm:$0xff]   ;;  %v5445_v24 = vld [vmem:[%s7013_s1 + $0x64] ss:$8 sps:$4 sm:$0xff]   ;;  %v5449_v26 = vld [vmem:[%s7013_s1 + $0x60] ss:$8 sps:$4 sm:$0xff]  }
   0xe   : > { %v5447_v25 = vld [vmem:[%s7013_s1 + $0x364] ss:$8 sps:$4 sm:$0xff]   ;;  %v5450_v27 = vld [vmem:[%s7013_s1 + $0x360] ss:$8 sps:$4 sm:$0xff]   ;;  %v5451_v28 = vld [vmem:[%s7013_s1 + $0x74] ss:$8 sps:$4 sm:$0xff]  }
   0xf   : > { %2606 = vmatpush1.bf16.msra.mxu1 %v5425_v10  ;;  %s165_s22 = smul.u32 40, %s4420_s13  ;;  %v5453_v29 = vld [vmem:[%s7013_s1 + $0x374] ss:$8 sps:$4 sm:$0xff]   ;;  %v5455_v30 = vld [vmem:[%s7013_s1 + $0x70] ss:$8 sps:$4 sm:$0xff]   ;;  %vm4319_vm1 = vcmask 1043456  }
  0x10   : > { %3305 = vmatpush1.bf16.msra.mxu0 %v5426_v11  ;;  %2607 = vmatprep.subr.bf16.mxu1 %v5427_v12  ;;  %v5456_v31 = vld [vmem:[%s7013_s1 + $0x370] ss:$8 sps:$4 sm:$0xff]   ;;  %v5457_v32 = vld [vmem:[%s7013_s1 + $0x84] ss:$8 sps:$4 sm:$0xff]   ;;  %v5461_v34 = vld [vmem:[%s7013_s1 + $0x80] ss:$8 sps:$4 sm:$0xff]  }
  0x11   : > { %3306 = vmatprep.subr.bf16.mxu0 %v5429_v13  ;;  %p166_p3 = scmp.lt.s32.totalorder %s165_s22, 79  ;;  %v5459_v33 = vld [vmem:[%s7013_s1 + $0x384] ss:$8 sps:$4 sm:$0xff]   ;;  %v5462_v35 = vld [vmem:[%s7013_s1 + $0x380] ss:$8 sps:$4 sm:$0xff]   ;;  %vm4320_vm2 = vcmask 523268  }
  0x12   : > { %v5463_v36 = vld [vmem:[%s7013_s1 + $0x94] ss:$8 sps:$4 sm:$0xff]   ;;  %v5467_v38 = vld [vmem:[%s7013_s1 + $0x90] ss:$8 sps:$4 sm:$0xff]   ;;  %v5469_v40 = vld [vmem:[%s7013_s1 + $0xa4] ss:$8 sps:$4 sm:$0xff]  }
  0x13   : > { %2608 = vmatpush1.bf16.msra.mxu1 %v5431_v14  ;;  %s7019_s22 = smov (!%p166_p3, %s165_s22), 79  ;;  %v5465_v37 = vld [vmem:[%s7013_s1 + $0x394] ss:$8 sps:$4 sm:$0xff]   ;;  %v5468_v39 = vld [vmem:[%s7013_s1 + $0x390] ss:$8 sps:$4 sm:$0xff]   ;;  %vm6809_vm3 = vmor %vm4320_vm2, %vm4319_vm1 }
  0x14   : > { %3307 = vmatpush1.bf16.msra.mxu0 %v5432_v15  ;;  %2609 = vmatprep.subr.bf16.mxu1 %v5433_v16  ;;  %s5399_s21 = smul.u32 44, %s7019_s22  ;;  %v5471_v41 = vld [vmem:[%s7013_s1 + $0x3a4] ss:$8 sps:$4 sm:$0xff]   ;;  %v5473_v42 = vld [vmem:[%s7013_s1 + $0xa0] ss:$8 sps:$4 sm:$0xff]  }
  0x15   : > { %3308 = vmatprep.subr.bf16.mxu0 %v5435_v17  ;;  %v5474_v43 = vld [vmem:[%s7013_s1 + $0x3a0] ss:$8 sps:$4 sm:$0xff]   ;;  %v5475_v44 = vld [vmem:[%s7013_s1 + $0xb4] ss:$8 sps:$4 sm:$0xff]   ;;  %v5479_v46 = vld [vmem:[%s7013_s1 + $0xb0] ss:$8 sps:$4 sm:$0xff]  }
  0x16   : > { %s6161_s5 = scalar_lea.vmem %s7012_s0, %s5399_s21  ;;  %v5477_v45 = vld [vmem:[%s7013_s1 + $0x3b4] ss:$8 sps:$4 sm:$0xff]   ;;  %v5480_v47 = vld [vmem:[%s7013_s1 + $0x3b0] ss:$8 sps:$4 sm:$0xff]   ;;  %v5481_v48 = vld [vmem:[%s7013_s1 + $0xc4] ss:$8 sps:$4 sm:$0xff]  }
  0x17   : > { %2610 = vmatpush1.bf16.msra.mxu1 %v5437_v18  ;;  %v5507_v49 = vld [vmem:[%s6161_s5 + $0x4] ss:$44 sps:$4 sm:$0xff]   ;;  %v5510_v51 = vld [vmem:[%s6161_s5 + $0x1c] ss:$44 sps:$4 sm:$0xff]   ;;  %v5505_v4 = vld [vmem:[%s6161_s5] ss:$44 sps:$4 sm:$0xff]  }
  0x18   : > { %3309 = vmatpush1.bf16.msra.mxu0 %v5438_v19  ;;  %2611 = vmatprep.subr.bf16.mxu1 %v5439_v20  ;;  %v5483_v50 = vld [vmem:[%s7013_s1 + $0x3c4] ss:$8 sps:$4 sm:$0xff]   ;;  %v5485_v52 = vld [vmem:[%s7013_s1 + $0xc0] ss:$8 sps:$4 sm:$0xff]   ;;  %v5487_v54 = vld [vmem:[%s7013_s1 + $0xd4] ss:$8 sps:$4 sm:$0xff]  }
  0x19   : > { %3310 = vmatprep.subr.bf16.mxu0 %v5441_v21  ;;  %2633 = vmatprep.mubr.bf16.mxu1 %v5507_v49  ;;  %v5486_v53 = vld [vmem:[%s7013_s1 + $0x3c0] ss:$8 sps:$4 sm:$0xff]   ;;  %v5489_v55 = vld [vmem:[%s7013_s1 + $0x3d4] ss:$8 sps:$4 sm:$0xff]   ;;  %v5491_v56 = vld [vmem:[%s7013_s1 + $0xd0] ss:$8 sps:$4 sm:$0xff]  }
  0x1a   : > { %3332 = vmatprep.mubr.bf16.mxu0 %v5510_v51  ;;  %v5492_v57 = vld [vmem:[%s7013_s1 + $0x3d0] ss:$8 sps:$4 sm:$0xff]   ;;  %v5493_v58 = vld [vmem:[%s7013_s1 + $0xe4] ss:$8 sps:$4 sm:$0xff]   ;;  %v5497_v60 = vld [vmem:[%s7013_s1 + $0xe0] ss:$8 sps:$4 sm:$0xff]  }
  0x1b   : > { %2612 = vmatpush1.bf16.msra.mxu1 %v5443_v22  ;;  %v5495_v59 = vld [vmem:[%s7013_s1 + $0x3e4] ss:$8 sps:$4 sm:$0xff]   ;;  %v5498_v61 = vld [vmem:[%s7013_s1 + $0x3e0] ss:$8 sps:$4 sm:$0xff]   ;;  %v5499_v62 = vld [vmem:[%s7013_s1 + $0xf4] ss:$8 sps:$4 sm:$0xff]  }
  0x1c   : > { %3311 = vmatpush1.bf16.msra.mxu0 %v5444_v23  ;;  %2613 = vmatprep.subr.bf16.mxu1 %v5445_v24  ;;  %v5501_v63 = vld [vmem:[%s7013_s1 + $0x3f4] ss:$8 sps:$4 sm:$0xff]   ;;  %v5503_v0 = vld [vmem:[%s7013_s1 + $0xf0] ss:$8 sps:$4 sm:$0xff]   ;;  %v5513_v2 = vld [vmem:[%s7013_s1 + $0x104] ss:$8 sps:$4 sm:$0xff]  }
  0x1d   : > { %3312 = vmatprep.subr.bf16.mxu0 %v5447_v25  ;;  %v5504_v1 = vld [vmem:[%s7013_s1 + $0x3f0] ss:$8 sps:$4 sm:$0xff]   ;;  %v5516_v3 = vld [vmem:[%s7013_s1 + $0x404] ss:$8 sps:$4 sm:$0xff]   ;;  %v5511_v6 = vld [vmem:[%s7013_s1 + $0x100] ss:$8 sps:$4 sm:$0xff]  }
  0x1e   : > { %v5508_v5 = vld [vmem:[%s6161_s5 + $0x18] ss:$44 sps:$4 sm:$0xff]   ;;  %v5514_v7 = vld [vmem:[%s7013_s1 + $0x400] ss:$8 sps:$4 sm:$0xff]   ;;  %v5525_v10 = vld [vmem:[%s7013_s1 + $0x114] ss:$8 sps:$4 sm:$0xff]  }
  0x1f   : > { %2614 = vmatpush1.bf16.msra.mxu1 %v5449_v26  ;;  %v5517_v8 = vld [vmem:[%s6161_s5 + $0x5c] ss:$44 sps:$4 sm:$0xff]   ;;  %v5519_v9 = vld [vmem:[%s6161_s5 + $0x74] ss:$44 sps:$4 sm:$0xff]   ;;  %v5523_v12 = vld [vmem:[%s7013_s1 + $0x110] ss:$8 sps:$4 sm:$0xff]  }
  0x20   : > { %3313 = vmatpush1.bf16.msra.mxu0 %v5450_v27  ;;  %2615 = vmatprep.subr.bf16.mxu1 %v5451_v28  ;;  %v5528_v11 = vld [vmem:[%s7013_s1 + $0x414] ss:$8 sps:$4 sm:$0xff]   ;;  %v5526_v13 = vld [vmem:[%s7013_s1 + $0x410] ss:$8 sps:$4 sm:$0xff]   ;;  %v5537_v14 = vld [vmem:[%s7013_s1 + $0x124] ss:$8 sps:$4 sm:$0xff]  }
  0x21   : > { %3314 = vmatprep.subr.bf16.mxu0 %v5453_v29  ;;  %v5540_v15 = vld [vmem:[%s7013_s1 + $0x424] ss:$8 sps:$4 sm:$0xff]   ;;  %v5522_v17 = vld [vmem:[%s6161_s5 + $0x70] ss:$44 sps:$4 sm:$0xff]   ;;  %v5529_v18 = vld [vmem:[%s6161_s5 + $0xb4] ss:$44 sps:$4 sm:$0xff]  }
  0x22   : > { %v5521_v16 = vld [vmem:[%s6161_s5 + $0x58] ss:$44 sps:$4 sm:$0xff]   ;;  %v5535_v20 = vld [vmem:[%s7013_s1 + $0x120] ss:$8 sps:$4 sm:$0xff]   ;;  %v5549_v22 = vld [vmem:[%s7013_s1 + $0x134] ss:$8 sps:$4 sm:$0xff]  }
  0x23   : > { %2616 = vmatpush1.bf16.msra.mxu1 %v5455_v30  ;;  %v5531_v19 = vld [vmem:[%s6161_s5 + $0xcc] ss:$44 sps:$4 sm:$0xff]   ;;  %v5538_v21 = vld [vmem:[%s7013_s1 + $0x420] ss:$8 sps:$4 sm:$0xff]   ;;  %v5558_v23 = vld [vmem:[%s7013_s1 + $0x434] ss:$8 sps:$4 sm:$0xff]  }
  0x24   : > { %3315 = vmatpush1.bf16.msra.mxu0 %v5456_v31  ;;  %2617 = vmatprep.subr.bf16.mxu1 %v5457_v32  ;;  %v5547_v24 = vld [vmem:[%s7013_s1 + $0x130] ss:$8 sps:$4 sm:$0xff]   ;;  %v5566_v27 = vld [vmem:[%s7013_s1 + $0x144] ss:$8 sps:$4 sm:$0xff]   ;;  %v5534_v29 = vld [vmem:[%s6161_s5 + $0xc8] ss:$44 sps:$4 sm:$0xff]  }
  0x25   : > { %3316 = vmatprep.subr.bf16.mxu0 %v5459_v33  ;;  %v5556_v25 = vld [vmem:[%s7013_s1 + $0x430] ss:$8 sps:$4 sm:$0xff]   ;;  %v5570_v28 = vld [vmem:[%s7013_s1 + $0x444] ss:$8 sps:$4 sm:$0xff]   ;;  %v5564_v32 = vld [vmem:[%s7013_s1 + $0x140] ss:$8 sps:$4 sm:$0xff]  }
  0x26   : > { %v5533_v26 = vld [vmem:[%s6161_s5 + $0xb0] ss:$44 sps:$4 sm:$0xff]   ;;  %v5541_v30 = vld [vmem:[%s6161_s5 + $0x10c] ss:$44 sps:$4 sm:$0xff]   ;;  %v5568_v33 = vld [vmem:[%s7013_s1 + $0x440] ss:$8 sps:$4 sm:$0xff]  }
  0x27   : > { %2618 = vmatpush1.bf16.msra.mxu1 %v5461_v34  ;;  %v5543_v31 = vld [vmem:[%s6161_s5 + $0x124] ss:$44 sps:$4 sm:$0xff]   ;;  %v5579_v34 = vld [vmem:[%s7013_s1 + $0x154] ss:$8 sps:$4 sm:$0xff]   ;;  %v5554_v49 = vld [vmem:[%s6161_s5 + $0x160] ss:$44 sps:$4 sm:$0xff]  }
  0x28   : > { %3317 = vmatpush1.bf16.msra.mxu0 %v5462_v35  ;;  %2619 = vmatprep.subr.bf16.mxu1 %v5463_v36  ;;  %v5582_v35 = vld [vmem:[%s7013_s1 + $0x454] ss:$8 sps:$4 sm:$0xff]   ;;  %v5577_v36 = vld [vmem:[%s7013_s1 + $0x150] ss:$8 sps:$4 sm:$0xff]  }
  0x29   : > { %3318 = vmatprep.subr.bf16.mxu0 %v5465_v37  ;;  %v5545_v37 = vld [vmem:[%s6161_s5 + $0x108] ss:$44 sps:$4 sm:$0xff]   ;;  %v5610_v51 = vld [vmem:[%s7013_s1 + $0x470] ss:$8 sps:$4 sm:$0xff]  }
  0x2b   : > { %2620 = vmatpush1.bf16.msra.mxu1 %v5467_v38  ;;  %v5546_v38 = vld [vmem:[%s6161_s5 + $0x120] ss:$44 sps:$4 sm:$0xff]  }
  0x2c   : > { %3319 = vmatpush1.bf16.msra.mxu0 %v5468_v39  ;;  %2621 = vmatprep.subr.bf16.mxu1 %v5469_v40  ;;  %v5580_v39 = vld [vmem:[%s7013_s1 + $0x450] ss:$8 sps:$4 sm:$0xff]   ;;  %v5591_v40 = vld [vmem:[%s7013_s1 + $0x164] ss:$8 sps:$4 sm:$0xff]  }
  0x2d   : > { %3320 = vmatprep.subr.bf16.mxu0 %v5471_v41  ;;  %v5594_v41 = vld [vmem:[%s7013_s1 + $0x464] ss:$8 sps:$4 sm:$0xff]  }
  0x2f   : > { %2622 = vmatpush1.bf16.msra.mxu1 %v5473_v42  ;;  %v5550_v42 = vld [vmem:[%s6161_s5 + $0x164] ss:$44 sps:$4 sm:$0xff]  }
  0x30   : > { %3321 = vmatpush1.bf16.msra.mxu0 %v5474_v43  ;;  %2623 = vmatprep.subr.bf16.mxu1 %v5475_v44  ;;  %v5552_v43 = vld [vmem:[%s6161_s5 + $0x17c] ss:$44 sps:$4 sm:$0xff]  }
  0x31   : > { %3322 = vmatprep.subr.bf16.mxu0 %v5477_v45  ;;  %v5589_v44 = vld [vmem:[%s7013_s1 + $0x160] ss:$8 sps:$4 sm:$0xff]  }
  0x32   : > { %v5592_v45 = vld [vmem:[%s7013_s1 + $0x460] ss:$8 sps:$4 sm:$0xff]  }
  0x33   : > { %2624 = vmatpush1.bf16.msra.mxu1 %v5479_v46  ;;  %v5603_v46 = vld [vmem:[%s7013_s1 + $0x174] ss:$8 sps:$4 sm:$0xff]  }
  0x34   : > { %3323 = vmatpush1.bf16.msra.mxu0 %v5480_v47  ;;  %2625 = vmatprep.subr.bf16.mxu1 %v5481_v48  ;;  %v5612_v47 = vld [vmem:[%s7013_s1 + $0x474] ss:$8 sps:$4 sm:$0xff]   ;;  %v5601_v48 = vld [vmem:[%s7013_s1 + $0x170] ss:$8 sps:$4 sm:$0xff]  }
  0x35   : > { %3324 = vmatprep.subr.bf16.mxu0 %v5483_v50  ;;  %v5555_v50 = vld [vmem:[%s6161_s5 + $0x178] ss:$44 sps:$4 sm:$0xff]  }
  0x37   : > { %2626 = vmatpush1.bf16.msra.mxu1 %v5485_v52  ;;  %v5559_v52 = vld [vmem:[%s6161_s5 + $0x1bc] ss:$44 sps:$4 sm:$0xff]  }
  0x38   : > { %3325 = vmatpush1.bf16.msra.mxu0 %v5486_v53  ;;  %2627 = vmatprep.subr.bf16.mxu1 %v5487_v54  ;;  %v5620_v53 = vld [vmem:[%s7013_s1 + $0x184] ss:$8 sps:$4 sm:$0xff]   ;;  %v5561_v54 = vld [vmem:[%s6161_s5 + $0x1d4] ss:$44 sps:$4 sm:$0xff]  }
  0x39   : > { %3326 = vmatprep.subr.bf16.mxu0 %v5489_v55  ;;  %v5624_v55 = vld [vmem:[%s7013_s1 + $0x484] ss:$8 sps:$4 sm:$0xff]  }
  0x3b   : > { %2628 = vmatpush1.bf16.msra.mxu1 %v5491_v56  ;;  %v5618_v56 = vld [vmem:[%s7013_s1 + $0x180] ss:$8 sps:$4 sm:$0xff]  }
  0x3c   : > { %3327 = vmatpush1.bf16.msra.mxu0 %v5492_v57  ;;  %2629 = vmatprep.subr.bf16.mxu1 %v5493_v58  ;;  %v5622_v57 = vld [vmem:[%s7013_s1 + $0x480] ss:$8 sps:$4 sm:$0xff]   ;;  %v5631_v58 = vld [vmem:[%s7013_s1 + $0x190] ss:$8 sps:$4 sm:$0xff]  }
  0x3d   : > { %3328 = vmatprep.subr.bf16.mxu0 %v5495_v59  ;;  %v5633_v59 = vld [vmem:[%s7013_s1 + $0x194] ss:$8 sps:$4 sm:$0xff]  }
  0x3f   : > { %2630 = vmatpush1.bf16.msra.mxu1 %v5497_v60  ;;  %v5634_v60 = vld [vmem:[%s7013_s1 + $0x490] ss:$8 sps:$4 sm:$0xff]  }
  0x40   : > { %3329 = vmatpush1.bf16.msra.mxu0 %v5498_v61  ;;  %2631 = vmatprep.subr.bf16.mxu1 %v5499_v62  ;;  %v5636_v61 = vld [vmem:[%s7013_s1 + $0x494] ss:$8 sps:$4 sm:$0xff]   ;;  %v5563_v62 = vld [vmem:[%s6161_s5 + $0x1b8] ss:$44 sps:$4 sm:$0xff]  }
  0x41   : > { %3330 = vmatprep.subr.bf16.mxu0 %v5501_v63  ;;  %v5567_v63 = vld [vmem:[%s6161_s5 + $0x1d0] ss:$44 sps:$4 sm:$0xff]  }
  0x43   : > { %2632 = vmatpush1.bf16.msra.mxu1 %v5503_v0  ;;  %v5571_v0 = vld [vmem:[%s6161_s5 + $0x214] ss:$44 sps:$4 sm:$0xff]  }
  0x44   : > { %3331 = vmatpush1.bf16.msra.mxu0 %v5504_v1  ;;  %2834 = vmatprep.subr.bf16.mxu1 %v5513_v2  ;;  %v5573_v1 = vld [vmem:[%s6161_s5 + $0x22c] ss:$44 sps:$4 sm:$0xff]   ;;  %v5643_v2 = vld [vmem:[%s7013_s1 + $0x1a0] ss:$8 sps:$4 sm:$0xff]  }
  0x45   : > { %3533 = vmatprep.subr.bf16.mxu0 %v5516_v3  ;;  %v5645_v3 = vld [vmem:[%s7013_s1 + $0x1a4] ss:$8 sps:$4 sm:$0xff]  }
  0x46   : > { %2634 = vmatmul.mubr.bf16.vlgmr.msra.gmra.mrb[0].mxu1 %v5505_v4  ;;  %v5646_v4 = vld [vmem:[%s7013_s1 + $0x4a0] ss:$8 sps:$4 sm:$0xff]  }
  0x47   : > { %3333 = vmatmul.mubr.bf16.vlgmr.msra.gmra.mrb[0].mxu0 %v5508_v5  ;;  %2835 = vmatpush1.bf16.msra.mxu1 %v5511_v6  ;;  %v5648_v5 = vld [vmem:[%s7013_s1 + $0x4a4] ss:$8 sps:$4 sm:$0xff]   ;;  %v5575_v6 = vld [vmem:[%s6161_s5 + $0x210] ss:$44 sps:$4 sm:$0xff]  }
  0x48   : > { %3534 = vmatpush1.bf16.msra.mxu0 %v5514_v7  ;;  %2643 = vmatprep.mubr.bf16.mxu1 %v5517_v8  ;;  %v5655_v7 = vld [vmem:[%s7013_s1 + $0x1b0] ss:$8 sps:$4 sm:$0xff]   ;;  %v5657_v8 = vld [vmem:[%s7013_s1 + $0x1b4] ss:$8 sps:$4 sm:$0xff]  }
  0x49   : > { %3342 = vmatprep.mubr.bf16.mxu0 %v5519_v9  ;;  %2836 = vmatprep.subr.bf16.mxu1 %v5525_v10  ;;  %v5576_v9 = vld [vmem:[%s6161_s5 + $0x228] ss:$44 sps:$4 sm:$0xff]   ;;  %v5583_v10 = vld [vmem:[%s6161_s5 + $0x26c] ss:$44 sps:$4 sm:$0xff]  }
  0x4a   : > { %3535 = vmatprep.subr.bf16.mxu0 %v5528_v11  ;;  %v5585_v11 = vld [vmem:[%s6161_s5 + $0x284] ss:$44 sps:$4 sm:$0xff]  }
  0x4b   : > { %2837 = vmatpush1.bf16.msra.mxu1 %v5523_v12  ;;  %v5664_v12 = vld [vmem:[%s7013_s1 + $0x4b0] ss:$8 sps:$4 sm:$0xff]  }
  0x4c   : > { %3536 = vmatpush1.bf16.msra.mxu0 %v5526_v13  ;;  %2838 = vmatprep.subr.bf16.mxu1 %v5537_v14  ;;  %v5666_v13 = vld [vmem:[%s7013_s1 + $0x4b4] ss:$8 sps:$4 sm:$0xff]  }
  0x4d   : > { %3537 = vmatprep.subr.bf16.mxu0 %v5540_v15  ;;  %v5587_v14 = vld [vmem:[%s6161_s5 + $0x268] ss:$44 sps:$4 sm:$0xff]   ;;  %v5588_v15 = vld [vmem:[%s6161_s5 + $0x280] ss:$44 sps:$4 sm:$0xff]  }
  0x4e   : > { %2644 = vmatmul.mubr.bf16.gmra.mrb[4].mxu1 %v5521_v16  ;;  %v5672_v16 = vld [vmem:[%s7013_s1 + $0x1c0] ss:$8 sps:$4 sm:$0xff]  }
  0x4f   : > { %3343 = vmatmul.mubr.bf16.gmra.mrb[4].mxu0 %v5522_v17  ;;  %2653 = vmatprep.mubr.bf16.mxu1 %v5529_v18  ;;  %v5595_v17 = vld [vmem:[%s6161_s5 + $0x2c4] ss:$44 sps:$4 sm:$0xff]  }
  0x50   : > { %3352 = vmatprep.mubr.bf16.mxu0 %v5531_v19  ;;  %2839 = vmatpush1.bf16.msra.mxu1 %v5535_v20  ;;  %v5674_v18 = vld [vmem:[%s7013_s1 + $0x1c4] ss:$8 sps:$4 sm:$0xff]   ;;  %v5676_v19 = vld [vmem:[%s7013_s1 + $0x4c0] ss:$8 sps:$4 sm:$0xff]  }
  0x51   : > { %3538 = vmatpush1.bf16.msra.mxu0 %v5538_v21  ;;  %2840 = vmatprep.subr.bf16.mxu1 %v5549_v22  ;;  %v5678_v20 = vld [vmem:[%s7013_s1 + $0x4c4] ss:$8 sps:$4 sm:$0xff]   ;;  %v5597_v21 = vld [vmem:[%s6161_s5 + $0x2dc] ss:$44 sps:$4 sm:$0xff]   ;;  %v5685_v22 = vld [vmem:[%s7013_s1 + $0x1d0] ss:$8 sps:$4 sm:$0xff]  }
  0x52   : > { %3539 = vmatprep.subr.bf16.mxu0 %v5558_v23  ;;  %v5687_v23 = vld [vmem:[%s7013_s1 + $0x1d4] ss:$8 sps:$4 sm:$0xff]  }
  0x54   : > { %2841 = vmatpush1.bf16.msra.mxu1 %v5547_v24  ;;  %v5688_v24 = vld [vmem:[%s7013_s1 + $0x4d0] ss:$8 sps:$4 sm:$0xff]  }
  0x55   : > { %3540 = vmatpush1.bf16.msra.mxu0 %v5556_v25  ;;  %2842 = vmatprep.subr.bf16.mxu1 %v5566_v27  ;;  %v5690_v25 = vld [vmem:[%s7013_s1 + $0x4d4] ss:$8 sps:$4 sm:$0xff]   ;;  %v5600_v27 = vld [vmem:[%s6161_s5 + $0x2d8] ss:$44 sps:$4 sm:$0xff]  }
  0x56   : > { %3541 = vmatprep.subr.bf16.mxu0 %v5570_v28  ;;  %2654 = vmatmul.mubr.bf16.gmra.mrb[8].mxu1 %v5533_v26  ;;  %v5599_v26 = vld [vmem:[%s6161_s5 + $0x2c0] ss:$44 sps:$4 sm:$0xff]   ;;  %v5604_v28 = vld [vmem:[%s6161_s5 + $0x31c] ss:$44 sps:$4 sm:$0xff]  }
  0x57   : > { %3353 = vmatmul.mubr.bf16.gmra.mrb[8].mxu0 %v5534_v29  ;;  %2663 = vmatprep.mubr.bf16.mxu1 %v5541_v30  ;;  %v5606_v29 = vld [vmem:[%s6161_s5 + $0x334] ss:$44 sps:$4 sm:$0xff]  }
  0x58   : > { %3362 = vmatprep.mubr.bf16.mxu0 %v5543_v31  ;;  %2843 = vmatpush1.bf16.msra.mxu1 %v5564_v32  ;;  %v5697_v30 = vld [vmem:[%s7013_s1 + $0x1e0] ss:$8 sps:$4 sm:$0xff]   ;;  %v5699_v31 = vld [vmem:[%s7013_s1 + $0x1e4] ss:$8 sps:$4 sm:$0xff]  }
  0x59   : > { %3542 = vmatpush1.bf16.msra.mxu0 %v5568_v33  ;;  %2844 = vmatprep.subr.bf16.mxu1 %v5579_v34  ;;  %v5700_v32 = vld [vmem:[%s7013_s1 + $0x4e0] ss:$8 sps:$4 sm:$0xff]   ;;  %v5702_v33 = vld [vmem:[%s7013_s1 + $0x4e4] ss:$8 sps:$4 sm:$0xff]  }
  0x5a   : > { %3543 = vmatprep.subr.bf16.mxu0 %v5582_v35  ;;  %v5608_v34 = vld [vmem:[%s6161_s5 + $0x318] ss:$44 sps:$4 sm:$0xff]  }
  0x5b   : > { %v5709_v35 = vld [vmem:[%s7013_s1 + $0x1f0] ss:$8 sps:$4 sm:$0xff]  }
  0x5c   : > { %2845 = vmatpush1.bf16.msra.mxu1 %v5577_v36  ;;  %v5711_v36 = vld [vmem:[%s7013_s1 + $0x1f4] ss:$8 sps:$4 sm:$0xff]  }
  0x5d   : > { %3544 = vmatpush1.bf16.msra.mxu0 %v5580_v39  ;;  %2846 = vmatprep.subr.bf16.mxu1 %v5591_v40  ;;  %v5615_v39 = vld [vmem:[%s6161_s5 + $0x38c] ss:$44 sps:$4 sm:$0xff]  }
  0x5e   : > { %3545 = vmatprep.subr.bf16.mxu0 %v5594_v41  ;;  %2664 = vmatmul.mubr.bf16.gmra.mrb[12].mxu1 %v5545_v37  ;;  %v5609_v37 = vld [vmem:[%s6161_s5 + $0x330] ss:$44 sps:$4 sm:$0xff]  }
  0x5f   : > { %3363 = vmatmul.mubr.bf16.gmra.mrb[12].mxu0 %v5546_v38  ;;  %2673 = vmatprep.mubr.bf16.mxu1 %v5550_v42  ;;  %v5613_v38 = vld [vmem:[%s6161_s5 + $0x374] ss:$44 sps:$4 sm:$0xff]   ;;  %v5718_v40 = vld [vmem:[%s7013_s1 + $0x4f0] ss:$8 sps:$4 sm:$0xff]  }
  0x60   : > { %3372 = vmatprep.mubr.bf16.mxu0 %v5552_v43  ;;  %2847 = vmatpush1.bf16.msra.mxu1 %v5589_v44  ;;  %v5720_v41 = vld [vmem:[%s7013_s1 + $0x4f4] ss:$8 sps:$4 sm:$0xff]   ;;  %v5729_v44 = vld [vmem:[%s7013_s1 + $0x204] ss:$8 sps:$4 sm:$0xff]  }
  0x61   : > { %3546 = vmatpush1.bf16.msra.mxu0 %v5592_v45  ;;  %2848 = vmatprep.subr.bf16.mxu1 %v5603_v46  ;;  %v5617_v42 = vld [vmem:[%s6161_s5 + $0x370] ss:$44 sps:$4 sm:$0xff]   ;;  %v5621_v43 = vld [vmem:[%s6161_s5 + $0x388] ss:$44 sps:$4 sm:$0xff]   ;;  %v5625_v45 = vld [vmem:[%s6161_s5 + $0x3cc] ss:$44 sps:$4 sm:$0xff]  }
  0x62   : > { %3547 = vmatprep.subr.bf16.mxu0 %v5612_v47  ;;  %v5732_v46 = vld [vmem:[%s7013_s1 + $0x504] ss:$8 sps:$4 sm:$0xff]  }
  0x63   : > { %v5627_v47 = vld [vmem:[%s6161_s5 + $0x3e4] ss:$44 sps:$4 sm:$0xff]  }
  0x64   : > { %2849 = vmatpush1.bf16.msra.mxu1 %v5601_v48  ;;  %v5629_v48 = vld [vmem:[%s6161_s5 + $0x3c8] ss:$44 sps:$4 sm:$0xff]  }
  0x65   : > { %3548 = vmatpush1.bf16.msra.mxu0 %v5610_v51  ;;  %2850 = vmatprep.subr.bf16.mxu1 %v5620_v53  ;;  %v5639_v51 = vld [vmem:[%s6161_s5 + $0x43c] ss:$44 sps:$4 sm:$0xff]   ;;  %v5642_v53 = vld [vmem:[%s6161_s5 + $0x438] ss:$44 sps:$4 sm:$0xff]  }
  0x66   : > { %3549 = vmatprep.subr.bf16.mxu0 %v5624_v55  ;;  %2674 = vmatmul.mubr.bf16.gmra.mrb[16].mxu1 %v5554_v49  ;;  %v5630_v49 = vld [vmem:[%s6161_s5 + $0x3e0] ss:$44 sps:$4 sm:$0xff]  }
  0x67   : > { %3373 = vmatmul.mubr.bf16.gmra.mrb[16].mxu0 %v5555_v50  ;;  %2683 = vmatprep.mubr.bf16.mxu1 %v5559_v52  ;;  %v5637_v50 = vld [vmem:[%s6161_s5 + $0x424] ss:$44 sps:$4 sm:$0xff]   ;;  %v5641_v52 = vld [vmem:[%s6161_s5 + $0x420] ss:$44 sps:$4 sm:$0xff]  }
  0x68   : > { %3382 = vmatprep.mubr.bf16.mxu0 %v5561_v54  ;;  %2851 = vmatpush1.bf16.msra.mxu1 %v5618_v56  ;;  %v5649_v54 = vld [vmem:[%s6161_s5 + $0x47c] ss:$44 sps:$4 sm:$0xff]   ;;  %v5651_v55 = vld [vmem:[%s6161_s5 + $0x494] ss:$44 sps:$4 sm:$0xff]   ;;  %v5653_v56 = vld [vmem:[%s6161_s5 + $0x478] ss:$44 sps:$4 sm:$0xff]  }
  0x69   : > { %3550 = vmatpush1.bf16.msra.mxu0 %v5622_v57  ;;  %2852 = vmatprep.subr.bf16.mxu1 %v5633_v59  ;;  %v5654_v57 = vld [vmem:[%s6161_s5 + $0x490] ss:$44 sps:$4 sm:$0xff]   ;;  %v5660_v59 = vld [vmem:[%s6161_s5 + $0x4ec] ss:$44 sps:$4 sm:$0xff]  }
  0x6a   : > { %3551 = vmatprep.subr.bf16.mxu0 %v5636_v61  ;;  %v5663_v61 = vld [vmem:[%s6161_s5 + $0x4e8] ss:$44 sps:$4 sm:$0xff]  }
  0x6c   : > { %2853 = vmatpush1.bf16.msra.mxu1 %v5631_v58  ;;  %v5658_v58 = vld [vmem:[%s6161_s5 + $0x4d4] ss:$44 sps:$4 sm:$0xff]  }
  0x6d   : > { %3552 = vmatpush1.bf16.msra.mxu0 %v5634_v60  ;;  %2854 = vmatprep.subr.bf16.mxu1 %v5645_v3  ;;  %v5662_v60 = vld [vmem:[%s6161_s5 + $0x4d0] ss:$44 sps:$4 sm:$0xff]  }
  0x6e   : > { %2684 = vmatmul.mubr.bf16.gmra.mrb[20].mxu1 %v5563_v62  ;;  %3553 = vmatprep.subr.bf16.mxu0 %v5648_v5  ;;  %v5667_v62 = vld [vmem:[%s6161_s5 + $0x52c] ss:$44 sps:$4 sm:$0xff]   ;;  %v5681_v3 = vld [vmem:[%s6161_s5 + $0x59c] ss:$44 sps:$4 sm:$0xff]  }
  0x6f   : > { %3383 = vmatmul.mubr.bf16.gmra.mrb[20].mxu0 %v5567_v63  ;;  %2693 = vmatprep.mubr.bf16.mxu1 %v5571_v0  ;;  %v5669_v63 = vld [vmem:[%s6161_s5 + $0x544] ss:$44 sps:$4 sm:$0xff]   ;;  %v5671_v0 = vld [vmem:[%s6161_s5 + $0x528] ss:$44 sps:$4 sm:$0xff]  }
  0x70   : > { %3392 = vmatprep.mubr.bf16.mxu0 %v5573_v1  ;;  %2855 = vmatpush1.bf16.msra.mxu1 %v5643_v2  ;;  %v5675_v1 = vld [vmem:[%s6161_s5 + $0x540] ss:$44 sps:$4 sm:$0xff]   ;;  %v5679_v2 = vld [vmem:[%s6161_s5 + $0x584] ss:$44 sps:$4 sm:$0xff]  }
  0x71   : > { %3554 = vmatpush1.bf16.msra.mxu0 %v5646_v4  ;;  %2856 = vmatprep.subr.bf16.mxu1 %v5657_v8  ;;  %v5683_v4 = vld [vmem:[%s6161_s5 + $0x580] ss:$44 sps:$4 sm:$0xff]   ;;  %v5684_v5 = vld [vmem:[%s6161_s5 + $0x598] ss:$44 sps:$4 sm:$0xff]  }
  0x72   : > { %3555 = vmatprep.subr.bf16.mxu0 %v5666_v13  ;;  %v5695_v8 = vld [vmem:[%s6161_s5 + $0x5d8] ss:$44 sps:$4 sm:$0xff]   ;;  %v5708_v13 = vld [vmem:[%s6161_s5 + $0x648] ss:$44 sps:$4 sm:$0xff]  }
  0x74   : > { %2857 = vmatpush1.bf16.msra.mxu1 %v5655_v7  ;;  %v5693_v7 = vld [vmem:[%s6161_s5 + $0x5f4] ss:$44 sps:$4 sm:$0xff]  }
  0x75   : > { %3556 = vmatpush1.bf16.msra.mxu0 %v5664_v12  ;;  %2858 = vmatprep.subr.bf16.mxu1 %v5674_v18  ;;  %v5707_v12 = vld [vmem:[%s6161_s5 + $0x630] ss:$44 sps:$4 sm:$0xff]   ;;  %v5723_v18 = vld [vmem:[%s6161_s5 + $0xc] ss:$44 sps:$4 sm:$0xff]  }
  0x76   : > { %2694 = vmatmul.mubr.bf16.gmra.mrb[24].mxu1 %v5575_v6  ;;  %3557 = vmatprep.subr.bf16.mxu0 %v5678_v20  ;;  %v5691_v6 = vld [vmem:[%s6161_s5 + $0x5dc] ss:$44 sps:$4 sm:$0xff]  }
  0x77   : > { %3393 = vmatmul.mubr.bf16.gmra.mrb[24].mxu0 %v5576_v9  ;;  %2703 = vmatprep.mubr.bf16.mxu1 %v5583_v10  ;;  %v5696_v9 = vld [vmem:[%s6161_s5 + $0x5f0] ss:$44 sps:$4 sm:$0xff]   ;;  %v5703_v10 = vld [vmem:[%s6161_s5 + $0x634] ss:$44 sps:$4 sm:$0xff]  }
  0x78   : > { %3402 = vmatprep.mubr.bf16.mxu0 %v5585_v11  ;;  %2859 = vmatpush1.bf16.msra.mxu1 %v5672_v16  ;;  %v5705_v11 = vld [vmem:[%s6161_s5 + $0x64c] ss:$44 sps:$4 sm:$0xff]   ;;  %v5716_v16 = vld [vmem:[%s6161_s5 + $0x688] ss:$44 sps:$4 sm:$0xff]  }
  0x79   : > { %3558 = vmatpush1.bf16.msra.mxu0 %v5676_v19  ;;  %2860 = vmatprep.subr.bf16.mxu1 %v5687_v23  ;;  %v5726_v19 = vld [vmem:[%s6161_s5 + $0x24] ss:$44 sps:$4 sm:$0xff]   ;;  %v5721_v20 = vld [vmem:[%s6161_s5 + $0x8] ss:$44 sps:$4 sm:$0xff]  }
  0x7a   : > { %3559 = vmatprep.subr.bf16.mxu0 %v5690_v25  ;;  %v5730_v23 = vld [vmem:[%s7013_s1 + $0x500] ss:$8 sps:$4 sm:$0xff]  }
  0x7b   : > { %v5735_v25 = vld [vmem:[%s6161_s5 + $0x7c] ss:$44 sps:$4 sm:$0xff]  }
  0x7c   : > { %2861 = vmatpush1.bf16.msra.mxu1 %v5685_v22  ;;  %v5727_v22 = vld [vmem:[%s7013_s1 + $0x200] ss:$8 sps:$4 sm:$0xff]  }
  0x7d   : > { %3560 = vmatpush1.bf16.msra.mxu0 %v5688_v24  ;;  %2862 = vmatprep.subr.bf16.mxu1 %v5699_v31  ;;  %v5733_v24 = vld [vmem:[%s6161_s5 + $0x64] ss:$44 sps:$4 sm:$0xff]  }
  0x7e   : > { %2704 = vmatmul.mubr.bf16.gmra.mrb[28].mxu1 %v5587_v14  ;;  %3561 = vmatprep.subr.bf16.mxu0 %v5702_v33  ;;  %v5712_v14 = vld [vmem:[%s6161_s5 + $0x68c] ss:$44 sps:$4 sm:$0xff]  }
  0x7f   : > { %3403 = vmatmul.mubr.bf16.gmra.mrb[28].mxu0 %v5588_v15  ;;  %2713 = vmatprep.mubr.bf16.mxu1 %v5595_v17  ;;  %v5714_v15 = vld [vmem:[%s6161_s5 + $0x6a4] ss:$44 sps:$4 sm:$0xff]   ;;  %v5717_v17 = vld [vmem:[%s6161_s5 + $0x6a0] ss:$44 sps:$4 sm:$0xff]  }
  0x80   : > { %3412 = vmatprep.mubr.bf16.mxu0 %v5597_v21  ;;  %2863 = vmatpush1.bf16.msra.mxu1 %v5697_v30  ;;  %v5724_v21 = vld [vmem:[%s6161_s5 + $0x20] ss:$44 sps:$4 sm:$0xff]   ;;  %v5775_v30 = vld [vmem:[%s7013_s1 + $0x510] ss:$8 sps:$4 sm:$0xff]  }
  0x81   : > { %3562 = vmatpush1.bf16.msra.mxu0 %v5700_v32  ;;  %2864 = vmatprep.subr.bf16.mxu1 %v5711_v36  ;;  %v5822_v31 = vld [vmem:[%s7013_s1 + $0x524] ss:$8 sps:$4 sm:$0xff]   ;;  %v5748_v36 = vld [vmem:[%s7013_s1 + $0x220] ss:$8 sps:$4 sm:$0xff]  }
  0x82   : > { %3563 = vmatprep.subr.bf16.mxu0 %v5720_v41  ;;  %v5737_v32 = vld [vmem:[%s6161_s5 + $0x60] ss:$44 sps:$4 sm:$0xff]   ;;  %v5738_v33 = vld [vmem:[%s6161_s5 + $0x78] ss:$44 sps:$4 sm:$0xff]  }
  0x83   : > { %v5773_v41 = vld [vmem:[%s7013_s1 + $0x244] ss:$8 sps:$4 sm:$0xff]  }
  0x84   : > { %2865 = vmatpush1.bf16.msra.mxu1 %v5709_v35  ;;  %v5744_v35 = vld [vmem:[%s6161_s5 + $0xd4] ss:$44 sps:$4 sm:$0xff]  }
  0x85   : > { %3564 = vmatpush1.bf16.msra.mxu0 %v5718_v40  ;;  %3067 = vmatprep.subr.bf16.mxu1 %v5729_v44  ;;  %v5757_v40 = vld [vmem:[%s7013_s1 + $0x230] ss:$8 sps:$4 sm:$0xff]  }
  0x86   : > { %2714 = vmatmul.mubr.bf16.gmra.mrb[32].mxu1 %v5599_v26  ;;  %3766 = vmatprep.subr.bf16.mxu0 %v5732_v46  ;;  %v5741_v26 = vld [vmem:[%s7013_s1 + $0x214] ss:$8 sps:$4 sm:$0xff]   ;;  %v5753_v46 = vld [vmem:[%s6161_s5 + $0x12c] ss:$44 sps:$4 sm:$0xff]  }
  0x87   : > { %3413 = vmatmul.mubr.bf16.gmra.mrb[32].mxu0 %v5600_v27  ;;  %2723 = vmatprep.mubr.bf16.mxu1 %v5604_v28  ;;  %v5777_v27 = vld [vmem:[%s7013_s1 + $0x514] ss:$8 sps:$4 sm:$0xff]   ;;  %v5739_v28 = vld [vmem:[%s7013_s1 + $0x210] ss:$8 sps:$4 sm:$0xff]  }
  0x88   : > { %3422 = vmatprep.mubr.bf16.mxu0 %v5606_v29  ;;  %v5750_v29 = vld [vmem:[%s7013_s1 + $0x224] ss:$8 sps:$4 sm:$0xff]   ;;  %v5747_v44 = vld [vmem:[%s6161_s5 + $0xd0] ss:$44 sps:$4 sm:$0xff]  }
  0x8e   : > { %2724 = vmatmul.mubr.bf16.gmra.mrb[36].mxu1 %v5608_v34  ;;  %v5742_v34 = vld [vmem:[%s6161_s5 + $0xbc] ss:$44 sps:$4 sm:$0xff]  }
  0x8f   : > { %3423 = vmatmul.mubr.bf16.gmra.mrb[36].mxu0 %v5609_v37  ;;  %2733 = vmatprep.mubr.bf16.mxu1 %v5613_v38  ;;  %v5820_v37 = vld [vmem:[%s7013_s1 + $0x520] ss:$8 sps:$4 sm:$0xff]   ;;  %v5759_v38 = vld [vmem:[%s7013_s1 + $0x234] ss:$8 sps:$4 sm:$0xff]  }
  0x90   : > { %3432 = vmatprep.mubr.bf16.mxu0 %v5615_v39  ;;  %v5867_v39 = vld [vmem:[%s7013_s1 + $0x534] ss:$8 sps:$4 sm:$0xff]  }
  0x96   : > { %2734 = vmatmul.mubr.bf16.gmra.mrb[40].mxu1 %v5617_v42  ;;  %v5865_v42 = vld [vmem:[%s7013_s1 + $0x530] ss:$8 sps:$4 sm:$0xff]  }
  0x97   : > { %3433 = vmatmul.mubr.bf16.gmra.mrb[40].mxu0 %v5621_v43  ;;  %2743 = vmatprep.mubr.bf16.mxu1 %v5625_v45  ;;  %v5746_v43 = vld [vmem:[%s6161_s5 + $0xb8] ss:$44 sps:$4 sm:$0xff]   ;;  %v5751_v45 = vld [vmem:[%s6161_s5 + $0x114] ss:$44 sps:$4 sm:$0xff]  }
  0x98   : > { %3442 = vmatprep.mubr.bf16.mxu0 %v5627_v47  ;;  %v5771_v47 = vld [vmem:[%s7013_s1 + $0x240] ss:$8 sps:$4 sm:$0xff]  }
  0x9e   : > { %2744 = vmatmul.mubr.bf16.gmra.mrb[44].mxu1 %v5629_v48  ;;  %v5786_v48 = vld [vmem:[%s7013_s1 + $0x254] ss:$8 sps:$4 sm:$0xff]  }
  0x9f   : > { %3443 = vmatmul.mubr.bf16.gmra.mrb[44].mxu0 %v5630_v49  ;;  %2753 = vmatprep.mubr.bf16.mxu1 %v5637_v50  ;;  %v5784_v49 = vld [vmem:[%s7013_s1 + $0x250] ss:$8 sps:$4 sm:$0xff]   ;;  %v5795_v50 = vld [vmem:[%s7013_s1 + $0x264] ss:$8 sps:$4 sm:$0xff]  }
  0xa0   : > { %3452 = vmatprep.mubr.bf16.mxu0 %v5639_v51  ;;  %v5755_v51 = vld [vmem:[%s6161_s5 + $0x110] ss:$44 sps:$4 sm:$0xff]  }
  0xa6   : > { %2754 = vmatmul.mubr.bf16.gmra.mrb[48].mxu1 %v5641_v52  ;;  %v5756_v52 = vld [vmem:[%s6161_s5 + $0x128] ss:$44 sps:$4 sm:$0xff]  }
  0xa7   : > { %3453 = vmatmul.mubr.bf16.gmra.mrb[48].mxu0 %v5642_v53  ;;  %2763 = vmatprep.mubr.bf16.mxu1 %v5649_v54  ;;  %v5760_v53 = vld [vmem:[%s6161_s5 + $0x16c] ss:$44 sps:$4 sm:$0xff]   ;;  %v5762_v54 = vld [vmem:[%s6161_s5 + $0x184] ss:$44 sps:$4 sm:$0xff]  }
  0xa8   : > { %3462 = vmatprep.mubr.bf16.mxu0 %v5651_v55  ;;  %v5793_v55 = vld [vmem:[%s7013_s1 + $0x260] ss:$8 sps:$4 sm:$0xff]  }
  0xae   : > { %2764 = vmatmul.mubr.bf16.gmra.mrb[52].mxu1 %v5653_v56  ;;  %v5804_v56 = vld [vmem:[%s7013_s1 + $0x274] ss:$8 sps:$4 sm:$0xff]  }
  0xaf   : > { %3463 = vmatmul.mubr.bf16.gmra.mrb[52].mxu0 %v5654_v57  ;;  %2773 = vmatprep.mubr.bf16.mxu1 %v5658_v58  ;;  %v5802_v57 = vld [vmem:[%s7013_s1 + $0x270] ss:$8 sps:$4 sm:$0xff]   ;;  %v5818_v58 = vld [vmem:[%s7013_s1 + $0x284] ss:$8 sps:$4 sm:$0xff]  }
  0xb0   : > { %3472 = vmatprep.mubr.bf16.mxu0 %v5660_v59  ;;  %v5764_v59 = vld [vmem:[%s6161_s5 + $0x168] ss:$44 sps:$4 sm:$0xff]  }
  0xb6   : > { %2774 = vmatmul.mubr.bf16.gmra.mrb[56].mxu1 %v5662_v60  ;;  %v5765_v60 = vld [vmem:[%s6161_s5 + $0x180] ss:$44 sps:$4 sm:$0xff]  }
  0xb7   : > { %3473 = vmatmul.mubr.bf16.gmra.mrb[56].mxu0 %v5663_v61  ;;  %2783 = vmatprep.mubr.bf16.mxu1 %v5667_v62  ;;  %v5766_v61 = vld [vmem:[%s6161_s5 + $0x1c4] ss:$44 sps:$4 sm:$0xff]   ;;  %v5768_v62 = vld [vmem:[%s6161_s5 + $0x1dc] ss:$44 sps:$4 sm:$0xff]  }
  0xb8   : > { %3482 = vmatprep.mubr.bf16.mxu0 %v5669_v63  ;;  %v5816_v63 = vld [vmem:[%s7013_s1 + $0x280] ss:$8 sps:$4 sm:$0xff]  }
  0xbe   : > { %2784 = vmatmul.mubr.bf16.gmra.mrb[60].mxu1 %v5671_v0  ;;  %v5831_v0 = vld [vmem:[%s7013_s1 + $0x294] ss:$8 sps:$4 sm:$0xff]  }
  0xbf   : > { %3483 = vmatmul.mubr.bf16.gmra.mrb[60].mxu0 %v5675_v1  ;;  %2793 = vmatprep.mubr.bf16.mxu1 %v5679_v2  ;;  %v5829_v1 = vld [vmem:[%s7013_s1 + $0x290] ss:$8 sps:$4 sm:$0xff]   ;;  %v5840_v2 = vld [vmem:[%s7013_s1 + $0x2a4] ss:$8 sps:$4 sm:$0xff]  }
  0xc0   : > { %3492 = vmatprep.mubr.bf16.mxu0 %v5681_v3  ;;  %v5770_v3 = vld [vmem:[%s6161_s5 + $0x1c0] ss:$44 sps:$4 sm:$0xff]  }
  0xc6   : > { %2794 = vmatmul.mubr.bf16.gmra.mrb[64].mxu1 %v5683_v4  ;;  %v5774_v4 = vld [vmem:[%s6161_s5 + $0x1d8] ss:$44 sps:$4 sm:$0xff]  }
  0xc7   : > { %3493 = vmatmul.mubr.bf16.gmra.mrb[64].mxu0 %v5684_v5  ;;  %2803 = vmatprep.mubr.bf16.mxu1 %v5691_v6  ;;  %v5778_v5 = vld [vmem:[%s6161_s5 + $0x21c] ss:$44 sps:$4 sm:$0xff]   ;;  %v5780_v6 = vld [vmem:[%s6161_s5 + $0x234] ss:$44 sps:$4 sm:$0xff]  }
  0xc8   : > { %3502 = vmatprep.mubr.bf16.mxu0 %v5693_v7  ;;  %v5838_v7 = vld [vmem:[%s7013_s1 + $0x2a0] ss:$8 sps:$4 sm:$0xff]  }
  0xce   : > { %2804 = vmatmul.mubr.bf16.gmra.mrb[68].mxu1 %v5695_v8  ;;  %v5849_v8 = vld [vmem:[%s7013_s1 + $0x2b4] ss:$8 sps:$4 sm:$0xff]  }
  0xcf   : > { %3503 = vmatmul.mubr.bf16.gmra.mrb[68].mxu0 %v5696_v9  ;;  %2813 = vmatprep.mubr.bf16.mxu1 %v5703_v10  ;;  %v5847_v9 = vld [vmem:[%s7013_s1 + $0x2b0] ss:$8 sps:$4 sm:$0xff]   ;;  %v5863_v10 = vld [vmem:[%s7013_s1 + $0x2c4] ss:$8 sps:$4 sm:$0xff]  }
  0xd0   : > { %3512 = vmatprep.mubr.bf16.mxu0 %v5705_v11  ;;  %v5782_v11 = vld [vmem:[%s6161_s5 + $0x218] ss:$44 sps:$4 sm:$0xff]  }
  0xd6   : > { %2814 = vmatmul.mubr.bf16.gmra.mrb[72].mxu1 %v5707_v12  ;;  %v5783_v12 = vld [vmem:[%s6161_s5 + $0x230] ss:$44 sps:$4 sm:$0xff]  }
  0xd7   : > { %3513 = vmatmul.mubr.bf16.gmra.mrb[72].mxu0 %v5708_v13  ;;  %2823 = vmatprep.mubr.bf16.mxu1 %v5712_v14  ;;  %v5787_v13 = vld [vmem:[%s6161_s5 + $0x274] ss:$44 sps:$4 sm:$0xff]   ;;  %v5789_v14 = vld [vmem:[%s6161_s5 + $0x28c] ss:$44 sps:$4 sm:$0xff]  }
  0xd8   : > { %3522 = vmatprep.mubr.bf16.mxu0 %v5714_v15  ;;  %v5861_v15 = vld [vmem:[%s7013_s1 + $0x2c0] ss:$8 sps:$4 sm:$0xff]  }
  0xde   : > { %2824 = vmatmul.mubr.bf16.gmra.mrb[76].mxu1 %v5716_v16  ;;  %v5876_v16 = vld [vmem:[%s7013_s1 + $0x2d4] ss:$8 sps:$4 sm:$0xff]  }
  0xdf   : > { %3523 = vmatmul.mubr.bf16.gmra.mrb[76].mxu0 %v5717_v17  ;;  %2866 = vmatprep.mubr.bf16.mxu1 %v5723_v18  ;;  %v5874_v17 = vld [vmem:[%s7013_s1 + $0x2d0] ss:$8 sps:$4 sm:$0xff]   ;;  %v5885_v18 = vld [vmem:[%s7013_s1 + $0x2e4] ss:$8 sps:$4 sm:$0xff]  }
  0xe0   : > { %3565 = vmatprep.mubr.bf16.mxu0 %v5726_v19  ;;  %v5791_v19 = vld [vmem:[%s6161_s5 + $0x270] ss:$44 sps:$4 sm:$0xff]  }
  0xe6   : > { %2867 = vmatmul.mubr.bf16.vlgmr.msra.gmra.mrb[0].mxu1 %v5721_v20  ;;  %v5792_v20 = vld [vmem:[%s6161_s5 + $0x288] ss:$44 sps:$4 sm:$0xff]  }
  0xe7   : > { %3566 = vmatmul.mubr.bf16.vlgmr.msra.gmra.mrb[0].mxu0 %v5724_v21  ;;  %3068 = vmatpush1.bf16.msra.mxu1 %v5727_v22  ;;  %v5796_v21 = vld [vmem:[%s6161_s5 + $0x2cc] ss:$44 sps:$4 sm:$0xff]   ;;  %v5798_v22 = vld [vmem:[%s6161_s5 + $0x2e4] ss:$44 sps:$4 sm:$0xff]  }
  0xe8   : > { %3767 = vmatpush1.bf16.msra.mxu0 %v5730_v23  ;;  %2876 = vmatprep.mubr.bf16.mxu1 %v5733_v24  ;;  %v5883_v23 = vld [vmem:[%s7013_s1 + $0x2e0] ss:$8 sps:$4 sm:$0xff]   ;;  %v5894_v24 = vld [vmem:[%s7013_s1 + $0x2f4] ss:$8 sps:$4 sm:$0xff]  }
  0xe9   : > { %3575 = vmatprep.mubr.bf16.mxu0 %v5735_v25  ;;  %3069 = vmatprep.subr.bf16.mxu1 %v5741_v26  ;;  %v5892_v25 = vld [vmem:[%s7013_s1 + $0x2f0] ss:$8 sps:$4 sm:$0xff]   ;;  %v5800_v26 = vld [vmem:[%s6161_s5 + $0x2c8] ss:$44 sps:$4 sm:$0xff]  }
  0xea   : > { %3768 = vmatprep.subr.bf16.mxu0 %v5777_v27  ;;  %v5801_v27 = vld [vmem:[%s6161_s5 + $0x2e0] ss:$44 sps:$4 sm:$0xff]  }
  0xeb   : > { %3070 = vmatpush1.bf16.msra.mxu1 %v5739_v28  ;;  %v5805_v28 = vld [vmem:[%s6161_s5 + $0x324] ss:$44 sps:$4 sm:$0xff]  }
  0xec   : > { %3769 = vmatpush1.bf16.msra.mxu0 %v5775_v30  ;;  %3071 = vmatprep.subr.bf16.mxu1 %v5750_v29  ;;  %v5807_v29 = vld [vmem:[%s6161_s5 + $0x33c] ss:$44 sps:$4 sm:$0xff]   ;;  %v5809_v30 = vld [vmem:[%s6161_s5 + $0x320] ss:$44 sps:$4 sm:$0xff]  }
  0xed   : > { %3770 = vmatprep.subr.bf16.mxu0 %v5822_v31  ;;  %v5810_v31 = vld [vmem:[%s6161_s5 + $0x338] ss:$44 sps:$4 sm:$0xff]  }
  0xee   : > { %2877 = vmatmul.mubr.bf16.gmra.mrb[4].mxu1 %v5737_v32  ;;  %v5811_v32 = vld [vmem:[%s6161_s5 + $0x37c] ss:$44 sps:$4 sm:$0xff]  }
  0xef   : > { %3576 = vmatmul.mubr.bf16.gmra.mrb[4].mxu0 %v5738_v33  ;;  %2886 = vmatprep.mubr.bf16.mxu1 %v5742_v34  ;;  %v5813_v33 = vld [vmem:[%s6161_s5 + $0x394] ss:$44 sps:$4 sm:$0xff]   ;;  %v5815_v34 = vld [vmem:[%s6161_s5 + $0x378] ss:$44 sps:$4 sm:$0xff]  }
  0xf0   : > { %3585 = vmatprep.mubr.bf16.mxu0 %v5744_v35  ;;  %3072 = vmatpush1.bf16.msra.mxu1 %v5748_v36  ;;  %v5819_v35 = vld [vmem:[%s6161_s5 + $0x390] ss:$44 sps:$4 sm:$0xff]   ;;  %v5823_v36 = vld [vmem:[%s6161_s5 + $0x3d4] ss:$44 sps:$4 sm:$0xff]  }
  0xf1   : > { %3771 = vmatpush1.bf16.msra.mxu0 %v5820_v37  ;;  %3073 = vmatprep.subr.bf16.mxu1 %v5759_v38  ;;  %v5825_v37 = vld [vmem:[%s6161_s5 + $0x3ec] ss:$44 sps:$4 sm:$0xff]   ;;  %v5827_v38 = vld [vmem:[%s6161_s5 + $0x3d0] ss:$44 sps:$4 sm:$0xff]  }
  0xf2   : > { %3772 = vmatprep.subr.bf16.mxu0 %v5867_v39  ;;  %v5828_v39 = vld [vmem:[%s6161_s5 + $0x3e8] ss:$44 sps:$4 sm:$0xff]  }
  0xf4   : > { %3074 = vmatpush1.bf16.msra.mxu1 %v5757_v40  ;;  %v5832_v40 = vld [vmem:[%s6161_s5 + $0x42c] ss:$44 sps:$4 sm:$0xff]  }
  0xf5   : > { %3773 = vmatpush1.bf16.msra.mxu0 %v5865_v42  ;;  %3075 = vmatprep.subr.bf16.mxu1 %v5773_v41  ;;  %v5834_v41 = vld [vmem:[%s6161_s5 + $0x444] ss:$44 sps:$4 sm:$0xff]   ;;  %v5836_v42 = vld [vmem:[%s6161_s5 + $0x428] ss:$44 sps:$4 sm:$0xff]  }
  0xf6   : > { %2887 = vmatmul.mubr.bf16.gmra.mrb[8].mxu1 %v5746_v43  ;;  %v5837_v43 = vld [vmem:[%s6161_s5 + $0x440] ss:$44 sps:$4 sm:$0xff]  }
  0xf7   : > { %3586 = vmatmul.mubr.bf16.gmra.mrb[8].mxu0 %v5747_v44  ;;  %2896 = vmatprep.mubr.bf16.mxu1 %v5751_v45  ;;  %v5841_v44 = vld [vmem:[%s6161_s5 + $0x484] ss:$44 sps:$4 sm:$0xff]   ;;  %v5843_v45 = vld [vmem:[%s6161_s5 + $0x49c] ss:$44 sps:$4 sm:$0xff]  }
  0xf8   : > { %3595 = vmatprep.mubr.bf16.mxu0 %v5753_v46  ;;  %3076 = vmatpush1.bf16.msra.mxu1 %v5771_v47  ;;  %v5845_v46 = vld [vmem:[%s6161_s5 + $0x480] ss:$44 sps:$4 sm:$0xff]   ;;  %v5846_v47 = vld [vmem:[%s6161_s5 + $0x498] ss:$44 sps:$4 sm:$0xff]  }
  0xf9   : > { %3077 = vmatprep.subr.bf16.mxu1 %v5786_v48  ;;  %v5850_v48 = vld [vmem:[%s6161_s5 + $0x4dc] ss:$44 sps:$4 sm:$0xff]  }
  0xfc   : > { %3078 = vmatpush1.bf16.msra.mxu1 %v5784_v49  ;;  %v5852_v49 = vld [vmem:[%s6161_s5 + $0x4f4] ss:$44 sps:$4 sm:$0xff]  }
  0xfd   : > { %3079 = vmatprep.subr.bf16.mxu1 %v5795_v50  ;;  %v5854_v50 = vld [vmem:[%s6161_s5 + $0x4d8] ss:$44 sps:$4 sm:$0xff]  }
  0xfe   : > { %2897 = vmatmul.mubr.bf16.gmra.mrb[12].mxu1 %v5755_v51  ;;  %v5855_v51 = vld [vmem:[%s6161_s5 + $0x4f0] ss:$44 sps:$4 sm:$0xff]  }
  0xff   : > { %3596 = vmatmul.mubr.bf16.gmra.mrb[12].mxu0 %v5756_v52  ;;  %2906 = vmatprep.mubr.bf16.mxu1 %v5760_v53  ;;  %v5856_v52 = vld [vmem:[%s6161_s5 + $0x534] ss:$44 sps:$4 sm:$0xff]   ;;  %v5858_v53 = vld [vmem:[%s6161_s5 + $0x54c] ss:$44 sps:$4 sm:$0xff]  }
 0x100   : > { %3605 = vmatprep.mubr.bf16.mxu0 %v5762_v54  ;;  %3080 = vmatpush1.bf16.msra.mxu1 %v5793_v55  ;;  %v5860_v54 = vld [vmem:[%s6161_s5 + $0x530] ss:$44 sps:$4 sm:$0xff]   ;;  %v5864_v55 = vld [vmem:[%s6161_s5 + $0x548] ss:$44 sps:$4 sm:$0xff]  }
 0x101   : > { %3081 = vmatprep.subr.bf16.mxu1 %v5804_v56  ;;  %v5868_v56 = vld [vmem:[%s6161_s5 + $0x58c] ss:$44 sps:$4 sm:$0xff]  }
 0x104   : > { %3082 = vmatpush1.bf16.msra.mxu1 %v5802_v57  ;;  %v5870_v57 = vld [vmem:[%s6161_s5 + $0x5a4] ss:$44 sps:$4 sm:$0xff]  }
 0x105   : > { %3083 = vmatprep.subr.bf16.mxu1 %v5818_v58  ;;  %v5872_v58 = vld [vmem:[%s6161_s5 + $0x588] ss:$44 sps:$4 sm:$0xff]  }
 0x106   : > { %2907 = vmatmul.mubr.bf16.gmra.mrb[16].mxu1 %v5764_v59  ;;  %v5873_v59 = vld [vmem:[%s6161_s5 + $0x5a0] ss:$44 sps:$4 sm:$0xff]  }
 0x107   : > { %3606 = vmatmul.mubr.bf16.gmra.mrb[16].mxu0 %v5765_v60  ;;  %2916 = vmatprep.mubr.bf16.mxu1 %v5766_v61  ;;  %v5877_v60 = vld [vmem:[%s6161_s5 + $0x5e4] ss:$44 sps:$4 sm:$0xff]   ;;  %v5879_v61 = vld [vmem:[%s6161_s5 + $0x5fc] ss:$44 sps:$4 sm:$0xff]  }
 0x108   : > { %3615 = vmatprep.mubr.bf16.mxu0 %v5768_v62  ;;  %3084 = vmatpush1.bf16.msra.mxu1 %v5816_v63  ;;  %v5881_v62 = vld [vmem:[%s6161_s5 + $0x5e0] ss:$44 sps:$4 sm:$0xff]   ;;  %v5882_v63 = vld [vmem:[%s6161_s5 + $0x5f8] ss:$44 sps:$4 sm:$0xff]  }
 0x109   : > { %3085 = vmatprep.subr.bf16.mxu1 %v5831_v0  ;;  %v5886_v0 = vld [vmem:[%s6161_s5 + $0x63c] ss:$44 sps:$4 sm:$0xff]  }
 0x10c   : > { %3086 = vmatpush1.bf16.msra.mxu1 %v5829_v1  ;;  %v5888_v1 = vld [vmem:[%s6161_s5 + $0x654] ss:$44 sps:$4 sm:$0xff]  }
 0x10d   : > { %3087 = vmatprep.subr.bf16.mxu1 %v5840_v2  ;;  %v5890_v2 = vld [vmem:[%s6161_s5 + $0x638] ss:$44 sps:$4 sm:$0xff]  }
 0x10e   : > { %2917 = vmatmul.mubr.bf16.gmra.mrb[20].mxu1 %v5770_v3  ;;  %v5891_v3 = vld [vmem:[%s6161_s5 + $0x650] ss:$44 sps:$4 sm:$0xff]  }
 0x10f   : > { %3616 = vmatmul.mubr.bf16.gmra.mrb[20].mxu0 %v5774_v4  ;;  %2926 = vmatprep.mubr.bf16.mxu1 %v5778_v5  ;;  %v5895_v4 = vld [vmem:[%s6161_s5 + $0x694] ss:$44 sps:$4 sm:$0xff]   ;;  %v5897_v5 = vld [vmem:[%s6161_s5 + $0x6ac] ss:$44 sps:$4 sm:$0xff]  }
 0x110   : > { %3625 = vmatprep.mubr.bf16.mxu0 %v5780_v6  ;;  %3088 = vmatpush1.bf16.msra.mxu1 %v5838_v7  ;;  %v5899_v6 = vld [vmem:[%s6161_s5 + $0x690] ss:$44 sps:$4 sm:$0xff]   ;;  %v5900_v7 = vld [vmem:[%s6161_s5 + $0x6a8] ss:$44 sps:$4 sm:$0xff]  }
 0x111   : > { %3089 = vmatprep.subr.bf16.mxu1 %v5849_v8  ;;  %v5903_v8 = vld [vmem:[%s6161_s5 + $0x14] ss:$44 sps:$4 sm:$0xff]  }
 0x114   : > { %3090 = vmatpush1.bf16.msra.mxu1 %v5847_v9  ;;  %v5989_v9 = vmov 0  }
 0x115   : > { %3091 = vmatprep.subr.bf16.mxu1 %v5863_v10  ;;  %v5901_v10 = vld [vmem:[%s6161_s5 + $0x10] ss:$44 sps:$4 sm:$0xff]  }
 0x116   : > { %2927 = vmatmul.mubr.bf16.gmra.mrb[24].mxu1 %v5782_v11  ;;  %v5904_v11 = vld [vmem:[%s6161_s5 + $0x28] ss:$44 sps:$4 sm:$0xff]  }
 0x117   : > { %3626 = vmatmul.mubr.bf16.gmra.mrb[24].mxu0 %v5783_v12  ;;  %2936 = vmatprep.mubr.bf16.mxu1 %v5787_v13  ;;  %v5905_v12 = vld [vmem:[%s6161_s5 + $0x6c] ss:$44 sps:$4 sm:$0xff]   ;;  %v5907_v13 = vld [vmem:[%s6161_s5 + $0x68] ss:$44 sps:$4 sm:$0xff]  }
 0x118   : > { %3635 = vmatprep.mubr.bf16.mxu0 %v5789_v14  ;;  %3092 = vmatpush1.bf16.msra.mxu1 %v5861_v15  ;;  %v5908_v14 = vld [vmem:[%s6161_s5 + $0x80] ss:$44 sps:$4 sm:$0xff]   ;;  %v5909_v15 = vld [vmem:[%s6161_s5 + $0xc4] ss:$44 sps:$4 sm:$0xff]  }
 0x119   : > { %3093 = vmatprep.subr.bf16.mxu1 %v5876_v16  ;;  %v5911_v16 = vld [vmem:[%s6161_s5 + $0xc0] ss:$44 sps:$4 sm:$0xff]  }
 0x11c   : > { %3094 = vmatpush1.bf16.msra.mxu1 %v5874_v17  ;;  %v5912_v17 = vld [vmem:[%s6161_s5 + $0xd8] ss:$44 sps:$4 sm:$0xff]  }
 0x11d   : > { %3095 = vmatprep.subr.bf16.mxu1 %v5885_v18  ;;  %v5913_v18 = vld [vmem:[%s6161_s5 + $0x11c] ss:$44 sps:$4 sm:$0xff]  }
 0x11e   : > { %2937 = vmatmul.mubr.bf16.gmra.mrb[28].mxu1 %v5791_v19  ;;  %v5915_v19 = vld [vmem:[%s6161_s5 + $0x118] ss:$44 sps:$4 sm:$0xff]  }
 0x11f   : > { %3636 = vmatmul.mubr.bf16.gmra.mrb[28].mxu0 %v5792_v20  ;;  %2946 = vmatprep.mubr.bf16.mxu1 %v5796_v21  ;;  %v5916_v20 = vld [vmem:[%s6161_s5 + $0x130] ss:$44 sps:$4 sm:$0xff]   ;;  %v5917_v21 = vld [vmem:[%s6161_s5 + $0x174] ss:$44 sps:$4 sm:$0xff]  }
 0x120   : > { %3645 = vmatprep.mubr.bf16.mxu0 %v5798_v22  ;;  %3096 = vmatpush1.bf16.msra.mxu1 %v5883_v23  ;;  %v5919_v22 = vld [vmem:[%s6161_s5 + $0x170] ss:$44 sps:$4 sm:$0xff]   ;;  %v5920_v23 = vld [vmem:[%s6161_s5 + $0x188] ss:$44 sps:$4 sm:$0xff]  }
 0x121   : > { %3097 = vmatprep.subr.bf16.mxu1 %v5894_v24  ;;  %v5921_v24 = vld [vmem:[%s6161_s5 + $0x1cc] ss:$44 sps:$4 sm:$0xff]  }
 0x124   : > { %3098 = vmatpush1.bf16.msra.mxu1 %v5892_v25  ;;  %v5923_v25 = vld [vmem:[%s6161_s5 + $0x1c8] ss:$44 sps:$4 sm:$0xff]  }
 0x126   : > { %2947 = vmatmul.mubr.bf16.gmra.mrb[32].mxu1 %v5800_v26  ;;  %v5924_v26 = vld [vmem:[%s6161_s5 + $0x1e0] ss:$44 sps:$4 sm:$0xff]  }
 0x127   : > { %3646 = vmatmul.mubr.bf16.gmra.mrb[32].mxu0 %v5801_v27  ;;  %2956 = vmatprep.mubr.bf16.mxu1 %v5805_v28  ;;  %v5925_v27 = vld [vmem:[%s6161_s5 + $0x224] ss:$44 sps:$4 sm:$0xff]   ;;  %v5927_v28 = vld [vmem:[%s6161_s5 + $0x220] ss:$44 sps:$4 sm:$0xff]  }
 0x128   : > { %3655 = vmatprep.mubr.bf16.mxu0 %v5807_v29  ;;  %v5928_v29 = vld [vmem:[%s6161_s5 + $0x238] ss:$44 sps:$4 sm:$0xff]  }
 0x12e   : > { %2957 = vmatmul.mubr.bf16.gmra.mrb[36].mxu1 %v5809_v30  ;;  %v5929_v30 = vld [vmem:[%s6161_s5 + $0x27c] ss:$44 sps:$4 sm:$0xff]  }
 0x12f   : > { %3656 = vmatmul.mubr.bf16.gmra.mrb[36].mxu0 %v5810_v31  ;;  %2966 = vmatprep.mubr.bf16.mxu1 %v5811_v32  ;;  %v5931_v31 = vld [vmem:[%s6161_s5 + $0x278] ss:$44 sps:$4 sm:$0xff]   ;;  %v5932_v32 = vld [vmem:[%s6161_s5 + $0x290] ss:$44 sps:$4 sm:$0xff]  }
 0x130   : > { %3665 = vmatprep.mubr.bf16.mxu0 %v5813_v33  ;;  %v5933_v33 = vld [vmem:[%s6161_s5 + $0x2d4] ss:$44 sps:$4 sm:$0xff]  }
 0x136   : > { %2967 = vmatmul.mubr.bf16.gmra.mrb[40].mxu1 %v5815_v34  ;;  %v5935_v34 = vld [vmem:[%s6161_s5 + $0x2d0] ss:$44 sps:$4 sm:$0xff]  }
 0x137   : > { %3666 = vmatmul.mubr.bf16.gmra.mrb[40].mxu0 %v5819_v35  ;;  %2976 = vmatprep.mubr.bf16.mxu1 %v5823_v36  ;;  %v5936_v35 = vld [vmem:[%s6161_s5 + $0x2e8] ss:$44 sps:$4 sm:$0xff]   ;;  %v5937_v36 = vld [vmem:[%s6161_s5 + $0x32c] ss:$44 sps:$4 sm:$0xff]  }
 0x138   : > { %3675 = vmatprep.mubr.bf16.mxu0 %v5825_v37  ;;  %v5939_v37 = vld [vmem:[%s6161_s5 + $0x328] ss:$44 sps:$4 sm:$0xff]  }
 0x13e   : > { %2977 = vmatmul.mubr.bf16.gmra.mrb[44].mxu1 %v5827_v38  ;;  %v5940_v38 = vld [vmem:[%s6161_s5 + $0x340] ss:$44 sps:$4 sm:$0xff]  }
 0x13f   : > { %3676 = vmatmul.mubr.bf16.gmra.mrb[44].mxu0 %v5828_v39  ;;  %2986 = vmatprep.mubr.bf16.mxu1 %v5832_v40  ;;  %v5941_v39 = vld [vmem:[%s6161_s5 + $0x384] ss:$44 sps:$4 sm:$0xff]   ;;  %v5943_v40 = vld [vmem:[%s6161_s5 + $0x380] ss:$44 sps:$4 sm:$0xff]  }
 0x140   : > { %3685 = vmatprep.mubr.bf16.mxu0 %v5834_v41  ;;  %v5944_v41 = vld [vmem:[%s6161_s5 + $0x398] ss:$44 sps:$4 sm:$0xff]  }
 0x146   : > { %2987 = vmatmul.mubr.bf16.gmra.mrb[48].mxu1 %v5836_v42  ;;  %v5945_v42 = vld [vmem:[%s6161_s5 + $0x3dc] ss:$44 sps:$4 sm:$0xff]  }
 0x147   : > { %3686 = vmatmul.mubr.bf16.gmra.mrb[48].mxu0 %v5837_v43  ;;  %2996 = vmatprep.mubr.bf16.mxu1 %v5841_v44  ;;  %v5947_v43 = vld [vmem:[%s6161_s5 + $0x3d8] ss:$44 sps:$4 sm:$0xff]   ;;  %v5948_v44 = vld [vmem:[%s6161_s5 + $0x3f0] ss:$44 sps:$4 sm:$0xff]  }
 0x148   : > { %3695 = vmatprep.mubr.bf16.mxu0 %v5843_v45  ;;  %v5949_v45 = vld [vmem:[%s6161_s5 + $0x434] ss:$44 sps:$4 sm:$0xff]  }
 0x14e   : > { %2997 = vmatmul.mubr.bf16.gmra.mrb[52].mxu1 %v5845_v46  ;;  %v5951_v46 = vld [vmem:[%s6161_s5 + $0x430] ss:$44 sps:$4 sm:$0xff]  }
 0x14f   : > { %3696 = vmatmul.mubr.bf16.gmra.mrb[52].mxu0 %v5846_v47  ;;  %3006 = vmatprep.mubr.bf16.mxu1 %v5850_v48  ;;  %v5952_v47 = vld [vmem:[%s6161_s5 + $0x448] ss:$44 sps:$4 sm:$0xff]   ;;  %v5953_v48 = vld [vmem:[%s6161_s5 + $0x48c] ss:$44 sps:$4 sm:$0xff]  }
 0x150   : > { %3705 = vmatprep.mubr.bf16.mxu0 %v5852_v49  ;;  %v5955_v49 = vld [vmem:[%s6161_s5 + $0x488] ss:$44 sps:$4 sm:$0xff]  }
 0x156   : > { %3007 = vmatmul.mubr.bf16.gmra.mrb[56].mxu1 %v5854_v50  ;;  %v5956_v50 = vld [vmem:[%s6161_s5 + $0x4a0] ss:$44 sps:$4 sm:$0xff]  }
 0x157   : > { %3706 = vmatmul.mubr.bf16.gmra.mrb[56].mxu0 %v5855_v51  ;;  %3016 = vmatprep.mubr.bf16.mxu1 %v5856_v52  ;;  %v5957_v51 = vld [vmem:[%s6161_s5 + $0x4e4] ss:$44 sps:$4 sm:$0xff]   ;;  %v5959_v52 = vld [vmem:[%s6161_s5 + $0x4e0] ss:$44 sps:$4 sm:$0xff]  }
 0x158   : > { %3715 = vmatprep.mubr.bf16.mxu0 %v5858_v53  ;;  %v5960_v53 = vld [vmem:[%s6161_s5 + $0x4f8] ss:$44 sps:$4 sm:$0xff]  }
 0x15e   : > { %3017 = vmatmul.mubr.bf16.gmra.mrb[60].mxu1 %v5860_v54  ;;  %v5961_v54 = vld [vmem:[%s6161_s5 + $0x53c] ss:$44 sps:$4 sm:$0xff]  }
 0x15f   : > { %3716 = vmatmul.mubr.bf16.gmra.mrb[60].mxu0 %v5864_v55  ;;  %3026 = vmatprep.mubr.bf16.mxu1 %v5868_v56  ;;  %v5963_v55 = vld [vmem:[%s6161_s5 + $0x538] ss:$44 sps:$4 sm:$0xff]   ;;  %v5964_v56 = vld [vmem:[%s6161_s5 + $0x550] ss:$44 sps:$4 sm:$0xff]  }
 0x160   : > { %3725 = vmatprep.mubr.bf16.mxu0 %v5870_v57  ;;  %v5965_v57 = vld [vmem:[%s6161_s5 + $0x594] ss:$44 sps:$4 sm:$0xff]  }
 0x166   : > { %3027 = vmatmul.mubr.bf16.gmra.mrb[64].mxu1 %v5872_v58  ;;  %v5967_v58 = vld [vmem:[%s6161_s5 + $0x590] ss:$44 sps:$4 sm:$0xff]  }
 0x167   : > { %3726 = vmatmul.mubr.bf16.gmra.mrb[64].mxu0 %v5873_v59  ;;  %3036 = vmatprep.mubr.bf16.mxu1 %v5877_v60  ;;  %v5968_v59 = vld [vmem:[%s6161_s5 + $0x5a8] ss:$44 sps:$4 sm:$0xff]   ;;  %v5969_v60 = vld [vmem:[%s6161_s5 + $0x5ec] ss:$44 sps:$4 sm:$0xff]  }
 0x168   : > { %3735 = vmatprep.mubr.bf16.mxu0 %v5879_v61  ;;  %v5971_v61 = vld [vmem:[%s6161_s5 + $0x5e8] ss:$44 sps:$4 sm:$0xff]  }
 0x16e   : > { %3037 = vmatmul.mubr.bf16.gmra.mrb[68].mxu1 %v5881_v62  ;;  %v5972_v62 = vld [vmem:[%s6161_s5 + $0x600] ss:$44 sps:$4 sm:$0xff]  }
 0x16f   : > { %3736 = vmatmul.mubr.bf16.gmra.mrb[68].mxu0 %v5882_v63  ;;  %3046 = vmatprep.mubr.bf16.mxu1 %v5886_v0  ;;  %v5973_v63 = vld [vmem:[%s6161_s5 + $0x644] ss:$44 sps:$4 sm:$0xff]   ;;  %v5975_v0 = vld [vmem:[%s6161_s5 + $0x640] ss:$44 sps:$4 sm:$0xff]  }
 0x170   : > { %3745 = vmatprep.mubr.bf16.mxu0 %v5888_v1  ;;  %v5976_v1 = vld [vmem:[%s6161_s5 + $0x658] ss:$44 sps:$4 sm:$0xff]  }
 0x176   : > { %3047 = vmatmul.mubr.bf16.gmra.mrb[72].mxu1 %v5890_v2  ;;  %v5977_v2 = vld [vmem:[%s6161_s5 + $0x69c] ss:$44 sps:$4 sm:$0xff]  }
 0x177   : > { %3746 = vmatmul.mubr.bf16.gmra.mrb[72].mxu0 %v5891_v3  ;;  %3056 = vmatprep.mubr.bf16.mxu1 %v5895_v4  ;;  %v5979_v3 = vld [vmem:[%s6161_s5 + $0x698] ss:$44 sps:$4 sm:$0xff]   ;;  %v5980_v4 = vld [vmem:[%s6161_s5 + $0x6b0] ss:$44 sps:$4 sm:$0xff]   ;;  %s4878_s5 = sshll.u32 %s7019_s22, 3 }
 0x178   : > { %3755 = vmatprep.mubr.bf16.mxu0 %v5897_v5  ;;  %v590_v5 = vlaneseq  ;;  %s6807_s18 = scalar_lea.vmem %s7015_s3, %s4878_s5 }
 0x17e   : > { %3057 = vmatmul.mubr.bf16.gmra.mrb[76].mxu1 %v5899_v6  ;;  %v591_v6 = vshrl.u32 %v590_v5, 7 }
 0x17f   : > { %3756 = vmatmul.mubr.bf16.gmra.mrb[76].mxu0 %v5900_v7  ;;  %3099 = vmatprep.mubr.bf16.mxu1 %v5903_v8  ;;  %v588_v8 = vld [vmem:[%s7014_s2] sm:$0x3] }
 0x180   : > { %3798 = vmatprep.mubr.bf16.mxu0 %v5989_v9  ;;  %v592_v7 = vsub.s32 0, %v591_v6 }
 0x186   : > { %3100 = vmatmul.mubr.bf16.vlgmr.msra.gmra.mrb[0].mxu1 %v5901_v10  ;;  %v596_v10 = vsub.s32 1, %v591_v6 }
 0x187   : > { %4816 = vmatmul.mubr.msk.bf16.vlgmr.msra.gmra.mrb[0].mxu0 %vm2540_vm0, %v5904_v11  ;;  %3109 = vmatprep.mubr.bf16.mxu1 %v5905_v12  ;;  %v6795_v11 = vrot.slane %v588_v8, %v592_v7 }
 0x188   : > { %3808 = vmatprep.mubr.bf16.mxu0 %v5989_v9  ;;  %v6797_v12 = vrot.slane %v588_v8, %v596_v10 }
 0x18e   : > { %3110 = vmatmul.mubr.bf16.gmra.mrb[4].mxu1 %v5907_v13 }
 0x18f   : > { %4817 = vmatmul.mubr.msk.bf16.gmra.mrb[4].mxu0 %vm2540_vm0, %v5908_v14  ;;  %3119 = vmatprep.mubr.bf16.mxu1 %v5909_v15 }
 0x190   : > { %3818 = vmatprep.mubr.bf16.mxu0 %v5989_v9 }
 0x196   : > { %3120 = vmatmul.mubr.bf16.gmra.mrb[8].mxu1 %v5911_v16 }
 0x197   : > { %4818 = vmatmul.mubr.msk.bf16.gmra.mrb[8].mxu0 %vm2540_vm0, %v5912_v17  ;;  %3129 = vmatprep.mubr.bf16.mxu1 %v5913_v18 }
 0x198   : > { %3828 = vmatprep.mubr.bf16.mxu0 %v5989_v9 }
 0x19e   : > { %3130 = vmatmul.mubr.bf16.gmra.mrb[12].mxu1 %v5915_v19 }
 0x19f   : > { %4819 = vmatmul.mubr.msk.bf16.gmra.mrb[12].mxu0 %vm2540_vm0, %v5916_v20  ;;  %3139 = vmatprep.mubr.bf16.mxu1 %v5917_v21 }
 0x1a0   : > { %3838 = vmatprep.mubr.bf16.mxu0 %v5989_v9 }
 0x1a6   : > { %3140 = vmatmul.mubr.bf16.gmra.mrb[16].mxu1 %v5919_v22 }
 0x1a7   : > { %4820 = vmatmul.mubr.msk.bf16.gmra.mrb[16].mxu0 %vm2540_vm0, %v5920_v23  ;;  %3149 = vmatprep.mubr.bf16.mxu1 %v5921_v24 }
 0x1a8   : > { %3848 = vmatprep.mubr.bf16.mxu0 %v5989_v9 }
 0x1ae   : > { %3150 = vmatmul.mubr.bf16.gmra.mrb[20].mxu1 %v5923_v25 }
 0x1af   : > { %4821 = vmatmul.mubr.msk.bf16.gmra.mrb[20].mxu0 %vm2540_vm0, %v5924_v26  ;;  %3159 = vmatprep.mubr.bf16.mxu1 %v5925_v27 }
 0x1b0   : > { %3858 = vmatprep.mubr.bf16.mxu0 %v5989_v9 }
 0x1b6   : > { %3160 = vmatmul.mubr.bf16.gmra.mrb[24].mxu1 %v5927_v28 }
 0x1b7   : > { %4822 = vmatmul.mubr.msk.bf16.gmra.mrb[24].mxu0 %vm2540_vm0, %v5928_v29  ;;  %3169 = vmatprep.mubr.bf16.mxu1 %v5929_v30 }
 0x1b8   : > { %3868 = vmatprep.mubr.bf16.mxu0 %v5989_v9 }
 0x1be   : > { %3170 = vmatmul.mubr.bf16.gmra.mrb[28].mxu1 %v5931_v31 }
 0x1bf   : > { %4823 = vmatmul.mubr.msk.bf16.gmra.mrb[28].mxu0 %vm2540_vm0, %v5932_v32  ;;  %3179 = vmatprep.mubr.bf16.mxu1 %v5933_v33 }
 0x1c0   : > { %3878 = vmatprep.mubr.bf16.mxu0 %v5989_v9 }
 0x1c6   : > { %3180 = vmatmul.mubr.bf16.gmra.mrb[32].mxu1 %v5935_v34 }
 0x1c7   : > { %4824 = vmatmul.mubr.msk.bf16.gmra.mrb[32].mxu0 %vm2540_vm0, %v5936_v35  ;;  %3189 = vmatprep.mubr.bf16.mxu1 %v5937_v36 }
 0x1c8   : > { %3888 = vmatprep.mubr.bf16.mxu0 %v5989_v9 }
 0x1ce   : > { %3190 = vmatmul.mubr.bf16.gmra.mrb[36].mxu1 %v5939_v37 }
 0x1cf   : > { %4825 = vmatmul.mubr.msk.bf16.gmra.mrb[36].mxu0 %vm2540_vm0, %v5940_v38  ;;  %3199 = vmatprep.mubr.bf16.mxu1 %v5941_v39 }
 0x1d0   : > { %3898 = vmatprep.mubr.bf16.mxu0 %v5989_v9 }
 0x1d6   : > { %3200 = vmatmul.mubr.bf16.gmra.mrb[40].mxu1 %v5943_v40 }
 0x1d7   : > { %4826 = vmatmul.mubr.msk.bf16.gmra.mrb[40].mxu0 %vm2540_vm0, %v5944_v41  ;;  %3209 = vmatprep.mubr.bf16.mxu1 %v5945_v42 }
 0x1d8   : > { %3908 = vmatprep.mubr.bf16.mxu0 %v5989_v9 }
 0x1de   : > { %3210 = vmatmul.mubr.bf16.gmra.mrb[44].mxu1 %v5947_v43 }
 0x1df   : > { %4827 = vmatmul.mubr.msk.bf16.gmra.mrb[44].mxu0 %vm2540_vm0, %v5948_v44  ;;  %3219 = vmatprep.mubr.bf16.mxu1 %v5949_v45 }
 0x1e0   : > { %3918 = vmatprep.mubr.bf16.mxu0 %v5989_v9 }
 0x1e6   : > { %3220 = vmatmul.mubr.bf16.gmra.mrb[48].mxu1 %v5951_v46 }
 0x1e7   : > { %4828 = vmatmul.mubr.msk.bf16.gmra.mrb[48].mxu0 %vm2540_vm0, %v5952_v47  ;;  %3229 = vmatprep.mubr.bf16.mxu1 %v5953_v48 }
 0x1e8   : > { %3928 = vmatprep.mubr.bf16.mxu0 %v5989_v9 }
 0x1ee   : > { %3230 = vmatmul.mubr.bf16.gmra.mrb[52].mxu1 %v5955_v49 }
 0x1ef   : > { %4829 = vmatmul.mubr.msk.bf16.gmra.mrb[52].mxu0 %vm2540_vm0, %v5956_v50  ;;  %3239 = vmatprep.mubr.bf16.mxu1 %v5957_v51 }
 0x1f0   : > { %3938 = vmatprep.mubr.bf16.mxu0 %v5989_v9 }
 0x1f6   : > { %3240 = vmatmul.mubr.bf16.gmra.mrb[56].mxu1 %v5959_v52 }
 0x1f7   : > { %4830 = vmatmul.mubr.msk.bf16.gmra.mrb[56].mxu0 %vm2540_vm0, %v5960_v53  ;;  %3249 = vmatprep.mubr.bf16.mxu1 %v5961_v54 }
 0x1f8   : > { %3948 = vmatprep.mubr.bf16.mxu0 %v5989_v9 }
 0x1fe   : > { %3250 = vmatmul.mubr.bf16.gmra.mrb[60].mxu1 %v5963_v55 }
 0x1ff   : > { %4831 = vmatmul.mubr.msk.bf16.gmra.mrb[60].mxu0 %vm2540_vm0, %v5964_v56  ;;  %3259 = vmatprep.mubr.bf16.mxu1 %v5965_v57 }
 0x200   : > { %3958 = vmatprep.mubr.bf16.mxu0 %v5989_v9 }
 0x206   : > { %3260 = vmatmul.mubr.bf16.gmra.mrb[64].mxu1 %v5967_v58 }
 0x207   : > { %4832 = vmatmul.mubr.msk.bf16.gmra.mrb[64].mxu0 %vm2540_vm0, %v5968_v59  ;;  %3269 = vmatprep.mubr.bf16.mxu1 %v5969_v60 }
 0x208   : > { %3968 = vmatprep.mubr.bf16.mxu0 %v5989_v9 }
 0x20e   : > { %3270 = vmatmul.mubr.bf16.gmra.mrb[68].mxu1 %v5971_v61 }
 0x20f   : > { %4833 = vmatmul.mubr.msk.bf16.gmra.mrb[68].mxu0 %vm2540_vm0, %v5972_v62  ;;  %3279 = vmatprep.mubr.bf16.mxu1 %v5973_v63 }
 0x210   : > { %3978 = vmatprep.mubr.bf16.mxu0 %v5989_v9 }
 0x216   : > { %3280 = vmatmul.mubr.bf16.gmra.mrb[72].mxu1 %v5975_v0 }
 0x217   : > { %4834 = vmatmul.mubr.msk.bf16.gmra.mrb[72].mxu0 %vm2540_vm0, %v5976_v1  ;;  %3289 = vmatprep.mubr.bf16.mxu1 %v5977_v2 }
 0x218   : > { %3988 = vmatprep.mubr.bf16.mxu0 %v5989_v9 }
 0x21e   : > { %3290 = vmatmul.mubr.bf16.gmra.mrb[76].mxu1 %v5979_v3 }
 0x21f   : > { %4835 = vmatmul.mubr.msk.bf16.gmra.mrb[76].mxu0 %vm2540_vm0, %v5980_v4 }
 0x259   : > { %v3101_v13 = vpop.f32.mrb[0].mxu1 }
 0x25a   : > { %v3800_v9 = vpop.f32.mrb[0].mxu0  ;;  %v4919_v14 = vadd.f32 %v3101_v13, %v6795_v11  ;;  %v3103_v15 = vpop.f32.mrb[1].mxu1 }
 0x25b   : > { %v3802_v16 = vpop.f32.mrb[1].mxu0  ;;  %v4921_v17 = vadd.f32 %v3103_v15, %v6797_v12  ;;  %v3105_v18 = vpop.f32.mrb[2].mxu1 }
 0x25c   : > { %v3804_v19 = vpop.f32.mrb[2].mxu0  ;;  %v4920_v20 = vadd.f32 %v4919_v14, %v3800_v9  ;;  %v4923_v21 = vadd.f32 %v3105_v18, %v6795_v11  ;;  %v3107_v22 = vpop.f32.mrb[3].mxu1 }
 0x25d   : > { %v3806_v23 = vpop.f32.mrb[3].mxu0  ;;  %v4922_v24 = vadd.f32 %v4921_v17, %v3802_v16  ;;  %v4925_v25 = vadd.f32 %v3107_v22, %v6797_v12 }
 0x25e   : > { %v3999_v26 = vmax.f32 %v4920_v20, 0.0  ;;  %v4924_v27 = vadd.f32 %v4923_v21, %v3804_v19 }
 0x25f   : > { %v4000_v28 = vmax.f32 %v4922_v24, 0.0  ;;  %v4926_v29 = vadd.f32 %v4925_v25, %v3806_v23 }
 0x260   : > { %v4001_v31 = vmax.f32 %v4924_v27, 0.0 }
 0x261   : > { %v4879_v32 = vpack.c.bf16 %v4000_v28, %v3999_v26  ;;  %v4002_v33 = vmax.f32 %v4926_v29, 0.0  ;;  %v3111_v34 = vpop.f32.mrb[4].mxu1 }
 0x262   : > { %v3810_v35 = vpop.f32.mrb[4].mxu0  ;;  %v4927_v36 = vadd.f32 %v3111_v34, %v6795_v11  ;;  %v3113_v37 = vpop.f32.mrb[5].mxu1 }
 0x263   : > { %v3812_v38 = vpop.f32.mrb[5].mxu0  ;;  %4322 = vst.msk [vmem:[%s6807_s18] sm:$0xff] %vm6809_vm3, %v4879_v32  ;;  %v4880_v39 = vpack.c.bf16 %v4002_v33, %v4001_v31  ;;  %v4929_v40 = vadd.f32 %v3113_v37, %v6797_v12  ;;  %v3115_v41 = vpop.f32.mrb[6].mxu1 }
 0x264   : > { %v3814_v42 = vpop.f32.mrb[6].mxu0  ;;  %v4928_v43 = vadd.f32 %v4927_v36, %v3810_v35  ;;  %v4931_v44 = vadd.f32 %v3115_v41, %v6795_v11  ;;  %v3117_v45 = vpop.f32.mrb[7].mxu1 }
 0x265   : > { %v3816_v46 = vpop.f32.mrb[7].mxu0  ;;  %4323 = vst.msk [vmem:[%s6807_s18 + $0x8] sm:$0xff] %vm6809_vm3, %v4880_v39  ;;  %v4930_v47 = vadd.f32 %v4929_v40, %v3812_v38  ;;  %v4933_v48 = vadd.f32 %v3117_v45, %v6797_v12 }
 0x266   : > { %v4003_v49 = vmax.f32 %v4928_v43, 0.0  ;;  %v4932_v50 = vadd.f32 %v4931_v44, %v3814_v42 }
 0x267   : > { %v4004_v51 = vmax.f32 %v4930_v47, 0.0  ;;  %v4934_v52 = vadd.f32 %v4933_v48, %v3816_v46 }
 0x268   : > { %v4005_v53 = vmax.f32 %v4932_v50, 0.0 }
 0x269   : > { %v4881_v54 = vpack.c.bf16 %v4004_v51, %v4003_v49  ;;  %v4006_v55 = vmax.f32 %v4934_v52, 0.0  ;;  %v3121_v56 = vpop.f32.mrb[8].mxu1 }
 0x26a   : > { %v3820_v57 = vpop.f32.mrb[8].mxu0  ;;  %v4935_v58 = vadd.f32 %v3121_v56, %v6795_v11  ;;  %v3123_v59 = vpop.f32.mrb[9].mxu1 }
 0x26b   : > { %v3822_v60 = vpop.f32.mrb[9].mxu0  ;;  %4324 = vst.msk [vmem:[%s6807_s18 + $0x10] sm:$0xff] %vm6809_vm3, %v4881_v54  ;;  %v4882_v61 = vpack.c.bf16 %v4006_v55, %v4005_v53  ;;  %v4937_v62 = vadd.f32 %v3123_v59, %v6797_v12  ;;  %v3125_v63 = vpop.f32.mrb[10].mxu1 }
 0x26c   : > { %v3824_v0 = vpop.f32.mrb[10].mxu0  ;;  %v4936_v1 = vadd.f32 %v4935_v58, %v3820_v57  ;;  %v4939_v2 = vadd.f32 %v3125_v63, %v6795_v11  ;;  %v3127_v3 = vpop.f32.mrb[11].mxu1 }
 0x26d   : > { %v3826_v4 = vpop.f32.mrb[11].mxu0  ;;  %4325 = vst.msk [vmem:[%s6807_s18 + $0x18] sm:$0xff] %vm6809_vm3, %v4882_v61  ;;  %v4938_v5 = vadd.f32 %v4937_v62, %v3822_v60  ;;  %v4941_v6 = vadd.f32 %v3127_v3, %v6797_v12 }
 0x26e   : > { %v4007_v7 = vmax.f32 %v4936_v1, 0.0  ;;  %v4940_v8 = vadd.f32 %v4939_v2, %v3824_v0 }
 0x26f   : > { %v4008_v10 = vmax.f32 %v4938_v5, 0.0  ;;  %v4942_v13 = vadd.f32 %v4941_v6, %v3826_v4 }
 0x270   : > { %v4009_v9 = vmax.f32 %v4940_v8, 0.0 }
 0x271   : > { %v4883_v14 = vpack.c.bf16 %v4008_v10, %v4007_v7  ;;  %v4010_v15 = vmax.f32 %v4942_v13, 0.0  ;;  %v3131_v16 = vpop.f32.mrb[12].mxu1 }
 0x272   : > { %v3830_v17 = vpop.f32.mrb[12].mxu0  ;;  %v4943_v18 = vadd.f32 %v3131_v16, %v6795_v11  ;;  %v3133_v19 = vpop.f32.mrb[13].mxu1 }
 0x273   : > { %v3832_v20 = vpop.f32.mrb[13].mxu0  ;;  %4326 = vst.msk [vmem:[%s6807_s18 + $0x20] sm:$0xff] %vm6809_vm3, %v4883_v14  ;;  %v4884_v21 = vpack.c.bf16 %v4010_v15, %v4009_v9  ;;  %v4945_v22 = vadd.f32 %v3133_v19, %v6797_v12  ;;  %v3135_v23 = vpop.f32.mrb[14].mxu1 }
 0x274   : > { %v3834_v24 = vpop.f32.mrb[14].mxu0  ;;  %v4944_v25 = vadd.f32 %v4943_v18, %v3830_v17  ;;  %v4947_v26 = vadd.f32 %v3135_v23, %v6795_v11  ;;  %v3137_v27 = vpop.f32.mrb[15].mxu1 }
 0x275   : > { %v3836_v28 = vpop.f32.mrb[15].mxu0  ;;  %4327 = vst.msk [vmem:[%s6807_s18 + $0x28] sm:$0xff] %vm6809_vm3, %v4884_v21  ;;  %v4946_v29 = vadd.f32 %v4945_v22, %v3832_v20  ;;  %v4949_v31 = vadd.f32 %v3137_v27, %v6797_v12 }
 0x276   : > { %v4011_v32 = vmax.f32 %v4944_v25, 0.0  ;;  %v4948_v33 = vadd.f32 %v4947_v26, %v3834_v24 }
 0x277   : > { %v4012_v34 = vmax.f32 %v4946_v29, 0.0  ;;  %v4950_v35 = vadd.f32 %v4949_v31, %v3836_v28 }
 0x278   : > { %v4013_v36 = vmax.f32 %v4948_v33, 0.0 }
 0x279   : > { %v4885_v37 = vpack.c.bf16 %v4012_v34, %v4011_v32  ;;  %v4014_v38 = vmax.f32 %v4950_v35, 0.0  ;;  %v3141_v39 = vpop.f32.mrb[16].mxu1 }
 0x27a   : > { %v3840_v40 = vpop.f32.mrb[16].mxu0  ;;  %v4951_v41 = vadd.f32 %v3141_v39, %v6795_v11  ;;  %v3143_v42 = vpop.f32.mrb[17].mxu1 }
 0x27b   : > { %v3842_v43 = vpop.f32.mrb[17].mxu0  ;;  %4328 = vst.msk [vmem:[%s6807_s18 + $0x30] sm:$0xff] %vm6809_vm3, %v4885_v37  ;;  %v4886_v44 = vpack.c.bf16 %v4014_v38, %v4013_v36  ;;  %v4953_v45 = vadd.f32 %v3143_v42, %v6797_v12  ;;  %v3145_v46 = vpop.f32.mrb[18].mxu1 }
 0x27c   : > { %v3844_v47 = vpop.f32.mrb[18].mxu0  ;;  %v4952_v48 = vadd.f32 %v4951_v41, %v3840_v40  ;;  %v4955_v49 = vadd.f32 %v3145_v46, %v6795_v11  ;;  %v3147_v50 = vpop.f32.mrb[19].mxu1 }
 0x27d   : > { %v3846_v51 = vpop.f32.mrb[19].mxu0  ;;  %4329 = vst.msk [vmem:[%s6807_s18 + $0x38] sm:$0xff] %vm6809_vm3, %v4886_v44  ;;  %v4954_v52 = vadd.f32 %v4953_v45, %v3842_v43  ;;  %v4957_v53 = vadd.f32 %v3147_v50, %v6797_v12 }
 0x27e   : > { %v4015_v54 = vmax.f32 %v4952_v48, 0.0  ;;  %v4956_v55 = vadd.f32 %v4955_v49, %v3844_v47 }
 0x27f   : > { %v4016_v56 = vmax.f32 %v4954_v52, 0.0  ;;  %v4958_v57 = vadd.f32 %v4957_v53, %v3846_v51 }
 0x280   : > { %v4017_v58 = vmax.f32 %v4956_v55, 0.0 }
 0x281   : > { %v4887_v59 = vpack.c.bf16 %v4016_v56, %v4015_v54  ;;  %v4018_v60 = vmax.f32 %v4958_v57, 0.0  ;;  %v3151_v61 = vpop.f32.mrb[20].mxu1 }
 0x282   : > { %v3850_v62 = vpop.f32.mrb[20].mxu0  ;;  %v4959_v63 = vadd.f32 %v3151_v61, %v6795_v11  ;;  %v3153_v0 = vpop.f32.mrb[21].mxu1 }
 0x283   : > { %v3852_v1 = vpop.f32.mrb[21].mxu0  ;;  %4330 = vst.msk [vmem:[%s6807_s18 + $0x40] sm:$0xff] %vm6809_vm3, %v4887_v59  ;;  %v4888_v2 = vpack.c.bf16 %v4018_v60, %v4017_v58  ;;  %v4961_v3 = vadd.f32 %v3153_v0, %v6797_v12  ;;  %v3155_v4 = vpop.f32.mrb[22].mxu1 }
 0x284   : > { %v3854_v5 = vpop.f32.mrb[22].mxu0  ;;  %v4960_v6 = vadd.f32 %v4959_v63, %v3850_v62  ;;  %v4963_v7 = vadd.f32 %v3155_v4, %v6795_v11  ;;  %v3157_v8 = vpop.f32.mrb[23].mxu1 }
 0x285   : > { %v3856_v10 = vpop.f32.mrb[23].mxu0  ;;  %4331 = vst.msk [vmem:[%s6807_s18 + $0x48] sm:$0xff] %vm6809_vm3, %v4888_v2  ;;  %v4962_v13 = vadd.f32 %v4961_v3, %v3852_v1  ;;  %v4965_v9 = vadd.f32 %v3157_v8, %v6797_v12 }
 0x286   : > { %v4019_v14 = vmax.f32 %v4960_v6, 0.0  ;;  %v4964_v15 = vadd.f32 %v4963_v7, %v3854_v5 }
 0x287   : > { %v4020_v16 = vmax.f32 %v4962_v13, 0.0  ;;  %v4966_v17 = vadd.f32 %v4965_v9, %v3856_v10 }
 0x288   : > { %v4021_v18 = vmax.f32 %v4964_v15, 0.0 }
 0x289   : > { %v4889_v19 = vpack.c.bf16 %v4020_v16, %v4019_v14  ;;  %v4022_v20 = vmax.f32 %v4966_v17, 0.0  ;;  %v3161_v21 = vpop.f32.mrb[24].mxu1 }
 0x28a   : > { %v3860_v22 = vpop.f32.mrb[24].mxu0  ;;  %v4967_v23 = vadd.f32 %v3161_v21, %v6795_v11  ;;  %v3163_v24 = vpop.f32.mrb[25].mxu1 }
 0x28b   : > { %v3862_v25 = vpop.f32.mrb[25].mxu0  ;;  %4332 = vst.msk [vmem:[%s6807_s18 + $0x50] sm:$0xff] %vm6809_vm3, %v4889_v19  ;;  %v4890_v26 = vpack.c.bf16 %v4022_v20, %v4021_v18  ;;  %v4969_v27 = vadd.f32 %v3163_v24, %v6797_v12  ;;  %v3165_v28 = vpop.f32.mrb[26].mxu1 }
 0x28c   : > { %v3864_v29 = vpop.f32.mrb[26].mxu0  ;;  %v4968_v31 = vadd.f32 %v4967_v23, %v3860_v22  ;;  %v4971_v32 = vadd.f32 %v3165_v28, %v6795_v11  ;;  %v3167_v33 = vpop.f32.mrb[27].mxu1 }
 0x28d   : > { %v3866_v34 = vpop.f32.mrb[27].mxu0  ;;  %4333 = vst.msk [vmem:[%s6807_s18 + $0x58] sm:$0xff] %vm6809_vm3, %v4890_v26  ;;  %v4970_v35 = vadd.f32 %v4969_v27, %v3862_v25  ;;  %v4973_v36 = vadd.f32 %v3167_v33, %v6797_v12 }
 0x28e   : > { %v4023_v37 = vmax.f32 %v4968_v31, 0.0  ;;  %v4972_v38 = vadd.f32 %v4971_v32, %v3864_v29 }
 0x28f   : > { %v4024_v39 = vmax.f32 %v4970_v35, 0.0  ;;  %v4974_v40 = vadd.f32 %v4973_v36, %v3866_v34 }
 0x290   : > { %v4025_v41 = vmax.f32 %v4972_v38, 0.0 }
 0x291   : > { %v4891_v42 = vpack.c.bf16 %v4024_v39, %v4023_v37  ;;  %v4026_v43 = vmax.f32 %v4974_v40, 0.0  ;;  %v3171_v44 = vpop.f32.mrb[28].mxu1 }
 0x292   : > { %v3870_v45 = vpop.f32.mrb[28].mxu0  ;;  %v4975_v46 = vadd.f32 %v3171_v44, %v6795_v11  ;;  %v3173_v47 = vpop.f32.mrb[29].mxu1 }
 0x293   : > { %v3872_v48 = vpop.f32.mrb[29].mxu0  ;;  %4334 = vst.msk [vmem:[%s6807_s18 + $0x60] sm:$0xff] %vm6809_vm3, %v4891_v42  ;;  %v4892_v49 = vpack.c.bf16 %v4026_v43, %v4025_v41  ;;  %v4977_v50 = vadd.f32 %v3173_v47, %v6797_v12  ;;  %v3175_v51 = vpop.f32.mrb[30].mxu1 }
 0x294   : > { %v3874_v52 = vpop.f32.mrb[30].mxu0  ;;  %v4976_v53 = vadd.f32 %v4975_v46, %v3870_v45  ;;  %v4979_v54 = vadd.f32 %v3175_v51, %v6795_v11  ;;  %v3177_v55 = vpop.f32.mrb[31].mxu1 }
 0x295   : > { %v3876_v56 = vpop.f32.mrb[31].mxu0  ;;  %4335 = vst.msk [vmem:[%s6807_s18 + $0x68] sm:$0xff] %vm6809_vm3, %v4892_v49  ;;  %v4978_v57 = vadd.f32 %v4977_v50, %v3872_v48  ;;  %v4981_v58 = vadd.f32 %v3177_v55, %v6797_v12 }
 0x296   : > { %v4027_v59 = vmax.f32 %v4976_v53, 0.0  ;;  %v4980_v60 = vadd.f32 %v4979_v54, %v3874_v52 }
 0x297   : > { %v4028_v61 = vmax.f32 %v4978_v57, 0.0  ;;  %v4982_v62 = vadd.f32 %v4981_v58, %v3876_v56 }
 0x298   : > { %v4029_v63 = vmax.f32 %v4980_v60, 0.0 }
 0x299   : > { %v4893_v0 = vpack.c.bf16 %v4028_v61, %v4027_v59  ;;  %v4030_v1 = vmax.f32 %v4982_v62, 0.0  ;;  %v3181_v2 = vpop.f32.mrb[32].mxu1 }
 0x29a   : > { %v3880_v3 = vpop.f32.mrb[32].mxu0  ;;  %v4983_v4 = vadd.f32 %v3181_v2, %v6795_v11  ;;  %v3183_v5 = vpop.f32.mrb[33].mxu1 }
 0x29b   : > { %v3882_v6 = vpop.f32.mrb[33].mxu0  ;;  %4336 = vst.msk [vmem:[%s6807_s18 + $0x70] sm:$0xff] %vm6809_vm3, %v4893_v0  ;;  %v4894_v7 = vpack.c.bf16 %v4030_v1, %v4029_v63  ;;  %v4985_v8 = vadd.f32 %v3183_v5, %v6797_v12  ;;  %v3185_v10 = vpop.f32.mrb[34].mxu1 }
 0x29c   : > { %v3884_v13 = vpop.f32.mrb[34].mxu0  ;;  %v4984_v9 = vadd.f32 %v4983_v4, %v3880_v3  ;;  %v4987_v14 = vadd.f32 %v3185_v10, %v6795_v11  ;;  %v3187_v15 = vpop.f32.mrb[35].mxu1 }
 0x29d   : > { %v3886_v16 = vpop.f32.mrb[35].mxu0  ;;  %4337 = vst.msk [vmem:[%s6807_s18 + $0x78] sm:$0xff] %vm6809_vm3, %v4894_v7  ;;  %v4986_v17 = vadd.f32 %v4985_v8, %v3882_v6  ;;  %v4989_v18 = vadd.f32 %v3187_v15, %v6797_v12 }
 0x29e   : > { %v4031_v19 = vmax.f32 %v4984_v9, 0.0  ;;  %v4988_v20 = vadd.f32 %v4987_v14, %v3884_v13 }
 0x29f   : > { %v4032_v21 = vmax.f32 %v4986_v17, 0.0  ;;  %v4990_v22 = vadd.f32 %v4989_v18, %v3886_v16 }
 0x2a0   : > { %v4033_v23 = vmax.f32 %v4988_v20, 0.0 }
 0x2a1   : > { %v4895_v24 = vpack.c.bf16 %v4032_v21, %v4031_v19  ;;  %v4034_v25 = vmax.f32 %v4990_v22, 0.0  ;;  %v3191_v26 = vpop.f32.mrb[36].mxu1 }
 0x2a2   : > { %v3890_v27 = vpop.f32.mrb[36].mxu0  ;;  %v4991_v28 = vadd.f32 %v3191_v26, %v6795_v11  ;;  %v3193_v29 = vpop.f32.mrb[37].mxu1 }
 0x2a3   : > { %v3892_v31 = vpop.f32.mrb[37].mxu0  ;;  %4338 = vst.msk [vmem:[%s6807_s18 + $0x80] sm:$0xff] %vm6809_vm3, %v4895_v24  ;;  %v4896_v32 = vpack.c.bf16 %v4034_v25, %v4033_v23  ;;  %v4993_v33 = vadd.f32 %v3193_v29, %v6797_v12  ;;  %v3195_v34 = vpop.f32.mrb[38].mxu1 }
 0x2a4   : > { %v3894_v35 = vpop.f32.mrb[38].mxu0  ;;  %v4992_v36 = vadd.f32 %v4991_v28, %v3890_v27  ;;  %v4995_v37 = vadd.f32 %v3195_v34, %v6795_v11  ;;  %v3197_v38 = vpop.f32.mrb[39].mxu1 }
 0x2a5   : > { %v3896_v39 = vpop.f32.mrb[39].mxu0  ;;  %4339 = vst.msk [vmem:[%s6807_s18 + $0x88] sm:$0xff] %vm6809_vm3, %v4896_v32  ;;  %v4994_v40 = vadd.f32 %v4993_v33, %v3892_v31  ;;  %v4997_v41 = vadd.f32 %v3197_v38, %v6797_v12 }
 0x2a6   : > { %v4035_v42 = vmax.f32 %v4992_v36, 0.0  ;;  %v4996_v43 = vadd.f32 %v4995_v37, %v3894_v35 }
 0x2a7   : > { %v4036_v44 = vmax.f32 %v4994_v40, 0.0  ;;  %v4998_v45 = vadd.f32 %v4997_v41, %v3896_v39 }
 0x2a8   : > { %v4037_v46 = vmax.f32 %v4996_v43, 0.0 }
 0x2a9   : > { %v4897_v47 = vpack.c.bf16 %v4036_v44, %v4035_v42  ;;  %v4038_v48 = vmax.f32 %v4998_v45, 0.0  ;;  %v3201_v49 = vpop.f32.mrb[40].mxu1 }
 0x2aa   : > { %v3900_v50 = vpop.f32.mrb[40].mxu0  ;;  %v4999_v51 = vadd.f32 %v3201_v49, %v6795_v11  ;;  %v3203_v52 = vpop.f32.mrb[41].mxu1 }
 0x2ab   : > { %v3902_v53 = vpop.f32.mrb[41].mxu0  ;;  %4340 = vst.msk [vmem:[%s6807_s18 + $0x90] sm:$0xff] %vm6809_vm3, %v4897_v47  ;;  %v4898_v54 = vpack.c.bf16 %v4038_v48, %v4037_v46  ;;  %v5001_v55 = vadd.f32 %v3203_v52, %v6797_v12  ;;  %v3205_v56 = vpop.f32.mrb[42].mxu1 }
 0x2ac   : > { %v3904_v57 = vpop.f32.mrb[42].mxu0  ;;  %v5000_v58 = vadd.f32 %v4999_v51, %v3900_v50  ;;  %v5003_v59 = vadd.f32 %v3205_v56, %v6795_v11  ;;  %v3207_v60 = vpop.f32.mrb[43].mxu1 }
 0x2ad   : > { %v3906_v61 = vpop.f32.mrb[43].mxu0  ;;  %4341 = vst.msk [vmem:[%s6807_s18 + $0x98] sm:$0xff] %vm6809_vm3, %v4898_v54  ;;  %v5002_v62 = vadd.f32 %v5001_v55, %v3902_v53  ;;  %v5005_v63 = vadd.f32 %v3207_v60, %v6797_v12 }
 0x2ae   : > { %v4039_v0 = vmax.f32 %v5000_v58, 0.0  ;;  %v5004_v1 = vadd.f32 %v5003_v59, %v3904_v57 }
 0x2af   : > { %v4040_v2 = vmax.f32 %v5002_v62, 0.0  ;;  %v5006_v3 = vadd.f32 %v5005_v63, %v3906_v61 }
 0x2b0   : > { %v4041_v4 = vmax.f32 %v5004_v1, 0.0 }
 0x2b1   : > { %v4899_v5 = vpack.c.bf16 %v4040_v2, %v4039_v0  ;;  %v4042_v6 = vmax.f32 %v5006_v3, 0.0  ;;  %v3211_v7 = vpop.f32.mrb[44].mxu1 }
 0x2b2   : > { %v3910_v8 = vpop.f32.mrb[44].mxu0  ;;  %v5007_v10 = vadd.f32 %v3211_v7, %v6795_v11  ;;  %v3213_v13 = vpop.f32.mrb[45].mxu1 }
 0x2b3   : > { %v3912_v9 = vpop.f32.mrb[45].mxu0  ;;  %4342 = vst.msk [vmem:[%s6807_s18 + $0xa0] sm:$0xff] %vm6809_vm3, %v4899_v5  ;;  %v4900_v14 = vpack.c.bf16 %v4042_v6, %v4041_v4  ;;  %v5009_v15 = vadd.f32 %v3213_v13, %v6797_v12  ;;  %v3215_v16 = vpop.f32.mrb[46].mxu1 }
 0x2b4   : > { %v3914_v17 = vpop.f32.mrb[46].mxu0  ;;  %v5008_v18 = vadd.f32 %v5007_v10, %v3910_v8  ;;  %v5011_v19 = vadd.f32 %v3215_v16, %v6795_v11  ;;  %v3217_v20 = vpop.f32.mrb[47].mxu1 }
 0x2b5   : > { %v3916_v21 = vpop.f32.mrb[47].mxu0  ;;  %4343 = vst.msk [vmem:[%s6807_s18 + $0xa8] sm:$0xff] %vm6809_vm3, %v4900_v14  ;;  %v5010_v22 = vadd.f32 %v5009_v15, %v3912_v9  ;;  %v5013_v23 = vadd.f32 %v3217_v20, %v6797_v12 }
 0x2b6   : > { %v4043_v24 = vmax.f32 %v5008_v18, 0.0  ;;  %v5012_v25 = vadd.f32 %v5011_v19, %v3914_v17 }
 0x2b7   : > { %v4044_v26 = vmax.f32 %v5010_v22, 0.0  ;;  %v5014_v27 = vadd.f32 %v5013_v23, %v3916_v21 }
 0x2b8   : > { %v4045_v28 = vmax.f32 %v5012_v25, 0.0 }
 0x2b9   : > { %v4901_v29 = vpack.c.bf16 %v4044_v26, %v4043_v24  ;;  %v4046_v31 = vmax.f32 %v5014_v27, 0.0  ;;  %v3221_v32 = vpop.f32.mrb[48].mxu1 }
 0x2ba   : > { %v3920_v33 = vpop.f32.mrb[48].mxu0  ;;  %v5015_v34 = vadd.f32 %v3221_v32, %v6795_v11  ;;  %v3223_v35 = vpop.f32.mrb[49].mxu1 }
 0x2bb   : > { %v3922_v36 = vpop.f32.mrb[49].mxu0  ;;  %4344 = vst.msk [vmem:[%s6807_s18 + $0xb0] sm:$0xff] %vm6809_vm3, %v4901_v29  ;;  %v4902_v37 = vpack.c.bf16 %v4046_v31, %v4045_v28  ;;  %v5017_v38 = vadd.f32 %v3223_v35, %v6797_v12  ;;  %v3225_v39 = vpop.f32.mrb[50].mxu1 }
 0x2bc   : > { %v3924_v40 = vpop.f32.mrb[50].mxu0  ;;  %v5016_v41 = vadd.f32 %v5015_v34, %v3920_v33  ;;  %v5019_v42 = vadd.f32 %v3225_v39, %v6795_v11  ;;  %v3227_v43 = vpop.f32.mrb[51].mxu1 }
 0x2bd   : > { %v3926_v44 = vpop.f32.mrb[51].mxu0  ;;  %4345 = vst.msk [vmem:[%s6807_s18 + $0xb8] sm:$0xff] %vm6809_vm3, %v4902_v37  ;;  %v5018_v45 = vadd.f32 %v5017_v38, %v3922_v36  ;;  %v5021_v46 = vadd.f32 %v3227_v43, %v6797_v12 }
 0x2be   : > { %v4047_v47 = vmax.f32 %v5016_v41, 0.0  ;;  %v5020_v48 = vadd.f32 %v5019_v42, %v3924_v40 }
 0x2bf   : > { %v4048_v49 = vmax.f32 %v5018_v45, 0.0  ;;  %v5022_v50 = vadd.f32 %v5021_v46, %v3926_v44 }
 0x2c0   : > { %v4049_v51 = vmax.f32 %v5020_v48, 0.0 }
 0x2c1   : > { %v4903_v52 = vpack.c.bf16 %v4048_v49, %v4047_v47  ;;  %v4050_v53 = vmax.f32 %v5022_v50, 0.0  ;;  %v3231_v54 = vpop.f32.mrb[52].mxu1 }
 0x2c2   : > { %v3930_v55 = vpop.f32.mrb[52].mxu0  ;;  %v5023_v56 = vadd.f32 %v3231_v54, %v6795_v11  ;;  %v3233_v57 = vpop.f32.mrb[53].mxu1 }
 0x2c3   : > { %v3932_v58 = vpop.f32.mrb[53].mxu0  ;;  %4346 = vst.msk [vmem:[%s6807_s18 + $0xc0] sm:$0xff] %vm6809_vm3, %v4903_v52  ;;  %v4904_v59 = vpack.c.bf16 %v4050_v53, %v4049_v51  ;;  %v5025_v60 = vadd.f32 %v3233_v57, %v6797_v12  ;;  %v3235_v61 = vpop.f32.mrb[54].mxu1 }
 0x2c4   : > { %v3934_v62 = vpop.f32.mrb[54].mxu0  ;;  %v5024_v63 = vadd.f32 %v5023_v56, %v3930_v55  ;;  %v5027_v0 = vadd.f32 %v3235_v61, %v6795_v11  ;;  %v3237_v1 = vpop.f32.mrb[55].mxu1 }
 0x2c5   : > { %v3936_v2 = vpop.f32.mrb[55].mxu0  ;;  %4347 = vst.msk [vmem:[%s6807_s18 + $0xc8] sm:$0xff] %vm6809_vm3, %v4904_v59  ;;  %v5026_v3 = vadd.f32 %v5025_v60, %v3932_v58  ;;  %v5029_v4 = vadd.f32 %v3237_v1, %v6797_v12 }
 0x2c6   : > { %v4051_v5 = vmax.f32 %v5024_v63, 0.0  ;;  %v5028_v6 = vadd.f32 %v5027_v0, %v3934_v62 }
 0x2c7   : > { %v4052_v7 = vmax.f32 %v5026_v3, 0.0  ;;  %v5030_v8 = vadd.f32 %v5029_v4, %v3936_v2 }
 0x2c8   : > { %v4053_v10 = vmax.f32 %v5028_v6, 0.0 }
 0x2c9   : > { %v4905_v13 = vpack.c.bf16 %v4052_v7, %v4051_v5  ;;  %v4054_v9 = vmax.f32 %v5030_v8, 0.0  ;;  %v3241_v14 = vpop.f32.mrb[56].mxu1 }
 0x2ca   : > { %v3940_v15 = vpop.f32.mrb[56].mxu0  ;;  %v5031_v16 = vadd.f32 %v3241_v14, %v6795_v11  ;;  %v3243_v17 = vpop.f32.mrb[57].mxu1 }
 0x2cb   : > { %v3942_v18 = vpop.f32.mrb[57].mxu0  ;;  %4348 = vst.msk [vmem:[%s6807_s18 + $0xd0] sm:$0xff] %vm6809_vm3, %v4905_v13  ;;  %v4906_v19 = vpack.c.bf16 %v4054_v9, %v4053_v10  ;;  %v5033_v20 = vadd.f32 %v3243_v17, %v6797_v12  ;;  %v3245_v21 = vpop.f32.mrb[58].mxu1 }
 0x2cc   : > { %v3944_v22 = vpop.f32.mrb[58].mxu0  ;;  %v5032_v23 = vadd.f32 %v5031_v16, %v3940_v15  ;;  %v5035_v24 = vadd.f32 %v3245_v21, %v6795_v11  ;;  %v3247_v25 = vpop.f32.mrb[59].mxu1 }
 0x2cd   : > { %v3946_v26 = vpop.f32.mrb[59].mxu0  ;;  %4349 = vst.msk [vmem:[%s6807_s18 + $0xd8] sm:$0xff] %vm6809_vm3, %v4906_v19  ;;  %v5034_v27 = vadd.f32 %v5033_v20, %v3942_v18  ;;  %v5037_v28 = vadd.f32 %v3247_v25, %v6797_v12 }
 0x2ce   : > { %v4055_v29 = vmax.f32 %v5032_v23, 0.0  ;;  %v5036_v31 = vadd.f32 %v5035_v24, %v3944_v22 }
 0x2cf   : > { %v4056_v32 = vmax.f32 %v5034_v27, 0.0  ;;  %v5038_v33 = vadd.f32 %v5037_v28, %v3946_v26 }
 0x2d0   : > { %v4057_v34 = vmax.f32 %v5036_v31, 0.0 }
 0x2d1   : > { %v4907_v35 = vpack.c.bf16 %v4056_v32, %v4055_v29  ;;  %v4058_v36 = vmax.f32 %v5038_v33, 0.0  ;;  %v3251_v37 = vpop.f32.mrb[60].mxu1 }
 0x2d2   : > { %v3950_v38 = vpop.f32.mrb[60].mxu0  ;;  %v5039_v39 = vadd.f32 %v3251_v37, %v6795_v11  ;;  %v3253_v40 = vpop.f32.mrb[61].mxu1 }
 0x2d3   : > { %v3952_v41 = vpop.f32.mrb[61].mxu0  ;;  %4350 = vst.msk [vmem:[%s6807_s18 + $0xe0] sm:$0xff] %vm6809_vm3, %v4907_v35  ;;  %v4908_v42 = vpack.c.bf16 %v4058_v36, %v4057_v34  ;;  %v5041_v43 = vadd.f32 %v3253_v40, %v6797_v12  ;;  %v3255_v44 = vpop.f32.mrb[62].mxu1 }
 0x2d4   : > { %v3954_v45 = vpop.f32.mrb[62].mxu0  ;;  %v5040_v46 = vadd.f32 %v5039_v39, %v3950_v38  ;;  %v5043_v47 = vadd.f32 %v3255_v44, %v6795_v11  ;;  %v3257_v48 = vpop.f32.mrb[63].mxu1 }
 0x2d5   : > { %v3956_v49 = vpop.f32.mrb[63].mxu0  ;;  %4351 = vst.msk [vmem:[%s6807_s18 + $0xe8] sm:$0xff] %vm6809_vm3, %v4908_v42  ;;  %v5042_v50 = vadd.f32 %v5041_v43, %v3952_v41  ;;  %v5045_v51 = vadd.f32 %v3257_v48, %v6797_v12 }
 0x2d6   : > { %v4059_v52 = vmax.f32 %v5040_v46, 0.0  ;;  %v5044_v53 = vadd.f32 %v5043_v47, %v3954_v45 }
 0x2d7   : > { %v4060_v54 = vmax.f32 %v5042_v50, 0.0  ;;  %v5046_v55 = vadd.f32 %v5045_v51, %v3956_v49 }
 0x2d8   : > { %v4061_v56 = vmax.f32 %v5044_v53, 0.0 }
 0x2d9   : > { %v4909_v57 = vpack.c.bf16 %v4060_v54, %v4059_v52  ;;  %v4062_v58 = vmax.f32 %v5046_v55, 0.0  ;;  %v3261_v59 = vpop.f32.mrb[64].mxu1 }
 0x2da   : > { %v3960_v60 = vpop.f32.mrb[64].mxu0  ;;  %v5047_v61 = vadd.f32 %v3261_v59, %v6795_v11  ;;  %v3263_v62 = vpop.f32.mrb[65].mxu1 }
 0x2db   : > { %v3962_v63 = vpop.f32.mrb[65].mxu0  ;;  %4352 = vst.msk [vmem:[%s6807_s18 + $0xf0] sm:$0xff] %vm6809_vm3, %v4909_v57  ;;  %v4910_v0 = vpack.c.bf16 %v4062_v58, %v4061_v56  ;;  %v5049_v1 = vadd.f32 %v3263_v62, %v6797_v12  ;;  %v3265_v2 = vpop.f32.mrb[66].mxu1 }
 0x2dc   : > { %v3964_v3 = vpop.f32.mrb[66].mxu0  ;;  %v5048_v4 = vadd.f32 %v5047_v61, %v3960_v60  ;;  %v5051_v5 = vadd.f32 %v3265_v2, %v6795_v11  ;;  %v3267_v6 = vpop.f32.mrb[67].mxu1 }
 0x2dd   : > { %v3966_v7 = vpop.f32.mrb[67].mxu0  ;;  %4353 = vst.msk [vmem:[%s6807_s18 + $0xf8] sm:$0xff] %vm6809_vm3, %v4910_v0  ;;  %v5050_v8 = vadd.f32 %v5049_v1, %v3962_v63  ;;  %v5053_v10 = vadd.f32 %v3267_v6, %v6797_v12 }
 0x2de   : > { %v4063_v13 = vmax.f32 %v5048_v4, 0.0  ;;  %v5052_v9 = vadd.f32 %v5051_v5, %v3964_v3 }
 0x2df   : > { %v4064_v14 = vmax.f32 %v5050_v8, 0.0  ;;  %v5054_v15 = vadd.f32 %v5053_v10, %v3966_v7 }
 0x2e0   : > { %v4065_v16 = vmax.f32 %v5052_v9, 0.0 }
 0x2e1   : > { %v4911_v17 = vpack.c.bf16 %v4064_v14, %v4063_v13  ;;  %v4066_v18 = vmax.f32 %v5054_v15, 0.0  ;;  %v3271_v19 = vpop.f32.mrb[68].mxu1 }
 0x2e2   : > { %v3970_v20 = vpop.f32.mrb[68].mxu0  ;;  %v5055_v21 = vadd.f32 %v3271_v19, %v6795_v11  ;;  %v3273_v22 = vpop.f32.mrb[69].mxu1 }
 0x2e3   : > { %v3972_v23 = vpop.f32.mrb[69].mxu0  ;;  %4354 = vst.msk [vmem:[%s6807_s18 + $0x100] sm:$0xff] %vm6809_vm3, %v4911_v17  ;;  %v4912_v24 = vpack.c.bf16 %v4066_v18, %v4065_v16  ;;  %v5057_v25 = vadd.f32 %v3273_v22, %v6797_v12  ;;  %v3275_v26 = vpop.f32.mrb[70].mxu1 }
 0x2e4   : > { %v3974_v27 = vpop.f32.mrb[70].mxu0  ;;  %v5056_v28 = vadd.f32 %v5055_v21, %v3970_v20  ;;  %v5059_v29 = vadd.f32 %v3275_v26, %v6795_v11  ;;  %v3277_v31 = vpop.f32.mrb[71].mxu1 }
 0x2e5   : > { %v3976_v32 = vpop.f32.mrb[71].mxu0  ;;  %4355 = vst.msk [vmem:[%s6807_s18 + $0x108] sm:$0xff] %vm6809_vm3, %v4912_v24  ;;  %v5058_v33 = vadd.f32 %v5057_v25, %v3972_v23  ;;  %v5061_v34 = vadd.f32 %v3277_v31, %v6797_v12 }
 0x2e6   : > { %v4067_v35 = vmax.f32 %v5056_v28, 0.0  ;;  %v5060_v36 = vadd.f32 %v5059_v29, %v3974_v27 }
 0x2e7   : > { %v4068_v37 = vmax.f32 %v5058_v33, 0.0  ;;  %v5062_v38 = vadd.f32 %v5061_v34, %v3976_v32 }
 0x2e8   : > { %v4069_v39 = vmax.f32 %v5060_v36, 0.0 }
 0x2e9   : > { %v4913_v40 = vpack.c.bf16 %v4068_v37, %v4067_v35  ;;  %v4070_v41 = vmax.f32 %v5062_v38, 0.0  ;;  %v3281_v42 = vpop.f32.mrb[72].mxu1 }
 0x2ea   : > { %v3980_v43 = vpop.f32.mrb[72].mxu0  ;;  %v5063_v44 = vadd.f32 %v3281_v42, %v6795_v11  ;;  %v3283_v45 = vpop.f32.mrb[73].mxu1 }
 0x2eb   : > { %v3982_v46 = vpop.f32.mrb[73].mxu0  ;;  %4356 = vst.msk [vmem:[%s6807_s18 + $0x110] sm:$0xff] %vm6809_vm3, %v4913_v40  ;;  %v4914_v47 = vpack.c.bf16 %v4070_v41, %v4069_v39  ;;  %v5065_v48 = vadd.f32 %v3283_v45, %v6797_v12  ;;  %v3285_v49 = vpop.f32.mrb[74].mxu1 }
 0x2ec   : > { %v3984_v50 = vpop.f32.mrb[74].mxu0  ;;  %v5064_v51 = vadd.f32 %v5063_v44, %v3980_v43  ;;  %v5067_v52 = vadd.f32 %v3285_v49, %v6795_v11  ;;  %v3287_v53 = vpop.f32.mrb[75].mxu1 }
 0x2ed   : > { %v3986_v54 = vpop.f32.mrb[75].mxu0  ;;  %4357 = vst.msk [vmem:[%s6807_s18 + $0x118] sm:$0xff] %vm6809_vm3, %v4914_v47  ;;  %v5066_v55 = vadd.f32 %v5065_v48, %v3982_v46  ;;  %v5069_v56 = vadd.f32 %v3287_v53, %v6797_v12 }
 0x2ee   : > { %v4071_v57 = vmax.f32 %v5064_v51, 0.0  ;;  %v5068_v58 = vadd.f32 %v5067_v52, %v3984_v50 }
 0x2ef   : > { %v4072_v59 = vmax.f32 %v5066_v55, 0.0  ;;  %v5070_v60 = vadd.f32 %v5069_v56, %v3986_v54 }
 0x2f0   : > { %v4073_v61 = vmax.f32 %v5068_v58, 0.0 }
 0x2f1   : > { %v4915_v62 = vpack.c.bf16 %v4072_v59, %v4071_v57  ;;  %v4074_v63 = vmax.f32 %v5070_v60, 0.0  ;;  %v3291_v0 = vpop.f32.mrb[76].mxu1 }
 0x2f2   : > { %v3990_v1 = vpop.f32.mrb[76].mxu0  ;;  %v5071_v2 = vadd.f32 %v3291_v0, %v6795_v11  ;;  %v3293_v3 = vpop.f32.mrb[77].mxu1 }
 0x2f3   : > { %v3992_v4 = vpop.f32.mrb[77].mxu0  ;;  %4358 = vst.msk [vmem:[%s6807_s18 + $0x120] sm:$0xff] %vm6809_vm3, %v4915_v62  ;;  %v4916_v5 = vpack.c.bf16 %v4074_v63, %v4073_v61  ;;  %v5073_v6 = vadd.f32 %v3293_v3, %v6797_v12  ;;  %v3295_v7 = vpop.f32.mrb[78].mxu1 }
 0x2f4   : > { %v3994_v8 = vpop.f32.mrb[78].mxu0  ;;  %v5072_v10 = vadd.f32 %v5071_v2, %v3990_v1  ;;  %v5075_v13 = vadd.f32 %v3295_v7, %v6795_v11  ;;  %v3297_v9 = vpop.f32.mrb[79].mxu1 }
 0x2f5   : > { %v3996_v14 = vpop.f32.mrb[79].mxu0  ;;  %4359 = vst.msk [vmem:[%s6807_s18 + $0x128] sm:$0xff] %vm6809_vm3, %v4916_v5  ;;  %v5074_v15 = vadd.f32 %v5073_v6, %v3992_v4  ;;  %v5077_v16 = vadd.f32 %v3297_v9, %v6797_v12 }
 0x2f6   : > { %v4075_v17 = vmax.f32 %v5072_v10, 0.0  ;;  %v5076_v18 = vadd.f32 %v5075_v13, %v3994_v8 }
 0x2f7   : > { %v4076_v19 = vmax.f32 %v5074_v15, 0.0  ;;  %v5078_v20 = vadd.f32 %v5077_v16, %v3996_v14 }
 0x2f8   : > { %v4077_v21 = vmax.f32 %v5076_v18, 0.0 }
 0x2f9   : > { %v4917_v22 = vpack.c.bf16 %v4076_v19, %v4075_v17  ;;  %v4078_v23 = vmax.f32 %v5078_v20, 0.0 }
 0x2fb   : > { %4360 = vst.msk [vmem:[%s6807_s18 + $0x130] sm:$0xff] %vm6809_vm3, %v4917_v22  ;;  %v4918_v24 = vpack.c.bf16 %v4078_v23, %v4077_v21 }
 0x2fd   : > { %4361 = vst.msk [vmem:[%s6807_s18 + $0x138] sm:$0xff] %vm6809_vm3, %v4918_v24 }
 0x2fe PF: > { %s13_s12 = sadd.s32 1, %s5987_s12  }
 0x2ff   : > { %p10_p4 = scmp.ge.s32.totalorder %s13_s12, 4  }
 0x301   :  { %12 = sbr.rel (!%p10_p4) target bundleno = 1 (0x1), region = 62 }

// kernel: inception_d_forward.10
= control target key start
LH: loop header
LB: loop body
LE: loop exit
PB: predicated region body
PF: predicated region fallthrough
CT: control target
= control target key end

     0   :  { %s3304_s12 = smov 0   ;;  %s4098_s0 = inlined_call_operand.vmem [shape: bf16[128,1728], index: 0, kind: input, shape index: {}]   ;;  %s4099_s1 = inlined_call_operand.vmem [shape: bf16[1728,192], index: 1, kind: input, shape index: {}]   ;;  %s4100_s2 = inlined_call_operand.vmem [shape: f32[1,192], index: 2, kind: input, shape index: {}]   ;;  %s4101_s3 = inlined_call_operand.vmem [shape: f32[128,192], index: 3, kind: output, shape index: {}]  }
   0x1 LB: > { %s2434_s13 = sadd.s32 4294967295, %s3282_s12   ;;  %p2438_p0 = scmp.ge.s32.totalorder %s3282_s12, 1  ;;  %s3282_s12 = sphi %s3304_s12, %s13_s12  }
   0x2   : > { %p139_p1 = scmp.lt.s32.totalorder %s3282_s12, 3 }
   0x4   : > { %p140_p2 = pnand %p2438_p0, %p139_p1 }
   0x5   : > { %v2868_v0 = vld [vmem:[%s4099_s1 + $0x4] ss:$8 sps:$4 sm:$0xff] (!%p140_p2)   ;;  %v2872_v2 = vld [vmem:[%s4099_s1] ss:$8 sps:$4 sm:$0xff] (!%p140_p2)   ;;  %v2874_v4 = vld [vmem:[%s4099_s1 + $0x14] ss:$8 sps:$4 sm:$0xff] (!%p140_p2)  }
   0x6   : > { %143 = sbr.rel (%p140_p2) target bundleno = 475 (0x1db), region = 32  ;;  %v2870_v1 = vld [vmem:[%s4099_s1 + $0x304] ss:$8 sps:$4 sm:$0xff] (!%p140_p2)   ;;  %1833 = vmatprep.subr.bf16.mxu1 (!%p140_p2), %v2868_v0  ;;  %v2873_v3 = vld [vmem:[%s4099_s1 + $0x300] ss:$8 sps:$4 sm:$0xff] (!%p140_p2)   ;;  %s2439_s24 = sshll.u32 (!%p140_p2), %s2434_s13, 3 }
   0x7   : > { %2052 = vmatprep.subr.bf16.mxu0 (!%p140_p2), %v2870_v1  ;;  %1834 = vmatpush1.bf16.msra.mxu1 (!%p140_p2), %v2872_v2  ;;  %v2876_v5 = vld [vmem:[%s4099_s1 + $0x314] ss:$8 sps:$4 sm:$0xff] (!%p140_p2)   ;;  %v2878_v6 = vld [vmem:[%s4099_s1 + $0x10] ss:$8 sps:$4 sm:$0xff] (!%p140_p2)   ;;  %v2880_v8 = vld [vmem:[%s4099_s1 + $0x24] ss:$8 sps:$4 sm:$0xff] (!%p140_p2)  }
   0x8   : > { %2053 = vmatpush1.bf16.msra.mxu0 (!%p140_p2), %v2873_v3  ;;  %1835 = vmatprep.subr.bf16.mxu1 (!%p140_p2), %v2874_v4  ;;  %v2879_v7 = vld [vmem:[%s4099_s1 + $0x310] ss:$8 sps:$4 sm:$0xff] (!%p140_p2)   ;;  %v2882_v9 = vld [vmem:[%s4099_s1 + $0x324] ss:$8 sps:$4 sm:$0xff] (!%p140_p2)   ;;  %v2884_v10 = vld [vmem:[%s4099_s1 + $0x20] ss:$8 sps:$4 sm:$0xff] (!%p140_p2)  }
   0x9   : > { %2054 = vmatprep.subr.bf16.mxu0 (!%p140_p2), %v2876_v5  ;;  %v2885_v11 = vld [vmem:[%s4099_s1 + $0x320] ss:$8 sps:$4 sm:$0xff] (!%p140_p2)   ;;  %v2886_v12 = vld [vmem:[%s4099_s1 + $0x34] ss:$8 sps:$4 sm:$0xff] (!%p140_p2)   ;;  %v2890_v14 = vld [vmem:[%s4099_s1 + $0x30] ss:$8 sps:$4 sm:$0xff] (!%p140_p2)  }
   0xa   : > { %v2888_v13 = vld [vmem:[%s4099_s1 + $0x334] ss:$8 sps:$4 sm:$0xff] (!%p140_p2)   ;;  %v2891_v15 = vld [vmem:[%s4099_s1 + $0x330] ss:$8 sps:$4 sm:$0xff] (!%p140_p2)   ;;  %v2892_v16 = vld [vmem:[%s4099_s1 + $0x44] ss:$8 sps:$4 sm:$0xff] (!%p140_p2)  }
   0xb   : > { %1836 = vmatpush1.bf16.msra.mxu1 (!%p140_p2), %v2878_v6  ;;  %v2894_v17 = vld [vmem:[%s4099_s1 + $0x344] ss:$8 sps:$4 sm:$0xff] (!%p140_p2)   ;;  %v2896_v18 = vld [vmem:[%s4099_s1 + $0x40] ss:$8 sps:$4 sm:$0xff] (!%p140_p2)   ;;  %v2898_v20 = vld [vmem:[%s4099_s1 + $0x54] ss:$8 sps:$4 sm:$0xff] (!%p140_p2)  }
   0xc   : > { %2055 = vmatpush1.bf16.msra.mxu0 (!%p140_p2), %v2879_v7  ;;  %1837 = vmatprep.subr.bf16.mxu1 (!%p140_p2), %v2880_v8  ;;  %v2897_v19 = vld [vmem:[%s4099_s1 + $0x340] ss:$8 sps:$4 sm:$0xff] (!%p140_p2)   ;;  %v2900_v21 = vld [vmem:[%s4099_s1 + $0x354] ss:$8 sps:$4 sm:$0xff] (!%p140_p2)   ;;  %v2902_v22 = vld [vmem:[%s4099_s1 + $0x50] ss:$8 sps:$4 sm:$0xff] (!%p140_p2)  }
   0xd   : > { %2056 = vmatprep.subr.bf16.mxu0 %v2882_v9  ;;  %v2903_v23 = vld [vmem:[%s4099_s1 + $0x350] ss:$8 sps:$4 sm:$0xff]   ;;  %v2904_v24 = vld [vmem:[%s4099_s1 + $0x64] ss:$8 sps:$4 sm:$0xff]   ;;  %v2908_v26 = vld [vmem:[%s4099_s1 + $0x60] ss:$8 sps:$4 sm:$0xff]  }
   0xe   : > { %v2906_v25 = vld [vmem:[%s4099_s1 + $0x364] ss:$8 sps:$4 sm:$0xff]   ;;  %v2909_v27 = vld [vmem:[%s4099_s1 + $0x360] ss:$8 sps:$4 sm:$0xff]   ;;  %v2910_v28 = vld [vmem:[%s4099_s1 + $0x74] ss:$8 sps:$4 sm:$0xff]  }
   0xf   : > { %1838 = vmatpush1.bf16.msra.mxu1 %v2884_v10  ;;  %v2912_v29 = vld [vmem:[%s4099_s1 + $0x374] ss:$8 sps:$4 sm:$0xff]   ;;  %v2914_v30 = vld [vmem:[%s4099_s1 + $0x70] ss:$8 sps:$4 sm:$0xff]   ;;  %v2916_v32 = vld [vmem:[%s4099_s1 + $0x84] ss:$8 sps:$4 sm:$0xff]  }
  0x10   : > { %2057 = vmatpush1.bf16.msra.mxu0 %v2885_v11  ;;  %1839 = vmatprep.subr.bf16.mxu1 %v2886_v12  ;;  %v2915_v31 = vld [vmem:[%s4099_s1 + $0x370] ss:$8 sps:$4 sm:$0xff]   ;;  %p166_p3 = scmp.lt.s32.totalorder %s2439_s24, 15  ;;  %v2918_v33 = vld [vmem:[%s4099_s1 + $0x384] ss:$8 sps:$4 sm:$0xff]   ;;  %vm1820_vm0 = vcmask 523264  }
  0x11   : > { %2058 = vmatprep.subr.bf16.mxu0 %v2888_v13  ;;  %v2920_v34 = vld [vmem:[%s4099_s1 + $0x80] ss:$8 sps:$4 sm:$0xff]   ;;  %v2922_v36 = vld [vmem:[%s4099_s1 + $0x94] ss:$8 sps:$4 sm:$0xff]   ;;  %v2926_v38 = vld [vmem:[%s4099_s1 + $0x90] ss:$8 sps:$4 sm:$0xff]  }
  0x12   : > { %v2921_v35 = vld [vmem:[%s4099_s1 + $0x380] ss:$8 sps:$4 sm:$0xff]   ;;  %s4103_s24 = smov (!%p166_p3, %s2439_s24), 15  ;;  %v2924_v37 = vld [vmem:[%s4099_s1 + $0x394] ss:$8 sps:$4 sm:$0xff]  }
  0x13   : > { %1840 = vmatpush1.bf16.msra.mxu1 %v2890_v14  ;;  %v2927_v39 = vld [vmem:[%s4099_s1 + $0x390] ss:$8 sps:$4 sm:$0xff]   ;;  %v2928_v40 = vld [vmem:[%s4099_s1 + $0xa4] ss:$8 sps:$4 sm:$0xff]   ;;  %s2859_s21 = smul.u32 56, %s4103_s24 }
  0x14   : > { %2059 = vmatpush1.bf16.msra.mxu0 %v2891_v15  ;;  %1841 = vmatprep.subr.bf16.mxu1 %v2892_v16  ;;  %v2930_v41 = vld [vmem:[%s4099_s1 + $0x3a4] ss:$8 sps:$4 sm:$0xff]   ;;  %v2932_v42 = vld [vmem:[%s4099_s1 + $0xa0] ss:$8 sps:$4 sm:$0xff]   ;;  %v2934_v44 = vld [vmem:[%s4099_s1 + $0xb4] ss:$8 sps:$4 sm:$0xff]  }
  0x15   : > { %2060 = vmatprep.subr.bf16.mxu0 %v2894_v17  ;;  %v2933_v43 = vld [vmem:[%s4099_s1 + $0x3a0] ss:$8 sps:$4 sm:$0xff]   ;;  %s3455_s13 = scalar_lea.vmem %s4098_s0, %s2859_s21  ;;  %v2936_v45 = vld [vmem:[%s4099_s1 + $0x3b4] ss:$8 sps:$4 sm:$0xff]   ;;  %v2938_v46 = vld [vmem:[%s4099_s1 + $0xb0] ss:$8 sps:$4 sm:$0xff]  }
  0x16   : > { %v2939_v47 = vld [vmem:[%s4099_s1 + $0x3b0] ss:$8 sps:$4 sm:$0xff]   ;;  %v2966_v48 = vld [vmem:[%s3455_s13 + $0x4] ss:$56 sps:$4 sm:$0xff]   ;;  %v2944_v52 = vld [vmem:[%s4099_s1 + $0xc0] ss:$8 sps:$4 sm:$0xff]  }
  0x17   : > { %1842 = vmatpush1.bf16.msra.mxu1 %v2896_v18  ;;  %v2940_v49 = vld [vmem:[%s4099_s1 + $0xc4] ss:$8 sps:$4 sm:$0xff]   ;;  %1865 = vmatprep.mubr.bf16.mxu1 %v2966_v48  ;;  %v2972_v51 = vld [vmem:[%s3455_s13 + $0x1c] ss:$56 sps:$4 sm:$0xff]   ;;  %v2945_v53 = vld [vmem:[%s4099_s1 + $0x3c0] ss:$8 sps:$4 sm:$0xff]  }
  0x18   : > { %2061 = vmatpush1.bf16.msra.mxu0 %v2897_v19  ;;  %1843 = vmatprep.subr.bf16.mxu1 %v2898_v20  ;;  %v2942_v50 = vld [vmem:[%s4099_s1 + $0x3c4] ss:$8 sps:$4 sm:$0xff]   ;;  %v2946_v54 = vld [vmem:[%s4099_s1 + $0xd4] ss:$8 sps:$4 sm:$0xff]   ;;  %v2950_v56 = vld [vmem:[%s4099_s1 + $0xd0] ss:$8 sps:$4 sm:$0xff]  }
  0x19   : > { %2062 = vmatprep.subr.bf16.mxu0 %v2900_v21  ;;  %v2948_v55 = vld [vmem:[%s4099_s1 + $0x3d4] ss:$8 sps:$4 sm:$0xff]   ;;  %2084 = vmatprep.mubr.bf16.mxu0 %v2972_v51  ;;  %v2951_v57 = vld [vmem:[%s4099_s1 + $0x3d0] ss:$8 sps:$4 sm:$0xff]   ;;  %v2952_v58 = vld [vmem:[%s4099_s1 + $0xe4] ss:$8 sps:$4 sm:$0xff]  }
  0x1a   : > { %v2954_v59 = vld [vmem:[%s4099_s1 + $0x3e4] ss:$8 sps:$4 sm:$0xff]   ;;  %v2956_v60 = vld [vmem:[%s4099_s1 + $0xe0] ss:$8 sps:$4 sm:$0xff]   ;;  %v2958_v62 = vld [vmem:[%s4099_s1 + $0xf4] ss:$8 sps:$4 sm:$0xff]  }
  0x1b   : > { %1844 = vmatpush1.bf16.msra.mxu1 %v2902_v22  ;;  %v2957_v61 = vld [vmem:[%s4099_s1 + $0x3e0] ss:$8 sps:$4 sm:$0xff]   ;;  %v2960_v63 = vld [vmem:[%s4099_s1 + $0x3f4] ss:$8 sps:$4 sm:$0xff]   ;;  %v2962_v0 = vld [vmem:[%s4099_s1 + $0xf0] ss:$8 sps:$4 sm:$0xff]  }
  0x1c   : > { %2063 = vmatpush1.bf16.msra.mxu0 %v2903_v23  ;;  %1845 = vmatprep.subr.bf16.mxu1 %v2904_v24  ;;  %v2963_v1 = vld [vmem:[%s4099_s1 + $0x3f0] ss:$8 sps:$4 sm:$0xff]   ;;  %v2969_v2 = vld [vmem:[%s4099_s1 + $0x104] ss:$8 sps:$4 sm:$0xff]   ;;  %v2967_v5 = vld [vmem:[%s4099_s1 + $0x100] ss:$8 sps:$4 sm:$0xff]  }
  0x1d   : > { %2064 = vmatprep.subr.bf16.mxu0 %v2906_v25  ;;  %v2975_v3 = vld [vmem:[%s4099_s1 + $0x404] ss:$8 sps:$4 sm:$0xff]   ;;  %v2964_v4 = vld [vmem:[%s3455_s13] ss:$56 sps:$4 sm:$0xff]   ;;  %v2978_v8 = vld [vmem:[%s4099_s1 + $0x114] ss:$8 sps:$4 sm:$0xff]  }
  0x1e   : > { %v2970_v6 = vld [vmem:[%s3455_s13 + $0x18] ss:$56 sps:$4 sm:$0xff]   ;;  %v2973_v7 = vld [vmem:[%s4099_s1 + $0x400] ss:$8 sps:$4 sm:$0xff]   ;;  %v2981_v9 = vld [vmem:[%s4099_s1 + $0x414] ss:$8 sps:$4 sm:$0xff]  }
  0x1f   : > { %1846 = vmatpush1.bf16.msra.mxu1 %v2908_v26  ;;  %v2976_v10 = vld [vmem:[%s4099_s1 + $0x110] ss:$8 sps:$4 sm:$0xff]   ;;  %v2984_v12 = vld [vmem:[%s4099_s1 + $0x124] ss:$8 sps:$4 sm:$0xff]   ;;  %v2982_v14 = vld [vmem:[%s4099_s1 + $0x120] ss:$8 sps:$4 sm:$0xff]  }
  0x20   : > { %2065 = vmatpush1.bf16.msra.mxu0 %v2909_v27  ;;  %1847 = vmatprep.subr.bf16.mxu1 %v2910_v28  ;;  %v2979_v11 = vld [vmem:[%s4099_s1 + $0x410] ss:$8 sps:$4 sm:$0xff]   ;;  %v2987_v13 = vld [vmem:[%s4099_s1 + $0x424] ss:$8 sps:$4 sm:$0xff]   ;;  %v2985_v15 = vld [vmem:[%s4099_s1 + $0x420] ss:$8 sps:$4 sm:$0xff]  }
  0x21   : > { %2066 = vmatprep.subr.bf16.mxu0 %v2912_v29  ;;  %v2990_v16 = vld [vmem:[%s4099_s1 + $0x134] ss:$8 sps:$4 sm:$0xff]   ;;  %v2988_v19 = vld [vmem:[%s4099_s1 + $0x130] ss:$8 sps:$4 sm:$0xff]   ;;  %v3035_v21 = vld [vmem:[%s3455_s13 + $0x8c] ss:$56 sps:$4 sm:$0xff]  }
  0x22   : > { %v3030_v17 = vld [vmem:[%s3455_s13 + $0x74] ss:$56 sps:$4 sm:$0xff]   ;;  %v2991_v20 = vld [vmem:[%s4099_s1 + $0x430] ss:$8 sps:$4 sm:$0xff]   ;;  %v3041_v25 = vld [vmem:[%s3455_s13 + $0x88] ss:$56 sps:$4 sm:$0xff]  }
  0x23   : > { %1848 = vmatpush1.bf16.msra.mxu1 %v2914_v30  ;;  %v2993_v18 = vld [vmem:[%s4099_s1 + $0x434] ss:$8 sps:$4 sm:$0xff]   ;;  %v2996_v22 = vld [vmem:[%s4099_s1 + $0x144] ss:$8 sps:$4 sm:$0xff]   ;;  %v3040_v24 = vld [vmem:[%s3455_s13 + $0x70] ss:$56 sps:$4 sm:$0xff]  }
  0x24   : > { %2067 = vmatpush1.bf16.msra.mxu0 %v2915_v31  ;;  %1849 = vmatprep.subr.bf16.mxu1 %v2916_v32  ;;  %v2999_v23 = vld [vmem:[%s4099_s1 + $0x444] ss:$8 sps:$4 sm:$0xff]   ;;  %v2994_v26 = vld [vmem:[%s4099_s1 + $0x140] ss:$8 sps:$4 sm:$0xff]   ;;  %v3002_v28 = vld [vmem:[%s4099_s1 + $0x154] ss:$8 sps:$4 sm:$0xff]  }
  0x25   : > { %2068 = vmatprep.subr.bf16.mxu0 %v2918_v33  ;;  %v2997_v27 = vld [vmem:[%s4099_s1 + $0x440] ss:$8 sps:$4 sm:$0xff]   ;;  %v3048_v29 = vld [vmem:[%s3455_s13 + $0xe4] ss:$56 sps:$4 sm:$0xff]   ;;  %v3000_v31 = vld [vmem:[%s4099_s1 + $0x150] ss:$8 sps:$4 sm:$0xff]  }
  0x26   : > { %v3005_v30 = vld [vmem:[%s4099_s1 + $0x454] ss:$8 sps:$4 sm:$0xff]   ;;  %v3003_v32 = vld [vmem:[%s4099_s1 + $0x450] ss:$8 sps:$4 sm:$0xff]   ;;  %v3021_v51 = vld [vmem:[%s4099_s1 + $0x480] ss:$8 sps:$4 sm:$0xff]  }
  0x27   : > { %1850 = vmatpush1.bf16.msra.mxu1 %v2920_v34  ;;  %v3053_v33 = vld [vmem:[%s3455_s13 + $0xfc] ss:$56 sps:$4 sm:$0xff]   ;;  %v3008_v34 = vld [vmem:[%s4099_s1 + $0x164] ss:$8 sps:$4 sm:$0xff]   ;;  %v3076_v48 = vld [vmem:[%s3455_s13 + $0x150] ss:$56 sps:$4 sm:$0xff]  }
  0x28   : > { %2069 = vmatpush1.bf16.msra.mxu0 %v2921_v35  ;;  %1851 = vmatprep.subr.bf16.mxu1 %v2922_v36  ;;  %v3011_v35 = vld [vmem:[%s4099_s1 + $0x464] ss:$8 sps:$4 sm:$0xff]   ;;  %v3058_v36 = vld [vmem:[%s3455_s13 + $0xe0] ss:$56 sps:$4 sm:$0xff]  }
  0x29   : > { %2070 = vmatprep.subr.bf16.mxu0 %v2924_v37  ;;  %v3059_v37 = vld [vmem:[%s3455_s13 + $0xf8] ss:$56 sps:$4 sm:$0xff]  }
  0x2b   : > { %1852 = vmatpush1.bf16.msra.mxu1 %v2926_v38  ;;  %v3006_v38 = vld [vmem:[%s4099_s1 + $0x160] ss:$8 sps:$4 sm:$0xff]  }
  0x2c   : > { %2071 = vmatpush1.bf16.msra.mxu0 %v2927_v39  ;;  %1853 = vmatprep.subr.bf16.mxu1 %v2928_v40  ;;  %v3009_v39 = vld [vmem:[%s4099_s1 + $0x460] ss:$8 sps:$4 sm:$0xff]   ;;  %v3014_v40 = vld [vmem:[%s4099_s1 + $0x174] ss:$8 sps:$4 sm:$0xff]  }
  0x2d   : > { %2072 = vmatprep.subr.bf16.mxu0 %v2930_v41  ;;  %v3066_v41 = vld [vmem:[%s3455_s13 + $0x154] ss:$56 sps:$4 sm:$0xff]  }
  0x2f   : > { %1854 = vmatpush1.bf16.msra.mxu1 %v2932_v42  ;;  %v3017_v42 = vld [vmem:[%s4099_s1 + $0x474] ss:$8 sps:$4 sm:$0xff]  }
  0x30   : > { %2073 = vmatpush1.bf16.msra.mxu0 %v2933_v43  ;;  %1855 = vmatprep.subr.bf16.mxu1 %v2934_v44  ;;  %v3012_v43 = vld [vmem:[%s4099_s1 + $0x170] ss:$8 sps:$4 sm:$0xff]  }
  0x31   : > { %2074 = vmatprep.subr.bf16.mxu0 %v2936_v45  ;;  %v3015_v44 = vld [vmem:[%s4099_s1 + $0x470] ss:$8 sps:$4 sm:$0xff]   ;;  %v3071_v45 = vld [vmem:[%s3455_s13 + $0x16c] ss:$56 sps:$4 sm:$0xff]  }
  0x33   : > { %1856 = vmatpush1.bf16.msra.mxu1 %v2938_v46  ;;  %v3020_v46 = vld [vmem:[%s4099_s1 + $0x184] ss:$8 sps:$4 sm:$0xff]  }
  0x34   : > { %2075 = vmatpush1.bf16.msra.mxu0 %v2939_v47  ;;  %1857 = vmatprep.subr.bf16.mxu1 %v2940_v49  ;;  %v3023_v47 = vld [vmem:[%s4099_s1 + $0x484] ss:$8 sps:$4 sm:$0xff]   ;;  %v3077_v49 = vld [vmem:[%s3455_s13 + $0x168] ss:$56 sps:$4 sm:$0xff]  }
  0x35   : > { %2076 = vmatprep.subr.bf16.mxu0 %v2942_v50  ;;  %v3018_v50 = vld [vmem:[%s4099_s1 + $0x180] ss:$8 sps:$4 sm:$0xff]  }
  0x37   : > { %1858 = vmatpush1.bf16.msra.mxu1 %v2944_v52  ;;  %v3026_v52 = vld [vmem:[%s4099_s1 + $0x194] ss:$8 sps:$4 sm:$0xff]  }
  0x38   : > { %2077 = vmatpush1.bf16.msra.mxu0 %v2945_v53  ;;  %1859 = vmatprep.subr.bf16.mxu1 %v2946_v54  ;;  %v3029_v53 = vld [vmem:[%s4099_s1 + $0x494] ss:$8 sps:$4 sm:$0xff]   ;;  %v3086_v54 = vld [vmem:[%s3455_s13 + $0xc] ss:$56 sps:$4 sm:$0xff]  }
  0x39   : > { %2078 = vmatprep.subr.bf16.mxu0 %v2948_v55  ;;  %v3024_v55 = vld [vmem:[%s4099_s1 + $0x190] ss:$8 sps:$4 sm:$0xff]  }
  0x3b   : > { %1860 = vmatpush1.bf16.msra.mxu1 %v2950_v56  ;;  %v3027_v56 = vld [vmem:[%s4099_s1 + $0x490] ss:$8 sps:$4 sm:$0xff]  }
  0x3c   : > { %2079 = vmatpush1.bf16.msra.mxu0 %v2951_v57  ;;  %1861 = vmatprep.subr.bf16.mxu1 %v2952_v58  ;;  %v3092_v57 = vld [vmem:[%s3455_s13 + $0x24] ss:$56 sps:$4 sm:$0xff]  }
  0x3d   : > { %2080 = vmatprep.subr.bf16.mxu0 %v2954_v59  ;;  %v3034_v58 = vld [vmem:[%s4099_s1 + $0x1a4] ss:$8 sps:$4 sm:$0xff]  }
  0x3e   : > { %v3039_v59 = vld [vmem:[%s4099_s1 + $0x4a4] ss:$8 sps:$4 sm:$0xff]  }
  0x3f   : > { %1862 = vmatpush1.bf16.msra.mxu1 %v2956_v60  ;;  %v3032_v60 = vld [vmem:[%s4099_s1 + $0x1a0] ss:$8 sps:$4 sm:$0xff]  }
  0x40   : > { %2081 = vmatpush1.bf16.msra.mxu0 %v2957_v61  ;;  %1863 = vmatprep.subr.bf16.mxu1 %v2958_v62  ;;  %v3037_v61 = vld [vmem:[%s4099_s1 + $0x4a0] ss:$8 sps:$4 sm:$0xff]   ;;  %v3044_v62 = vld [vmem:[%s4099_s1 + $0x1b4] ss:$8 sps:$4 sm:$0xff]  }
  0x41   : > { %2082 = vmatprep.subr.bf16.mxu0 %v2960_v63  ;;  %v3047_v63 = vld [vmem:[%s4099_s1 + $0x4b4] ss:$8 sps:$4 sm:$0xff]  }
  0x43   : > { %1864 = vmatpush1.bf16.msra.mxu1 %v2962_v0  ;;  %v3042_v0 = vld [vmem:[%s4099_s1 + $0x1b0] ss:$8 sps:$4 sm:$0xff]  }
  0x44   : > { %2083 = vmatpush1.bf16.msra.mxu0 %v2963_v1  ;;  %1906 = vmatprep.subr.bf16.mxu1 %v2969_v2  ;;  %v3045_v1 = vld [vmem:[%s4099_s1 + $0x4b0] ss:$8 sps:$4 sm:$0xff]   ;;  %v3052_v2 = vld [vmem:[%s4099_s1 + $0x1c4] ss:$8 sps:$4 sm:$0xff]  }
  0x45   : > { %2125 = vmatprep.subr.bf16.mxu0 %v2975_v3  ;;  %v3057_v3 = vld [vmem:[%s4099_s1 + $0x4c4] ss:$8 sps:$4 sm:$0xff]  }
  0x46   : > { %1866 = vmatmul.mubr.bf16.vlgmr.msra.gmra.mrb[0].mxu1 %v2964_v4  ;;  %v3050_v4 = vld [vmem:[%s4099_s1 + $0x1c0] ss:$8 sps:$4 sm:$0xff]  }
  0x47   : > { %2085 = vmatmul.mubr.bf16.vlgmr.msra.gmra.mrb[0].mxu0 %v2970_v6  ;;  %1907 = vmatpush1.bf16.msra.mxu1 %v2967_v5  ;;  %v3055_v5 = vld [vmem:[%s4099_s1 + $0x4c0] ss:$8 sps:$4 sm:$0xff]   ;;  %v3062_v6 = vld [vmem:[%s4099_s1 + $0x1d4] ss:$8 sps:$4 sm:$0xff]  }
  0x48   : > { %2126 = vmatpush1.bf16.msra.mxu0 %v2973_v7  ;;  %1908 = vmatprep.subr.bf16.mxu1 %v2978_v8  ;;  %v3065_v7 = vld [vmem:[%s4099_s1 + $0x4d4] ss:$8 sps:$4 sm:$0xff]   ;;  %v3060_v8 = vld [vmem:[%s4099_s1 + $0x1d0] ss:$8 sps:$4 sm:$0xff]  }
  0x49   : > { %2127 = vmatprep.subr.bf16.mxu0 %v2981_v9  ;;  %1875 = vmatprep.mubr.bf16.mxu1 %v3030_v17  ;;  %v3063_v9 = vld [vmem:[%s4099_s1 + $0x4d0] ss:$8 sps:$4 sm:$0xff]  }
  0x4a   : > { %2094 = vmatprep.mubr.bf16.mxu0 %v3035_v21  ;;  %v3081_v17 = vld [vmem:[%s4099_s1 + $0x4f0] ss:$8 sps:$4 sm:$0xff]   ;;  %v3087_v21 = vld [vmem:[%s4099_s1 + $0x200] ss:$8 sps:$4 sm:$0xff]  }
  0x4b   : > { %1909 = vmatpush1.bf16.msra.mxu1 %v2976_v10  ;;  %v3070_v10 = vld [vmem:[%s4099_s1 + $0x1e4] ss:$8 sps:$4 sm:$0xff]  }
  0x4c   : > { %2128 = vmatpush1.bf16.msra.mxu0 %v2979_v11  ;;  %1910 = vmatprep.subr.bf16.mxu1 %v2984_v12  ;;  %v3075_v11 = vld [vmem:[%s4099_s1 + $0x4e4] ss:$8 sps:$4 sm:$0xff]   ;;  %v3068_v12 = vld [vmem:[%s4099_s1 + $0x1e0] ss:$8 sps:$4 sm:$0xff]  }
  0x4d   : > { %2129 = vmatprep.subr.bf16.mxu0 %v2987_v13  ;;  %v3073_v13 = vld [vmem:[%s4099_s1 + $0x4e0] ss:$8 sps:$4 sm:$0xff]  }
  0x4e   : > { %1876 = vmatmul.mubr.bf16.gmra.mrb[4].mxu1 %v3040_v24  ;;  %v3098_v24 = vld [vmem:[%s4099_s1 + $0x214] ss:$8 sps:$4 sm:$0xff]  }
  0x4f   : > { %1911 = vmatpush1.bf16.msra.mxu1 %v2982_v14  ;;  %2095 = vmatmul.mubr.bf16.gmra.mrb[4].mxu0 %v3041_v25  ;;  %v3080_v14 = vld [vmem:[%s4099_s1 + $0x1f4] ss:$8 sps:$4 sm:$0xff]  }
  0x50   : > { %2130 = vmatpush1.bf16.msra.mxu0 %v2985_v15  ;;  %1912 = vmatprep.subr.bf16.mxu1 %v2990_v16  ;;  %v3083_v15 = vld [vmem:[%s4099_s1 + $0x4f4] ss:$8 sps:$4 sm:$0xff]   ;;  %v3078_v16 = vld [vmem:[%s4099_s1 + $0x1f0] ss:$8 sps:$4 sm:$0xff]  }
  0x51   : > { %2131 = vmatprep.subr.bf16.mxu0 %v2993_v18  ;;  %1885 = vmatprep.mubr.bf16.mxu1 %v3048_v29  ;;  %v3089_v18 = vld [vmem:[%s4099_s1 + $0x204] ss:$8 sps:$4 sm:$0xff]   ;;  %v3101_v25 = vld [vmem:[%s4099_s1 + $0x514] ss:$8 sps:$4 sm:$0xff]   ;;  %v3099_v29 = vld [vmem:[%s4099_s1 + $0x510] ss:$8 sps:$4 sm:$0xff]  }
  0x52   : > { %2104 = vmatprep.mubr.bf16.mxu0 %v3053_v33  ;;  %v3154_v33 = vld [vmem:[%s3455_s13 + $0x78] ss:$56 sps:$4 sm:$0xff]  }
  0x53   : > { %1913 = vmatpush1.bf16.msra.mxu1 %v2988_v19  ;;  %v3095_v19 = vld [vmem:[%s4099_s1 + $0x504] ss:$8 sps:$4 sm:$0xff]  }
  0x54   : > { %2132 = vmatpush1.bf16.msra.mxu0 %v2991_v20  ;;  %1914 = vmatprep.subr.bf16.mxu1 %v2996_v22  ;;  %v3084_v20 = vld [vmem:[%s3455_s13 + $0x8] ss:$56 sps:$4 sm:$0xff]  }
  0x55   : > { %2133 = vmatprep.subr.bf16.mxu0 %v2999_v23  ;;  %v3090_v22 = vld [vmem:[%s3455_s13 + $0x20] ss:$56 sps:$4 sm:$0xff]  }
  0x56   : > { %1886 = vmatmul.mubr.bf16.gmra.mrb[8].mxu1 %v3058_v36  ;;  %v3093_v23 = vld [vmem:[%s4099_s1 + $0x500] ss:$8 sps:$4 sm:$0xff]   ;;  %v3110_v36 = vld [vmem:[%s4099_s1 + $0x234] ss:$8 sps:$4 sm:$0xff]  }
  0x57   : > { %1915 = vmatpush1.bf16.msra.mxu1 %v2994_v26  ;;  %2105 = vmatmul.mubr.bf16.gmra.mrb[8].mxu0 %v3059_v37  ;;  %v3150_v26 = vld [vmem:[%s3455_s13 + $0x7c] ss:$56 sps:$4 sm:$0xff]  }
  0x58   : > { %2134 = vmatpush1.bf16.msra.mxu0 %v2997_v27  ;;  %1916 = vmatprep.subr.bf16.mxu1 %v3002_v28  ;;  %v3152_v27 = vld [vmem:[%s3455_s13 + $0x94] ss:$56 sps:$4 sm:$0xff]   ;;  %v3096_v28 = vld [vmem:[%s4099_s1 + $0x210] ss:$8 sps:$4 sm:$0xff]  }
  0x59   : > { %2135 = vmatprep.subr.bf16.mxu0 %v3005_v30  ;;  %1895 = vmatprep.mubr.bf16.mxu1 %v3066_v41  ;;  %v3104_v30 = vld [vmem:[%s4099_s1 + $0x224] ss:$8 sps:$4 sm:$0xff]   ;;  %v3113_v37 = vld [vmem:[%s4099_s1 + $0x534] ss:$8 sps:$4 sm:$0xff]   ;;  %v3111_v41 = vld [vmem:[%s4099_s1 + $0x530] ss:$8 sps:$4 sm:$0xff]  }
  0x5a   : > { %2114 = vmatprep.mubr.bf16.mxu0 %v3071_v45  ;;  %v3172_v45 = vld [vmem:[%s3455_s13 + $0xe8] ss:$56 sps:$4 sm:$0xff]  }
  0x5b   : > { %1917 = vmatpush1.bf16.msra.mxu1 %v3000_v31  ;;  %v3107_v31 = vld [vmem:[%s4099_s1 + $0x524] ss:$8 sps:$4 sm:$0xff]  }
  0x5c   : > { %2136 = vmatpush1.bf16.msra.mxu0 %v3003_v32  ;;  %1918 = vmatprep.subr.bf16.mxu1 %v3008_v34  ;;  %v3102_v32 = vld [vmem:[%s4099_s1 + $0x220] ss:$8 sps:$4 sm:$0xff]  }
  0x5d   : > { %2137 = vmatprep.subr.bf16.mxu0 %v3011_v35  ;;  %v3158_v34 = vld [vmem:[%s3455_s13 + $0x90] ss:$56 sps:$4 sm:$0xff]  }
  0x5e   : > { %1896 = vmatmul.mubr.bf16.gmra.mrb[12].mxu1 %v3076_v48  ;;  %v3105_v35 = vld [vmem:[%s4099_s1 + $0x520] ss:$8 sps:$4 sm:$0xff]   ;;  %v3122_v48 = vld [vmem:[%s4099_s1 + $0x254] ss:$8 sps:$4 sm:$0xff]  }
  0x5f   : > { %1919 = vmatpush1.bf16.msra.mxu1 %v3006_v38  ;;  %2115 = vmatmul.mubr.bf16.gmra.mrb[12].mxu0 %v3077_v49  ;;  %v3168_v38 = vld [vmem:[%s3455_s13 + $0xec] ss:$56 sps:$4 sm:$0xff]   ;;  %v3125_v49 = vld [vmem:[%s4099_s1 + $0x554] ss:$8 sps:$4 sm:$0xff]  }
  0x60   : > { %2138 = vmatpush1.bf16.msra.mxu0 %v3009_v39  ;;  %1920 = vmatprep.subr.bf16.mxu1 %v3014_v40  ;;  %v3170_v39 = vld [vmem:[%s3455_s13 + $0x104] ss:$56 sps:$4 sm:$0xff]   ;;  %v3108_v40 = vld [vmem:[%s4099_s1 + $0x230] ss:$8 sps:$4 sm:$0xff]  }
  0x61   : > { %2139 = vmatprep.subr.bf16.mxu0 %v3017_v42  ;;  %1938 = vmatprep.mubr.bf16.mxu1 %v3086_v54  ;;  %v3116_v42 = vld [vmem:[%s4099_s1 + $0x244] ss:$8 sps:$4 sm:$0xff]  }
  0x62   : > { %2157 = vmatprep.mubr.bf16.mxu0 %v3092_v57  ;;  %v3128_v54 = vld [vmem:[%s4099_s1 + $0x264] ss:$8 sps:$4 sm:$0xff]   ;;  %v3129_v57 = vld [vmem:[%s4099_s1 + $0x560] ss:$8 sps:$4 sm:$0xff]  }
  0x63   : > { %1921 = vmatpush1.bf16.msra.mxu1 %v3012_v43  ;;  %v3119_v43 = vld [vmem:[%s4099_s1 + $0x544] ss:$8 sps:$4 sm:$0xff]  }
  0x64   : > { %2140 = vmatpush1.bf16.msra.mxu0 %v3015_v44  ;;  %1922 = vmatprep.subr.bf16.mxu1 %v3020_v46  ;;  %v3114_v44 = vld [vmem:[%s4099_s1 + $0x240] ss:$8 sps:$4 sm:$0xff]  }
  0x65   : > { %2141 = vmatprep.subr.bf16.mxu0 %v3023_v47  ;;  %v3176_v46 = vld [vmem:[%s3455_s13 + $0x100] ss:$56 sps:$4 sm:$0xff]  }
  0x66   : > { %v3117_v47 = vld [vmem:[%s4099_s1 + $0x540] ss:$8 sps:$4 sm:$0xff]  }
  0x67   : > { %1923 = vmatpush1.bf16.msra.mxu1 %v3018_v50  ;;  %v3186_v50 = vld [vmem:[%s3455_s13 + $0x15c] ss:$56 sps:$4 sm:$0xff]  }
  0x68   : > { %2142 = vmatpush1.bf16.msra.mxu0 %v3021_v51  ;;  %1924 = vmatprep.subr.bf16.mxu1 %v3026_v52  ;;  %v3188_v51 = vld [vmem:[%s3455_s13 + $0x174] ss:$56 sps:$4 sm:$0xff]   ;;  %v3120_v52 = vld [vmem:[%s4099_s1 + $0x250] ss:$8 sps:$4 sm:$0xff]  }
  0x69   : > { %2143 = vmatprep.subr.bf16.mxu0 %v3029_v53  ;;  %v3123_v53 = vld [vmem:[%s4099_s1 + $0x550] ss:$8 sps:$4 sm:$0xff]  }
  0x6b   : > { %1925 = vmatpush1.bf16.msra.mxu1 %v3024_v55  ;;  %v3131_v55 = vld [vmem:[%s4099_s1 + $0x564] ss:$8 sps:$4 sm:$0xff]  }
  0x6c   : > { %2144 = vmatpush1.bf16.msra.mxu0 %v3027_v56  ;;  %1926 = vmatprep.subr.bf16.mxu1 %v3034_v58  ;;  %v3126_v56 = vld [vmem:[%s4099_s1 + $0x260] ss:$8 sps:$4 sm:$0xff]   ;;  %v3190_v58 = vld [vmem:[%s3455_s13 + $0x158] ss:$56 sps:$4 sm:$0xff]  }
  0x6d   : > { %2145 = vmatprep.subr.bf16.mxu0 %v3039_v59  ;;  %v3194_v59 = vld [vmem:[%s3455_s13 + $0x170] ss:$56 sps:$4 sm:$0xff]  }
  0x6f   : > { %1927 = vmatpush1.bf16.msra.mxu1 %v3032_v60  ;;  %v3134_v60 = vld [vmem:[%s4099_s1 + $0x274] ss:$8 sps:$4 sm:$0xff]  }
  0x70   : > { %2146 = vmatpush1.bf16.msra.mxu0 %v3037_v61  ;;  %1928 = vmatprep.subr.bf16.mxu1 %v3044_v62  ;;  %v3137_v61 = vld [vmem:[%s4099_s1 + $0x574] ss:$8 sps:$4 sm:$0xff]  }
  0x71   : > { %2147 = vmatprep.subr.bf16.mxu0 %v3047_v63  ;;  %v3206_v62 = vld [vmem:[%s3455_s13 + $0x14] ss:$56 sps:$4 sm:$0xff]  }
  0x72   : > { %v3209_v63 = vld [vmem:[%s3455_s13 + $0x2c] ss:$56 sps:$4 sm:$0xff]  }
  0x73   : > { %1929 = vmatpush1.bf16.msra.mxu1 %v3042_v0  ;;  %v3132_v0 = vld [vmem:[%s4099_s1 + $0x270] ss:$8 sps:$4 sm:$0xff]  }
  0x74   : > { %2148 = vmatpush1.bf16.msra.mxu0 %v3045_v1  ;;  %1930 = vmatprep.subr.bf16.mxu1 %v3052_v2  ;;  %v3135_v1 = vld [vmem:[%s4099_s1 + $0x570] ss:$8 sps:$4 sm:$0xff]   ;;  %v3140_v2 = vld [vmem:[%s4099_s1 + $0x284] ss:$8 sps:$4 sm:$0xff]  }
  0x75   : > { %2149 = vmatprep.subr.bf16.mxu0 %v3057_v3  ;;  %v3143_v3 = vld [vmem:[%s4099_s1 + $0x584] ss:$8 sps:$4 sm:$0xff]  }
  0x77   : > { %1931 = vmatpush1.bf16.msra.mxu1 %v3050_v4  ;;  %v3138_v4 = vld [vmem:[%s4099_s1 + $0x280] ss:$8 sps:$4 sm:$0xff]  }
  0x78   : > { %2150 = vmatpush1.bf16.msra.mxu0 %v3055_v5  ;;  %1932 = vmatprep.subr.bf16.mxu1 %v3062_v6  ;;  %v3141_v5 = vld [vmem:[%s4099_s1 + $0x580] ss:$8 sps:$4 sm:$0xff]   ;;  %v3146_v6 = vld [vmem:[%s4099_s1 + $0x294] ss:$8 sps:$4 sm:$0xff]  }
  0x79   : > { %2151 = vmatprep.subr.bf16.mxu0 %v3065_v7  ;;  %v3149_v7 = vld [vmem:[%s4099_s1 + $0x594] ss:$8 sps:$4 sm:$0xff]  }
  0x7b   : > { %1933 = vmatpush1.bf16.msra.mxu1 %v3060_v8  ;;  %v3144_v8 = vld [vmem:[%s4099_s1 + $0x290] ss:$8 sps:$4 sm:$0xff]  }
  0x7c   : > { %2152 = vmatpush1.bf16.msra.mxu0 %v3063_v9  ;;  %1934 = vmatprep.subr.bf16.mxu1 %v3070_v10  ;;  %v3147_v9 = vld [vmem:[%s4099_s1 + $0x590] ss:$8 sps:$4 sm:$0xff]   ;;  %v3157_v10 = vld [vmem:[%s4099_s1 + $0x2a4] ss:$8 sps:$4 sm:$0xff]  }
  0x7d   : > { %2153 = vmatprep.subr.bf16.mxu0 %v3075_v11  ;;  %v3161_v11 = vld [vmem:[%s4099_s1 + $0x5a4] ss:$8 sps:$4 sm:$0xff]  }
  0x7f   : > { %1935 = vmatpush1.bf16.msra.mxu1 %v3068_v12  ;;  %v3155_v12 = vld [vmem:[%s4099_s1 + $0x2a0] ss:$8 sps:$4 sm:$0xff]  }
  0x80   : > { %2154 = vmatpush1.bf16.msra.mxu0 %v3073_v13  ;;  %1936 = vmatprep.subr.bf16.mxu1 %v3080_v14  ;;  %v3159_v13 = vld [vmem:[%s4099_s1 + $0x5a0] ss:$8 sps:$4 sm:$0xff]   ;;  %v3164_v14 = vld [vmem:[%s4099_s1 + $0x2b4] ss:$8 sps:$4 sm:$0xff]  }
  0x81   : > { %2155 = vmatprep.subr.bf16.mxu0 %v3083_v15  ;;  %v3167_v15 = vld [vmem:[%s4099_s1 + $0x5b4] ss:$8 sps:$4 sm:$0xff]  }
  0x83   : > { %1937 = vmatpush1.bf16.msra.mxu1 %v3078_v16  ;;  %v3162_v16 = vld [vmem:[%s4099_s1 + $0x2b0] ss:$8 sps:$4 sm:$0xff]  }
  0x84   : > { %2156 = vmatpush1.bf16.msra.mxu0 %v3081_v17  ;;  %1979 = vmatprep.subr.bf16.mxu1 %v3089_v18  ;;  %v3165_v17 = vld [vmem:[%s4099_s1 + $0x5b0] ss:$8 sps:$4 sm:$0xff]   ;;  %v3175_v18 = vld [vmem:[%s4099_s1 + $0x2c4] ss:$8 sps:$4 sm:$0xff]  }
  0x85   : > { %2198 = vmatprep.subr.bf16.mxu0 %v3095_v19  ;;  %v3179_v19 = vld [vmem:[%s4099_s1 + $0x5c4] ss:$8 sps:$4 sm:$0xff]  }
  0x86   : > { %1939 = vmatmul.mubr.bf16.vlgmr.msra.gmra.mrb[0].mxu1 %v3084_v20  ;;  %v3173_v20 = vld [vmem:[%s4099_s1 + $0x2c0] ss:$8 sps:$4 sm:$0xff]  }
  0x87   : > { %2158 = vmatmul.mubr.bf16.vlgmr.msra.gmra.mrb[0].mxu0 %v3090_v22  ;;  %1980 = vmatpush1.bf16.msra.mxu1 %v3087_v21  ;;  %v3177_v21 = vld [vmem:[%s4099_s1 + $0x5c0] ss:$8 sps:$4 sm:$0xff]   ;;  %v3182_v22 = vld [vmem:[%s4099_s1 + $0x2d4] ss:$8 sps:$4 sm:$0xff]  }
  0x88   : > { %2199 = vmatpush1.bf16.msra.mxu0 %v3093_v23  ;;  %1981 = vmatprep.subr.bf16.mxu1 %v3098_v24  ;;  %v3185_v23 = vld [vmem:[%s4099_s1 + $0x5d4] ss:$8 sps:$4 sm:$0xff]   ;;  %v3180_v24 = vld [vmem:[%s4099_s1 + $0x2d0] ss:$8 sps:$4 sm:$0xff]  }
  0x89   : > { %2200 = vmatprep.subr.bf16.mxu0 %v3101_v25  ;;  %1948 = vmatprep.mubr.bf16.mxu1 %v3150_v26  ;;  %v3183_v25 = vld [vmem:[%s4099_s1 + $0x5d0] ss:$8 sps:$4 sm:$0xff]   ;;  %v3193_v26 = vld [vmem:[%s4099_s1 + $0x2e4] ss:$8 sps:$4 sm:$0xff]  }
  0x8a   : > { %2167 = vmatprep.mubr.bf16.mxu0 %v3152_v27  ;;  %v3197_v27 = vld [vmem:[%s4099_s1 + $0x5e4] ss:$8 sps:$4 sm:$0xff]  }
  0x8b   : > { %1982 = vmatpush1.bf16.msra.mxu1 %v3096_v28  ;;  %v3191_v28 = vld [vmem:[%s4099_s1 + $0x2e0] ss:$8 sps:$4 sm:$0xff]  }
  0x8c   : > { %2201 = vmatpush1.bf16.msra.mxu0 %v3099_v29  ;;  %1983 = vmatprep.subr.bf16.mxu1 %v3104_v30  ;;  %v3195_v29 = vld [vmem:[%s4099_s1 + $0x5e0] ss:$8 sps:$4 sm:$0xff]   ;;  %v3200_v30 = vld [vmem:[%s4099_s1 + $0x2f4] ss:$8 sps:$4 sm:$0xff]  }
  0x8d   : > { %2202 = vmatprep.subr.bf16.mxu0 %v3107_v31  ;;  %v3203_v31 = vld [vmem:[%s4099_s1 + $0x5f4] ss:$8 sps:$4 sm:$0xff]  }
  0x8e   : > { %1949 = vmatmul.mubr.bf16.gmra.mrb[4].mxu1 %v3154_v33  ;;  %v3201_v33 = vld [vmem:[%s4099_s1 + $0x5f0] ss:$8 sps:$4 sm:$0xff]  }
  0x8f   : > { %2168 = vmatmul.mubr.bf16.gmra.mrb[4].mxu0 %v3158_v34  ;;  %1984 = vmatpush1.bf16.msra.mxu1 %v3102_v32  ;;  %v3198_v32 = vld [vmem:[%s4099_s1 + $0x2f0] ss:$8 sps:$4 sm:$0xff]   ;;  %v3212_v34 = vld [vmem:[%s4099_s1 + $0x604] ss:$8 sps:$4 sm:$0xff]  }
  0x90   : > { %2203 = vmatpush1.bf16.msra.mxu0 %v3105_v35  ;;  %1985 = vmatprep.subr.bf16.mxu1 %v3110_v36  ;;  %v3204_v35 = vld [vmem:[%s3455_s13 + $0x10] ss:$56 sps:$4 sm:$0xff]  }
  0x91   : > { %2204 = vmatprep.subr.bf16.mxu0 %v3113_v37  ;;  %1958 = vmatprep.mubr.bf16.mxu1 %v3168_v38  ;;  %v3207_v36 = vld [vmem:[%s3455_s13 + $0x28] ss:$56 sps:$4 sm:$0xff]   ;;  %v3215_v38 = vld [vmem:[%s4099_s1 + $0x614] ss:$8 sps:$4 sm:$0xff]  }
  0x92   : > { %2177 = vmatprep.mubr.bf16.mxu0 %v3170_v39  ;;  %v3210_v37 = vld [vmem:[%s4099_s1 + $0x600] ss:$8 sps:$4 sm:$0xff]   ;;  %v3216_v39 = vld [vmem:[%s3455_s13 + $0x84] ss:$56 sps:$4 sm:$0xff]  }
  0x93   : > { %1986 = vmatpush1.bf16.msra.mxu1 %v3108_v40  ;;  %v3218_v40 = vld [vmem:[%s3455_s13 + $0x9c] ss:$56 sps:$4 sm:$0xff]  }
  0x94   : > { %2205 = vmatpush1.bf16.msra.mxu0 %v3111_v41  ;;  %1987 = vmatprep.subr.bf16.mxu1 %v3116_v42  ;;  %v3213_v41 = vld [vmem:[%s4099_s1 + $0x610] ss:$8 sps:$4 sm:$0xff]   ;;  %v3224_v42 = vld [vmem:[%s4099_s1 + $0x624] ss:$8 sps:$4 sm:$0xff]  }
  0x95   : > { %2206 = vmatprep.subr.bf16.mxu0 %v3119_v43  ;;  %v3220_v43 = vld [vmem:[%s3455_s13 + $0x80] ss:$56 sps:$4 sm:$0xff]  }
  0x96   : > { %1959 = vmatmul.mubr.bf16.gmra.mrb[8].mxu1 %v3172_v45  ;;  %v3222_v45 = vld [vmem:[%s4099_s1 + $0x620] ss:$8 sps:$4 sm:$0xff]  }
  0x97   : > { %2178 = vmatmul.mubr.bf16.gmra.mrb[8].mxu0 %v3176_v46  ;;  %1988 = vmatpush1.bf16.msra.mxu1 %v3114_v44  ;;  %v3221_v44 = vld [vmem:[%s3455_s13 + $0x98] ss:$56 sps:$4 sm:$0xff]   ;;  %v3227_v46 = vld [vmem:[%s4099_s1 + $0x634] ss:$8 sps:$4 sm:$0xff]  }
  0x98   : > { %2207 = vmatpush1.bf16.msra.mxu0 %v3117_v47  ;;  %1989 = vmatprep.subr.bf16.mxu1 %v3122_v48  ;;  %v3228_v47 = vld [vmem:[%s3455_s13 + $0xf4] ss:$56 sps:$4 sm:$0xff]  }
  0x99   : > { %2208 = vmatprep.subr.bf16.mxu0 %v3125_v49  ;;  %1968 = vmatprep.mubr.bf16.mxu1 %v3186_v50  ;;  %v3230_v48 = vld [vmem:[%s3455_s13 + $0x10c] ss:$56 sps:$4 sm:$0xff]   ;;  %v3225_v49 = vld [vmem:[%s4099_s1 + $0x630] ss:$8 sps:$4 sm:$0xff]  }
  0x9a   : > { %2187 = vmatprep.mubr.bf16.mxu0 %v3188_v51  ;;  %v3236_v50 = vld [vmem:[%s4099_s1 + $0x644] ss:$8 sps:$4 sm:$0xff]   ;;  %v3232_v51 = vld [vmem:[%s3455_s13 + $0xf0] ss:$56 sps:$4 sm:$0xff]  }
  0x9b   : > { %1990 = vmatpush1.bf16.msra.mxu1 %v3120_v52  ;;  %v3233_v52 = vld [vmem:[%s3455_s13 + $0x108] ss:$56 sps:$4 sm:$0xff]  }
  0x9c   : > { %2209 = vmatpush1.bf16.msra.mxu0 %v3123_v53  ;;  %1991 = vmatprep.subr.bf16.mxu1 %v3128_v54  ;;  %v3234_v53 = vld [vmem:[%s4099_s1 + $0x640] ss:$8 sps:$4 sm:$0xff]   ;;  %v3239_v54 = vld [vmem:[%s4099_s1 + $0x654] ss:$8 sps:$4 sm:$0xff]  }
  0x9d   : > { %2210 = vmatprep.subr.bf16.mxu0 %v3131_v55  ;;  %v3240_v55 = vld [vmem:[%s3455_s13 + $0x164] ss:$56 sps:$4 sm:$0xff]  }
  0x9e   : > { %1969 = vmatmul.mubr.bf16.gmra.mrb[12].mxu1 %v3190_v58  ;;  %v3248_v58 = vld [vmem:[%s4099_s1 + $0x664] ss:$8 sps:$4 sm:$0xff]  }
  0x9f   : > { %2188 = vmatmul.mubr.bf16.gmra.mrb[12].mxu0 %v3194_v59  ;;  %1992 = vmatpush1.bf16.msra.mxu1 %v3126_v56  ;;  %v3242_v56 = vld [vmem:[%s3455_s13 + $0x17c] ss:$56 sps:$4 sm:$0xff]   ;;  %v3244_v59 = vld [vmem:[%s3455_s13 + $0x160] ss:$56 sps:$4 sm:$0xff]  }
  0xa0   : > { %2211 = vmatpush1.bf16.msra.mxu0 %v3129_v57  ;;  %1993 = vmatprep.subr.bf16.mxu1 %v3134_v60  ;;  %v3237_v57 = vld [vmem:[%s4099_s1 + $0x650] ss:$8 sps:$4 sm:$0xff]  }
  0xa1   : > { %2212 = vmatprep.subr.bf16.mxu0 %v3137_v61  ;;  %2011 = vmatprep.mubr.bf16.mxu1 %v3206_v62  ;;  %v3245_v60 = vld [vmem:[%s3455_s13 + $0x178] ss:$56 sps:$4 sm:$0xff]   ;;  %v3246_v61 = vld [vmem:[%s4099_s1 + $0x660] ss:$8 sps:$4 sm:$0xff]   ;;  %v3251_v62 = vld [vmem:[%s4099_s1 + $0x674] ss:$8 sps:$4 sm:$0xff]  }
  0xa2   : > { %2230 = vmatprep.mubr.bf16.mxu0 %v3209_v63  ;;  %v3266_v63 = vld [vmem:[%s3455_s13 + $0x34] ss:$56 sps:$4 sm:$0xff]  }
  0xa3   : > { %1994 = vmatpush1.bf16.msra.mxu1 %v3132_v0  ;;  %v3269_v0 = vld [vmem:[%s3455_s13 + $0x114] ss:$56 sps:$4 sm:$0xff]  }
  0xa4   : > { %2213 = vmatpush1.bf16.msra.mxu0 %v3135_v1  ;;  %1995 = vmatprep.subr.bf16.mxu1 %v3140_v2  ;;  %v3249_v1 = vld [vmem:[%s4099_s1 + $0x670] ss:$8 sps:$4 sm:$0xff]   ;;  %v3254_v2 = vld [vmem:[%s4099_s1 + $0x684] ss:$8 sps:$4 sm:$0xff]  }
  0xa5   : > { %2214 = vmatprep.subr.bf16.mxu0 %v3143_v3  ;;  %v3252_v3 = vld [vmem:[%s4099_s1 + $0x680] ss:$8 sps:$4 sm:$0xff]  }
  0xa7   : > { %1996 = vmatpush1.bf16.msra.mxu1 %v3138_v4  ;;  %v3257_v4 = vld [vmem:[%s4099_s1 + $0x694] ss:$8 sps:$4 sm:$0xff]  }
  0xa8   : > { %2215 = vmatpush1.bf16.msra.mxu0 %v3141_v5  ;;  %1997 = vmatprep.subr.bf16.mxu1 %v3146_v6  ;;  %v3255_v5 = vld [vmem:[%s4099_s1 + $0x690] ss:$8 sps:$4 sm:$0xff]   ;;  %v3260_v6 = vld [vmem:[%s4099_s1 + $0x6a4] ss:$8 sps:$4 sm:$0xff]  }
  0xa9   : > { %2216 = vmatprep.subr.bf16.mxu0 %v3149_v7  ;;  %v3258_v7 = vld [vmem:[%s4099_s1 + $0x6a0] ss:$8 sps:$4 sm:$0xff]  }
  0xab   : > { %1998 = vmatpush1.bf16.msra.mxu1 %v3144_v8  ;;  %v3263_v8 = vld [vmem:[%s4099_s1 + $0x6b4] ss:$8 sps:$4 sm:$0xff]  }
  0xac   : > { %2217 = vmatpush1.bf16.msra.mxu0 %v3147_v9  ;;  %1999 = vmatprep.subr.bf16.mxu1 %v3157_v10  ;;  %v3261_v9 = vld [vmem:[%s4099_s1 + $0x6b0] ss:$8 sps:$4 sm:$0xff]  }
  0xad   : > { %2218 = vmatprep.subr.bf16.mxu0 %v3161_v11  ;;  %v3264_v10 = vld [vmem:[%s3455_s13 + $0x30] ss:$56 sps:$4 sm:$0xff]  }
  0xae   : > { %v3267_v11 = vld [vmem:[%s3455_s13 + $0x110] ss:$56 sps:$4 sm:$0xff]  }
  0xaf   : > { %2000 = vmatpush1.bf16.msra.mxu1 %v3155_v12  ;;  %v3270_v12 = vld [vmem:[%s3455_s13 + $0xa4] ss:$56 sps:$4 sm:$0xff]  }
  0xb0   : > { %2219 = vmatpush1.bf16.msra.mxu0 %v3159_v13  ;;  %2001 = vmatprep.subr.bf16.mxu1 %v3164_v14  ;;  %v3272_v13 = vld [vmem:[%s3455_s13 + $0x184] ss:$56 sps:$4 sm:$0xff]   ;;  %v3274_v14 = vld [vmem:[%s3455_s13 + $0xa0] ss:$56 sps:$4 sm:$0xff]  }
  0xb1   : > { %2220 = vmatprep.subr.bf16.mxu0 %v3167_v15  ;;  %v3275_v15 = vld [vmem:[%s3455_s13 + $0x180] ss:$56 sps:$4 sm:$0xff]   ;;  %s2722_s13 = sshll.u32 %s4103_s24, 4 }
  0xb2   : > { %s4061_s18 = scalar_lea.vmem %s4101_s3, %s2722_s13 }
  0xb3   : > { %2002 = vmatpush1.bf16.msra.mxu1 %v3162_v16 }
  0xb4   : > { %2221 = vmatpush1.bf16.msra.mxu0 %v3165_v17  ;;  %2003 = vmatprep.subr.bf16.mxu1 %v3175_v18 }
  0xb5   : > { %2222 = vmatprep.subr.bf16.mxu0 %v3179_v19  ;;  %v454_v19 = vlaneseq }
  0xb7   : > { %2004 = vmatpush1.bf16.msra.mxu1 %v3173_v20 }
  0xb8   : > { %2223 = vmatpush1.bf16.msra.mxu0 %v3177_v21  ;;  %2005 = vmatprep.subr.bf16.mxu1 %v3182_v22  ;;  %v455_v21 = vshrl.u32 %v454_v19, 7 }
  0xb9   : > { %2224 = vmatprep.subr.bf16.mxu0 %v3185_v23 }
  0xbb   : > { %2006 = vmatpush1.bf16.msra.mxu1 %v3180_v24 }
  0xbc   : > { %2225 = vmatpush1.bf16.msra.mxu0 %v3183_v25  ;;  %2007 = vmatprep.subr.bf16.mxu1 %v3193_v26  ;;  %v456_v25 = vsub.s32 0, %v455_v21 }
  0xbd   : > { %2226 = vmatprep.subr.bf16.mxu0 %v3197_v27  ;;  %v452_v27 = vld [vmem:[%s4100_s2] sm:$0x3] }
  0xbf   : > { %2008 = vmatpush1.bf16.msra.mxu1 %v3191_v28  ;;  %v460_v28 = vsub.s32 1, %v455_v21 }
  0xc0   : > { %2227 = vmatpush1.bf16.msra.mxu0 %v3195_v29  ;;  %2009 = vmatprep.subr.bf16.mxu1 %v3200_v30  ;;  %v4041_v29 = vrot.slane %v452_v27, %v456_v25 }
  0xc1   : > { %2228 = vmatprep.subr.bf16.mxu0 %v3203_v31  ;;  %v4043_v30 = vrot.slane %v452_v27, %v460_v28 }
  0xc3   : > { %2010 = vmatpush1.bf16.msra.mxu1 %v3198_v32 }
  0xc4   : > { %2229 = vmatpush1.bf16.msra.mxu0 %v3201_v33  ;;  %2723 = vmatprep.subr.bf16.mxu1 %v3212_v34 }
  0xc5   : > { %2271 = vmatprep.subr.bf16.mxu0 %v3212_v34 }
  0xc6   : > { %2012 = vmatmul.mubr.bf16.vlgmr.msra.gmra.mrb[0].mxu1 %v3204_v35 }
  0xc7   : > { %2231 = vmatmul.mubr.bf16.vlgmr.msra.gmra.mrb[0].mxu0 %v3207_v36  ;;  %2735 = vmatpush1.bf16.msra.mxu1 %v3210_v37 }
  0xc8   : > { %2272 = vmatpush1.bf16.msra.mxu0 %v3210_v37  ;;  %2724 = vmatprep.subr.bf16.mxu1 %v3215_v38 }
  0xc9   : > { %2273 = vmatprep.subr.bf16.mxu0 %v3215_v38  ;;  %2021 = vmatprep.mubr.bf16.mxu1 %v3216_v39 }
  0xca   : > { %2240 = vmatprep.mubr.bf16.mxu0 %v3218_v40 }
  0xcb   : > { %2736 = vmatpush1.bf16.msra.mxu1 %v3213_v41 }
  0xcc   : > { %2274 = vmatpush1.bf16.msra.mxu0 %v3213_v41  ;;  %2725 = vmatprep.subr.bf16.mxu1 %v3224_v42 }
  0xcd   : > { %2275 = vmatprep.subr.bf16.mxu0 %v3224_v42 }
  0xce   : > { %2022 = vmatmul.mubr.bf16.gmra.mrb[4].mxu1 %v3220_v43 }
  0xcf   : > { %2241 = vmatmul.mubr.bf16.gmra.mrb[4].mxu0 %v3221_v44  ;;  %2737 = vmatpush1.bf16.msra.mxu1 %v3222_v45 }
  0xd0   : > { %2276 = vmatpush1.bf16.msra.mxu0 %v3222_v45  ;;  %2726 = vmatprep.subr.bf16.mxu1 %v3227_v46 }
  0xd1   : > { %2277 = vmatprep.subr.bf16.mxu0 %v3227_v46  ;;  %2031 = vmatprep.mubr.bf16.mxu1 %v3228_v47 }
  0xd2   : > { %2250 = vmatprep.mubr.bf16.mxu0 %v3230_v48 }
  0xd3   : > { %2738 = vmatpush1.bf16.msra.mxu1 %v3225_v49 }
  0xd4   : > { %2278 = vmatpush1.bf16.msra.mxu0 %v3225_v49  ;;  %2727 = vmatprep.subr.bf16.mxu1 %v3236_v50 }
  0xd5   : > { %2279 = vmatprep.subr.bf16.mxu0 %v3236_v50 }
  0xd6   : > { %2032 = vmatmul.mubr.bf16.gmra.mrb[8].mxu1 %v3232_v51 }
  0xd7   : > { %2251 = vmatmul.mubr.bf16.gmra.mrb[8].mxu0 %v3233_v52  ;;  %2739 = vmatpush1.bf16.msra.mxu1 %v3234_v53 }
  0xd8   : > { %2280 = vmatpush1.bf16.msra.mxu0 %v3234_v53  ;;  %2728 = vmatprep.subr.bf16.mxu1 %v3239_v54 }
  0xd9   : > { %2281 = vmatprep.subr.bf16.mxu0 %v3239_v54  ;;  %2041 = vmatprep.mubr.bf16.mxu1 %v3240_v55 }
  0xda   : > { %2260 = vmatprep.mubr.bf16.mxu0 %v3242_v56 }
  0xdb   : > { %2740 = vmatpush1.bf16.msra.mxu1 %v3237_v57 }
  0xdc   : > { %2282 = vmatpush1.bf16.msra.mxu0 %v3237_v57  ;;  %2729 = vmatprep.subr.bf16.mxu1 %v3248_v58 }
  0xdd   : > { %2283 = vmatprep.subr.bf16.mxu0 %v3248_v58 }
  0xde   : > { %2042 = vmatmul.mubr.bf16.gmra.mrb[12].mxu1 %v3244_v59 }
  0xdf   : > { %2261 = vmatmul.mubr.bf16.gmra.mrb[12].mxu0 %v3245_v60  ;;  %2741 = vmatpush1.bf16.msra.mxu1 %v3246_v61 }
  0xe0   : > { %2284 = vmatpush1.bf16.msra.mxu0 %v3246_v61  ;;  %2730 = vmatprep.subr.bf16.mxu1 %v3251_v62 }
  0xe1   : > { %2285 = vmatprep.subr.bf16.mxu0 %v3251_v62  ;;  %2716 = vmatprep.mubr.msk.bf16.mxu0 %vm1820_vm0, %v3266_v63 }
  0xe2   : > { %2718 = vmatprep.mubr.msk.bf16.mxu1 %vm1820_vm0, %v3269_v0 }
  0xe3   : > { %2742 = vmatpush1.bf16.msra.mxu1 %v3249_v1 }
  0xe4   : > { %2286 = vmatpush1.bf16.msra.mxu0 %v3249_v1  ;;  %2731 = vmatprep.subr.bf16.mxu1 %v3254_v2 }
  0xe5   : > { %2287 = vmatprep.subr.bf16.mxu0 %v3254_v2 }
  0xe7   : > { %2743 = vmatpush1.bf16.msra.mxu1 %v3252_v3 }
  0xe8   : > { %2288 = vmatpush1.bf16.msra.mxu0 %v3252_v3  ;;  %2732 = vmatprep.subr.bf16.mxu1 %v3257_v4 }
  0xe9   : > { %2289 = vmatprep.subr.bf16.mxu0 %v3257_v4 }
  0xeb   : > { %2744 = vmatpush1.bf16.msra.mxu1 %v3255_v5 }
  0xec   : > { %2290 = vmatpush1.bf16.msra.mxu0 %v3255_v5  ;;  %2733 = vmatprep.subr.bf16.mxu1 %v3260_v6 }
  0xed   : > { %2291 = vmatprep.subr.bf16.mxu0 %v3260_v6 }
  0xef   : > { %2745 = vmatpush1.bf16.msra.mxu1 %v3258_v7 }
  0xf0   : > { %2292 = vmatpush1.bf16.msra.mxu0 %v3258_v7  ;;  %2734 = vmatprep.subr.bf16.mxu1 %v3263_v8 }
  0xf1   : > { %2293 = vmatprep.subr.bf16.mxu0 %v3263_v8 }
  0xf3   : > { %2746 = vmatpush1.bf16.msra.mxu1 %v3261_v9 }
  0xf4   : > { %2294 = vmatpush1.bf16.msra.mxu0 %v3261_v9 }
  0xf6   : > { %2324 = vmatmul.mubr.bf16.vlgmr.msra.gmra.mrb[16].mxu1 %v3267_v11 }
  0xf7   : > { %2304 = vmatmul.mubr.bf16.vlgmr.msra.gmra.mrb[0].mxu0 %v3264_v10  ;;  %2719 = vmatprep.mubr.msk.bf16.mxu1 %vm1820_vm0, %v3272_v13 }
  0xf8   : > { %2717 = vmatprep.mubr.msk.bf16.mxu0 %vm1820_vm0, %v3270_v12 }
  0xfe   : > { %2334 = vmatmul.mubr.bf16.gmra.mrb[20].mxu1 %v3275_v15 }
  0xff   : > { %2314 = vmatmul.mubr.bf16.gmra.mrb[4].mxu0 %v3274_v14 }
 0x199   : > { %v2013_v16 = vpop.f32.mrb[0].mxu1 }
 0x19a   : > { %v2015_v17 = vpop.f32.mrb[1].mxu1  ;;  %v2747_v63 = vadd.f32 %v2013_v16, %v4041_v29 }
 0x19b   : > { %v2017_v18 = vpop.f32.mrb[2].mxu1  ;;  %v2749_v0 = vadd.f32 %v2015_v17, %v4043_v30 }
 0x19c   : > { %v2019_v20 = vpop.f32.mrb[3].mxu1  ;;  %v2751_v3 = vadd.f32 %v2017_v18, %v4041_v29 }
 0x19d   : > { %v2753_v8 = vadd.f32 %v2019_v20, %v4043_v30 }
 0x1a1   : > { %v4030_v22 = vpop.f32.mrb[4].mxu1 }
 0x1a2   : > { %v4032_v23 = vpop.f32.mrb[5].mxu1 }
 0x1a3   : > { %v4034_v24 = vpop.f32.mrb[6].mxu1 }
 0x1a4   : > { %v4036_v26 = vpop.f32.mrb[7].mxu1 }
 0x1a9   : > { %v2033_v31 = vpop.f32.mrb[8].mxu1 }
 0x1aa   : > { %v2252_v32 = vpop.f32.mrb[8].mxu0  ;;  %v2763_v33 = vadd.f32 %v2033_v31, %v4041_v29  ;;  %v2035_v34 = vpop.f32.mrb[9].mxu1 }
 0x1ab   : > { %v2254_v35 = vpop.f32.mrb[9].mxu0  ;;  %v2766_v36 = vadd.f32 %v2035_v34, %v4043_v30  ;;  %v2037_v37 = vpop.f32.mrb[10].mxu1  ;;  %v2757_v34 = vadd.f32 %v4032_v23, %v4043_v30 }
 0x1ac   : > { %v2256_v38 = vpop.f32.mrb[10].mxu0  ;;  %v2764_v39 = vadd.f32 %v2763_v33, %v2252_v32  ;;  %v2769_v40 = vadd.f32 %v2037_v37, %v4041_v29  ;;  %v2039_v41 = vpop.f32.mrb[11].mxu1  ;;  %v2755_v33 = vadd.f32 %v4030_v22, %v4041_v29  ;;  %v2759_v37 = vadd.f32 %v4034_v24, %v4041_v29 }
 0x1ad   : > { %v2258_v42 = vpop.f32.mrb[11].mxu0  ;;  %v2767_v43 = vadd.f32 %v2766_v36, %v2254_v35  ;;  %v2772_v44 = vadd.f32 %v2039_v41, %v4043_v30  ;;  %v2761_v22 = vadd.f32 %v4036_v26, %v4043_v30 }
 0x1ae   : > { %v2770_v45 = vadd.f32 %v2769_v40, %v2256_v38 }
 0x1af   : > { %v2773_v46 = vadd.f32 %v2772_v44, %v2258_v42 }
 0x1b1   : > { %v2043_v47 = vpop.f32.mrb[12].mxu1 }
 0x1b2   : > { %v2262_v48 = vpop.f32.mrb[12].mxu0  ;;  %v2775_v49 = vadd.f32 %v2043_v47, %v4041_v29  ;;  %v2045_v50 = vpop.f32.mrb[13].mxu1 }
 0x1b3   : > { %v2264_v51 = vpop.f32.mrb[13].mxu0  ;;  %v2778_v52 = vadd.f32 %v2045_v50, %v4043_v30  ;;  %v2047_v53 = vpop.f32.mrb[14].mxu1 }
 0x1b4   : > { %v2266_v54 = vpop.f32.mrb[14].mxu0  ;;  %v2776_v55 = vadd.f32 %v2775_v49, %v2262_v48  ;;  %v2781_v56 = vadd.f32 %v2047_v53, %v4041_v29  ;;  %v2049_v57 = vpop.f32.mrb[15].mxu1 }
 0x1b5   : > { %v2268_v58 = vpop.f32.mrb[15].mxu0  ;;  %v2779_v59 = vadd.f32 %v2778_v52, %v2264_v51  ;;  %v2784_v60 = vadd.f32 %v2049_v57, %v4043_v30 }
 0x1b6   : > { %v2782_v61 = vadd.f32 %v2781_v56, %v2266_v54 }
 0x1b7   : > { %v2785_v62 = vadd.f32 %v2784_v60, %v2268_v58 }
 0x1c9   : > { %v2325_v2 = vpop.f32.mrb[16].mxu1 }
 0x1ca   : > { %v2305_v1 = vpop.f32.mrb[0].mxu0  ;;  %v2765_v5 = vadd.f32 %v2764_v39, %v2325_v2  ;;  %v2327_v7 = vpop.f32.mrb[17].mxu1 }
 0x1cb   : > { %v2748_v4 = vadd.f32 %v2747_v63, %v2305_v1  ;;  %v2307_v6 = vpop.f32.mrb[1].mxu0  ;;  %v2768_v10 = vadd.f32 %v2767_v43, %v2327_v7  ;;  %v2329_v12 = vpop.f32.mrb[18].mxu1 }
 0x1cc   : > { %v2750_v9 = vadd.f32 %v2749_v0, %v2307_v6  ;;  %v2309_v11 = vpop.f32.mrb[2].mxu0  ;;  %v2352_v14 = vmax.f32 %v2765_v5, 0.0  ;;  %v2771_v16 = vadd.f32 %v2770_v45, %v2329_v12  ;;  %v2331_v18 = vpop.f32.mrb[19].mxu1 }
 0x1cd   : > { %v2344_v13 = vmax.f32 %v2748_v4, 0.0  ;;  %v2752_v15 = vadd.f32 %v2751_v3, %v2309_v11  ;;  %v2311_v17 = vpop.f32.mrb[3].mxu0  ;;  %v2353_v20 = vmax.f32 %v2768_v10, 0.0  ;;  %v2774_v25 = vadd.f32 %v2773_v46, %v2331_v18 }
 0x1ce   : > { %v2345_v19 = vmax.f32 %v2750_v9, 0.0  ;;  %v2754_v21 = vadd.f32 %v2753_v8, %v2311_v17  ;;  %2368 = vst [vmem:[%s4061_s18 + $0x40] sm:$0xff] %v2352_v14  ;;  %v2354_v28 = vmax.f32 %v2771_v16, 0.0 }
 0x1cf   : > { %2360 = vst [vmem:[%s4061_s18] sm:$0xff] %v2344_v13  ;;  %v2346_v27 = vmax.f32 %v2752_v15, 0.0  ;;  %2369 = vst.msk [vmem:[%s4061_s18 + $0x48] sm:$0xff] %vm1820_vm0, %v2353_v20  ;;  %v2355_v32 = vmax.f32 %v2774_v25, 0.0 }
 0x1d0   : > { %2361 = vst.msk [vmem:[%s4061_s18 + $0x8] sm:$0xff] %vm1820_vm0, %v2345_v19  ;;  %v2347_v31 = vmax.f32 %v2754_v21, 0.0  ;;  %2370 = vst [vmem:[%s4061_s18 + $0x50] sm:$0xff] %v2354_v28 }
 0x1d1   : > { %2362 = vst [vmem:[%s4061_s18 + $0x10] sm:$0xff] %v2346_v27  ;;  %2371 = vst.msk [vmem:[%s4061_s18 + $0x58] sm:$0xff] %vm1820_vm0, %v2355_v32  ;;  %v2335_v36 = vpop.f32.mrb[20].mxu1 }
 0x1d2   : > { %2363 = vst.msk [vmem:[%s4061_s18 + $0x18] sm:$0xff] %vm1820_vm0, %v2347_v31  ;;  %v2315_v35 = vpop.f32.mrb[4].mxu0  ;;  %v2777_v39 = vadd.f32 %v2776_v55, %v2335_v36  ;;  %v2337_v41 = vpop.f32.mrb[21].mxu1 }
 0x1d3   : > { %v2756_v38 = vadd.f32 %v2755_v33, %v2315_v35  ;;  %v2317_v40 = vpop.f32.mrb[5].mxu0  ;;  %v2780_v23 = vadd.f32 %v2779_v59, %v2337_v41  ;;  %v2339_v44 = vpop.f32.mrb[22].mxu1 }
 0x1d4   : > { %v2758_v42 = vadd.f32 %v2757_v34, %v2317_v40  ;;  %v2319_v43 = vpop.f32.mrb[6].mxu0  ;;  %v2356_v46 = vmax.f32 %v2777_v39, 0.0  ;;  %v2783_v24 = vadd.f32 %v2782_v61, %v2339_v44  ;;  %v2341_v48 = vpop.f32.mrb[23].mxu1 }
 0x1d5   : > { %v2348_v45 = vmax.f32 %v2756_v38, 0.0  ;;  %v2760_v47 = vadd.f32 %v2759_v37, %v2319_v43  ;;  %v2321_v29 = vpop.f32.mrb[7].mxu0  ;;  %v2357_v50 = vmax.f32 %v2780_v23, 0.0  ;;  %v2786_v30 = vadd.f32 %v2785_v62, %v2341_v48 }
 0x1d6   : > { %v2349_v49 = vmax.f32 %v2758_v42, 0.0  ;;  %v2762_v26 = vadd.f32 %v2761_v22, %v2321_v29  ;;  %2372 = vst [vmem:[%s4061_s18 + $0x60] sm:$0xff] %v2356_v46  ;;  %v2358_v52 = vmax.f32 %v2783_v24, 0.0 }
 0x1d7   : > { %2364 = vst [vmem:[%s4061_s18 + $0x20] sm:$0xff] %v2348_v45  ;;  %v2350_v51 = vmax.f32 %v2760_v47, 0.0  ;;  %2373 = vst.msk [vmem:[%s4061_s18 + $0x68] sm:$0xff] %vm1820_vm0, %v2357_v50  ;;  %v2359_v54 = vmax.f32 %v2786_v30, 0.0 }
 0x1d8   : > { %2365 = vst.msk [vmem:[%s4061_s18 + $0x28] sm:$0xff] %vm1820_vm0, %v2349_v49  ;;  %v2351_v53 = vmax.f32 %v2762_v26, 0.0  ;;  %2374 = vst [vmem:[%s4061_s18 + $0x70] sm:$0xff] %v2358_v52 }
 0x1d9   : > { %2366 = vst [vmem:[%s4061_s18 + $0x30] sm:$0xff] %v2350_v51  ;;  %2375 = vst.msk [vmem:[%s4061_s18 + $0x78] sm:$0xff] %vm1820_vm0, %v2359_v54 }
 0x1da   : > { %2367 = vst.msk [vmem:[%s4061_s18 + $0x38] sm:$0xff] %vm1820_vm0, %v2351_v53 }
 0x1db PF: > { %s13_s12 = sadd.s32 1, %s3282_s12  }
 0x1dc   : > { %p10_p4 = scmp.ge.s32.totalorder %s13_s12, 4  }
 0x1de   :  { %12 = sbr.rel (!%p10_p4) target bundleno = 1 (0x1), region = 62 }

// kernel: inception_d_forward.11
= control target key start
LH: loop header
LB: loop body
LE: loop exit
PB: predicated region body
PF: predicated region fallthrough
CT: control target
= control target key end

     0   :  { %s789_s6 = smov 0   ;;  %s791_s7 = smov 0   ;;  %s1162_s0 = inlined_call_operand.vmem [shape: f32[9,128,16], index: 0, kind: input, shape index: {}]   ;;  %s1163_s1 = inlined_call_operand.vmem [shape: f32[128,16], index: 1, kind: output, shape index: {}]  }
   0x1   :  { %s793_s8 = smov 0  }
   0x2 LB: > { %s717_s9 = sadd.s32 4294967295, %s777_s8   ;;  %s806_s10 = sadd.s32 1, %s777_s8   ;;  %s777_s8 = sphi %s793_s8, %s1166_s8   ;;  %s773_s7 = sphi %s791_s7, %s1165_s7   ;;  %s769_s6 = sphi %s789_s6, %s1164_s6  }
   0x3   : > { %s15_s11 = ssub.s32 %s777_s8, %s806_s10  ;;  %s18_s12 = sadd.s32 1, %s773_s7 }
   0x4   : > { %p16_p0 = scmp.eq.s32.totalorder %s15_s11, 0  ;;  %p25_p1 = scmp.ne.s32.totalorder %s773_s7, %s769_s6 }
   0x5   : > { %p26_p2 = scmp.eq.s32.totalorder %s777_s8, 0  ;;  %p720_p4 = scmp.ge.s32.totalorder %s777_s8, 2 }
   0x6   : > { %s815_s13 = scalar_select %p16_p0, %s773_s7, %s18_s12  }
   0x7   : > { %p27_p3 = por %p26_p2, %p25_p1  ;;  %77 = sbr.rel (%p720_p4) target bundleno = 55 (0x37), region = 16 }
   0xe   : > { %80 = sbr.rel (!%p27_p3) target bundleno = 55 (0x37), region = 20  ;;  %s82_s14 = sand.u32 (%p27_p3), 1, %s773_s7  }
   0xf   : > { %s728_s15 = sshll.u32 (%p27_p3), %s777_s8, 6  ;;  %s729_s16 = smul.u32 (%p27_p3), 576, %s82_s14 }
  0x10   : > { %s823_s19 = scalar_lea.vmem (%p27_p3), %s1162_s0, %s728_s15 }
  0x11   : > { %v257_v0 = vld [vmem:[%s823_s19] sm:$0xff] (%p27_p3)  ;;  %v259_v1 = vld [vmem:[%s823_s19 + $0x8] sm:$0xff] (%p27_p3)  ;;  %v261_v2 = vld [vmem:[%s823_s19 + $0x10] sm:$0xff] (%p27_p3)  ;;  %s831_s20 = scalar_lea.vmem (%p27_p3), [#allocation2], %s729_s16 }
  0x12   : > { %v263_v3 = vld [vmem:[%s823_s19 + $0x18] sm:$0xff] (%p27_p3)  ;;  %v265_v4 = vld [vmem:[%s823_s19 + $0x20] sm:$0xff] (%p27_p3)  ;;  %v267_v5 = vld [vmem:[%s823_s19 + $0x28] sm:$0xff] (%p27_p3)  ;;  %258 = vst [vmem:[%s831_s20] sm:$0xff] (%p27_p3), %v257_v0 }
  0x13   : > { %260 = vst [vmem:[%s831_s20 + $0x8] sm:$0xff] (%p27_p3), %v259_v1  ;;  %262 = vst [vmem:[%s831_s20 + $0x10] sm:$0xff] (%p27_p3), %v261_v2  ;;  %v269_v6 = vld [vmem:[%s823_s19 + $0x30] sm:$0xff] (%p27_p3)  ;;  %v271_v7 = vld [vmem:[%s823_s19 + $0x38] sm:$0xff] (%p27_p3) }
  0x14   : > { %264 = vst [vmem:[%s831_s20 + $0x18] sm:$0xff] (%p27_p3), %v263_v3  ;;  %266 = vst [vmem:[%s831_s20 + $0x20] sm:$0xff] (%p27_p3), %v265_v4  ;;  %v273_v8 = vld [vmem:[%s823_s19 + $0x80] sm:$0xff] (%p27_p3)  ;;  %v275_v9 = vld [vmem:[%s823_s19 + $0x88] sm:$0xff] (%p27_p3) }
  0x15   : > { %268 = vst [vmem:[%s831_s20 + $0x28] sm:$0xff] %v267_v5  ;;  %270 = vst [vmem:[%s831_s20 + $0x30] sm:$0xff] %v269_v6  ;;  %v277_v10 = vld [vmem:[%s823_s19 + $0x90] sm:$0xff]  ;;  %v279_v11 = vld [vmem:[%s823_s19 + $0x98] sm:$0xff] }
  0x16   : > { %272 = vst [vmem:[%s831_s20 + $0x38] sm:$0xff] %v271_v7  ;;  %274 = vst [vmem:[%s831_s20 + $0x40] sm:$0xff] %v273_v8  ;;  %v281_v12 = vld [vmem:[%s823_s19 + $0xa0] sm:$0xff]  ;;  %v283_v13 = vld [vmem:[%s823_s19 + $0xa8] sm:$0xff] }
  0x17   : > { %276 = vst [vmem:[%s831_s20 + $0x48] sm:$0xff] %v275_v9  ;;  %278 = vst [vmem:[%s831_s20 + $0x50] sm:$0xff] %v277_v10  ;;  %v285_v14 = vld [vmem:[%s823_s19 + $0xb0] sm:$0xff]  ;;  %v287_v15 = vld [vmem:[%s823_s19 + $0xb8] sm:$0xff] }
  0x18   : > { %280 = vst [vmem:[%s831_s20 + $0x58] sm:$0xff] %v279_v11  ;;  %282 = vst [vmem:[%s831_s20 + $0x60] sm:$0xff] %v281_v12  ;;  %v289_v16 = vld [vmem:[%s823_s19 + $0x100] sm:$0xff]  ;;  %v291_v17 = vld [vmem:[%s823_s19 + $0x108] sm:$0xff] }
  0x19   : > { %284 = vst [vmem:[%s831_s20 + $0x68] sm:$0xff] %v283_v13  ;;  %286 = vst [vmem:[%s831_s20 + $0x70] sm:$0xff] %v285_v14  ;;  %v293_v18 = vld [vmem:[%s823_s19 + $0x110] sm:$0xff]  ;;  %v295_v19 = vld [vmem:[%s823_s19 + $0x118] sm:$0xff] }
  0x1a   : > { %288 = vst [vmem:[%s831_s20 + $0x78] sm:$0xff] %v287_v15  ;;  %290 = vst [vmem:[%s831_s20 + $0x80] sm:$0xff] %v289_v16  ;;  %v297_v20 = vld [vmem:[%s823_s19 + $0x120] sm:$0xff]  ;;  %v299_v21 = vld [vmem:[%s823_s19 + $0x128] sm:$0xff] }
  0x1b   : > { %292 = vst [vmem:[%s831_s20 + $0x88] sm:$0xff] %v291_v17  ;;  %294 = vst [vmem:[%s831_s20 + $0x90] sm:$0xff] %v293_v18  ;;  %v301_v22 = vld [vmem:[%s823_s19 + $0x130] sm:$0xff]  ;;  %v303_v23 = vld [vmem:[%s823_s19 + $0x138] sm:$0xff] }
  0x1c   : > { %296 = vst [vmem:[%s831_s20 + $0x98] sm:$0xff] %v295_v19  ;;  %298 = vst [vmem:[%s831_s20 + $0xa0] sm:$0xff] %v297_v20  ;;  %v305_v24 = vld [vmem:[%s823_s19 + $0x180] sm:$0xff]  ;;  %v307_v25 = vld [vmem:[%s823_s19 + $0x188] sm:$0xff] }
  0x1d   : > { %300 = vst [vmem:[%s831_s20 + $0xa8] sm:$0xff] %v299_v21  ;;  %302 = vst [vmem:[%s831_s20 + $0xb0] sm:$0xff] %v301_v22  ;;  %v309_v26 = vld [vmem:[%s823_s19 + $0x190] sm:$0xff]  ;;  %v311_v27 = vld [vmem:[%s823_s19 + $0x198] sm:$0xff] }
  0x1e   : > { %304 = vst [vmem:[%s831_s20 + $0xb8] sm:$0xff] %v303_v23  ;;  %306 = vst [vmem:[%s831_s20 + $0xc0] sm:$0xff] %v305_v24  ;;  %v313_v28 = vld [vmem:[%s823_s19 + $0x1a0] sm:$0xff]  ;;  %v315_v29 = vld [vmem:[%s823_s19 + $0x1a8] sm:$0xff] }
  0x1f   : > { %308 = vst [vmem:[%s831_s20 + $0xc8] sm:$0xff] %v307_v25  ;;  %310 = vst [vmem:[%s831_s20 + $0xd0] sm:$0xff] %v309_v26  ;;  %v317_v30 = vld [vmem:[%s823_s19 + $0x1b0] sm:$0xff]  ;;  %v319_v31 = vld [vmem:[%s823_s19 + $0x1b8] sm:$0xff] }
  0x20   : > { %312 = vst [vmem:[%s831_s20 + $0xd8] sm:$0xff] %v311_v27  ;;  %314 = vst [vmem:[%s831_s20 + $0xe0] sm:$0xff] %v313_v28  ;;  %v321_v32 = vld [vmem:[%s823_s19 + $0x200] sm:$0xff]  ;;  %v323_v33 = vld [vmem:[%s823_s19 + $0x208] sm:$0xff] }
  0x21   : > { %316 = vst [vmem:[%s831_s20 + $0xe8] sm:$0xff] %v315_v29  ;;  %318 = vst [vmem:[%s831_s20 + $0xf0] sm:$0xff] %v317_v30  ;;  %v325_v34 = vld [vmem:[%s823_s19 + $0x210] sm:$0xff]  ;;  %v327_v35 = vld [vmem:[%s823_s19 + $0x218] sm:$0xff] }
  0x22   : > { %320 = vst [vmem:[%s831_s20 + $0xf8] sm:$0xff] %v319_v31  ;;  %322 = vst [vmem:[%s831_s20 + $0x100] sm:$0xff] %v321_v32  ;;  %v329_v36 = vld [vmem:[%s823_s19 + $0x220] sm:$0xff]  ;;  %v331_v37 = vld [vmem:[%s823_s19 + $0x228] sm:$0xff] }
  0x23   : > { %324 = vst [vmem:[%s831_s20 + $0x108] sm:$0xff] %v323_v33  ;;  %326 = vst [vmem:[%s831_s20 + $0x110] sm:$0xff] %v325_v34  ;;  %v333_v38 = vld [vmem:[%s823_s19 + $0x230] sm:$0xff]  ;;  %v335_v39 = vld [vmem:[%s823_s19 + $0x238] sm:$0xff] }
  0x24   : > { %328 = vst [vmem:[%s831_s20 + $0x118] sm:$0xff] %v327_v35  ;;  %330 = vst [vmem:[%s831_s20 + $0x120] sm:$0xff] %v329_v36  ;;  %v337_v40 = vld [vmem:[%s823_s19 + $0x280] sm:$0xff]  ;;  %v339_v41 = vld [vmem:[%s823_s19 + $0x288] sm:$0xff] }
  0x25   : > { %332 = vst [vmem:[%s831_s20 + $0x128] sm:$0xff] %v331_v37  ;;  %334 = vst [vmem:[%s831_s20 + $0x130] sm:$0xff] %v333_v38  ;;  %v341_v42 = vld [vmem:[%s823_s19 + $0x290] sm:$0xff]  ;;  %v343_v43 = vld [vmem:[%s823_s19 + $0x298] sm:$0xff] }
  0x26   : > { %336 = vst [vmem:[%s831_s20 + $0x138] sm:$0xff] %v335_v39  ;;  %338 = vst [vmem:[%s831_s20 + $0x140] sm:$0xff] %v337_v40  ;;  %v345_v44 = vld [vmem:[%s823_s19 + $0x2a0] sm:$0xff]  ;;  %v347_v45 = vld [vmem:[%s823_s19 + $0x2a8] sm:$0xff] }
  0x27   : > { %340 = vst [vmem:[%s831_s20 + $0x148] sm:$0xff] %v339_v41  ;;  %342 = vst [vmem:[%s831_s20 + $0x150] sm:$0xff] %v341_v42  ;;  %v349_v46 = vld [vmem:[%s823_s19 + $0x2b0] sm:$0xff]  ;;  %v351_v47 = vld [vmem:[%s823_s19 + $0x2b8] sm:$0xff] }
  0x28   : > { %344 = vst [vmem:[%s831_s20 + $0x158] sm:$0xff] %v343_v43  ;;  %346 = vst [vmem:[%s831_s20 + $0x160] sm:$0xff] %v345_v44  ;;  %v353_v48 = vld [vmem:[%s823_s19 + $0x300] sm:$0xff]  ;;  %v355_v49 = vld [vmem:[%s823_s19 + $0x308] sm:$0xff] }
  0x29   : > { %348 = vst [vmem:[%s831_s20 + $0x168] sm:$0xff] %v347_v45  ;;  %350 = vst [vmem:[%s831_s20 + $0x170] sm:$0xff] %v349_v46  ;;  %v357_v50 = vld [vmem:[%s823_s19 + $0x310] sm:$0xff]  ;;  %v359_v51 = vld [vmem:[%s823_s19 + $0x318] sm:$0xff] }
  0x2a   : > { %352 = vst [vmem:[%s831_s20 + $0x178] sm:$0xff] %v351_v47  ;;  %354 = vst [vmem:[%s831_s20 + $0x180] sm:$0xff] %v353_v48  ;;  %v361_v52 = vld [vmem:[%s823_s19 + $0x320] sm:$0xff]  ;;  %v363_v53 = vld [vmem:[%s823_s19 + $0x328] sm:$0xff] }
  0x2b   : > { %356 = vst [vmem:[%s831_s20 + $0x188] sm:$0xff] %v355_v49  ;;  %358 = vst [vmem:[%s831_s20 + $0x190] sm:$0xff] %v357_v50  ;;  %v365_v54 = vld [vmem:[%s823_s19 + $0x330] sm:$0xff]  ;;  %v367_v55 = vld [vmem:[%s823_s19 + $0x338] sm:$0xff] }
  0x2c   : > { %360 = vst [vmem:[%s831_s20 + $0x198] sm:$0xff] %v359_v51  ;;  %362 = vst [vmem:[%s831_s20 + $0x1a0] sm:$0xff] %v361_v52  ;;  %v369_v56 = vld [vmem:[%s823_s19 + $0x380] sm:$0xff]  ;;  %v371_v57 = vld [vmem:[%s823_s19 + $0x388] sm:$0xff] }
  0x2d   : > { %364 = vst [vmem:[%s831_s20 + $0x1a8] sm:$0xff] %v363_v53  ;;  %366 = vst [vmem:[%s831_s20 + $0x1b0] sm:$0xff] %v365_v54  ;;  %v373_v58 = vld [vmem:[%s823_s19 + $0x390] sm:$0xff]  ;;  %v375_v59 = vld [vmem:[%s823_s19 + $0x398] sm:$0xff] }
  0x2e   : > { %368 = vst [vmem:[%s831_s20 + $0x1b8] sm:$0xff] %v367_v55  ;;  %370 = vst [vmem:[%s831_s20 + $0x1c0] sm:$0xff] %v369_v56  ;;  %v377_v60 = vld [vmem:[%s823_s19 + $0x3a0] sm:$0xff]  ;;  %v379_v61 = vld [vmem:[%s823_s19 + $0x3a8] sm:$0xff] }
  0x2f   : > { %372 = vst [vmem:[%s831_s20 + $0x1c8] sm:$0xff] %v371_v57  ;;  %374 = vst [vmem:[%s831_s20 + $0x1d0] sm:$0xff] %v373_v58  ;;  %v381_v62 = vld [vmem:[%s823_s19 + $0x3b0] sm:$0xff]  ;;  %v383_v63 = vld [vmem:[%s823_s19 + $0x3b8] sm:$0xff] }
  0x30   : > { %376 = vst [vmem:[%s831_s20 + $0x1d8] sm:$0xff] %v375_v59  ;;  %378 = vst [vmem:[%s831_s20 + $0x1e0] sm:$0xff] %v377_v60  ;;  %v385_v0 = vld [vmem:[%s823_s19 + $0x400] sm:$0xff]  ;;  %v387_v1 = vld [vmem:[%s823_s19 + $0x408] sm:$0xff] }
  0x31   : > { %380 = vst [vmem:[%s831_s20 + $0x1e8] sm:$0xff] %v379_v61  ;;  %382 = vst [vmem:[%s831_s20 + $0x1f0] sm:$0xff] %v381_v62  ;;  %v389_v2 = vld [vmem:[%s823_s19 + $0x410] sm:$0xff]  ;;  %v391_v3 = vld [vmem:[%s823_s19 + $0x418] sm:$0xff] }
  0x32   : > { %384 = vst [vmem:[%s831_s20 + $0x1f8] sm:$0xff] %v383_v63  ;;  %386 = vst [vmem:[%s831_s20 + $0x200] sm:$0xff] %v385_v0  ;;  %v393_v4 = vld [vmem:[%s823_s19 + $0x420] sm:$0xff]  ;;  %v395_v5 = vld [vmem:[%s823_s19 + $0x428] sm:$0xff] }
  0x33   : > { %388 = vst [vmem:[%s831_s20 + $0x208] sm:$0xff] %v387_v1  ;;  %390 = vst [vmem:[%s831_s20 + $0x210] sm:$0xff] %v389_v2  ;;  %v397_v6 = vld [vmem:[%s823_s19 + $0x430] sm:$0xff]  ;;  %v399_v7 = vld [vmem:[%s823_s19 + $0x438] sm:$0xff] }
  0x34   : > { %392 = vst [vmem:[%s831_s20 + $0x218] sm:$0xff] %v391_v3  ;;  %394 = vst [vmem:[%s831_s20 + $0x220] sm:$0xff] %v393_v4 }
  0x35   : > { %396 = vst [vmem:[%s831_s20 + $0x228] sm:$0xff] %v395_v5  ;;  %398 = vst [vmem:[%s831_s20 + $0x230] sm:$0xff] %v397_v6 }
  0x36   : > { %400 = vst [vmem:[%s831_s20 + $0x238] sm:$0xff] %v399_v7 }
  0x37 PF: > { %p723_p5 = scmp.ge.s32.totalorder %s777_s8, 1  ;;  %p405_p6 = scmp.lt.s32.totalorder %s777_s8, 3 }
  0x39   : > { %p406_p7 = pnand %p723_p5, %p405_p6 }
  0x3a   : > { %s412_s21 = sand.u32 (!%p406_p7), 1, %s769_s6   ;;  %vm510_vm0 = vcmask (!%p406_p7), 130048   ;;  %s981_s24 = sshll.u32 (!%p406_p7), %s717_s9, 3 }
  0x3b   : > { %409 = sbr.rel (%p406_p7) target bundleno = 108 (0x6c), region = 58  ;;  %p433_p8 = scmp.lt.s32.totalorder (!%p406_p7), %s981_s24, 15 }
  0x3c   : > { %s730_s22 = smul.u32 (!%p406_p7), 576, %s412_s21 }
  0x3e   : > { %s974_s23 = scalar_lea.vmem (!%p406_p7), [#allocation2], %s730_s22 }
  0x3f   : > { %v438_v8 = vld [vmem:[%s974_s23] sm:$0xff] (!%p406_p7)  ;;  %v439_v21 = vld [vmem:[%s974_s23 + $0x8] sm:$0xff] (!%p406_p7)  ;;  %v440_v41 = vld [vmem:[%s974_s23 + $0x10] sm:$0xff] (!%p406_p7) }
  0x40   : > { %v446_v9 = vld [vmem:[%s974_s23 + $0x40] sm:$0xff] (!%p406_p7)  ;;  %v511_v12 = vsel (!%p406_p7), %vm510_vm0, %v438_v8, -inf  ;;  %v447_v22 = vld [vmem:[%s974_s23 + $0x48] sm:$0xff] (!%p406_p7)  ;;  %v528_v27 = vsel (!%p406_p7), %vm510_vm0, %v439_v21, -inf  ;;  %v448_v42 = vld [vmem:[%s974_s23 + $0x50] sm:$0xff] (!%p406_p7)  ;;  %v545_v48 = vsel (!%p406_p7), %vm510_vm0, %v440_v41, -inf }
  0x41   : > { %v454_v10 = vld [vmem:[%s974_s23 + $0x80] sm:$0xff] (!%p406_p7)  ;;  %v512_v13 = vsel (!%p406_p7), %vm510_vm0, %v446_v9, -inf  ;;  %v455_v25 = vld [vmem:[%s974_s23 + $0x88] sm:$0xff] (!%p406_p7)  ;;  %v529_v28 = vsel (!%p406_p7), %vm510_vm0, %v447_v22, -inf  ;;  %v456_v45 = vld [vmem:[%s974_s23 + $0x90] sm:$0xff] (!%p406_p7)  ;;  %v546_v49 = vsel (!%p406_p7), %vm510_vm0, %v448_v42, -inf }
  0x42   : > { %v462_v11 = vld [vmem:[%s974_s23 + $0xc0] sm:$0xff]  ;;  %v514_v14 = vsel %vm510_vm0, %v454_v10, -inf  ;;  %v513_v18 = vmax.f32 %v511_v12, %v512_v13  ;;  %v463_v26 = vld [vmem:[%s974_s23 + $0xc8] sm:$0xff]  ;;  %v530_v34 = vmax.f32 %v528_v27, %v529_v28  ;;  %v531_v35 = vsel %vm510_vm0, %v455_v25, -inf  ;;  %v464_v46 = vld [vmem:[%s974_s23 + $0xd0] sm:$0xff]  ;;  %s1168_s24 = smov (!%p433_p8, %s981_s24), 15 }
  0x43   : > { %v470_v15 = vld [vmem:[%s974_s23 + $0x100] sm:$0xff]  ;;  %v516_v20 = vsel %vm510_vm0, %v462_v11, -inf  ;;  %v471_v31 = vld [vmem:[%s974_s23 + $0x108] sm:$0xff]  ;;  %v533_v40 = vsel %vm510_vm0, %v463_v26, -inf  ;;  %v472_v47 = vld [vmem:[%s974_s23 + $0x110] sm:$0xff]  ;;  %v547_v53 = vmax.f32 %v545_v48, %v546_v49  ;;  %v548_v54 = vsel %vm510_vm0, %v456_v45, -inf }
  0x44   : > { %v478_v16 = vld [vmem:[%s974_s23 + $0x140] sm:$0xff]  ;;  %v515_v24 = vmax.f32 %v513_v18, %v514_v14  ;;  %v518_v29 = vsel %vm510_vm0, %v470_v15, -inf  ;;  %v479_v32 = vld [vmem:[%s974_s23 + $0x148] sm:$0xff]  ;;  %v532_v44 = vmax.f32 %v530_v34, %v531_v35  ;;  %v535_v52 = vsel %vm510_vm0, %v471_v31, -inf  ;;  %v480_v58 = vld [vmem:[%s974_s23 + $0x150] sm:$0xff]  ;;  %s725_s25 = sshll.u32 %s1168_s24, 3 }
  0x45   : > { %v486_v17 = vld [vmem:[%s974_s23 + $0x180] sm:$0xff]  ;;  %v520_v30 = vsel %vm510_vm0, %v478_v16, -inf  ;;  %v487_v33 = vld [vmem:[%s974_s23 + $0x188] sm:$0xff]  ;;  %v537_v56 = vsel %vm510_vm0, %v479_v32, -inf  ;;  %v550_v59 = vsel %vm510_vm0, %v464_v46, -inf  ;;  %v441_v60 = vld [vmem:[%s974_s23 + $0x18] sm:$0xff]  ;;  %v549_v1 = vmax.f32 %v547_v53, %v548_v54  ;;  %s1056_s28 = scalar_lea.vmem %s1163_s1, %s725_s25 }
  0x46   : > { %v494_v19 = vld [vmem:[%s974_s23 + $0x1c0] sm:$0xff]  ;;  %v517_v36 = vmax.f32 %v515_v24, %v516_v20  ;;  %v522_v37 = vsel %vm510_vm0, %v486_v17, -inf  ;;  %v495_v39 = vld [vmem:[%s974_s23 + $0x1c8] sm:$0xff]  ;;  %v534_v55 = vmax.f32 %v532_v44, %v533_v40  ;;  %v539_v57 = vsel %vm510_vm0, %v487_v33, -inf  ;;  %v449_v61 = vld [vmem:[%s974_s23 + $0x58] sm:$0xff] }
  0x47   : > { %v502_v23 = vld [vmem:[%s974_s23 + $0x200] sm:$0xff]  ;;  %v524_v38 = vsel %vm510_vm0, %v494_v19, -inf  ;;  %v503_v51 = vld [vmem:[%s974_s23 + $0x208] sm:$0xff]  ;;  %v541_v63 = vsel %vm510_vm0, %v495_v39, -inf  ;;  %v488_v0 = vld [vmem:[%s974_s23 + $0x190] sm:$0xff]  ;;  %v552_v2 = vsel %vm510_vm0, %v472_v47, -inf  ;;  %v551_v12 = vmax.f32 %v549_v1, %v550_v59 }
  0x48   : > { %v526_v43 = vsel %vm510_vm0, %v502_v23, -inf  ;;  %v519_v50 = vmax.f32 %v517_v36, %v518_v29  ;;  %v457_v3 = vld [vmem:[%s974_s23 + $0x98] sm:$0xff]  ;;  %v536_v5 = vmax.f32 %v534_v55, %v535_v52  ;;  %v496_v6 = vld [vmem:[%s974_s23 + $0x1d0] sm:$0xff]  ;;  %v562_v7 = vsel %vm510_vm0, %v441_v60, -inf  ;;  %v442_v15 = vld [vmem:[%s974_s23 + $0x20] sm:$0xff] }
  0x49   : > { %v465_v4 = vld [vmem:[%s974_s23 + $0xd8] sm:$0xff]  ;;  %v563_v8 = vsel %vm510_vm0, %v449_v61, -inf  ;;  %v565_v9 = vsel %vm510_vm0, %v457_v3, -inf  ;;  %v543_v11 = vsel %vm510_vm0, %v503_v51, -inf  ;;  %v450_v16 = vld [vmem:[%s974_s23 + $0x60] sm:$0xff]  ;;  %v554_v18 = vsel %vm510_vm0, %v480_v58, -inf }
  0x4a   : > { %v521_v62 = vmax.f32 %v519_v50, %v520_v30  ;;  %v473_v13 = vld [vmem:[%s974_s23 + $0x118] sm:$0xff]  ;;  %v564_v14 = vmax.f32 %v562_v7, %v563_v8  ;;  %v538_v17 = vmax.f32 %v536_v5, %v537_v56  ;;  %v556_v19 = vsel %vm510_vm0, %v488_v0, -inf  ;;  %v458_v26 = vld [vmem:[%s974_s23 + $0xa0] sm:$0xff]  ;;  %v504_v33 = vld [vmem:[%s974_s23 + $0x210] sm:$0xff] }
  0x4b   : > { %v567_v20 = vsel %vm510_vm0, %v465_v4, -inf  ;;  %v553_v22 = vmax.f32 %v551_v12, %v552_v2  ;;  %v558_v23 = vsel %vm510_vm0, %v496_v6, -inf  ;;  %v481_v24 = vld [vmem:[%s974_s23 + $0x158] sm:$0xff]  ;;  %v466_v27 = vld [vmem:[%s974_s23 + $0xe0] sm:$0xff]  ;;  %v569_v29 = vsel %vm510_vm0, %v473_v13, -inf  ;;  %v451_v49 = vld [vmem:[%s974_s23 + $0x68] sm:$0xff] }
  0x4c   : > { %v523_v10 = vmax.f32 %v521_v62, %v522_v37  ;;  %v566_v25 = vmax.f32 %v564_v14, %v565_v9  ;;  %v540_v28 = vmax.f32 %v538_v17, %v539_v57  ;;  %v579_v30 = vsel %vm510_vm0, %v442_v15, -inf  ;;  %v489_v35 = vld [vmem:[%s974_s23 + $0x198] sm:$0xff]  ;;  %v474_v37 = vld [vmem:[%s974_s23 + $0x120] sm:$0xff]  ;;  %v459_v50 = vld [vmem:[%s974_s23 + $0xa8] sm:$0xff] }
  0x4d   : > { %v580_v31 = vsel %vm510_vm0, %v450_v16, -inf  ;;  %v555_v34 = vmax.f32 %v553_v22, %v554_v18  ;;  %v497_v40 = vld [vmem:[%s974_s23 + $0x1d8] sm:$0xff]  ;;  %v571_v41 = vsel %vm510_vm0, %v481_v24, -inf  ;;  %v582_v42 = vsel %vm510_vm0, %v458_v26, -inf  ;;  %v482_v47 = vld [vmem:[%s974_s23 + $0x160] sm:$0xff]  ;;  %v467_v60 = vld [vmem:[%s974_s23 + $0xe8] sm:$0xff] }
  0x4e   : > { %v525_v21 = vmax.f32 %v523_v10, %v524_v38  ;;  %v568_v36 = vmax.f32 %v566_v25, %v567_v20  ;;  %v581_v38 = vmax.f32 %v579_v30, %v580_v31  ;;  %v542_v39 = vmax.f32 %v540_v28, %v541_v63  ;;  %v505_v56 = vld [vmem:[%s974_s23 + $0x218] sm:$0xff]  ;;  %v490_v58 = vld [vmem:[%s974_s23 + $0x1a0] sm:$0xff]  ;;  %v444_v3 = vld [vmem:[%s974_s23 + $0x30] sm:$0xff] }
  0x4f   : > { %v584_v44 = vsel %vm510_vm0, %v466_v27, -inf  ;;  %v557_v45 = vmax.f32 %v555_v34, %v556_v19  ;;  %v560_v52 = vsel %vm510_vm0, %v504_v33, -inf  ;;  %v573_v53 = vsel %vm510_vm0, %v489_v35, -inf  ;;  %v498_v63 = vld [vmem:[%s974_s23 + $0x1e0] sm:$0xff]  ;;  %v475_v7 = vld [vmem:[%s974_s23 + $0x128] sm:$0xff]  ;;  %v452_v9 = vld [vmem:[%s974_s23 + $0x70] sm:$0xff] }
  0x50   : > { %v527_v32 = vmax.f32 %v525_v21, %v526_v43  ;;  %v443_v43 = vld [vmem:[%s974_s23 + $0x28] sm:$0xff]  ;;  %v570_v46 = vmax.f32 %v568_v36, %v569_v29  ;;  %v583_v48 = vmax.f32 %v581_v38, %v582_v42  ;;  %v544_v51 = vmax.f32 %v542_v39, %v543_v11  ;;  %v460_v10 = vld [vmem:[%s974_s23 + $0xb0] sm:$0xff]  ;;  %v506_v15 = vld [vmem:[%s974_s23 + $0x220] sm:$0xff] }
  0x51   : > { %v586_v54 = vsel %vm510_vm0, %v474_v37, -inf  ;;  %v559_v55 = vmax.f32 %v557_v45, %v558_v23  ;;  %v596_v61 = vsel %vm510_vm0, %v443_v43, -inf  ;;  %v575_v62 = vsel %vm510_vm0, %v497_v40, -inf  ;;  %v483_v17 = vld [vmem:[%s974_s23 + $0x168] sm:$0xff]  ;;  %v468_v19 = vld [vmem:[%s974_s23 + $0xf0] sm:$0xff]  ;;  %v445_v26 = vld [vmem:[%s974_s23 + $0x38] sm:$0xff] }
  0x52   : > { %647 = vst.msk [vmem:[%s1056_s28] sm:$0xff] %vm510_vm0, %v527_v32  ;;  %v572_v57 = vmax.f32 %v570_v46, %v571_v41  ;;  %v585_v59 = vmax.f32 %v583_v48, %v584_v44  ;;  %648 = vst.msk [vmem:[%s1056_s28 + $0x8] sm:$0xff] %vm510_vm0, %v544_v51  ;;  %v588_v0 = vsel %vm510_vm0, %v482_v47, -inf  ;;  %v597_v1 = vsel %vm510_vm0, %v451_v49, -inf  ;;  %v491_v22 = vld [vmem:[%s974_s23 + $0x1a8] sm:$0xff]  ;;  %v476_v30 = vld [vmem:[%s974_s23 + $0x130] sm:$0xff] }
  0x53   : > { %v599_v2 = vsel %vm510_vm0, %v459_v50, -inf  ;;  %v561_v4 = vmax.f32 %v559_v55, %v560_v52  ;;  %v598_v8 = vmax.f32 %v596_v61, %v597_v1  ;;  %v577_v11 = vsel %vm510_vm0, %v505_v56, -inf  ;;  %v453_v32 = vld [vmem:[%s974_s23 + $0x78] sm:$0xff]  ;;  %v499_v38 = vld [vmem:[%s974_s23 + $0x1e8] sm:$0xff]  ;;  %v484_v40 = vld [vmem:[%s974_s23 + $0x170] sm:$0xff] }
  0x54   : > { %v574_v5 = vmax.f32 %v572_v57, %v573_v53  ;;  %v587_v6 = vmax.f32 %v585_v59, %v586_v54  ;;  %v590_v12 = vsel %vm510_vm0, %v490_v58, -inf  ;;  %v601_v13 = vsel %vm510_vm0, %v467_v60, -inf  ;;  %v461_v33 = vld [vmem:[%s974_s23 + $0xb8] sm:$0xff]  ;;  %v507_v49 = vld [vmem:[%s974_s23 + $0x228] sm:$0xff]  ;;  %v492_v51 = vld [vmem:[%s974_s23 + $0x1b0] sm:$0xff] }
  0x55   : > { %649 = vst.msk [vmem:[%s1056_s28 + $0x10] sm:$0xff] %vm510_vm0, %v561_v4  ;;  %v600_v18 = vmax.f32 %v598_v8, %v599_v2  ;;  %v613_v20 = vsel %vm510_vm0, %v444_v3, -inf  ;;  %v592_v21 = vsel %vm510_vm0, %v498_v63, -inf  ;;  %v603_v23 = vsel %vm510_vm0, %v475_v7, -inf  ;;  %v469_v42 = vld [vmem:[%s974_s23 + $0xf8] sm:$0xff]  ;;  %v500_v59 = vld [vmem:[%s974_s23 + $0x1f0] sm:$0xff] }
  0x56   : > { %v576_v14 = vmax.f32 %v574_v5, %v575_v62  ;;  %v589_v16 = vmax.f32 %v587_v6, %v588_v0  ;;  %v614_v24 = vsel %vm510_vm0, %v452_v9, -inf  ;;  %v616_v25 = vsel %vm510_vm0, %v460_v10, -inf  ;;  %v477_v53 = vld [vmem:[%s974_s23 + $0x138] sm:$0xff]  ;;  %v508_v3 = vld [vmem:[%s974_s23 + $0x230] sm:$0xff] }
  0x57   : > { %v602_v29 = vmax.f32 %v600_v18, %v601_v13  ;;  %v615_v31 = vmax.f32 %v613_v20, %v614_v24  ;;  %v594_v34 = vsel %vm510_vm0, %v506_v15, -inf  ;;  %v605_v35 = vsel %vm510_vm0, %v483_v17, -inf  ;;  %v485_v61 = vld [vmem:[%s974_s23 + $0x178] sm:$0xff] }
  0x58   : > { %v578_v27 = vmax.f32 %v576_v14, %v577_v11  ;;  %v591_v28 = vmax.f32 %v589_v16, %v590_v12  ;;  %v618_v36 = vsel %vm510_vm0, %v468_v19, -inf  ;;  %v630_v44 = vsel %vm510_vm0, %v445_v26, -inf  ;;  %v493_v5 = vld [vmem:[%s974_s23 + $0x1b8] sm:$0xff] }
  0x59   : > { %v604_v39 = vmax.f32 %v602_v29, %v603_v23  ;;  %v617_v41 = vmax.f32 %v615_v31, %v616_v25  ;;  %v607_v43 = vsel %vm510_vm0, %v491_v22, -inf  ;;  %v620_v45 = vsel %vm510_vm0, %v476_v30, -inf  ;;  %v501_v11 = vld [vmem:[%s974_s23 + $0x1f8] sm:$0xff] }
  0x5a   : > { %650 = vst.msk [vmem:[%s1056_s28 + $0x18] sm:$0xff] %vm510_vm0, %v578_v27  ;;  %v593_v37 = vmax.f32 %v591_v28, %v592_v21  ;;  %v631_v46 = vsel %vm510_vm0, %v453_v32, -inf  ;;  %v633_v47 = vsel %vm510_vm0, %v461_v33, -inf  ;;  %v609_v55 = vsel %vm510_vm0, %v499_v38, -inf  ;;  %v509_v16 = vld [vmem:[%s974_s23 + $0x238] sm:$0xff] }
  0x5b   : > { %v606_v50 = vmax.f32 %v604_v39, %v605_v35  ;;  %v619_v52 = vmax.f32 %v617_v41, %v618_v36  ;;  %v632_v54 = vmax.f32 %v630_v44, %v631_v46  ;;  %v622_v56 = vsel %vm510_vm0, %v484_v40, -inf }
  0x5c   : > { %v595_v48 = vmax.f32 %v593_v37, %v594_v34  ;;  %v635_v57 = vsel %vm510_vm0, %v469_v42, -inf  ;;  %v611_v63 = vsel %vm510_vm0, %v507_v49, -inf  ;;  %v624_v0 = vsel %vm510_vm0, %v492_v51, -inf }
  0x5d   : > { %v608_v58 = vmax.f32 %v606_v50, %v607_v43  ;;  %v621_v60 = vmax.f32 %v619_v52, %v620_v45  ;;  %v634_v62 = vmax.f32 %v632_v54, %v633_v47  ;;  %v637_v1 = vsel %vm510_vm0, %v477_v53, -inf }
  0x5e   : > { %651 = vst.msk [vmem:[%s1056_s28 + $0x20] sm:$0xff] %vm510_vm0, %v595_v48  ;;  %v626_v7 = vsel %vm510_vm0, %v500_v59, -inf  ;;  %v639_v8 = vsel %vm510_vm0, %v485_v61, -inf  ;;  %v628_v13 = vsel %vm510_vm0, %v508_v3, -inf  ;;  %v641_v14 = vsel %vm510_vm0, %v493_v5, -inf }
  0x5f   : > { %v610_v2 = vmax.f32 %v608_v58, %v609_v55  ;;  %v623_v4 = vmax.f32 %v621_v60, %v622_v56  ;;  %v636_v6 = vmax.f32 %v634_v62, %v635_v57  ;;  %v643_v18 = vsel %vm510_vm0, %v501_v11, -inf }
  0x60   : > { %v645_v21 = vsel %vm510_vm0, %v509_v16, -inf }
  0x61   : > { %v612_v9 = vmax.f32 %v610_v2, %v611_v63  ;;  %v625_v10 = vmax.f32 %v623_v4, %v624_v0  ;;  %v638_v12 = vmax.f32 %v636_v6, %v637_v1 }
  0x63   : > { %652 = vst.msk [vmem:[%s1056_s28 + $0x28] sm:$0xff] %vm510_vm0, %v612_v9  ;;  %v627_v15 = vmax.f32 %v625_v10, %v626_v7  ;;  %v640_v17 = vmax.f32 %v638_v12, %v639_v8 }
  0x65   : > { %v629_v19 = vmax.f32 %v627_v15, %v628_v13  ;;  %v642_v20 = vmax.f32 %v640_v17, %v641_v14 }
  0x67   : > { %653 = vst.msk [vmem:[%s1056_s28 + $0x30] sm:$0xff] %vm510_vm0, %v629_v19  ;;  %v644_v22 = vmax.f32 %v642_v20, %v643_v18 }
  0x69   : > { %v646_v23 = vmax.f32 %v644_v22, %v645_v21 }
  0x6b   : > { %654 = vst.msk [vmem:[%s1056_s28 + $0x38] sm:$0xff] %vm510_vm0, %v646_v23 }
  0x6c PF: > { %p8_p9 = scmp.ge.s32.totalorder %s806_s10, 4   ;;  %s1164_s6 = smov %s773_s7 }
  0x6d   : > { %s1165_s7 = smov %s815_s13  ;;  %s1166_s8 = smov %s806_s10 }
  0x6e   :  { %10 = sbr.rel (!%p8_p9) target bundleno = 2 (0x2), region = 97 }

// kernel: inception_d_forward.7
= control target key start
LH: loop header
LB: loop body
LE: loop exit
PB: predicated region body
PF: predicated region fallthrough
CT: control target
= control target key end

     0   :  { %s5114_s12 = smov 0   ;;  %s6529_s0 = inlined_call_operand.vmem [shape: bf16[128,1728], index: 0, kind: input, shape index: {}]   ;;  %s6530_s1 = inlined_call_operand.vmem [shape: bf16[1728,320], index: 1, kind: input, shape index: {}]   ;;  %s6531_s2 = inlined_call_operand.vmem [shape: f32[1,320], index: 2, kind: input, shape index: {}]   ;;  %s6532_s3 = inlined_call_operand.vmem [shape: f32[128,320], index: 3, kind: output, shape index: {}]  }
   0x1 LB: > { %s3774_s13 = sadd.s32 4294967295, %s5091_s12   ;;  %p3778_p0 = scmp.ge.s32.totalorder %s5091_s12, 1  ;;  %s5091_s12 = sphi %s5114_s12, %s13_s12  }
   0x2   : > { %p139_p1 = scmp.lt.s32.totalorder %s5091_s12, 3 }
   0x4   : > { %p140_p2 = pnand %p3778_p0, %p139_p1 }
   0x6   : > { %143 = sbr.rel (%p140_p2) target bundleno = 602 (0x25a), region = 32 }
   0xd   : > { %v4560_v0 = vld [vmem:[%s6530_s1 + $0x4] ss:$12 sps:$4 sm:$0xff]   ;;  %v4564_v2 = vld [vmem:[%s6530_s1] ss:$12 sps:$4 sm:$0xff]   ;;  %v4566_v4 = vld [vmem:[%s6530_s1 + $0x1c] ss:$12 sps:$4 sm:$0xff]  }
   0xe   : > { %v4562_v1 = vld [vmem:[%s6530_s1 + $0x184] ss:$12 sps:$4 sm:$0xff]   ;;  %2702 = vmatprep.subr.bf16.mxu1 %v4560_v0  ;;  %v4565_v3 = vld [vmem:[%s6530_s1 + $0x180] ss:$12 sps:$4 sm:$0xff]   ;;  %v4568_v5 = vld [vmem:[%s6530_s1 + $0x19c] ss:$12 sps:$4 sm:$0xff]  }
   0xf   : > { %2775 = vmatprep.subr.bf16.mxu0 %v4562_v1  ;;  %2703 = vmatpush1.bf16.msra.mxu1 %v4564_v2  ;;  %v4570_v6 = vld [vmem:[%s6530_s1 + $0x18] ss:$12 sps:$4 sm:$0xff]   ;;  %v4572_v8 = vld [vmem:[%s6530_s1 + $0x34] ss:$12 sps:$4 sm:$0xff]   ;;  %v4576_v10 = vld [vmem:[%s6530_s1 + $0x30] ss:$12 sps:$4 sm:$0xff]  }
  0x10   : > { %2776 = vmatpush1.bf16.msra.mxu0 %v4565_v3  ;;  %2704 = vmatprep.subr.bf16.mxu1 %v4566_v4  ;;  %v4571_v7 = vld [vmem:[%s6530_s1 + $0x198] ss:$12 sps:$4 sm:$0xff]   ;;  %v4574_v9 = vld [vmem:[%s6530_s1 + $0x1b4] ss:$12 sps:$4 sm:$0xff]   ;;  %v4577_v11 = vld [vmem:[%s6530_s1 + $0x1b0] ss:$12 sps:$4 sm:$0xff]  }
  0x11   : > { %2777 = vmatprep.subr.bf16.mxu0 %v4568_v5  ;;  %v4578_v12 = vld [vmem:[%s6530_s1 + $0x4c] ss:$12 sps:$4 sm:$0xff]   ;;  %v4582_v14 = vld [vmem:[%s6530_s1 + $0x48] ss:$12 sps:$4 sm:$0xff]   ;;  %v4584_v16 = vld [vmem:[%s6530_s1 + $0x64] ss:$12 sps:$4 sm:$0xff]  }
  0x12   : > { %v4580_v13 = vld [vmem:[%s6530_s1 + $0x1cc] ss:$12 sps:$4 sm:$0xff]   ;;  %v4583_v15 = vld [vmem:[%s6530_s1 + $0x1c8] ss:$12 sps:$4 sm:$0xff]   ;;  %v4586_v17 = vld [vmem:[%s6530_s1 + $0x1e4] ss:$12 sps:$4 sm:$0xff]  }
  0x13   : > { %2705 = vmatpush1.bf16.msra.mxu1 %v4570_v6  ;;  %v4588_v18 = vld [vmem:[%s6530_s1 + $0x60] ss:$12 sps:$4 sm:$0xff]   ;;  %v4590_v20 = vld [vmem:[%s6530_s1 + $0x7c] ss:$12 sps:$4 sm:$0xff]   ;;  %v4594_v22 = vld [vmem:[%s6530_s1 + $0x78] ss:$12 sps:$4 sm:$0xff]  }
  0x14   : > { %2778 = vmatpush1.bf16.msra.mxu0 %v4571_v7  ;;  %2706 = vmatprep.subr.bf16.mxu1 %v4572_v8  ;;  %v4589_v19 = vld [vmem:[%s6530_s1 + $0x1e0] ss:$12 sps:$4 sm:$0xff]   ;;  %v4592_v21 = vld [vmem:[%s6530_s1 + $0x1fc] ss:$12 sps:$4 sm:$0xff]   ;;  %v4595_v23 = vld [vmem:[%s6530_s1 + $0x1f8] ss:$12 sps:$4 sm:$0xff]  }
  0x15   : > { %2779 = vmatprep.subr.bf16.mxu0 %v4574_v9  ;;  %v4596_v24 = vld [vmem:[%s6530_s1 + $0x94] ss:$12 sps:$4 sm:$0xff]   ;;  %v4600_v26 = vld [vmem:[%s6530_s1 + $0x90] ss:$12 sps:$4 sm:$0xff]   ;;  %v4602_v28 = vld [vmem:[%s6530_s1 + $0xac] ss:$12 sps:$4 sm:$0xff]  }
  0x16   : > { %v4598_v25 = vld [vmem:[%s6530_s1 + $0x214] ss:$12 sps:$4 sm:$0xff]   ;;  %v4601_v27 = vld [vmem:[%s6530_s1 + $0x210] ss:$12 sps:$4 sm:$0xff]   ;;  %v4604_v29 = vld [vmem:[%s6530_s1 + $0x22c] ss:$12 sps:$4 sm:$0xff]  }
  0x17   : > { %2707 = vmatpush1.bf16.msra.mxu1 %v4576_v10  ;;  %s3779_s24 = sshll.u32 %s3774_s13, 3  ;;  %v4606_v30 = vld [vmem:[%s6530_s1 + $0xa8] ss:$12 sps:$4 sm:$0xff]   ;;  %v4608_v32 = vld [vmem:[%s6530_s1 + $0xc4] ss:$12 sps:$4 sm:$0xff]   ;;  %vm2689_vm0 = vcmask 523264  }
  0x18   : > { %2780 = vmatpush1.bf16.msra.mxu0 %v4577_v11  ;;  %2708 = vmatprep.subr.bf16.mxu1 %v4578_v12  ;;  %v4607_v31 = vld [vmem:[%s6530_s1 + $0x228] ss:$12 sps:$4 sm:$0xff]   ;;  %p166_p3 = scmp.lt.s32.totalorder %s3779_s24, 15  ;;  %v4610_v33 = vld [vmem:[%s6530_s1 + $0x244] ss:$12 sps:$4 sm:$0xff]  }
  0x19   : > { %2781 = vmatprep.subr.bf16.mxu0 %v4580_v13  ;;  %v4612_v34 = vld [vmem:[%s6530_s1 + $0xc0] ss:$12 sps:$4 sm:$0xff]   ;;  %v4614_v36 = vld [vmem:[%s6530_s1 + $0xdc] ss:$12 sps:$4 sm:$0xff]   ;;  %v4618_v38 = vld [vmem:[%s6530_s1 + $0xd8] ss:$12 sps:$4 sm:$0xff]  }
  0x1a   : > { %v4613_v35 = vld [vmem:[%s6530_s1 + $0x240] ss:$12 sps:$4 sm:$0xff]   ;;  %s6538_s24 = smov (!%p166_p3, %s3779_s24), 15  ;;  %v4616_v37 = vld [vmem:[%s6530_s1 + $0x25c] ss:$12 sps:$4 sm:$0xff]  }
  0x1b   : > { %2709 = vmatpush1.bf16.msra.mxu1 %v4582_v14  ;;  %v4619_v39 = vld [vmem:[%s6530_s1 + $0x258] ss:$12 sps:$4 sm:$0xff]   ;;  %v4620_v40 = vld [vmem:[%s6530_s1 + $0xf4] ss:$12 sps:$4 sm:$0xff]   ;;  %s4549_s21 = smul.u32 56, %s6538_s24 }
  0x1c   : > { %2782 = vmatpush1.bf16.msra.mxu0 %v4583_v15  ;;  %2710 = vmatprep.subr.bf16.mxu1 %v4584_v16  ;;  %v4622_v41 = vld [vmem:[%s6530_s1 + $0x274] ss:$12 sps:$4 sm:$0xff]   ;;  %v4624_v42 = vld [vmem:[%s6530_s1 + $0xf0] ss:$12 sps:$4 sm:$0xff]   ;;  %v4626_v44 = vld [vmem:[%s6530_s1 + $0x10c] ss:$12 sps:$4 sm:$0xff]  }
  0x1d   : > { %2783 = vmatprep.subr.bf16.mxu0 %v4586_v17  ;;  %v4625_v43 = vld [vmem:[%s6530_s1 + $0x270] ss:$12 sps:$4 sm:$0xff]   ;;  %s5265_s13 = scalar_lea.vmem %s6529_s0, %s4549_s21  ;;  %v4628_v45 = vld [vmem:[%s6530_s1 + $0x28c] ss:$12 sps:$4 sm:$0xff]   ;;  %v4630_v46 = vld [vmem:[%s6530_s1 + $0x108] ss:$12 sps:$4 sm:$0xff]  }
  0x1e   : > { %v4631_v47 = vld [vmem:[%s6530_s1 + $0x288] ss:$12 sps:$4 sm:$0xff]   ;;  %v4632_v48 = vld [vmem:[%s6530_s1 + $0x124] ss:$12 sps:$4 sm:$0xff]   ;;  %v4636_v52 = vld [vmem:[%s6530_s1 + $0x120] ss:$12 sps:$4 sm:$0xff]  }
  0x1f   : > { %2711 = vmatpush1.bf16.msra.mxu1 %v4588_v18  ;;  %v5280_v49 = vld [vmem:[%s5265_s13 + $0x4] ss:$56 sps:$4 sm:$0xff]   ;;  %v4637_v53 = vld [vmem:[%s6530_s1 + $0x2a0] ss:$12 sps:$4 sm:$0xff]   ;;  %v4654_v0 = vld [vmem:[%s6530_s1 + $0x168] ss:$12 sps:$4 sm:$0xff]  }
  0x20   : > { %2784 = vmatpush1.bf16.msra.mxu0 %v4589_v19  ;;  %2712 = vmatprep.subr.bf16.mxu1 %v4590_v20  ;;  %v4634_v50 = vld [vmem:[%s6530_s1 + $0x2a4] ss:$12 sps:$4 sm:$0xff]   ;;  %v4638_v54 = vld [vmem:[%s6530_s1 + $0x13c] ss:$12 sps:$4 sm:$0xff]   ;;  %v4644_v58 = vld [vmem:[%s6530_s1 + $0x154] ss:$12 sps:$4 sm:$0xff]  }
  0x21   : > { %2785 = vmatprep.subr.bf16.mxu0 %v4592_v21  ;;  %v4661_v51 = vld [vmem:[%s5265_s13 + $0xc] ss:$56 sps:$4 sm:$0xff]   ;;  %2734 = vmatprep.mubr.bf16.mxu1 %v5280_v49  ;;  %v4640_v55 = vld [vmem:[%s6530_s1 + $0x2bc] ss:$12 sps:$4 sm:$0xff]   ;;  %v4646_v59 = vld [vmem:[%s6530_s1 + $0x2d4] ss:$12 sps:$4 sm:$0xff]  }
  0x22   : > { %2807 = vmatprep.mubr.bf16.mxu0 %v4661_v51  ;;  %v4642_v56 = vld [vmem:[%s6530_s1 + $0x138] ss:$12 sps:$4 sm:$0xff]   ;;  %v4648_v60 = vld [vmem:[%s6530_s1 + $0x150] ss:$12 sps:$4 sm:$0xff]   ;;  %v4655_v1 = vld [vmem:[%s6530_s1 + $0x2e8] ss:$12 sps:$4 sm:$0xff]  }
  0x23   : > { %2713 = vmatpush1.bf16.msra.mxu1 %v4594_v22  ;;  %v4643_v57 = vld [vmem:[%s6530_s1 + $0x2b8] ss:$12 sps:$4 sm:$0xff]   ;;  %v4649_v61 = vld [vmem:[%s6530_s1 + $0x2d0] ss:$12 sps:$4 sm:$0xff]   ;;  %v5339_v5 = vld [vmem:[%s5265_s13 + $0x8] ss:$56 sps:$4 sm:$0xff]  }
  0x24   : > { %2786 = vmatpush1.bf16.msra.mxu0 %v4595_v23  ;;  %2714 = vmatprep.subr.bf16.mxu1 %v4596_v24  ;;  %v4650_v62 = vld [vmem:[%s6530_s1 + $0x16c] ss:$12 sps:$4 sm:$0xff]   ;;  %v4664_v2 = vld [vmem:[%s6530_s1 + $0x304] ss:$12 sps:$4 sm:$0xff]   ;;  %v4670_v8 = vld [vmem:[%s6530_s1 + $0x31c] ss:$12 sps:$4 sm:$0xff]  }
  0x25   : > { %2787 = vmatprep.subr.bf16.mxu0 %v4598_v25  ;;  %v4652_v63 = vld [vmem:[%s6530_s1 + $0x2ec] ss:$12 sps:$4 sm:$0xff]   ;;  %v4667_v3 = vld [vmem:[%s6530_s1 + $0x904] ss:$12 sps:$4 sm:$0xff]   ;;  %v4673_v9 = vld [vmem:[%s6530_s1 + $0x91c] ss:$12 sps:$4 sm:$0xff]  }
  0x26   : > { %v5336_v4 = vld [vmem:[%s5265_s13] ss:$56 sps:$4 sm:$0xff]   ;;  %v5354_v10 = vld [vmem:[%s5265_s13 + $0x74] ss:$56 sps:$4 sm:$0xff]   ;;  %v4674_v15 = vld [vmem:[%s6530_s1 + $0x330] ss:$12 sps:$4 sm:$0xff]  }
  0x27   : > { %2715 = vmatpush1.bf16.msra.mxu1 %v4600_v26  ;;  %v4662_v6 = vld [vmem:[%s6530_s1 + $0x300] ss:$12 sps:$4 sm:$0xff]   ;;  %v4668_v11 = vld [vmem:[%s6530_s1 + $0x318] ss:$12 sps:$4 sm:$0xff]   ;;  %v4677_v16 = vld [vmem:[%s6530_s1 + $0x930] ss:$12 sps:$4 sm:$0xff]  }
  0x28   : > { %2788 = vmatpush1.bf16.msra.mxu0 %v4601_v27  ;;  %2716 = vmatprep.subr.bf16.mxu1 %v4602_v28  ;;  %v4665_v7 = vld [vmem:[%s6530_s1 + $0x900] ss:$12 sps:$4 sm:$0xff]   ;;  %v4671_v12 = vld [vmem:[%s6530_s1 + $0x918] ss:$12 sps:$4 sm:$0xff]   ;;  %v5378_v17 = vld [vmem:[%s5265_s13 + $0x70] ss:$56 sps:$4 sm:$0xff]  }
  0x29   : > { %2789 = vmatprep.subr.bf16.mxu0 %v4604_v29  ;;  %v4676_v13 = vld [vmem:[%s6530_s1 + $0x334] ss:$12 sps:$4 sm:$0xff]   ;;  %v4682_v18 = vld [vmem:[%s6530_s1 + $0x34c] ss:$12 sps:$4 sm:$0xff]   ;;  %v5390_v21 = vld [vmem:[%s5265_s13 + $0xe4] ss:$56 sps:$4 sm:$0xff]  }
  0x2a   : > { %v4679_v14 = vld [vmem:[%s6530_s1 + $0x934] ss:$12 sps:$4 sm:$0xff]   ;;  %v4685_v19 = vld [vmem:[%s6530_s1 + $0x94c] ss:$12 sps:$4 sm:$0xff]   ;;  %v4688_v23 = vld [vmem:[%s6530_s1 + $0x364] ss:$12 sps:$4 sm:$0xff]  }
  0x2b   : > { %2717 = vmatpush1.bf16.msra.mxu1 %v4606_v30  ;;  %v4680_v20 = vld [vmem:[%s6530_s1 + $0x348] ss:$12 sps:$4 sm:$0xff]   ;;  %v4691_v25 = vld [vmem:[%s6530_s1 + $0x964] ss:$12 sps:$4 sm:$0xff]   ;;  %v4686_v26 = vld [vmem:[%s6530_s1 + $0x360] ss:$12 sps:$4 sm:$0xff]  }
  0x2c   : > { %2790 = vmatpush1.bf16.msra.mxu0 %v4607_v31  ;;  %2718 = vmatprep.subr.bf16.mxu1 %v4608_v32  ;;  %v4683_v22 = vld [vmem:[%s6530_s1 + $0x948] ss:$12 sps:$4 sm:$0xff]   ;;  %v4689_v27 = vld [vmem:[%s6530_s1 + $0x960] ss:$12 sps:$4 sm:$0xff]   ;;  %v5417_v29 = vld [vmem:[%s5265_s13 + $0x78] ss:$56 sps:$4 sm:$0xff]  }
  0x2d   : > { %2791 = vmatprep.subr.bf16.mxu0 %v4610_v33  ;;  %v5400_v24 = vld [vmem:[%s5265_s13 + $0x7c] ss:$56 sps:$4 sm:$0xff]   ;;  %v5414_v28 = vld [vmem:[%s5265_s13 + $0xe0] ss:$56 sps:$4 sm:$0xff]   ;;  %s4550_s15 = smul.u32 24, %s6538_s24 }
  0x2e   : > { %v4694_v30 = vld [vmem:[%s6530_s1 + $0x37c] ss:$12 sps:$4 sm:$0xff]   ;;  %v4692_v32 = vld [vmem:[%s6530_s1 + $0x378] ss:$12 sps:$4 sm:$0xff]   ;;  %v5429_v33 = vld [vmem:[%s5265_s13 + $0x154] ss:$56 sps:$4 sm:$0xff]  }
  0x2f   : > { %2719 = vmatpush1.bf16.msra.mxu1 %v4612_v34  ;;  %v4697_v31 = vld [vmem:[%s6530_s1 + $0x97c] ss:$12 sps:$4 sm:$0xff]   ;;  %v4695_v34 = vld [vmem:[%s6530_s1 + $0x978] ss:$12 sps:$4 sm:$0xff]   ;;  %v4716_v51 = vld [vmem:[%s6530_s1 + $0x3c0] ss:$12 sps:$4 sm:$0xff]   ;;  %s6435_s17 = scalar_lea.vmem %s6532_s3, %s4550_s15 }
  0x30   : > { %2792 = vmatpush1.bf16.msra.mxu0 %v4613_v35  ;;  %2720 = vmatprep.subr.bf16.mxu1 %v4614_v36  ;;  %v4703_v35 = vld [vmem:[%s6530_s1 + $0x394] ss:$12 sps:$4 sm:$0xff]   ;;  %v5440_v36 = vld [vmem:[%s5265_s13 + $0xec] ss:$56 sps:$4 sm:$0xff]  }
  0x31   : > { %2793 = vmatprep.subr.bf16.mxu0 %v4616_v37  ;;  %v4706_v37 = vld [vmem:[%s6530_s1 + $0x994] ss:$12 sps:$4 sm:$0xff]  }
  0x33   : > { %2721 = vmatpush1.bf16.msra.mxu1 %v4618_v38  ;;  %v4701_v38 = vld [vmem:[%s6530_s1 + $0x390] ss:$12 sps:$4 sm:$0xff]  }
  0x34   : > { %2794 = vmatpush1.bf16.msra.mxu0 %v4619_v39  ;;  %2722 = vmatprep.subr.bf16.mxu1 %v4620_v40  ;;  %v5451_v39 = vld [vmem:[%s5265_s13 + $0x150] ss:$56 sps:$4 sm:$0xff]  }
  0x35   : > { %2795 = vmatprep.subr.bf16.mxu0 %v4622_v41  ;;  %v5454_v40 = vld [vmem:[%s5265_s13 + $0xe8] ss:$56 sps:$4 sm:$0xff]   ;;  %v4704_v41 = vld [vmem:[%s6530_s1 + $0x990] ss:$12 sps:$4 sm:$0xff]  }
  0x37   : > { %2723 = vmatpush1.bf16.msra.mxu1 %v4624_v42  ;;  %v4709_v42 = vld [vmem:[%s6530_s1 + $0x3ac] ss:$12 sps:$4 sm:$0xff]  }
  0x38   : > { %2796 = vmatpush1.bf16.msra.mxu0 %v4625_v43  ;;  %2724 = vmatprep.subr.bf16.mxu1 %v4626_v44  ;;  %v4712_v43 = vld [vmem:[%s6530_s1 + $0x9ac] ss:$12 sps:$4 sm:$0xff]   ;;  %v4707_v44 = vld [vmem:[%s6530_s1 + $0x3a8] ss:$12 sps:$4 sm:$0xff]  }
  0x39   : > { %2797 = vmatprep.subr.bf16.mxu0 %v4628_v45  ;;  %v4710_v45 = vld [vmem:[%s6530_s1 + $0x9a8] ss:$12 sps:$4 sm:$0xff]  }
  0x3b   : > { %2725 = vmatpush1.bf16.msra.mxu1 %v4630_v46  ;;  %v4748_v46 = vld [vmem:[%s5265_s13 + $0x34] ss:$56 sps:$4 sm:$0xff]  }
  0x3c   : > { %2798 = vmatpush1.bf16.msra.mxu0 %v4631_v47  ;;  %2726 = vmatprep.subr.bf16.mxu1 %v4632_v48  ;;  %v4718_v47 = vld [vmem:[%s6530_s1 + $0x3c4] ss:$12 sps:$4 sm:$0xff]  }
  0x3d   : > { %2799 = vmatprep.subr.bf16.mxu0 %v4634_v50  ;;  %v4721_v48 = vld [vmem:[%s6530_s1 + $0x9c4] ss:$12 sps:$4 sm:$0xff]   ;;  %v5481_v50 = vld [vmem:[%s5265_s13 + $0x15c] ss:$56 sps:$4 sm:$0xff]  }
  0x3f   : > { %2727 = vmatpush1.bf16.msra.mxu1 %v4636_v52  ;;  %v4719_v52 = vld [vmem:[%s6530_s1 + $0x9c0] ss:$12 sps:$4 sm:$0xff]  }
  0x40   : > { %2800 = vmatpush1.bf16.msra.mxu0 %v4637_v53  ;;  %2728 = vmatprep.subr.bf16.mxu1 %v4638_v54  ;;  %v4724_v53 = vld [vmem:[%s6530_s1 + $0x3dc] ss:$12 sps:$4 sm:$0xff]   ;;  %v5495_v54 = vld [vmem:[%s5265_s13 + $0x158] ss:$56 sps:$4 sm:$0xff]  }
  0x41   : > { %2801 = vmatprep.subr.bf16.mxu0 %v4640_v55  ;;  %v4727_v55 = vld [vmem:[%s6530_s1 + $0x9dc] ss:$12 sps:$4 sm:$0xff]  }
  0x43   : > { %2729 = vmatpush1.bf16.msra.mxu1 %v4642_v56  ;;  %v4722_v56 = vld [vmem:[%s6530_s1 + $0x3d8] ss:$12 sps:$4 sm:$0xff]  }
  0x44   : > { %2802 = vmatpush1.bf16.msra.mxu0 %v4643_v57  ;;  %2730 = vmatprep.subr.bf16.mxu1 %v4644_v58  ;;  %v4725_v57 = vld [vmem:[%s6530_s1 + $0x9d8] ss:$12 sps:$4 sm:$0xff]   ;;  %v4735_v58 = vld [vmem:[%s6530_s1 + $0x3f4] ss:$12 sps:$4 sm:$0xff]  }
  0x45   : > { %2803 = vmatprep.subr.bf16.mxu0 %v4646_v59  ;;  %v4738_v59 = vld [vmem:[%s6530_s1 + $0x9f4] ss:$12 sps:$4 sm:$0xff]  }
  0x47   : > { %2731 = vmatpush1.bf16.msra.mxu1 %v4648_v60  ;;  %v4733_v60 = vld [vmem:[%s6530_s1 + $0x3f0] ss:$12 sps:$4 sm:$0xff]  }
  0x48   : > { %2804 = vmatpush1.bf16.msra.mxu0 %v4649_v61  ;;  %2732 = vmatprep.subr.bf16.mxu1 %v4650_v62  ;;  %v5517_v61 = vld [vmem:[%s5265_s13 + $0x14] ss:$56 sps:$4 sm:$0xff]   ;;  %v4736_v62 = vld [vmem:[%s6530_s1 + $0x9f0] ss:$12 sps:$4 sm:$0xff]  }
  0x49   : > { %2805 = vmatprep.subr.bf16.mxu0 %v4652_v63  ;;  %v4742_v63 = vld [vmem:[%s6530_s1 + $0x40c] ss:$12 sps:$4 sm:$0xff]  }
  0x4b   : > { %2733 = vmatpush1.bf16.msra.mxu1 %v4654_v0  ;;  %v4745_v0 = vld [vmem:[%s6530_s1 + $0xa0c] ss:$12 sps:$4 sm:$0xff]  }
  0x4c   : > { %2806 = vmatpush1.bf16.msra.mxu0 %v4655_v1  ;;  %3140 = vmatprep.subr.bf16.mxu1 %v4667_v3  ;;  %v4740_v1 = vld [vmem:[%s6530_s1 + $0x408] ss:$12 sps:$4 sm:$0xff]   ;;  %v4753_v3 = vld [vmem:[%s6530_s1 + $0x424] ss:$12 sps:$4 sm:$0xff]  }
  0x4d   : > { %2848 = vmatprep.subr.bf16.mxu0 %v4664_v2  ;;  %v4743_v2 = vld [vmem:[%s6530_s1 + $0xa08] ss:$12 sps:$4 sm:$0xff]  }
  0x4e   : > { %2735 = vmatmul.mubr.bf16.vlgmr.msra.gmra.mrb[0].mxu1 %v5336_v4 }
  0x4f   : > { %2808 = vmatmul.mubr.bf16.vlgmr.msra.gmra.mrb[0].mxu0 %v5339_v5  ;;  %3141 = vmatpush1.bf16.msra.mxu1 %v4665_v7  ;;  %v4746_v7 = vld [vmem:[%s5265_s13 + $0x30] ss:$56 sps:$4 sm:$0xff]  }
  0x50   : > { %2849 = vmatpush1.bf16.msra.mxu0 %v4662_v6  ;;  %3142 = vmatprep.subr.bf16.mxu1 %v4673_v9  ;;  %v4754_v6 = vld [vmem:[%s6530_s1 + $0xc8] ss:$12 sps:$4 sm:$0xff]  }
  0x51   : > { %2850 = vmatprep.subr.bf16.mxu0 %v4670_v8  ;;  %2744 = vmatprep.mubr.bf16.mxu1 %v5354_v10  ;;  %v4751_v8 = vld [vmem:[%s6530_s1 + $0x420] ss:$12 sps:$4 sm:$0xff]   ;;  %v4756_v9 = vld [vmem:[%s6530_s1 + $0x8] ss:$12 sps:$4 sm:$0xff]  }
  0x52   : > { %2817 = vmatprep.mubr.bf16.mxu0 %v5400_v24 }
  0x53   : > { %3143 = vmatpush1.bf16.msra.mxu1 %v4671_v12  ;;  %v4760_v12 = vld [vmem:[%s6530_s1 + $0xe0] ss:$12 sps:$4 sm:$0xff]  }
  0x54   : > { %2851 = vmatpush1.bf16.msra.mxu0 %v4668_v11  ;;  %3144 = vmatprep.subr.bf16.mxu1 %v4679_v14  ;;  %v4759_v11 = vld [vmem:[%s6530_s1 + $0x43c] ss:$12 sps:$4 sm:$0xff]   ;;  %v4757_v14 = vld [vmem:[%s6530_s1 + $0x438] ss:$12 sps:$4 sm:$0xff]  }
  0x55   : > { %2852 = vmatprep.subr.bf16.mxu0 %v4676_v13  ;;  %v4762_v13 = vld [vmem:[%s5265_s13 + $0xa4] ss:$56 sps:$4 sm:$0xff]  }
  0x56   : > { %2745 = vmatmul.mubr.bf16.gmra.mrb[4].mxu1 %v5378_v17 }
  0x57   : > { %3145 = vmatpush1.bf16.msra.mxu1 %v4677_v16  ;;  %2754 = vmatprep.mubr.bf16.mxu1 %v5390_v21  ;;  %v4768_v16 = vld [vmem:[%s6530_s1 + $0x454] ss:$12 sps:$4 sm:$0xff]  }
  0x58   : > { %2853 = vmatpush1.bf16.msra.mxu0 %v4674_v15  ;;  %3146 = vmatprep.subr.bf16.mxu1 %v4685_v19  ;;  %v4761_v15 = vld [vmem:[%s6530_s1 + $0x20] ss:$12 sps:$4 sm:$0xff]   ;;  %v4766_v19 = vld [vmem:[%s6530_s1 + $0x450] ss:$12 sps:$4 sm:$0xff]  }
  0x59   : > { %2854 = vmatprep.subr.bf16.mxu0 %v4682_v18  ;;  %2818 = vmatmul.mubr.bf16.gmra.mrb[4].mxu0 %v5417_v29  ;;  %v4770_v18 = vld [vmem:[%s6530_s1 + $0xf8] ss:$12 sps:$4 sm:$0xff]  }
  0x5a   : > { %2827 = vmatprep.mubr.bf16.mxu0 %v5440_v36 }
  0x5b   : > { %3147 = vmatpush1.bf16.msra.mxu1 %v4683_v22  ;;  %v4772_v22 = vld [vmem:[%s6530_s1 + $0x38] ss:$12 sps:$4 sm:$0xff]  }
  0x5c   : > { %2855 = vmatpush1.bf16.msra.mxu0 %v4680_v20  ;;  %3148 = vmatprep.subr.bf16.mxu1 %v4691_v25  ;;  %v4769_v20 = vld [vmem:[%s5265_s13 + $0xa0] ss:$56 sps:$4 sm:$0xff]   ;;  %v4776_v25 = vld [vmem:[%s6530_s1 + $0x110] ss:$12 sps:$4 sm:$0xff]  }
  0x5d   : > { %2856 = vmatprep.subr.bf16.mxu0 %v4688_v23  ;;  %v4775_v23 = vld [vmem:[%s6530_s1 + $0x46c] ss:$12 sps:$4 sm:$0xff]  }
  0x5e   : > { %2755 = vmatmul.mubr.bf16.gmra.mrb[8].mxu1 %v5414_v28 }
  0x5f   : > { %3149 = vmatpush1.bf16.msra.mxu1 %v4689_v27  ;;  %2764 = vmatprep.mubr.bf16.mxu1 %v5429_v33  ;;  %v4778_v27 = vld [vmem:[%s5265_s13 + $0x114] ss:$56 sps:$4 sm:$0xff]  }
  0x60   : > { %2857 = vmatpush1.bf16.msra.mxu0 %v4686_v26  ;;  %3150 = vmatprep.subr.bf16.mxu1 %v4697_v31  ;;  %v4773_v26 = vld [vmem:[%s6530_s1 + $0x468] ss:$12 sps:$4 sm:$0xff]   ;;  %v4785_v31 = vld [vmem:[%s6530_s1 + $0x484] ss:$12 sps:$4 sm:$0xff]  }
  0x61   : > { %2858 = vmatprep.subr.bf16.mxu0 %v4694_v30  ;;  %2828 = vmatmul.mubr.bf16.gmra.mrb[8].mxu0 %v5454_v40  ;;  %v4777_v30 = vld [vmem:[%s6530_s1 + $0x50] ss:$12 sps:$4 sm:$0xff]  }
  0x62   : > { %2837 = vmatprep.mubr.bf16.mxu0 %v5481_v50 }
  0x63   : > { %3151 = vmatpush1.bf16.msra.mxu1 %v4695_v34  ;;  %v5596_v34 = vld [vmem:[%s5265_s13 + $0x10] ss:$56 sps:$4 sm:$0xff]  }
  0x64   : > { %2859 = vmatpush1.bf16.msra.mxu0 %v4692_v32  ;;  %3152 = vmatprep.subr.bf16.mxu1 %v4706_v37  ;;  %v4787_v32 = vld [vmem:[%s6530_s1 + $0x128] ss:$12 sps:$4 sm:$0xff]  }
  0x65   : > { %2860 = vmatprep.subr.bf16.mxu0 %v4703_v35  ;;  %v4783_v35 = vld [vmem:[%s6530_s1 + $0x480] ss:$12 sps:$4 sm:$0xff]   ;;  %v4786_v37 = vld [vmem:[%s5265_s13 + $0x110] ss:$56 sps:$4 sm:$0xff]  }
  0x66   : > { %2765 = vmatmul.mubr.bf16.gmra.mrb[12].mxu1 %v5451_v39 }
  0x67   : > { %3153 = vmatpush1.bf16.msra.mxu1 %v4704_v41  ;;  %4163 = vmatprep.mubr.msk.bf16.mxu1 %vm2689_vm0, %v4748_v46  ;;  %v4791_v41 = vld [vmem:[%s6530_s1 + $0x49c] ss:$12 sps:$4 sm:$0xff]   ;;  %v4798_v46 = vld [vmem:[%s6530_s1 + $0x4b4] ss:$12 sps:$4 sm:$0xff]  }
  0x68   : > { %2861 = vmatpush1.bf16.msra.mxu0 %v4701_v38  ;;  %3154 = vmatprep.subr.bf16.mxu1 %v4712_v43  ;;  %v4788_v38 = vld [vmem:[%s6530_s1 + $0x68] ss:$12 sps:$4 sm:$0xff]   ;;  %v4789_v43 = vld [vmem:[%s6530_s1 + $0x498] ss:$12 sps:$4 sm:$0xff]  }
  0x69   : > { %2862 = vmatprep.subr.bf16.mxu0 %v4709_v42  ;;  %2838 = vmatmul.mubr.bf16.gmra.mrb[12].mxu0 %v5495_v54  ;;  %v4792_v42 = vld [vmem:[%s6530_s1 + $0x140] ss:$12 sps:$4 sm:$0xff]  }
  0x6a   : > { %2880 = vmatprep.mubr.bf16.mxu0 %v5517_v61 }
  0x6b   : > { %3155 = vmatpush1.bf16.msra.mxu1 %v4710_v45  ;;  %v4793_v45 = vld [vmem:[%s6530_s1 + $0x80] ss:$12 sps:$4 sm:$0xff]  }
  0x6c   : > { %2863 = vmatpush1.bf16.msra.mxu0 %v4707_v44  ;;  %3156 = vmatprep.subr.bf16.mxu1 %v4721_v48  ;;  %v4794_v44 = vld [vmem:[%s5265_s13 + $0x184] ss:$56 sps:$4 sm:$0xff]  }
  0x6d   : > { %2864 = vmatprep.subr.bf16.mxu0 %v4718_v47  ;;  %v4800_v47 = vld [vmem:[%s6530_s1 + $0x158] ss:$12 sps:$4 sm:$0xff]   ;;  %v4796_v48 = vld [vmem:[%s6530_s1 + $0x4b0] ss:$12 sps:$4 sm:$0xff]  }
  0x6f   : > { %3157 = vmatpush1.bf16.msra.mxu1 %v4719_v52  ;;  %v4801_v52 = vld [vmem:[%s6530_s1 + $0x98] ss:$12 sps:$4 sm:$0xff]  }
  0x70   : > { %2865 = vmatpush1.bf16.msra.mxu0 %v4716_v51  ;;  %3158 = vmatprep.subr.bf16.mxu1 %v4727_v55  ;;  %v4799_v51 = vld [vmem:[%s5265_s13 + $0x180] ss:$56 sps:$4 sm:$0xff]   ;;  %v4805_v55 = vld [vmem:[%s6530_s1 + $0x170] ss:$12 sps:$4 sm:$0xff]  }
  0x71   : > { %2866 = vmatprep.subr.bf16.mxu0 %v4724_v53  ;;  %v4804_v53 = vld [vmem:[%s6530_s1 + $0x4cc] ss:$12 sps:$4 sm:$0xff]  }
  0x73   : > { %3159 = vmatpush1.bf16.msra.mxu1 %v4725_v57  ;;  %v5643_v57 = vld [vmem:[%s5265_s13 + $0x84] ss:$56 sps:$4 sm:$0xff]  }
  0x74   : > { %2867 = vmatpush1.bf16.msra.mxu0 %v4722_v56  ;;  %3160 = vmatprep.subr.bf16.mxu1 %v4738_v59  ;;  %v4802_v56 = vld [vmem:[%s6530_s1 + $0x4c8] ss:$12 sps:$4 sm:$0xff]   ;;  %v4809_v59 = vld [vmem:[%s6530_s1 + $0x4e4] ss:$12 sps:$4 sm:$0xff]  }
  0x75   : > { %2868 = vmatprep.subr.bf16.mxu0 %v4735_v58  ;;  %v4806_v58 = vld [vmem:[%s6530_s1 + $0xb0] ss:$12 sps:$4 sm:$0xff]  }
  0x77   : > { %3161 = vmatpush1.bf16.msra.mxu1 %v4736_v62  ;;  %v5657_v62 = vld [vmem:[%s5265_s13 + $0x80] ss:$56 sps:$4 sm:$0xff]  }
  0x78   : > { %2869 = vmatpush1.bf16.msra.mxu0 %v4733_v60  ;;  %3162 = vmatprep.subr.bf16.mxu1 %v4745_v0  ;;  %v4810_v60 = vld [vmem:[%s6530_s1 + $0x248] ss:$12 sps:$4 sm:$0xff]  }
  0x79   : > { %2870 = vmatprep.subr.bf16.mxu0 %v4742_v63  ;;  %v4807_v63 = vld [vmem:[%s6530_s1 + $0x4e0] ss:$12 sps:$4 sm:$0xff]   ;;  %v4811_v0 = vld [vmem:[%s6530_s1 + $0x188] ss:$12 sps:$4 sm:$0xff]  }
  0x7b   : > { %3163 = vmatpush1.bf16.msra.mxu1 %v4743_v2  ;;  %v4812_v2 = vld [vmem:[%s6530_s1 + $0x4f8] ss:$12 sps:$4 sm:$0xff]  }
  0x7c   : > { %2871 = vmatpush1.bf16.msra.mxu0 %v4740_v1  ;;  %4173 = vmatprep.subr.bf16.mxu1 %v4754_v6  ;;  %v4814_v1 = vld [vmem:[%s6530_s1 + $0x4fc] ss:$12 sps:$4 sm:$0xff]   ;;  %v4816_v6 = vld [vmem:[%s6530_s1 + $0x1a0] ss:$12 sps:$4 sm:$0xff]  }
  0x7d   : > { %2872 = vmatprep.subr.bf16.mxu0 %v4753_v3  ;;  %v5677_v3 = vld [vmem:[%s5265_s13 + $0xf4] ss:$56 sps:$4 sm:$0xff]  }
  0x7e   : > { %3173 = vmatmul.mubr.bf16.vlgmr.msra.gmra.mrb[16].mxu1 %v4746_v7  ;;  %v4819_v7 = vld [vmem:[%s6530_s1 + $0x514] ss:$12 sps:$4 sm:$0xff]  }
  0x7f   : > { %4174 = vmatpush3.bf16.msra.mxu1 %v4756_v9  ;;  %4164 = vmatprep.mubr.msk.bf16.mxu1 %vm2689_vm0, %v4762_v13  ;;  %v4817_v9 = vld [vmem:[%s6530_s1 + $0x510] ss:$12 sps:$4 sm:$0xff]   ;;  %v4822_v13 = vld [vmem:[%s6530_s1 + $0x528] ss:$12 sps:$4 sm:$0xff]  }
  0x80   : > { %2873 = vmatpush1.bf16.msra.mxu0 %v4751_v8  ;;  %4175 = vmatprep.subr.bf16.mxu1 %v4760_v12  ;;  %v4820_v8 = vld [vmem:[%s6530_s1 + $0x278] ss:$12 sps:$4 sm:$0xff]  }
  0x81   : > { %2874 = vmatprep.subr.bf16.mxu0 %v4759_v11  ;;  %v4821_v11 = vld [vmem:[%s6530_s1 + $0x1b8] ss:$12 sps:$4 sm:$0xff]  }
  0x82   : > { %v4824_v12 = vld [vmem:[%s6530_s1 + $0x52c] ss:$12 sps:$4 sm:$0xff]  }
  0x83   : > { %4176 = vmatpush3.bf16.msra.mxu1 %v4761_v15  ;;  %v4826_v15 = vld [vmem:[%s6530_s1 + $0x1d0] ss:$12 sps:$4 sm:$0xff]  }
  0x84   : > { %2875 = vmatpush1.bf16.msra.mxu0 %v4757_v14  ;;  %4177 = vmatprep.subr.bf16.mxu1 %v4770_v18  ;;  %v5711_v14 = vld [vmem:[%s5265_s13 + $0x164] ss:$56 sps:$4 sm:$0xff]   ;;  %v4830_v18 = vld [vmem:[%s6530_s1 + $0x2a8] ss:$12 sps:$4 sm:$0xff]  }
  0x85   : > { %2876 = vmatprep.subr.bf16.mxu0 %v4768_v16  ;;  %v4829_v16 = vld [vmem:[%s6530_s1 + $0x544] ss:$12 sps:$4 sm:$0xff]  }
  0x86   : > { %3183 = vmatmul.mubr.bf16.gmra.mrb[20].mxu1 %v4769_v20  ;;  %v4831_v20 = vld [vmem:[%s6530_s1 + $0x1e8] ss:$12 sps:$4 sm:$0xff]  }
  0x87   : > { %4178 = vmatpush3.bf16.msra.mxu1 %v4772_v22  ;;  %4165 = vmatprep.mubr.msk.bf16.mxu1 %vm2689_vm0, %v4778_v27  ;;  %v4834_v22 = vld [vmem:[%s6530_s1 + $0x55c] ss:$12 sps:$4 sm:$0xff]   ;;  %v4841_v27 = vld [vmem:[%s6530_s1 + $0x574] ss:$12 sps:$4 sm:$0xff]  }
  0x88   : > { %2877 = vmatpush1.bf16.msra.mxu0 %v4766_v19  ;;  %4179 = vmatprep.subr.bf16.mxu1 %v4776_v25  ;;  %v4827_v19 = vld [vmem:[%s6530_s1 + $0x540] ss:$12 sps:$4 sm:$0xff]  }
  0x89   : > { %2878 = vmatprep.subr.bf16.mxu0 %v4775_v23  ;;  %v4832_v23 = vld [vmem:[%s6530_s1 + $0x558] ss:$12 sps:$4 sm:$0xff]   ;;  %v4836_v25 = vld [vmem:[%s6530_s1 + $0x200] ss:$12 sps:$4 sm:$0xff]  }
  0x8b   : > { %4180 = vmatpush3.bf16.msra.mxu1 %v4777_v30  ;;  %v4842_v30 = vld [vmem:[%s6530_s1 + $0x2d8] ss:$12 sps:$4 sm:$0xff]  }
  0x8c   : > { %2879 = vmatpush1.bf16.msra.mxu0 %v4773_v26  ;;  %4181 = vmatprep.subr.bf16.mxu1 %v4787_v32  ;;  %v5748_v26 = vld [vmem:[%s5265_s13 + $0x1c] ss:$56 sps:$4 sm:$0xff]   ;;  %v4847_v32 = vld [vmem:[%s6530_s1 + $0x58c] ss:$12 sps:$4 sm:$0xff]  }
  0x8d   : > { %2921 = vmatprep.subr.bf16.mxu0 %v4785_v31  ;;  %v4844_v31 = vld [vmem:[%s6530_s1 + $0x218] ss:$12 sps:$4 sm:$0xff]  }
  0x8e   : > { %3193 = vmatmul.mubr.bf16.gmra.mrb[24].mxu1 %v4786_v37  ;;  %v4849_v37 = vld [vmem:[%s6530_s1 + $0x230] ss:$12 sps:$4 sm:$0xff]  }
  0x8f   : > { %2881 = vmatmul.mubr.bf16.vlgmr.msra.gmra.mrb[0].mxu0 %v5596_v34  ;;  %4182 = vmatpush3.bf16.msra.mxu1 %v4788_v38  ;;  %v4854_v38 = vld [vmem:[%s6530_s1 + $0x5a4] ss:$12 sps:$4 sm:$0xff]  }
  0x90   : > { %2922 = vmatpush1.bf16.msra.mxu0 %v4783_v35  ;;  %4183 = vmatprep.subr.bf16.mxu1 %v4792_v42  ;;  %v4845_v35 = vld [vmem:[%s6530_s1 + $0x588] ss:$12 sps:$4 sm:$0xff]   ;;  %v4852_v42 = vld [vmem:[%s6530_s1 + $0x5a0] ss:$12 sps:$4 sm:$0xff]  }
  0x91   : > { %2923 = vmatprep.subr.bf16.mxu0 %v4791_v41  ;;  %4166 = vmatprep.mubr.msk.bf16.mxu1 %vm2689_vm0, %v4794_v44  ;;  %v5076_v41 = vld [vmem:[%s5265_s13 + $0xc] ss:$56 sps:$4 sm:$0xff]   ;;  %v4860_v44 = vld [vmem:[%s6530_s1 + $0x5bc] ss:$12 sps:$4 sm:$0xff]  }
  0x92   : > { %2890 = vmatprep.mubr.bf16.mxu0 %v5643_v57 }
  0x93   : > { %4184 = vmatpush3.bf16.msra.mxu1 %v4793_v45  ;;  %v4861_v45 = vld [vmem:[%s6530_s1 + $0x3e0] ss:$12 sps:$4 sm:$0xff]  }
  0x94   : > { %2924 = vmatpush1.bf16.msra.mxu0 %v4789_v43  ;;  %4185 = vmatprep.subr.bf16.mxu1 %v4800_v47  ;;  %v4857_v43 = vld [vmem:[%s6530_s1 + $0x308] ss:$12 sps:$4 sm:$0xff]   ;;  %v4862_v47 = vld [vmem:[%s6530_s1 + $0x320] ss:$12 sps:$4 sm:$0xff]  }
  0x95   : > { %2925 = vmatprep.subr.bf16.mxu0 %v4798_v46  ;;  %v4858_v46 = vld [vmem:[%s6530_s1 + $0x5b8] ss:$12 sps:$4 sm:$0xff]  }
  0x96   : > { %3203 = vmatmul.mubr.bf16.gmra.mrb[28].mxu1 %v4799_v51  ;;  %v4865_v51 = vld [vmem:[%s6530_s1 + $0x5d0] ss:$12 sps:$4 sm:$0xff]  }
  0x97   : > { %4186 = vmatpush3.bf16.msra.mxu1 %v4801_v52  ;;  %3245 = vmatprep.mubr.bf16.mxu1 %v5280_v49  ;;  %v4815_v49 = vld [vmem:[%s6530_s1 + $0x260] ss:$12 sps:$4 sm:$0xff]   ;;  %v4870_v52 = vld [vmem:[%s6530_s1 + $0x338] ss:$12 sps:$4 sm:$0xff]  }
  0x98   : > { %2926 = vmatpush1.bf16.msra.mxu0 %v4796_v48  ;;  %4187 = vmatprep.subr.bf16.mxu1 %v4805_v55  ;;  %v4867_v48 = vld [vmem:[%s6530_s1 + $0x5d4] ss:$12 sps:$4 sm:$0xff]  }
  0x99   : > { %2927 = vmatprep.subr.bf16.mxu0 %v4804_v53  ;;  %2891 = vmatmul.mubr.bf16.gmra.mrb[4].mxu0 %v5657_v62  ;;  %v4873_v53 = vld [vmem:[%s6530_s1 + $0x5ec] ss:$12 sps:$4 sm:$0xff]   ;;  %v4871_v55 = vld [vmem:[%s6530_s1 + $0x5e8] ss:$12 sps:$4 sm:$0xff]  }
  0x9a   : > { %2900 = vmatprep.mubr.bf16.mxu0 %v5677_v3 }
  0x9b   : > { %4188 = vmatpush3.bf16.msra.mxu1 %v4806_v58  ;;  %v4881_v58 = vld [vmem:[%s6530_s1 + $0x604] ss:$12 sps:$4 sm:$0xff]  }
  0x9c   : > { %2928 = vmatpush1.bf16.msra.mxu0 %v4802_v56  ;;  %4213 = vmatprep.subr.bf16.mxu1 %v4810_v60  ;;  %v4875_v56 = vld [vmem:[%s6530_s1 + $0x350] ss:$12 sps:$4 sm:$0xff]   ;;  %v4879_v60 = vld [vmem:[%s6530_s1 + $0x600] ss:$12 sps:$4 sm:$0xff]  }
  0x9d   : > { %2929 = vmatprep.subr.bf16.mxu0 %v4809_v59  ;;  %v5837_v59 = vld [vmem:[%s5265_s13 + $0x18] ss:$56 sps:$4 sm:$0xff]  }
  0x9e   : > { %3246 = vmatmul.mubr.bf16.vlgmr.msra.gmra.mrb[32].mxu1 %v5336_v4  ;;  %v5691_v4 = vld [vmem:[%s5265_s13 + $0xf0] ss:$56 sps:$4 sm:$0xff]  }
  0x9f   : > { %4214 = vmatpush3.bf16.msra.mxu1 %v4811_v0  ;;  %3253 = vmatprep.mubr.bf16.mxu1 %v5354_v10  ;;  %v4825_v10 = vld [vmem:[%s6530_s1 + $0x290] ss:$12 sps:$4 sm:$0xff]  }
  0xa0   : > { %2930 = vmatpush1.bf16.msra.mxu0 %v4807_v63  ;;  %4215 = vmatprep.subr.bf16.mxu1 %v4815_v49  ;;  %v4883_v63 = vld [vmem:[%s6530_s1 + $0x368] ss:$12 sps:$4 sm:$0xff]   ;;  %v4888_v49 = vld [vmem:[%s6530_s1 + $0x380] ss:$12 sps:$4 sm:$0xff]  }
  0xa1   : > { %2931 = vmatprep.subr.bf16.mxu0 %v4814_v1  ;;  %2901 = vmatmul.mubr.bf16.gmra.mrb[8].mxu0 %v5691_v4  ;;  %v4886_v0 = vld [vmem:[%s6530_s1 + $0x61c] ss:$12 sps:$4 sm:$0xff]   ;;  %v4884_v1 = vld [vmem:[%s6530_s1 + $0x618] ss:$12 sps:$4 sm:$0xff]  }
  0xa2   : > { %2910 = vmatprep.mubr.bf16.mxu0 %v5711_v14 }
  0xa3   : > { %4216 = vmatpush3.bf16.msra.mxu1 %v4816_v6  ;;  %v4892_v6 = vld [vmem:[%s6530_s1 + $0x458] ss:$12 sps:$4 sm:$0xff]  }
  0xa4   : > { %2932 = vmatpush1.bf16.msra.mxu0 %v4812_v2  ;;  %4217 = vmatprep.subr.bf16.mxu1 %v4820_v8  ;;  %v4891_v2 = vld [vmem:[%s6530_s1 + $0x634] ss:$12 sps:$4 sm:$0xff]   ;;  %v4893_v8 = vld [vmem:[%s6530_s1 + $0x398] ss:$12 sps:$4 sm:$0xff]  }
  0xa5   : > { %2933 = vmatprep.subr.bf16.mxu0 %v4819_v7  ;;  %v4889_v7 = vld [vmem:[%s6530_s1 + $0x630] ss:$12 sps:$4 sm:$0xff]  }
  0xa6   : > { %3254 = vmatmul.mubr.bf16.gmra.mrb[36].mxu1 %v5378_v17  ;;  %v5725_v17 = vld [vmem:[%s5265_s13 + $0x160] ss:$56 sps:$4 sm:$0xff]  }
  0xa7   : > { %4218 = vmatpush3.bf16.msra.mxu1 %v4821_v11  ;;  %3261 = vmatprep.mubr.bf16.mxu1 %v5390_v21  ;;  %v4835_v21 = vld [vmem:[%s6530_s1 + $0x2c0] ss:$12 sps:$4 sm:$0xff]  }
  0xa8   : > { %2934 = vmatpush1.bf16.msra.mxu0 %v4817_v9  ;;  %4219 = vmatprep.subr.bf16.mxu1 %v4825_v10  ;;  %v4896_v9 = vld [vmem:[%s6530_s1 + $0x64c] ss:$12 sps:$4 sm:$0xff]   ;;  %v5879_v11 = vld [vmem:[%s5265_s13 + $0x88] ss:$56 sps:$4 sm:$0xff]   ;;  %v4898_v10 = vld [vmem:[%s6530_s1 + $0x3b0] ss:$12 sps:$4 sm:$0xff]  }
  0xa9   : > { %2935 = vmatprep.subr.bf16.mxu0 %v4824_v12  ;;  %2911 = vmatmul.mubr.bf16.gmra.mrb[12].mxu0 %v5725_v17  ;;  %v4894_v12 = vld [vmem:[%s6530_s1 + $0x648] ss:$12 sps:$4 sm:$0xff]  }
  0xaa   : > { %2953 = vmatprep.mubr.bf16.mxu0 %v5748_v26 }
  0xab   : > { %4220 = vmatpush3.bf16.msra.mxu1 %v4826_v15  ;;  %v4902_v15 = vld [vmem:[%s6530_s1 + $0x548] ss:$12 sps:$4 sm:$0xff]  }
  0xac   : > { %2936 = vmatpush1.bf16.msra.mxu0 %v4822_v13  ;;  %4221 = vmatprep.subr.bf16.mxu1 %v4830_v18  ;;  %v4901_v13 = vld [vmem:[%s6530_s1 + $0x664] ss:$12 sps:$4 sm:$0xff]   ;;  %v4903_v18 = vld [vmem:[%s6530_s1 + $0x488] ss:$12 sps:$4 sm:$0xff]  }
  0xad   : > { %2937 = vmatprep.subr.bf16.mxu0 %v4829_v16  ;;  %v4899_v16 = vld [vmem:[%s6530_s1 + $0x660] ss:$12 sps:$4 sm:$0xff]  }
  0xae   : > { %3262 = vmatmul.mubr.bf16.gmra.mrb[40].mxu1 %v5414_v28  ;;  %v4839_v28 = vld [vmem:[%s6530_s1 + $0x570] ss:$12 sps:$4 sm:$0xff]  }
  0xaf   : > { %4222 = vmatpush3.bf16.msra.mxu1 %v4831_v20  ;;  %3269 = vmatprep.mubr.bf16.mxu1 %v5429_v33  ;;  %v4848_v33 = vld [vmem:[%s6530_s1 + $0x2f0] ss:$12 sps:$4 sm:$0xff]  }
  0xb0   : > { %2938 = vmatpush1.bf16.msra.mxu0 %v4827_v19  ;;  %4223 = vmatprep.subr.bf16.mxu1 %v4835_v21  ;;  %v4906_v19 = vld [vmem:[%s6530_s1 + $0x67c] ss:$12 sps:$4 sm:$0xff]   ;;  %v5913_v20 = vld [vmem:[%s5265_s13 + $0xf8] ss:$56 sps:$4 sm:$0xff]   ;;  %v4908_v21 = vld [vmem:[%s6530_s1 + $0x4a0] ss:$12 sps:$4 sm:$0xff]  }
  0xb1   : > { %2939 = vmatprep.subr.bf16.mxu0 %v4834_v22  ;;  %v4904_v22 = vld [vmem:[%s6530_s1 + $0x678] ss:$12 sps:$4 sm:$0xff]  }
  0xb3   : > { %4224 = vmatpush3.bf16.msra.mxu1 %v4836_v25  ;;  %v4912_v25 = vld [vmem:[%s6530_s1 + $0x578] ss:$12 sps:$4 sm:$0xff]  }
  0xb4   : > { %2940 = vmatpush1.bf16.msra.mxu0 %v4832_v23  ;;  %4225 = vmatprep.subr.bf16.mxu1 %v4842_v30  ;;  %v4911_v23 = vld [vmem:[%s6530_s1 + $0x694] ss:$12 sps:$4 sm:$0xff]   ;;  %v4913_v30 = vld [vmem:[%s6530_s1 + $0x4b8] ss:$12 sps:$4 sm:$0xff]  }
  0xb5   : > { %2941 = vmatprep.subr.bf16.mxu0 %v4841_v27  ;;  %v4909_v27 = vld [vmem:[%s6530_s1 + $0x690] ss:$12 sps:$4 sm:$0xff]  }
  0xb6   : > { %3270 = vmatmul.mubr.bf16.gmra.mrb[44].mxu1 %v5451_v39  ;;  %v4855_v39 = vld [vmem:[%s6530_s1 + $0x3c8] ss:$12 sps:$4 sm:$0xff]  }
  0xb7   : > { %4226 = vmatpush3.bf16.msra.mxu1 %v4844_v31  ;;  %3310 = vmatprep.mubr.bf16.mxu1 %v5076_v41  ;;  %v5947_v31 = vld [vmem:[%s5265_s13 + $0x168] ss:$56 sps:$4 sm:$0xff]  }
  0xb8   : > { %2942 = vmatpush1.bf16.msra.mxu0 %v4839_v28  ;;  %4227 = vmatprep.subr.bf16.mxu1 %v4848_v33  ;;  %v4916_v28 = vld [vmem:[%s6530_s1 + $0x6ac] ss:$12 sps:$4 sm:$0xff]   ;;  %v4918_v33 = vld [vmem:[%s6530_s1 + $0x4d0] ss:$12 sps:$4 sm:$0xff]  }
  0xb9   : > { %2943 = vmatprep.subr.bf16.mxu0 %v4847_v32  ;;  %v4914_v32 = vld [vmem:[%s6530_s1 + $0x6a8] ss:$12 sps:$4 sm:$0xff]  }
  0xba   : > { %v4926_v41 = vld [vmem:[%s6530_s1 + $0x6dc] ss:$12 sps:$4 sm:$0xff]  }
  0xbb   : > { %4228 = vmatpush3.bf16.msra.mxu1 %v4849_v37  ;;  %v4922_v37 = vld [vmem:[%s6530_s1 + $0x5a8] ss:$12 sps:$4 sm:$0xff]  }
  0xbc   : > { %2944 = vmatpush1.bf16.msra.mxu0 %v4845_v35  ;;  %4253 = vmatprep.subr.bf16.mxu1 %v4855_v39  ;;  %v4921_v35 = vld [vmem:[%s6530_s1 + $0x6c4] ss:$12 sps:$4 sm:$0xff]   ;;  %v4923_v39 = vld [vmem:[%s6530_s1 + $0x4e8] ss:$12 sps:$4 sm:$0xff]  }
  0xbd   : > { %2945 = vmatprep.subr.bf16.mxu0 %v4854_v38  ;;  %v4919_v38 = vld [vmem:[%s6530_s1 + $0x6c0] ss:$12 sps:$4 sm:$0xff]  }
  0xbe   : > { %3311 = vmatmul.mubr.bf16.vlgmr.msra.gmra.mrb[48].mxu1 %v5339_v5  ;;  %v4868_v5 = vld [vmem:[%s6530_s1 + $0x3f8] ss:$12 sps:$4 sm:$0xff]  }
  0xbf   : > { %4254 = vmatpush3.bf16.msra.mxu1 %v4857_v43  ;;  %3318 = vmatprep.mubr.bf16.mxu1 %v5400_v24  ;;  %v4874_v24 = vld [vmem:[%s6530_s1 + $0x410] ss:$12 sps:$4 sm:$0xff]   ;;  %v4928_v43 = vld [vmem:[%s6530_s1 + $0x500] ss:$12 sps:$4 sm:$0xff]  }
  0xc0   : > { %2946 = vmatpush1.bf16.msra.mxu0 %v4852_v42  ;;  %4255 = vmatprep.subr.bf16.mxu1 %v4861_v45  ;;  %v4924_v42 = vld [vmem:[%s6530_s1 + $0x6d8] ss:$12 sps:$4 sm:$0xff]  }
  0xc1   : > { %2947 = vmatprep.subr.bf16.mxu0 %v4860_v44  ;;  %v4933_v44 = vld [vmem:[%s6530_s1 + $0x6f4] ss:$12 sps:$4 sm:$0xff]   ;;  %v4934_v45 = vld [vmem:[%s6530_s1 + $0x5d8] ss:$12 sps:$4 sm:$0xff]  }
  0xc3   : > { %4256 = vmatpush3.bf16.msra.mxu1 %v4862_v47  ;;  %v4939_v47 = vld [vmem:[%s6530_s1 + $0x70c] ss:$12 sps:$4 sm:$0xff]  }
  0xc4   : > { %2948 = vmatpush1.bf16.msra.mxu0 %v4858_v46  ;;  %4257 = vmatprep.subr.bf16.mxu1 %v4868_v5  ;;  %v4936_v46 = vld [vmem:[%s6530_s1 + $0x518] ss:$12 sps:$4 sm:$0xff]   ;;  %v4941_v5 = vld [vmem:[%s6530_s1 + $0x530] ss:$12 sps:$4 sm:$0xff]  }
  0xc5   : > { %2949 = vmatprep.subr.bf16.mxu0 %v4867_v48  ;;  %v4937_v48 = vld [vmem:[%s6530_s1 + $0x708] ss:$12 sps:$4 sm:$0xff]  }
  0xc6   : > { %3319 = vmatmul.mubr.bf16.gmra.mrb[52].mxu1 %v5417_v29  ;;  %v4882_v29 = vld [vmem:[%s6530_s1 + $0x428] ss:$12 sps:$4 sm:$0xff]  }
  0xc7   : > { %4258 = vmatpush3.bf16.msra.mxu1 %v4870_v52  ;;  %3326 = vmatprep.mubr.bf16.mxu1 %v5440_v36  ;;  %v4887_v36 = vld [vmem:[%s6530_s1 + $0x440] ss:$12 sps:$4 sm:$0xff]   ;;  %v4947_v52 = vld [vmem:[%s6530_s1 + $0x6c8] ss:$12 sps:$4 sm:$0xff]  }
  0xc8   : > { %2950 = vmatpush1.bf16.msra.mxu0 %v4865_v51  ;;  %4259 = vmatprep.subr.bf16.mxu1 %v4874_v24  ;;  %v4946_v51 = vld [vmem:[%s6530_s1 + $0x724] ss:$12 sps:$4 sm:$0xff]   ;;  %v4952_v24 = vld [vmem:[%s6530_s1 + $0x73c] ss:$12 sps:$4 sm:$0xff]  }
  0xc9   : > { %2951 = vmatprep.subr.bf16.mxu0 %v4873_v53  ;;  %v4949_v53 = vld [vmem:[%s6530_s1 + $0x608] ss:$12 sps:$4 sm:$0xff]  }
  0xcb   : > { %4260 = vmatpush3.bf16.msra.mxu1 %v4875_v56  ;;  %v4954_v56 = vld [vmem:[%s6530_s1 + $0x620] ss:$12 sps:$4 sm:$0xff]  }
  0xcc   : > { %2952 = vmatpush1.bf16.msra.mxu0 %v4871_v55  ;;  %4261 = vmatprep.subr.bf16.mxu1 %v4882_v29  ;;  %v4950_v55 = vld [vmem:[%s6530_s1 + $0x738] ss:$12 sps:$4 sm:$0xff]  }
  0xcd   : > { %2994 = vmatprep.subr.bf16.mxu0 %v4881_v58  ;;  %v4959_v58 = vld [vmem:[%s6530_s1 + $0x754] ss:$12 sps:$4 sm:$0xff]   ;;  %v4960_v29 = vld [vmem:[%s6530_s1 + $0x6f8] ss:$12 sps:$4 sm:$0xff]  }
  0xce   : > { %3327 = vmatmul.mubr.bf16.gmra.mrb[56].mxu1 %v5454_v40  ;;  %v5867_v40 = vld [vmem:[%s5265_s13 + $0x8c] ss:$56 sps:$4 sm:$0xff]  }
  0xcf   : > { %2954 = vmatmul.mubr.bf16.vlgmr.msra.gmra.mrb[0].mxu0 %v5837_v59  ;;  %4262 = vmatpush3.bf16.msra.mxu1 %v4883_v63  ;;  %v4965_v63 = vld [vmem:[%s6530_s1 + $0x76c] ss:$12 sps:$4 sm:$0xff]  }
  0xd0   : > { %2995 = vmatpush1.bf16.msra.mxu0 %v4879_v60  ;;  %4263 = vmatprep.subr.bf16.mxu1 %v4887_v36  ;;  %v4962_v60 = vld [vmem:[%s6530_s1 + $0x638] ss:$12 sps:$4 sm:$0xff]   ;;  %v4963_v36 = vld [vmem:[%s6530_s1 + $0x768] ss:$12 sps:$4 sm:$0xff]  }
  0xd1   : > { %2996 = vmatprep.subr.bf16.mxu0 %v4886_v0  ;;  %3334 = vmatprep.mubr.bf16.mxu1 %v5481_v50  ;;  %v4897_v50 = vld [vmem:[%s6530_s1 + $0x470] ss:$12 sps:$4 sm:$0xff]  }
  0xd2   : > { %2963 = vmatprep.mubr.bf16.mxu0 %v5867_v40  ;;  %v4966_v0 = vld [vmem:[%s6530_s1 + $0x710] ss:$12 sps:$4 sm:$0xff]  }
  0xd3   : > { %4264 = vmatpush3.bf16.msra.mxu1 %v4888_v49  ;;  %v4973_v49 = vld [vmem:[%s6530_s1 + $0x784] ss:$12 sps:$4 sm:$0xff]  }
  0xd4   : > { %2997 = vmatpush1.bf16.msra.mxu0 %v4884_v1  ;;  %4265 = vmatprep.subr.bf16.mxu1 %v4892_v6  ;;  %v4967_v1 = vld [vmem:[%s6530_s1 + $0x650] ss:$12 sps:$4 sm:$0xff]   ;;  %v4968_v6 = vld [vmem:[%s5265_s13 + $0x20] ss:$56 sps:$4 sm:$0xff]  }
  0xd5   : > { %2998 = vmatprep.subr.bf16.mxu0 %v4891_v2  ;;  %v4974_v2 = vld [vmem:[%s6530_s1 + $0x728] ss:$12 sps:$4 sm:$0xff]  }
  0xd6   : > { %3335 = vmatmul.mubr.bf16.gmra.mrb[60].mxu1 %v5495_v54  ;;  %v5901_v54 = vld [vmem:[%s5265_s13 + $0xfc] ss:$56 sps:$4 sm:$0xff]  }
  0xd7   : > { %2964 = vmatmul.mubr.bf16.gmra.mrb[4].mxu0 %v5879_v11  ;;  %4266 = vmatpush3.bf16.msra.mxu1 %v4893_v8  ;;  %v4978_v8 = vld [vmem:[%s6530_s1 + $0x79c] ss:$12 sps:$4 sm:$0xff]  }
  0xd8   : > { %2999 = vmatpush1.bf16.msra.mxu0 %v4889_v7  ;;  %4267 = vmatprep.subr.bf16.mxu1 %v4897_v50  ;;  %v4975_v7 = vld [vmem:[%s6530_s1 + $0x668] ss:$12 sps:$4 sm:$0xff]   ;;  %v4980_v50 = vld [vmem:[%s6530_s1 + $0x680] ss:$12 sps:$4 sm:$0xff]  }
  0xd9   : > { %3000 = vmatprep.subr.bf16.mxu0 %v4896_v9  ;;  %3375 = vmatprep.mubr.bf16.mxu1 %v5517_v61  ;;  %v4907_v61 = vld [vmem:[%s6530_s1 + $0x560] ss:$12 sps:$4 sm:$0xff]  }
  0xda   : > { %2973 = vmatprep.mubr.bf16.mxu0 %v5901_v54  ;;  %v4979_v9 = vld [vmem:[%s6530_s1 + $0x740] ss:$12 sps:$4 sm:$0xff]  }
  0xdb   : > { %4268 = vmatpush3.bf16.msra.mxu1 %v4898_v10  ;;  %v4983_v10 = vld [vmem:[%s6530_s1 + $0x7b4] ss:$12 sps:$4 sm:$0xff]  }
  0xdc   : > { %3001 = vmatpush1.bf16.msra.mxu0 %v4894_v12  ;;  %4293 = vmatprep.subr.bf16.mxu1 %v4902_v15  ;;  %v5001_v12 = vld [vmem:[%s5265_s13 + $0x94] ss:$56 sps:$4 sm:$0xff]   ;;  %v4981_v15 = vld [vmem:[%s6530_s1 + $0x7b0] ss:$12 sps:$4 sm:$0xff]  }
  0xdd   : > { %3002 = vmatprep.subr.bf16.mxu0 %v4901_v13  ;;  %v4984_v13 = vld [vmem:[%s6530_s1 + $0x758] ss:$12 sps:$4 sm:$0xff]  }
  0xde   : > { %3376 = vmatmul.mubr.bf16.vlgmr.msra.gmra.mrb[64].mxu1 %v5596_v34  ;;  %v5935_v34 = vld [vmem:[%s5265_s13 + $0x16c] ss:$56 sps:$4 sm:$0xff]  }
  0xdf   : > { %2974 = vmatmul.mubr.bf16.gmra.mrb[8].mxu0 %v5913_v20  ;;  %4294 = vmatpush3.bf16.msra.mxu1 %v4903_v18  ;;  %v4989_v18 = vld [vmem:[%s6530_s1 + $0x770] ss:$12 sps:$4 sm:$0xff]  }
  0xe0   : > { %3003 = vmatpush1.bf16.msra.mxu0 %v4899_v16  ;;  %4295 = vmatprep.subr.bf16.mxu1 %v4907_v61  ;;  %v4988_v16 = vld [vmem:[%s6530_s1 + $0x7cc] ss:$12 sps:$4 sm:$0xff]   ;;  %v4990_v61 = vld [vmem:[%s6530_s1 + $0x6b0] ss:$12 sps:$4 sm:$0xff]  }
  0xe1   : > { %3004 = vmatprep.subr.bf16.mxu0 %v4906_v19  ;;  %3383 = vmatprep.mubr.bf16.mxu1 %v5643_v57  ;;  %v4917_v57 = vld [vmem:[%s6530_s1 + $0x590] ss:$12 sps:$4 sm:$0xff]  }
  0xe2   : > { %2983 = vmatprep.mubr.bf16.mxu0 %v5935_v34  ;;  %v5006_v19 = vld [vmem:[%s5265_s13 + $0x90] ss:$56 sps:$4 sm:$0xff]  }
  0xe3   : > { %4296 = vmatpush3.bf16.msra.mxu1 %v4908_v21  ;;  %v4993_v21 = vld [vmem:[%s6530_s1 + $0x7e4] ss:$12 sps:$4 sm:$0xff]  }
  0xe4   : > { %3005 = vmatpush1.bf16.msra.mxu0 %v4904_v22  ;;  %4297 = vmatprep.subr.bf16.mxu1 %v4912_v25  ;;  %v5014_v22 = vld [vmem:[%s5265_s13 + $0x104] ss:$56 sps:$4 sm:$0xff]   ;;  %v4991_v25 = vld [vmem:[%s6530_s1 + $0x7e0] ss:$12 sps:$4 sm:$0xff]  }
  0xe5   : > { %3006 = vmatprep.subr.bf16.mxu0 %v4911_v23  ;;  %v4994_v23 = vld [vmem:[%s6530_s1 + $0x848] ss:$12 sps:$4 sm:$0xff]  }
  0xe6   : > { %3384 = vmatmul.mubr.bf16.gmra.mrb[68].mxu1 %v5657_v62  ;;  %v5969_v62 = vld [vmem:[%s5265_s13 + $0x24] ss:$56 sps:$4 sm:$0xff]  }
  0xe7   : > { %2984 = vmatmul.mubr.bf16.gmra.mrb[12].mxu0 %v5947_v31  ;;  %4298 = vmatpush3.bf16.msra.mxu1 %v4913_v30  ;;  %v4999_v30 = vld [vmem:[%s6530_s1 + $0x860] ss:$12 sps:$4 sm:$0xff]  }
  0xe8   : > { %3007 = vmatpush1.bf16.msra.mxu0 %v4909_v27  ;;  %4299 = vmatprep.subr.bf16.mxu1 %v4917_v57  ;;  %v4998_v27 = vld [vmem:[%s6530_s1 + $0x7fc] ss:$12 sps:$4 sm:$0xff]   ;;  %v5000_v57 = vld [vmem:[%s6530_s1 + $0x7a0] ss:$12 sps:$4 sm:$0xff]  }
  0xe9   : > { %3008 = vmatprep.subr.bf16.mxu0 %v4916_v28  ;;  %3391 = vmatprep.mubr.bf16.mxu1 %v5677_v3  ;;  %v4927_v3 = vld [vmem:[%s6530_s1 + $0x5c0] ss:$12 sps:$4 sm:$0xff]  }
  0xea   : > { %3026 = vmatprep.mubr.bf16.mxu0 %v5969_v62  ;;  %v5019_v28 = vld [vmem:[%s5265_s13 + $0x100] ss:$56 sps:$4 sm:$0xff]  }
  0xeb   : > { %4300 = vmatpush3.bf16.msra.mxu1 %v4918_v33  ;;  %v5005_v33 = vld [vmem:[%s6530_s1 + $0x814] ss:$12 sps:$4 sm:$0xff]  }
  0xec   : > { %3009 = vmatpush1.bf16.msra.mxu0 %v4914_v32  ;;  %4301 = vmatprep.subr.bf16.mxu1 %v4922_v37  ;;  %v5027_v32 = vld [vmem:[%s5265_s13 + $0x174] ss:$56 sps:$4 sm:$0xff]  }
  0xed   : > { %3010 = vmatprep.subr.bf16.mxu0 %v4921_v35  ;;  %v5007_v35 = vld [vmem:[%s6530_s1 + $0x878] ss:$12 sps:$4 sm:$0xff]  }
  0xee   : > { %3392 = vmatmul.mubr.bf16.gmra.mrb[72].mxu1 %v5691_v4  ;;  %v4931_v4 = vld [vmem:[%s6530_s1 + $0x6f0] ss:$12 sps:$4 sm:$0xff]  }
  0xef   : > { %4302 = vmatpush3.bf16.msra.mxu1 %v4923_v39  ;;  %3399 = vmatprep.mubr.bf16.mxu1 %v5711_v14  ;;  %v4940_v14 = vld [vmem:[%s6530_s1 + $0x5f0] ss:$12 sps:$4 sm:$0xff]   ;;  %v5008_v39 = vld [vmem:[%s6530_s1 + $0x7b8] ss:$12 sps:$4 sm:$0xff]  }
  0xf0   : > { %3011 = vmatpush1.bf16.msra.mxu0 %v4919_v38  ;;  %4303 = vmatprep.subr.bf16.mxu1 %v4927_v3 }
  0xf1   : > { %3012 = vmatprep.subr.bf16.mxu0 %v4926_v41  ;;  %v5011_v41 = vld [vmem:[%s6530_s1 + $0x82c] ss:$12 sps:$4 sm:$0xff]  }
  0xf3   : > { %4304 = vmatpush3.bf16.msra.mxu1 %v4928_v43 }
  0xf4   : > { %3013 = vmatpush1.bf16.msra.mxu0 %v4924_v42  ;;  %4305 = vmatprep.subr.bf16.mxu1 %v4934_v45  ;;  %v5012_v42 = vld [vmem:[%s6530_s1 + $0x890] ss:$12 sps:$4 sm:$0xff]   ;;  %v5009_v45 = vld [vmem:[%s6530_s1 + $0x828] ss:$12 sps:$4 sm:$0xff]  }
  0xf5   : > { %3014 = vmatprep.subr.bf16.mxu0 %v4933_v44  ;;  %v5032_v44 = vld [vmem:[%s5265_s13 + $0x170] ss:$56 sps:$4 sm:$0xff]  }
  0xf6   : > { %3400 = vmatmul.mubr.bf16.gmra.mrb[76].mxu1 %v5725_v17  ;;  %v4944_v17 = vld [vmem:[%s6530_s1 + $0x720] ss:$12 sps:$4 sm:$0xff]  }
  0xf7   : > { %4306 = vmatpush3.bf16.msra.mxu1 %v4936_v46  ;;  %3440 = vmatprep.mubr.bf16.mxu1 %v5748_v26  ;;  %v4953_v26 = vld [vmem:[%s6530_s1 + $0x6e0] ss:$12 sps:$4 sm:$0xff]   ;;  %v5018_v46 = vld [vmem:[%s6530_s1 + $0x844] ss:$12 sps:$4 sm:$0xff]  }
  0xf8   : > { %3015 = vmatpush1.bf16.msra.mxu0 %v4931_v4  ;;  %4307 = vmatprep.subr.bf16.mxu1 %v4940_v14  ;;  %v5013_v4 = vld [vmem:[%s6530_s1 + $0x7d0] ss:$12 sps:$4 sm:$0xff]   ;;  %v5020_v14 = vld [vmem:[%s6530_s1 + $0x8a8] ss:$12 sps:$4 sm:$0xff]  }
  0xf9   : > { %3016 = vmatprep.subr.bf16.mxu0 %v4939_v47  ;;  %v5042_v47 = vld [vmem:[%s5265_s13 + $0x2c] ss:$56 sps:$4 sm:$0xff]  }
  0xfb   : > { %4308 = vmatpush3.bf16.msra.mxu1 %v4941_v5  ;;  %v5021_v5 = vld [vmem:[%s6530_s1 + $0x7e8] ss:$12 sps:$4 sm:$0xff]  }
  0xfc   : > { %3017 = vmatpush1.bf16.msra.mxu0 %v4937_v48  ;;  %4333 = vmatprep.subr.bf16.mxu1 %v4947_v52  ;;  %v5016_v48 = vld [vmem:[%s6530_s1 + $0x840] ss:$12 sps:$4 sm:$0xff]  }
  0xfd   : > { %3018 = vmatprep.subr.bf16.mxu0 %v4946_v51 }
  0xfe   : > { %3441 = vmatmul.mubr.bf16.vlgmr.msra.gmra.mrb[80].mxu1 %v5837_v59  ;;  %v4957_v59 = vld [vmem:[%s6530_s1 + $0x750] ss:$12 sps:$4 sm:$0xff]  }
  0xff   : > { %4334 = vmatpush3.bf16.msra.mxu1 %v4949_v53  ;;  %3448 = vmatprep.mubr.bf16.mxu1 %v5867_v40  ;;  %v4971_v40 = vld [vmem:[%s6530_s1 + $0x780] ss:$12 sps:$4 sm:$0xff]  }
 0x100   : > { %3019 = vmatpush1.bf16.msra.mxu0 %v4944_v17  ;;  %4335 = vmatprep.subr.bf16.mxu1 %v4953_v26  ;;  %v5024_v17 = vld [vmem:[%s6530_s1 + $0x85c] ss:$12 sps:$4 sm:$0xff]  }
 0x101   : > { %3020 = vmatprep.subr.bf16.mxu0 %v4952_v24  ;;  %v5025_v24 = vld [vmem:[%s6530_s1 + $0x8c0] ss:$12 sps:$4 sm:$0xff]  }
 0x103   : > { %4336 = vmatpush3.bf16.msra.mxu1 %v4954_v56  ;;  %v5026_v56 = vld [vmem:[%s6530_s1 + $0x800] ss:$12 sps:$4 sm:$0xff]  }
 0x104   : > { %3021 = vmatpush1.bf16.msra.mxu0 %v4950_v55  ;;  %4337 = vmatprep.subr.bf16.mxu1 %v4960_v29  ;;  %v5022_v55 = vld [vmem:[%s6530_s1 + $0x858] ss:$12 sps:$4 sm:$0xff]  }
 0x105   : > { %3022 = vmatprep.subr.bf16.mxu0 %v4959_v58  ;;  %v5031_v58 = vld [vmem:[%s6530_s1 + $0x874] ss:$12 sps:$4 sm:$0xff]   ;;  %v5033_v29 = vld [vmem:[%s6530_s1 + $0x8d8] ss:$12 sps:$4 sm:$0xff]  }
 0x106   : > { %3449 = vmatmul.mubr.bf16.gmra.mrb[84].mxu1 %v5879_v11  ;;  %v4976_v11 = vld [vmem:[%s6530_s1 + $0x798] ss:$12 sps:$4 sm:$0xff]  }
 0x107   : > { %4338 = vmatpush3.bf16.msra.mxu1 %v4962_v60  ;;  %3456 = vmatprep.mubr.bf16.mxu1 %v5901_v54  ;;  %v4985_v54 = vld [vmem:[%s6530_s1 + $0x698] ss:$12 sps:$4 sm:$0xff]  }
 0x108   : > { %3023 = vmatpush1.bf16.msra.mxu0 %v4957_v59  ;;  %4339 = vmatprep.subr.bf16.mxu1 %v4966_v0  ;;  %v5034_v0 = vld [vmem:[%s6530_s1 + $0x818] ss:$12 sps:$4 sm:$0xff]  }
 0x109   : > { %3024 = vmatprep.subr.bf16.mxu0 %v4965_v63  ;;  %v5029_v63 = vld [vmem:[%s6530_s1 + $0x870] ss:$12 sps:$4 sm:$0xff]  }
 0x10b   : > { %4340 = vmatpush3.bf16.msra.mxu1 %v4967_v1  ;;  %v5037_v1 = vld [vmem:[%s6530_s1 + $0x88c] ss:$12 sps:$4 sm:$0xff]  }
 0x10c   : > { %3025 = vmatpush1.bf16.msra.mxu0 %v4963_v36  ;;  %4341 = vmatprep.subr.bf16.mxu1 %v4974_v2 }
 0x10d   : > { %3067 = vmatprep.subr.bf16.mxu0 %v4973_v49  ;;  %v5038_v49 = vld [vmem:[%s6530_s1 + $0x8f0] ss:$12 sps:$4 sm:$0xff]  }
 0x10e   : > { %3457 = vmatmul.mubr.bf16.gmra.mrb[88].mxu1 %v5913_v20  ;;  %v4986_v20 = vld [vmem:[%s6530_s1 + $0x7c8] ss:$12 sps:$4 sm:$0xff]  }
 0x10f   : > { %3027 = vmatmul.mubr.bf16.vlgmr.msra.gmra.mrb[0].mxu0 %v4968_v6  ;;  %4342 = vmatpush3.bf16.msra.mxu1 %v4975_v7  ;;  %v5045_v7 = vld [vmem:[%s6530_s1 + $0x8a4] ss:$12 sps:$4 sm:$0xff]  }
 0x110   : > { %3068 = vmatpush1.bf16.msra.mxu0 %v4971_v40  ;;  %4343 = vmatprep.subr.bf16.mxu1 %v4979_v9  ;;  %v5039_v40 = vld [vmem:[%s6530_s1 + $0x830] ss:$12 sps:$4 sm:$0xff]   ;;  %v5040_v9 = vld [vmem:[%s5265_s13 + $0x28] ss:$56 sps:$4 sm:$0xff]  }
 0x111   : > { %3069 = vmatprep.subr.bf16.mxu0 %v4978_v8  ;;  %3464 = vmatprep.mubr.bf16.mxu1 %v5935_v34  ;;  %v4995_v34 = vld [vmem:[%s6530_s1 + $0x788] ss:$12 sps:$4 sm:$0xff]  }
 0x112   : > { %3036 = vmatprep.mubr.bf16.mxu0 %v5001_v12 }
 0x113   : > { %4344 = vmatpush3.bf16.msra.mxu1 %v4980_v50  ;;  %v5043_v50 = vld [vmem:[%s6530_s1 + $0x8a0] ss:$12 sps:$4 sm:$0xff]  }
 0x114   : > { %3070 = vmatpush1.bf16.msra.mxu0 %v4976_v11  ;;  %4345 = vmatprep.subr.bf16.mxu1 %v4984_v13  ;;  %v5093_v13 = vmov 0  }
 0x115   : > { %3071 = vmatprep.subr.bf16.mxu0 %v4983_v10 }
 0x116   : > { %3465 = vmatmul.mubr.bf16.gmra.mrb[92].mxu1 %v5947_v31  ;;  %v4996_v31 = vld [vmem:[%s6530_s1 + $0x7f8] ss:$12 sps:$4 sm:$0xff]  }
 0x117   : > { %3037 = vmatmul.mubr.bf16.gmra.mrb[4].mxu0 %v5006_v19  ;;  %4346 = vmatpush3.bf16.msra.mxu1 %v4985_v54 }
 0x118   : > { %3072 = vmatpush1.bf16.msra.mxu0 %v4981_v15  ;;  %4347 = vmatprep.subr.bf16.mxu1 %v4989_v18  ;;  %v5049_v15 = vld [vmem:[%s6530_s1 + $0x8bc] ss:$12 sps:$4 sm:$0xff]   ;;  %v5047_v18 = vld [vmem:[%s6530_s1 + $0x8b8] ss:$12 sps:$4 sm:$0xff]  }
 0x119   : > { %3073 = vmatprep.subr.bf16.mxu0 %v4988_v16  ;;  %3505 = vmatprep.mubr.bf16.mxu1 %v5969_v62  ;;  %v5003_v62 = vld [vmem:[%s6530_s1 + $0x810] ss:$12 sps:$4 sm:$0xff]  }
 0x11a   : > { %3046 = vmatprep.mubr.bf16.mxu0 %v5014_v22  ;;  %v5051_v16 = vld [vmem:[%s5265_s13 + $0x9c] ss:$56 sps:$4 sm:$0xff]  }
 0x11b   : > { %4348 = vmatpush3.bf16.msra.mxu1 %v4990_v61  ;;  %v5056_v61 = vld [vmem:[%s5265_s13 + $0x98] ss:$56 sps:$4 sm:$0xff]  }
 0x11c   : > { %3074 = vmatpush1.bf16.msra.mxu0 %v4986_v20  ;;  %4373 = vmatprep.subr.bf16.mxu1 %v4994_v23  ;;  %v5055_v20 = vld [vmem:[%s6530_s1 + $0x8d4] ss:$12 sps:$4 sm:$0xff]   ;;  %v5060_v23 = vld [vmem:[%s6530_s1 + $0x8ec] ss:$12 sps:$4 sm:$0xff]  }
 0x11d   : > { %3075 = vmatprep.subr.bf16.mxu0 %v4993_v21  ;;  %v5057_v21 = vld [vmem:[%s6530_s1 + $0x938] ss:$12 sps:$4 sm:$0xff]  }
 0x11e   : > { %3506 = vmatmul.mubr.bf16.vlgmr.msra.gmra.mrb[96].mxu1 %v4968_v6  ;;  %v5035_v6 = vld [vmem:[%s6530_s1 + $0x888] ss:$12 sps:$4 sm:$0xff]  }
 0x11f   : > { %3047 = vmatmul.mubr.bf16.gmra.mrb[8].mxu0 %v5019_v28  ;;  %4374 = vmatpush3.bf16.msra.mxu1 %v4995_v34  ;;  %v5058_v34 = vld [vmem:[%s6530_s1 + $0x8e8] ss:$12 sps:$4 sm:$0xff]  }
 0x120   : > { %3076 = vmatpush1.bf16.msra.mxu0 %v4991_v25  ;;  %4375 = vmatprep.subr.bf16.mxu1 %v4999_v30  ;;  %v5062_v25 = vld [vmem:[%s5265_s13 + $0x10c] ss:$56 sps:$4 sm:$0xff]   ;;  %v5064_v30 = vld [vmem:[%s5265_s13 + $0x108] ss:$56 sps:$4 sm:$0xff]  }
 0x121   : > { %3077 = vmatprep.subr.bf16.mxu0 %v4998_v27  ;;  %v6158_v37 = vpop.f32.mrb[0].mxu1  ;;  %3513 = vmatprep.mubr.bf16.mxu1 %v5001_v12  ;;  %v5046_v12 = vld [vmem:[%s6530_s1 + $0x908] ss:$12 sps:$4 sm:$0xff]   ;;  %v5061_v27 = vld [vmem:[%s6530_s1 + $0x950] ss:$12 sps:$4 sm:$0xff]  }
 0x122   : > { %3056 = vmatprep.mubr.bf16.mxu0 %v5027_v32  ;;  %v6163_v38 = vpop.f32.mrb[1].mxu1 }
 0x123   : > { %v6171_v3 = vpop.f32.mrb[2].mxu1  ;;  %4376 = vmatpush3.bf16.msra.mxu1 %v5000_v57  ;;  %v5066_v57 = vld [vmem:[%s6530_s1 + $0x980] ss:$12 sps:$4 sm:$0xff]  }
 0x124   : > { %3078 = vmatpush1.bf16.msra.mxu0 %v4996_v31  ;;  %v6176_v43 = vpop.f32.mrb[3].mxu1  ;;  %4377 = vmatprep.subr.bf16.mxu1 %v5007_v35  ;;  %v5067_v31 = vld [vmem:[%s5265_s13 + $0x17c] ss:$56 sps:$4 sm:$0xff]   ;;  %v5069_v35 = vld [vmem:[%s5265_s13 + $0x178] ss:$56 sps:$4 sm:$0xff]  }
 0x125   : > { %3079 = vmatprep.subr.bf16.mxu0 %v5005_v33 }
 0x126   : > { %3514 = vmatmul.mubr.bf16.gmra.mrb[100].mxu1 %v5006_v19  ;;  %v5050_v19 = vld [vmem:[%s6530_s1 + $0x920] ss:$12 sps:$4 sm:$0xff]  }
 0x127   : > { %3057 = vmatmul.mubr.bf16.gmra.mrb[12].mxu0 %v5032_v44  ;;  %4378 = vmatpush3.bf16.msra.mxu1 %v5008_v39  ;;  %v5070_v39 = vld [vmem:[%s6530_s1 + $0x998] ss:$12 sps:$4 sm:$0xff]  }
 0x128   : > { %3080 = vmatpush1.bf16.msra.mxu0 %v5003_v62  ;;  %4379 = vmatprep.subr.bf16.mxu1 %v5012_v42  ;;  %v5071_v42 = vld [vmem:[%s6530_s1 + $0x9b0] ss:$12 sps:$4 sm:$0xff]  }
 0x129   : > { %3081 = vmatprep.subr.bf16.mxu0 %v5011_v41  ;;  %3521 = vmatprep.mubr.bf16.mxu1 %v5014_v22  ;;  %v6198_v51 = vpop.f32.mrb[4].mxu1  ;;  %v5053_v22 = vld [vmem:[%s6530_s1 + $0x8d0] ss:$12 sps:$4 sm:$0xff]  }
 0x12a   : > { %3099 = vmatprep.mubr.bf16.mxu0 %v5042_v47  ;;  %v6200_v52 = vpop.f32.mrb[5].mxu1 }
 0x12b   : > { %4380 = vmatpush3.bf16.msra.mxu1 %v5013_v4  ;;  %v6205_v53 = vpop.f32.mrb[6].mxu1 }
 0x12c   : > { %3082 = vmatpush1.bf16.msra.mxu0 %v5009_v45  ;;  %4381 = vmatprep.subr.bf16.mxu1 %v5020_v14  ;;  %v6210_v26 = vpop.f32.mrb[7].mxu1  ;;  %v5077_v45 = vld [vmem:[%s5265_s13 + $0xa4] ss:$56 sps:$4 sm:$0xff]  }
 0x12d   : > { %3083 = vmatprep.subr.bf16.mxu0 %v5018_v46 }
 0x12e   : > { %3522 = vmatmul.mubr.bf16.gmra.mrb[104].mxu1 %v5019_v28  ;;  %v5065_v28 = vld [vmem:[%s6530_s1 + $0x968] ss:$12 sps:$4 sm:$0xff]  }
 0x12f   : > { %4382 = vmatpush3.bf16.msra.mxu1 %v5021_v5  ;;  %3529 = vmatprep.mubr.bf16.mxu1 %v5027_v32 }
 0x130   : > { %3084 = vmatpush1.bf16.msra.mxu0 %v5016_v48  ;;  %4383 = vmatprep.subr.bf16.mxu1 %v5025_v24  ;;  %v5073_v48 = vld [vmem:[%s6530_s1 + $0x9e0] ss:$12 sps:$4 sm:$0xff]  }
 0x131   : > { %3085 = vmatprep.subr.bf16.mxu0 %v5024_v17  ;;  %v6224_v59 = vpop.f32.mrb[8].mxu1 }
 0x132   : > { %v6226_v60 = vpop.f32.mrb[9].mxu1 }
 0x133   : > { %4384 = vmatpush3.bf16.msra.mxu1 %v5026_v56  ;;  %v6234_v36 = vpop.f32.mrb[10].mxu1 }
 0x134   : > { %3086 = vmatpush1.bf16.msra.mxu0 %v5022_v55  ;;  %4385 = vmatprep.subr.bf16.mxu1 %v5033_v29  ;;  %v6242_v2 = vpop.f32.mrb[11].mxu1  ;;  %v5074_v55 = vld [vmem:[%s6530_s1 + $0x9f8] ss:$12 sps:$4 sm:$0xff]  }
 0x135   : > { %3087 = vmatprep.subr.bf16.mxu0 %v5031_v58  ;;  %v5075_v58 = vld [vmem:[%s6530_s1 + $0xa10] ss:$12 sps:$4 sm:$0xff]  }
 0x136   : > { %3530 = vmatmul.mubr.bf16.gmra.mrb[108].mxu1 %v5032_v44 }
 0x137   : > { %4386 = vmatpush3.bf16.msra.mxu1 %v5034_v0  ;;  %3570 = vmatprep.mubr.bf16.mxu1 %v5042_v47  ;;  %v5072_v47 = vld [vmem:[%s6530_s1 + $0x9c8] ss:$12 sps:$4 sm:$0xff]  }
 0x138   : > { %3088 = vmatpush1.bf16.msra.mxu0 %v5029_v63  ;;  %4387 = vmatprep.subr.bf16.mxu1 %v5038_v49  ;;  %v5078_v63 = vld [vmem:[%s5265_s13 + $0x34] ss:$56 sps:$4 sm:$0xff]  }
 0x139   : > { %3089 = vmatprep.subr.bf16.mxu0 %v5037_v1  ;;  %v6253_v8 = vpop.f32.mrb[12].mxu1 }
 0x13a   : > { %v6256_v11 = vpop.f32.mrb[13].mxu1 }
 0x13b   : > { %4388 = vmatpush3.bf16.msra.mxu1 %v5039_v40  ;;  %v6264_v10 = vpop.f32.mrb[14].mxu1  ;;  %v5080_v40 = vld [vmem:[%s5265_s13 + $0x114] ss:$56 sps:$4 sm:$0xff]  }
 0x13c   : > { %3090 = vmatpush1.bf16.msra.mxu0 %v5035_v6  ;;  %4413 = vmatprep.subr.bf16.mxu1 %v5093_v13  ;;  %v6270_v54 = vpop.f32.mrb[15].mxu1  ;;  %v5079_v6 = vld [vmem:[%s5265_s13 + $0xa0] ss:$56 sps:$4 sm:$0xff]  }
 0x13d   : > { %3091 = vmatprep.subr.bf16.mxu0 %v5045_v7 }
 0x13e   : > { %3571 = vmatmul.mubr.bf16.vlgmr.msra.gmra.mrb[112].mxu1 %v5040_v9 }
 0x13f   : > { %4425 = vmatpush1.bf16.msra.mxu1 %v5046_v12  ;;  %3578 = vmatprep.mubr.bf16.mxu1 %v5051_v16 }
 0x140   : > { %3092 = vmatpush1.bf16.msra.mxu0 %v5043_v50  ;;  %4414 = vmatprep.subr.bf16.mxu1 %v5093_v13 }
 0x141   : > { %3093 = vmatprep.subr.bf16.mxu0 %v5049_v15 }
 0x143   : > { %4426 = vmatpush1.bf16.msra.mxu1 %v5050_v19 }
 0x144   : > { %3094 = vmatpush1.bf16.msra.mxu0 %v5047_v18  ;;  %4415 = vmatprep.subr.bf16.mxu1 %v5093_v13  ;;  %v5081_v18 = vld [vmem:[%s5265_s13 + $0x110] ss:$56 sps:$4 sm:$0xff]  }
 0x145   : > { %3095 = vmatprep.subr.bf16.mxu0 %v5055_v20 }
 0x146   : > { %3579 = vmatmul.mubr.bf16.gmra.mrb[116].mxu1 %v5056_v61 }
 0x147   : > { %4427 = vmatpush1.bf16.msra.mxu1 %v5057_v21  ;;  %3586 = vmatprep.mubr.bf16.mxu1 %v5062_v25 }
 0x148   : > { %3096 = vmatpush1.bf16.msra.mxu0 %v5053_v22  ;;  %4416 = vmatprep.subr.bf16.mxu1 %v5093_v13 }
 0x149   : > { %3097 = vmatprep.subr.bf16.mxu0 %v5060_v23 }
 0x14b   : > { %4428 = vmatpush1.bf16.msra.mxu1 %v5061_v27 }
 0x14c   : > { %3098 = vmatpush1.bf16.msra.mxu0 %v5058_v34  ;;  %4417 = vmatprep.subr.bf16.mxu1 %v5093_v13  ;;  %v5083_v34 = vld [vmem:[%s5265_s13 + $0x30] ss:$56 sps:$4 sm:$0xff]  }
 0x14d   : > { %3603 = vmatprep.subr.bf16.mxu0 %v5093_v13 }
 0x14e   : > { %3587 = vmatmul.mubr.bf16.gmra.mrb[120].mxu1 %v5064_v30 }
 0x14f   : > { %3100 = vmatmul.mubr.bf16.vlgmr.msra.gmra.mrb[0].mxu0 %v5040_v9  ;;  %4429 = vmatpush1.bf16.msra.mxu1 %v5065_v28 }
 0x150   : > { %3604 = vmatpush1.bf16.msra.mxu0 %v5046_v12  ;;  %4418 = vmatprep.subr.bf16.mxu1 %v5093_v13 }
 0x151   : > { %3605 = vmatprep.subr.bf16.mxu0 %v5093_v13  ;;  %v6314_v32 = vpop.f32.mrb[16].mxu1  ;;  %3109 = vmatprep.mubr.bf16.mxu0 %v5051_v16 }
 0x152   : > { %3594 = vmatprep.mubr.bf16.mxu1 %v5067_v31  ;;  %v6316_v33 = vpop.f32.mrb[17].mxu1 }
 0x153   : > { %v6319_v62 = vpop.f32.mrb[18].mxu1  ;;  %4430 = vmatpush1.bf16.msra.mxu1 %v5066_v57 }
 0x154   : > { %3606 = vmatpush1.bf16.msra.mxu0 %v5050_v19  ;;  %v6324_v41 = vpop.f32.mrb[19].mxu1  ;;  %4419 = vmatprep.subr.bf16.mxu1 %v5093_v13  ;;  %v5082_v19 = vld [vmem:[%s5265_s13 + $0x184] ss:$56 sps:$4 sm:$0xff]  }
 0x155   : > { %3607 = vmatprep.subr.bf16.mxu0 %v5093_v13 }
 0x156   : > { %3595 = vmatmul.mubr.bf16.gmra.mrb[124].mxu1 %v5069_v35 }
 0x157   : > { %3110 = vmatmul.mubr.bf16.gmra.mrb[4].mxu0 %v5056_v61  ;;  %4431 = vmatpush1.bf16.msra.mxu1 %v5070_v39 }
 0x158   : > { %3608 = vmatpush1.bf16.msra.mxu0 %v5057_v21  ;;  %4420 = vmatprep.subr.bf16.mxu1 %v5093_v13 }
 0x159   : > { %3609 = vmatprep.subr.bf16.mxu0 %v5093_v13  ;;  %v6333_v44 = vpop.f32.mrb[20].mxu1  ;;  %3119 = vmatprep.mubr.bf16.mxu0 %v5062_v25 }
 0x15a   : > { %4168 = vmatprep.mubr.msk.bf16.mxu1 %vm2689_vm0, %v5077_v45  ;;  %v6337_v4 = vpop.f32.mrb[21].mxu1 }
 0x15b   : > { %v6339_v46 = vpop.f32.mrb[22].mxu1  ;;  %4432 = vmatpush1.bf16.msra.mxu1 %v5071_v42 }
 0x15c   : > { %3610 = vmatpush1.bf16.msra.mxu0 %v5061_v27  ;;  %v6344_v14 = vpop.f32.mrb[23].mxu1  ;;  %4421 = vmatprep.subr.bf16.mxu1 %v5093_v13  ;;  %v5084_v27 = vld [vmem:[%s5265_s13 + $0x180] ss:$56 sps:$4 sm:$0xff]  }
 0x15d   : > { %3611 = vmatprep.subr.bf16.mxu0 %v5093_v13 }
 0x15f   : > { %3120 = vmatmul.mubr.bf16.gmra.mrb[8].mxu0 %v5064_v30  ;;  %4433 = vmatpush1.bf16.msra.mxu1 %v5072_v47 }
 0x160   : > { %3612 = vmatpush1.bf16.msra.mxu0 %v5065_v28  ;;  %4422 = vmatprep.subr.bf16.mxu1 %v5093_v13 }
 0x161   : > { %3613 = vmatprep.subr.bf16.mxu0 %v5093_v13  ;;  %v6353_v5 = vpop.f32.mrb[24].mxu1  ;;  %3129 = vmatprep.mubr.bf16.mxu0 %v5067_v31 }
 0x162   : > { %v6355_v17 = vpop.f32.mrb[25].mxu1 }
 0x163   : > { %v6357_v24 = vpop.f32.mrb[26].mxu1  ;;  %4434 = vmatpush1.bf16.msra.mxu1 %v5073_v48 }
 0x164   : > { %3614 = vmatpush1.bf16.msra.mxu0 %v5066_v57  ;;  %v6362_v56 = vpop.f32.mrb[27].mxu1  ;;  %4423 = vmatprep.subr.bf16.mxu1 %v5093_v13 }
 0x165   : > { %3615 = vmatprep.subr.bf16.mxu0 %v5093_v13 }
 0x167   : > { %3130 = vmatmul.mubr.bf16.gmra.mrb[12].mxu0 %v5069_v35  ;;  %4435 = vmatpush1.bf16.msra.mxu1 %v5074_v55 }
 0x168   : > { %3616 = vmatpush1.bf16.msra.mxu0 %v5070_v39  ;;  %4424 = vmatprep.subr.bf16.mxu1 %v5093_v13  ;;  %v670_v39 = vlaneseq }
 0x169   : > { %3617 = vmatprep.subr.bf16.mxu0 %v5093_v13  ;;  %v6371_v29 = vpop.f32.mrb[28].mxu1  ;;  %4167 = vmatprep.mubr.msk.bf16.mxu0 %vm2689_vm0, %v5078_v63 }
 0x16a   : > { %v6375_v0 = vpop.f32.mrb[29].mxu1  ;;  %v6393_v45 = vshrl.u32 %v670_v39, 7 }
 0x16b   : > { %v6377_v1 = vpop.f32.mrb[30].mxu1  ;;  %4436 = vmatpush1.bf16.msra.mxu1 %v5075_v58 }
 0x16c   : > { %6533 = vst [vmem:[#allocation2_spill] sm:$0xff] %v6377_v1  ;;  %3618 = vmatpush1.bf16.msra.mxu0 %v5071_v42  ;;  %v6379_v49 = vpop.f32.mrb[31].mxu1 }
 0x16d   : > { %6534 = vst [vmem:[#allocation3_spill] sm:$0xff] %v6379_v49  ;;  %3619 = vmatprep.subr.bf16.mxu0 %v5093_v13 }
 0x16e   : > { %3644 = vmatmul.mubr.bf16.vlgmr.msra.gmra.mrb[128].mxu1 %v5079_v6 }
 0x16f   : > { %4169 = vmatprep.mubr.msk.bf16.mxu1 %vm2689_vm0, %v5080_v40  ;;  %v6399_v40 = vld [vmem:[%s6531_s2] sm:$0x7] }
 0x170   : > { %3620 = vmatpush1.bf16.msra.mxu0 %v5072_v47 }
 0x171   : > { %3621 = vmatprep.subr.bf16.mxu0 %v5093_v13  ;;  %v4189_v7 = vpop.f32.mrb[32].mxu1 }
 0x172   : > { %v4190_v9 = vpop.f32.mrb[33].mxu1 }
 0x173   : > { %v4191_v50 = vadd.f32 %v4190_v9, %v4189_v7  ;;  %v4192_v12 = vpop.f32.mrb[34].mxu1 }
 0x174   : > { %3622 = vmatpush1.bf16.msra.mxu0 %v5073_v48  ;;  %v4193_v15 = vpop.f32.mrb[35].mxu1  ;;  %v680_v48 = vsub.s32 2, %v6393_v45 }
 0x175   : > { %3623 = vmatprep.subr.bf16.mxu0 %v5093_v13  ;;  %v4194_v16 = vadd.f32 %v4193_v15, %v4192_v12 }
 0x176   : > { %3652 = vmatmul.mubr.bf16.gmra.mrb[132].mxu1 %v5081_v18  ;;  %v681_v7 = vrot.slane %v6399_v40, %v680_v48 }
 0x177   : > { %4170 = vmatprep.mubr.msk.bf16.mxu1 %vm2689_vm0, %v5082_v19 }
 0x178   : > { %3624 = vmatpush1.bf16.msra.mxu0 %v5074_v55  ;;  %v3248_v15 = vadd.f32 %v4191_v50, %v681_v7 }
 0x179   : > { %3625 = vmatprep.subr.bf16.mxu0 %v5093_v13  ;;  %v4195_v20 = vpop.f32.mrb[36].mxu1 }
 0x17a   : > { %v4196_v61 = vpop.f32.mrb[37].mxu1 }
 0x17b   : > { %v4197_v22 = vadd.f32 %v4196_v61, %v4195_v20  ;;  %v4198_v21 = vpop.f32.mrb[38].mxu1  ;;  %v3251_v61 = vadd.f32 %v4194_v16, %v681_v7 }
 0x17c   : > { %3626 = vmatpush1.bf16.msra.mxu0 %v5075_v58  ;;  %v4199_v23 = vpop.f32.mrb[39].mxu1 }
 0x17d   : > { %v4200_v25 = vadd.f32 %v4199_v23, %v4198_v21 }
 0x17e   : > { %3660 = vmatmul.mubr.bf16.gmra.mrb[136].mxu1 %v5084_v27 }
 0x17f   : > { %3636 = vmatmul.mubr.bf16.vlgmr.msra.gmra.mrb[16].mxu0 %v5083_v34 }
 0x181   : > { %v4201_v30 = vpop.f32.mrb[40].mxu1 }
 0x182   : > { %v4202_v28 = vpop.f32.mrb[41].mxu1 }
 0x183   : > { %v4203_v31 = vadd.f32 %v4202_v28, %v4201_v30  ;;  %v4204_v57 = vpop.f32.mrb[42].mxu1  ;;  %v3256_v28 = vadd.f32 %v4197_v22, %v681_v7 }
 0x184   : > { %v4205_v35 = vpop.f32.mrb[43].mxu1 }
 0x185   : > { %v4206_v42 = vadd.f32 %v4205_v35, %v4204_v57  ;;  %v3264_v50 = vadd.f32 %v4203_v31, %v681_v7 }
 0x187   : > { %v3267_v16 = vadd.f32 %v4206_v42, %v681_v7 }
 0x189   : > { %v4207_v13 = vpop.f32.mrb[44].mxu1 }
 0x18a   : > { %v4208_v47 = vpop.f32.mrb[45].mxu1 }
 0x18b   : > { %v4209_v55 = vadd.f32 %v4208_v47, %v4207_v13  ;;  %v4210_v58 = vpop.f32.mrb[46].mxu1  ;;  %v3259_v13 = vadd.f32 %v4200_v25, %v681_v7 }
 0x18c   : > { %v4211_v63 = vpop.f32.mrb[47].mxu1 }
 0x18d   : > { %v4212_v6 = vadd.f32 %v4211_v63, %v4210_v58  ;;  %v3272_v22 = vadd.f32 %v4209_v55, %v681_v7 }
 0x18f   : > { %v3275_v25 = vadd.f32 %v4212_v6, %v681_v7 }
 0x191   : > { %v4229_v9 = vpop.f32.mrb[48].mxu1 }
 0x192   : > { %v4230_v12 = vpop.f32.mrb[49].mxu1 }
 0x193   : > { %v4231_v18 = vadd.f32 %v4230_v12, %v4229_v9  ;;  %v4232_v19 = vpop.f32.mrb[50].mxu1 }
 0x194   : > { %v4233_v20 = vpop.f32.mrb[51].mxu1 }
 0x195   : > { %v3313_v21 = vadd.f32 %v4231_v18, %v3248_v15  ;;  %v4234_v23 = vadd.f32 %v4233_v20, %v4232_v19 }
 0x197   : > { %v3316_v34 = vadd.f32 %v4234_v23, %v3251_v61 }
 0x199   : > { %v4235_v27 = vpop.f32.mrb[52].mxu1 }
 0x19a   : > { %v4236_v30 = vpop.f32.mrb[53].mxu1 }
 0x19b   : > { %v4237_v57 = vadd.f32 %v4236_v30, %v4235_v27  ;;  %v4238_v35 = vpop.f32.mrb[54].mxu1 }
 0x19c   : > { %v4239_v39 = vpop.f32.mrb[55].mxu1 }
 0x19d   : > { %v3321_v47 = vadd.f32 %v4237_v57, %v3256_v28  ;;  %v4240_v58 = vadd.f32 %v4239_v39, %v4238_v35 }
 0x19f   : > { %v3324_v48 = vadd.f32 %v4240_v58, %v3259_v13 }
 0x1a1   : > { %v4241_v63 = vpop.f32.mrb[56].mxu1 }
 0x1a2   : > { %v4242_v49 = vpop.f32.mrb[57].mxu1 }
 0x1a3   : > { %v4243_v9 = vadd.f32 %v4242_v49, %v4241_v63  ;;  %v4244_v12 = vpop.f32.mrb[58].mxu1 }
 0x1a4   : > { %v4245_v1 = vpop.f32.mrb[59].mxu1 }
 0x1a5   : > { %v3329_v15 = vadd.f32 %v4243_v9, %v3264_v50  ;;  %v4246_v18 = vadd.f32 %v4245_v1, %v4244_v12 }
 0x1a7   : > { %v3332_v19 = vadd.f32 %v4246_v18, %v3267_v16 }
 0x1a9   : > { %v4247_v20 = vpop.f32.mrb[60].mxu1 }
 0x1aa   : > { %v4248_v61 = vpop.f32.mrb[61].mxu1 }
 0x1ab   : > { %v4249_v23 = vadd.f32 %v4248_v61, %v4247_v20  ;;  %v4250_v27 = vpop.f32.mrb[62].mxu1 }
 0x1ac   : > { %v4251_v30 = vpop.f32.mrb[63].mxu1 }
 0x1ad   : > { %v3337_v28 = vadd.f32 %v4249_v23, %v3272_v22  ;;  %v4252_v57 = vadd.f32 %v4251_v30, %v4250_v27 }
 0x1af   : > { %v3340_v35 = vadd.f32 %v4252_v57, %v3275_v25 }
 0x1b1   : > { %v4269_v39 = vpop.f32.mrb[64].mxu1 }
 0x1b2   : > { %v4270_v13 = vpop.f32.mrb[65].mxu1 }
 0x1b3   : > { %v4271_v31 = vadd.f32 %v4270_v13, %v4269_v39  ;;  %v4272_v49 = vpop.f32.mrb[66].mxu1 }
 0x1b4   : > { %v4273_v58 = vpop.f32.mrb[67].mxu1 }
 0x1b5   : > { %v3378_v63 = vadd.f32 %v4271_v31, %v3313_v21  ;;  %v4274_v42 = vadd.f32 %v4273_v58, %v4272_v49 }
 0x1b7   : > { %v3381_v50 = vadd.f32 %v4274_v42, %v3316_v34 }
 0x1b9   : > { %v4275_v1 = vpop.f32.mrb[68].mxu1 }
 0x1ba   : > { %v4276_v9 = vpop.f32.mrb[69].mxu1 }
 0x1bb   : > { %v4277_v12 = vadd.f32 %v4276_v9, %v4275_v1  ;;  %v4278_v16 = vpop.f32.mrb[70].mxu1 }
 0x1bc   : > { %v4279_v55 = vpop.f32.mrb[71].mxu1 }
 0x1bd   : > { %v3386_v18 = vadd.f32 %v4277_v12, %v3321_v47  ;;  %v4280_v20 = vadd.f32 %v4279_v55, %v4278_v16 }
 0x1bf   : > { %v3389_v61 = vadd.f32 %v4280_v20, %v3324_v48 }
 0x1c1   : > { %v4281_v6 = vpop.f32.mrb[72].mxu1 }
 0x1c2   : > { %v4282_v7 = vpop.f32.mrb[73].mxu1 }
 0x1c3   : > { %v4283_v22 = vadd.f32 %v4282_v7, %v4281_v6  ;;  %v4284_v23 = vpop.f32.mrb[74].mxu1 }
 0x1c4   : > { %v4285_v27 = vpop.f32.mrb[75].mxu1 }
 0x1c5   : > { %v3394_v30 = vadd.f32 %v4283_v22, %v3329_v15  ;;  %v4286_v25 = vadd.f32 %v4285_v27, %v4284_v23 }
 0x1c7   : > { %v3397_v57 = vadd.f32 %v4286_v25, %v3332_v19 }
 0x1c9   : > { %v4287_v39 = vpop.f32.mrb[76].mxu1 }
 0x1ca   : > { %v4288_v21 = vpop.f32.mrb[77].mxu1 }
 0x1cb   : > { %v4289_v13 = vadd.f32 %v4288_v21, %v4287_v39  ;;  %v4290_v34 = vpop.f32.mrb[78].mxu1 }
 0x1cc   : > { %v4291_v31 = vpop.f32.mrb[79].mxu1 }
 0x1cd   : > { %v3402_v49 = vadd.f32 %v4289_v13, %v3337_v28  ;;  %v4292_v58 = vadd.f32 %v4291_v31, %v4290_v34 }
 0x1cf   : > { %v3405_v42 = vadd.f32 %v4292_v58, %v3340_v35 }
 0x1d1   : > { %v4309_v1 = vpop.f32.mrb[80].mxu1 }
 0x1d2   : > { %v4310_v47 = vpop.f32.mrb[81].mxu1 }
 0x1d3   : > { %v4311_v9 = vadd.f32 %v4310_v47, %v4309_v1  ;;  %v4312_v48 = vpop.f32.mrb[82].mxu1 }
 0x1d4   : > { %v4313_v12 = vpop.f32.mrb[83].mxu1 }
 0x1d5   : > { %v3443_v16 = vadd.f32 %v4311_v9, %v3378_v63  ;;  %v4314_v55 = vadd.f32 %v4313_v12, %v4312_v48 }
 0x1d7   : > { %v3446_v20 = vadd.f32 %v4314_v55, %v3381_v50 }
 0x1d9   : > { %v4315_v6 = vpop.f32.mrb[84].mxu1 }
 0x1da   : > { %v4316_v15 = vpop.f32.mrb[85].mxu1 }
 0x1db   : > { %v4317_v7 = vadd.f32 %v4316_v15, %v4315_v6  ;;  %v4318_v19 = vpop.f32.mrb[86].mxu1 }
 0x1dc   : > { %v4319_v22 = vpop.f32.mrb[87].mxu1 }
 0x1dd   : > { %v3451_v23 = vadd.f32 %v4317_v7, %v3386_v18  ;;  %v4320_v27 = vadd.f32 %v4319_v22, %v4318_v19 }
 0x1df   : > { %v3454_v25 = vadd.f32 %v4320_v27, %v3389_v61 }
 0x1e1   : > { %v4321_v39 = vpop.f32.mrb[88].mxu1 }
 0x1e2   : > { %v4322_v28 = vpop.f32.mrb[89].mxu1 }
 0x1e3   : > { %v4323_v21 = vadd.f32 %v4322_v28, %v4321_v39  ;;  %v4324_v35 = vpop.f32.mrb[90].mxu1 }
 0x1e4   : > { %v4325_v13 = vpop.f32.mrb[91].mxu1 }
 0x1e5   : > { %v3459_v34 = vadd.f32 %v4323_v21, %v3394_v30  ;;  %v4326_v31 = vadd.f32 %v4325_v13, %v4324_v35 }
 0x1e7   : > { %v3462_v58 = vadd.f32 %v4326_v31, %v3397_v57 }
 0x1e9   : > { %v4327_v1 = vpop.f32.mrb[92].mxu1 }
 0x1ea   : > { %v4328_v63 = vpop.f32.mrb[93].mxu1 }
 0x1eb   : > { %v4329_v47 = vadd.f32 %v4328_v63, %v4327_v1  ;;  %v4330_v50 = vpop.f32.mrb[94].mxu1 }
 0x1ec   : > { %v4331_v9 = vpop.f32.mrb[95].mxu1 }
 0x1ed   : > { %v3467_v48 = vadd.f32 %v4329_v47, %v3402_v49  ;;  %v4332_v12 = vadd.f32 %v4331_v9, %v4330_v50 }
 0x1ef   : > { %v3470_v55 = vadd.f32 %v4332_v12, %v3405_v42 }
 0x1f1   : > { %v4349_v6 = vpop.f32.mrb[96].mxu1 }
 0x1f2   : > { %v4350_v18 = vpop.f32.mrb[97].mxu1 }
 0x1f3   : > { %v4351_v15 = vadd.f32 %v4350_v18, %v4349_v6  ;;  %v4352_v61 = vpop.f32.mrb[98].mxu1 }
 0x1f4   : > { %v4353_v7 = vpop.f32.mrb[99].mxu1 }
 0x1f5   : > { %v3508_v19 = vadd.f32 %v4351_v15, %v3443_v16  ;;  %v4354_v22 = vadd.f32 %v4353_v7, %v4352_v61 }
 0x1f7   : > { %v3511_v27 = vadd.f32 %v4354_v22, %v3446_v20 }
 0x1f9   : > { %v4355_v39 = vpop.f32.mrb[100].mxu1 }
 0x1fa   : > { %v4356_v30 = vpop.f32.mrb[101].mxu1 }
 0x1fb   : > { %v4357_v28 = vadd.f32 %v4356_v30, %v4355_v39  ;;  %v4358_v57 = vpop.f32.mrb[102].mxu1 }
 0x1fc   : > { %v4359_v21 = vpop.f32.mrb[103].mxu1 }
 0x1fd   : > { %v3516_v35 = vadd.f32 %v4357_v28, %v3451_v23  ;;  %v4360_v13 = vadd.f32 %v4359_v21, %v4358_v57 }
 0x1ff   : > { %v3519_v31 = vadd.f32 %v4360_v13, %v3454_v25  ;;  %v676_v13 = vsub.s32 1, %v6393_v45 }
 0x201   : > { %v4361_v1 = vpop.f32.mrb[104].mxu1 }
 0x202   : > { %v4362_v49 = vpop.f32.mrb[105].mxu1 }
 0x203   : > { %v4363_v63 = vadd.f32 %v4362_v49, %v4361_v1  ;;  %v4364_v42 = vpop.f32.mrb[106].mxu1 }
 0x204   : > { %v4365_v47 = vpop.f32.mrb[107].mxu1 }
 0x205   : > { %v3524_v50 = vadd.f32 %v4363_v63, %v3459_v34  ;;  %v4366_v9 = vadd.f32 %v4365_v47, %v4364_v42  ;;  %v6416_v47 = vrot.slane %v6399_v40, %v676_v13 }
 0x207   : > { %v3527_v12 = vadd.f32 %v4366_v9, %v3462_v58  ;;  %v672_v58 = vsub.s32 0, %v6393_v45  ;;  %v2739_v45 = vadd.f32 %v6163_v38, %v6416_v47 }
 0x209   : > { %v4367_v6 = vpop.f32.mrb[108].mxu1  ;;  %v6413_v63 = vrot.slane %v6399_v40, %v672_v58 }
 0x20a   : > { %v4368_v16 = vpop.f32.mrb[109].mxu1 }
 0x20b   : > { %v4369_v18 = vadd.f32 %v4368_v16, %v4367_v6  ;;  %v4370_v20 = vpop.f32.mrb[110].mxu1  ;;  %v2737_v6 = vadd.f32 %v6158_v37, %v6413_v63 }
 0x20c   : > { %v4371_v15 = vpop.f32.mrb[111].mxu1 }
 0x20d   : > { %v6402_v61 = vadd.f32 %v4369_v18, %v3467_v48  ;;  %v4372_v7 = vadd.f32 %v4371_v15, %v4370_v20  ;;  %v2741_v20 = vadd.f32 %v6171_v3, %v6413_v63 }
 0x20f   : > { %v6404_v22 = vadd.f32 %v4372_v7, %v3470_v55 }
 0x211   : > { %v4389_v23 = vpop.f32.mrb[112].mxu1 }
 0x212   : > { %v4390_v25 = vpop.f32.mrb[113].mxu1 }
 0x213   : > { %v4391_v39 = vadd.f32 %v4390_v25, %v4389_v23  ;;  %v4392_v30 = vpop.f32.mrb[114].mxu1 }
 0x214   : > { %v4393_v28 = vpop.f32.mrb[115].mxu1 }
 0x215   : > { %v4394_v57 = vadd.f32 %v4393_v28, %v4392_v30  ;;  %v6406_v21 = vadd.f32 %v4391_v39, %v3508_v19 }
 0x217   : > { %v6408_v34 = vadd.f32 %v4394_v57, %v3511_v27 }
 0x219   : > { %v4395_v48 = vpop.f32.mrb[116].mxu1 }
 0x21a   : > { %v4396_v1 = vpop.f32.mrb[117].mxu1 }
 0x21b   : > { %v4397_v49 = vadd.f32 %v4396_v1, %v4395_v48  ;;  %v4398_v55 = vpop.f32.mrb[118].mxu1 }
 0x21c   : > { %v4399_v42 = vpop.f32.mrb[119].mxu1 }
 0x21d   : > { %v4400_v19 = vadd.f32 %v4399_v42, %v4398_v55  ;;  %v6418_v9 = vadd.f32 %v4397_v49, %v3516_v35  ;;  %v2743_v35 = vadd.f32 %v6176_v43, %v6416_v47  ;;  %v2747_v55 = vadd.f32 %v6198_v51, %v6413_v63 }
 0x21f   : > { %v6420_v27 = vadd.f32 %v4400_v19, %v3519_v31 }
 0x221   : > { %v4401_v18 = vpop.f32.mrb[120].mxu1 }
 0x222   : > { %v3101_v16 = vpop.f32.mrb[0].mxu0  ;;  %v4402_v7 = vpop.f32.mrb[121].mxu1 }
 0x223   : > { %v4438_v15 = vadd.f32 %v3101_v16, %v2737_v6  ;;  %v3103_v40 = vpop.f32.mrb[1].mxu0  ;;  %v4403_v23 = vadd.f32 %v4402_v7, %v4401_v18  ;;  %v4404_v39 = vpop.f32.mrb[122].mxu1  ;;  %v2753_v16 = vadd.f32 %v6210_v26, %v6416_v47 }
 0x224   : > { %v4441_v31 = vadd.f32 %v3103_v40, %v2739_v45  ;;  %v3105_v25 = vpop.f32.mrb[2].mxu0  ;;  %v4405_v28 = vpop.f32.mrb[123].mxu1 }
 0x225   : > { %v4439_v37 = vadd.f32 %v4438_v15, %v6314_v32  ;;  %v4444_v30 = vadd.f32 %v3105_v25, %v2741_v20  ;;  %v3107_v38 = vpop.f32.mrb[3].mxu0  ;;  %v4406_v43 = vadd.f32 %v4405_v28, %v4404_v39  ;;  %v6438_v58 = vadd.f32 %v4403_v23, %v3524_v50 }
 0x226   : > { %v4442_v3 = vadd.f32 %v4441_v31, %v6316_v33  ;;  %v4447_v57 = vadd.f32 %v3107_v38, %v2743_v35  ;;  %v2749_v33 = vadd.f32 %v6200_v52, %v6416_v47  ;;  %v2757_v38 = vadd.f32 %v6224_v59, %v6413_v63 }
 0x227   : > { %v3668_v13 = vmax.f32 %v4439_v37, 0.0  ;;  %v4445_v32 = vadd.f32 %v4444_v30, %v6319_v62  ;;  %v6442_v49 = vadd.f32 %v4406_v43, %v3527_v12  ;;  %v2751_v62 = vadd.f32 %v6205_v53, %v6413_v63 }
 0x228   : > { %v3669_v48 = vmax.f32 %v4442_v3, 0.0  ;;  %v4448_v1 = vadd.f32 %v4447_v57, %v6324_v41  ;;  %v2759_v28 = vadd.f32 %v6226_v60, %v6416_v47 }
 0x229   : > { %3692 = vst [vmem:[%s6435_s17] sm:$0xff] %v3668_v13  ;;  %v3671_v42 = vmax.f32 %v4445_v32, 0.0  ;;  %v4407_v6 = vpop.f32.mrb[124].mxu1 }
 0x22a   : > { %3693 = vst [vmem:[%s6435_s17 + $0x8] sm:$0xff] %v3669_v48  ;;  %v3672_v50 = vmax.f32 %v4448_v1, 0.0  ;;  %v3111_v19 = vpop.f32.mrb[4].mxu0  ;;  %v4408_v12 = vpop.f32.mrb[125].mxu1 }
 0x22b   : > { %3695 = vst [vmem:[%s6435_s17 + $0x18] sm:$0xff] %v3671_v42  ;;  %v4450_v41 = vadd.f32 %v3111_v19, %v2747_v55  ;;  %v3113_v45 = vpop.f32.mrb[5].mxu0  ;;  %v4409_v18 = vadd.f32 %v4408_v12, %v4407_v6  ;;  %v4410_v52 = vpop.f32.mrb[126].mxu1 }
 0x22c   : > { %3696 = vst [vmem:[%s6435_s17 + $0x20] sm:$0xff] %v3672_v50  ;;  %v4453_v51 = vadd.f32 %v3113_v45, %v2749_v33  ;;  %v3115_v20 = vpop.f32.mrb[6].mxu0  ;;  %v4411_v35 = vpop.f32.mrb[127].mxu1 }
 0x22d   : > { %v4451_v15 = vadd.f32 %v4450_v41, %v6333_v44  ;;  %v4456_v40 = vadd.f32 %v3115_v20, %v2751_v62  ;;  %v3117_v7 = vpop.f32.mrb[7].mxu0  ;;  %v4412_v23 = vadd.f32 %v4411_v35, %v4410_v52  ;;  %v6459_v25 = vadd.f32 %v4409_v18, %v6402_v61  ;;  %v6536_v52 = vld [vmem:[#allocation3_spill] sm:$0xff] }
 0x22e   : > { %v4454_v53 = vadd.f32 %v4453_v51, %v6337_v4  ;;  %v4459_v31 = vadd.f32 %v3117_v7, %v2753_v16  ;;  %v6535_v51 = vld [vmem:[#allocation2_spill] sm:$0xff] }
 0x22f   : > { %v3674_v26 = vmax.f32 %v4451_v15, 0.0  ;;  %v4457_v39 = vadd.f32 %v4456_v40, %v6339_v46  ;;  %v6464_v44 = vadd.f32 %v4412_v23, %v6404_v22  ;;  %v2761_v46 = vadd.f32 %v6234_v36, %v6413_v63 }
 0x230   : > { %v3675_v37 = vmax.f32 %v4454_v53, 0.0  ;;  %v4460_v30 = vadd.f32 %v4459_v31, %v6344_v14  ;;  %v2763_v22 = vadd.f32 %v6242_v2, %v6416_v47  ;;  %v2767_v2 = vadd.f32 %v6253_v8, %v6413_v63 }
 0x231   : > { %3698 = vst [vmem:[%s6435_s17 + $0x30] sm:$0xff] %v3674_v26  ;;  %v3677_v4 = vmax.f32 %v4457_v39, 0.0 }
 0x232   : > { %3699 = vst [vmem:[%s6435_s17 + $0x38] sm:$0xff] %v3675_v37  ;;  %v3678_v61 = vmax.f32 %v4460_v30, 0.0  ;;  %v3121_v3 = vpop.f32.mrb[8].mxu0 }
 0x233   : > { %3701 = vst [vmem:[%s6435_s17 + $0x48] sm:$0xff] %v3677_v4  ;;  %v4462_v57 = vadd.f32 %v3121_v3, %v2757_v38  ;;  %v3123_v14 = vpop.f32.mrb[9].mxu0 }
 0x234   : > { %3702 = vst [vmem:[%s6435_s17 + $0x50] sm:$0xff] %v3678_v61  ;;  %v4465_v59 = vadd.f32 %v3123_v14, %v2759_v28  ;;  %v3125_v43 = vpop.f32.mrb[10].mxu0 }
 0x235   : > { %v4463_v13 = vadd.f32 %v4462_v57, %v6353_v5  ;;  %v4468_v60 = vadd.f32 %v3125_v43, %v2761_v46  ;;  %v3127_v32 = vpop.f32.mrb[11].mxu0  ;;  %v2769_v5 = vadd.f32 %v6256_v11, %v6416_v47 }
 0x236   : > { %v4466_v48 = vadd.f32 %v4465_v59, %v6355_v17  ;;  %v4471_v1 = vadd.f32 %v3127_v32, %v2763_v22  ;;  %v2771_v17 = vadd.f32 %v6264_v10, %v6413_v63 }
 0x237   : > { %v3680_v36 = vmax.f32 %v4463_v13, 0.0  ;;  %v4469_v55 = vadd.f32 %v4468_v60, %v6357_v24 }
 0x238   : > { %v3681_v42 = vmax.f32 %v4466_v48, 0.0  ;;  %v4472_v33 = vadd.f32 %v4471_v1, %v6362_v56  ;;  %v2773_v56 = vadd.f32 %v6270_v54, %v6416_v47 }
 0x239   : > { %3704 = vst [vmem:[%s6435_s17 + $0x60] sm:$0xff] %v3680_v36  ;;  %v3683_v50 = vmax.f32 %v4469_v55, 0.0 }
 0x23a   : > { %3705 = vst [vmem:[%s6435_s17 + $0x68] sm:$0xff] %v3681_v42  ;;  %v3684_v19 = vmax.f32 %v4472_v33, 0.0  ;;  %v3131_v6 = vpop.f32.mrb[12].mxu0 }
 0x23b   : > { %3707 = vst [vmem:[%s6435_s17 + $0x78] sm:$0xff] %v3683_v50  ;;  %v4474_v24 = vadd.f32 %v3131_v6, %v2767_v2  ;;  %v3133_v62 = vpop.f32.mrb[13].mxu0 }
 0x23c   : > { %3708 = vst [vmem:[%s6435_s17 + $0x80] sm:$0xff] %v3684_v19  ;;  %v4477_v8 = vadd.f32 %v3133_v62, %v2769_v5  ;;  %v3135_v41 = vpop.f32.mrb[14].mxu0 }
 0x23d   : > { %v4475_v11 = vadd.f32 %v4474_v24, %v6371_v29  ;;  %v4480_v45 = vadd.f32 %v3135_v41, %v2771_v17  ;;  %v3137_v12 = vpop.f32.mrb[15].mxu0 }
 0x23e   : > { %v4478_v16 = vadd.f32 %v4477_v8, %v6375_v0  ;;  %v4483_v10 = vadd.f32 %v3137_v12, %v2773_v56 }
 0x23f   : > { %v3686_v63 = vmax.f32 %v4475_v11, 0.0  ;;  %v4481_v18 = vadd.f32 %v4480_v45, %v6535_v51 }
 0x240   : > { %v3687_v20 = vmax.f32 %v4478_v16, 0.0  ;;  %v4484_v15 = vadd.f32 %v4483_v10, %v6536_v52 }
 0x241   : > { %3710 = vst [vmem:[%s6435_s17 + $0x90] sm:$0xff] %v3686_v63  ;;  %v3689_v54 = vmax.f32 %v4481_v18, 0.0  ;;  %v3645_v40 = vpop.f32.mrb[128].mxu1 }
 0x242   : > { %3711 = vst [vmem:[%s6435_s17 + $0x98] sm:$0xff] %v3687_v20  ;;  %v3690_v47 = vmax.f32 %v4484_v15, 0.0  ;;  %v3646_v29 = vadd.f32 %v3645_v40, %v6418_v9  ;;  %v3647_v7 = vpop.f32.mrb[129].mxu1 }
 0x243   : > { %3713 = vst [vmem:[%s6435_s17 + $0xa8] sm:$0xff] %v3689_v54  ;;  %v3648_v0 = vpop.f32.mrb[130].mxu1 }
 0x244   : > { %3714 = vst [vmem:[%s6435_s17 + $0xb0] sm:$0xff] %v3690_v47  ;;  %v3676_v35 = vmax.f32 %v3646_v29, 0.0  ;;  %v3649_v53 = vadd.f32 %v3648_v0, %v6420_v27  ;;  %v3650_v31 = vpop.f32.mrb[131].mxu1 }
 0x246   : > { %3700 = vst.msk [vmem:[%s6435_s17 + $0x40] sm:$0xff] %vm2689_vm0, %v3676_v35  ;;  %v3679_v23 = vmax.f32 %v3649_v53, 0.0 }
 0x248   : > { %3703 = vst.msk [vmem:[%s6435_s17 + $0x58] sm:$0xff] %vm2689_vm0, %v3679_v23 }
 0x249   : > { %v3653_v26 = vpop.f32.mrb[132].mxu1 }
 0x24a   : > { %v3654_v39 = vadd.f32 %v3653_v26, %v6438_v58  ;;  %v3655_v37 = vpop.f32.mrb[133].mxu1 }
 0x24b   : > { %v3656_v30 = vpop.f32.mrb[134].mxu1 }
 0x24c   : > { %v3682_v9 = vmax.f32 %v3654_v39, 0.0  ;;  %v3657_v38 = vadd.f32 %v3656_v30, %v6442_v49  ;;  %v3658_v4 = vpop.f32.mrb[135].mxu1 }
 0x24e   : > { %3706 = vst.msk [vmem:[%s6435_s17 + $0x70] sm:$0xff] %vm2689_vm0, %v3682_v9  ;;  %v3685_v28 = vmax.f32 %v3657_v38, 0.0 }
 0x250   : > { %3709 = vst.msk [vmem:[%s6435_s17 + $0x88] sm:$0xff] %vm2689_vm0, %v3685_v28 }
 0x251   : > { %v3661_v61 = vpop.f32.mrb[136].mxu1 }
 0x252   : > { %v3637_v27 = vpop.f32.mrb[16].mxu0  ;;  %v3662_v58 = vadd.f32 %v3661_v61, %v6459_v25  ;;  %v3663_v57 = vpop.f32.mrb[137].mxu1 }
 0x253   : > { %v3638_v3 = vadd.f32 %v3637_v27, %v6406_v21  ;;  %v3639_v46 = vpop.f32.mrb[17].mxu0  ;;  %v3664_v49 = vpop.f32.mrb[138].mxu1 }
 0x254   : > { %v3640_v14 = vpop.f32.mrb[18].mxu0  ;;  %v3688_v59 = vmax.f32 %v3662_v58, 0.0  ;;  %v3665_v13 = vadd.f32 %v3664_v49, %v6464_v44  ;;  %v3666_v32 = vpop.f32.mrb[139].mxu1 }
 0x255   : > { %v3670_v22 = vmax.f32 %v3638_v3, 0.0  ;;  %v3641_v43 = vadd.f32 %v3640_v14, %v6408_v34  ;;  %v3642_v60 = vpop.f32.mrb[19].mxu0 }
 0x256   : > { %3712 = vst.msk [vmem:[%s6435_s17 + $0xa0] sm:$0xff] %vm2689_vm0, %v3688_v59  ;;  %v3691_v48 = vmax.f32 %v3665_v13, 0.0 }
 0x257   : > { %3694 = vst.msk [vmem:[%s6435_s17 + $0x10] sm:$0xff] %vm2689_vm0, %v3670_v22  ;;  %v3673_v21 = vmax.f32 %v3641_v43, 0.0 }
 0x258   : > { %3715 = vst.msk [vmem:[%s6435_s17 + $0xb8] sm:$0xff] %vm2689_vm0, %v3691_v48 }
 0x259   : > { %3697 = vst.msk [vmem:[%s6435_s17 + $0x28] sm:$0xff] %vm2689_vm0, %v3673_v21 }
 0x25a PF: > { %s13_s12 = sadd.s32 1, %s5091_s12  }
 0x25b   : > { %p10_p4 = scmp.ge.s32.totalorder %s13_s12, 4  }
 0x25d   :  { %12 = sbr.rel (!%p10_p4) target bundleno = 1 (0x1), region = 62 }

</bundles_post_ra>
